<compile_context>
chip_gen: v5e
topology: v5e:2x2
jax: 0.10.0
libtpu: 0.0.40
codegen_flags: <defaults>
</compile_context>

<pallas_src>
import jax
import jax.numpy as jnp
from jax.experimental import pallas as pl
from jax.experimental.pallas import tpu as pltpu


# ----------------------------------------------------------------------------
# Fused Inception kernel (one image per grid step)
# ----------------------------------------------------------------------------
def _make_inception_kernel(H, W, cin, c1, c2a, c2b, c3, c4a, c4b):
    HW = H * W
    ctot = c1 + c2b + c3 + c4b

    def pad1_hw(v):
        """Zero-pad a (H', W', C) value by 1 on both spatial dims (in VMEM)."""
        h, w, c = v.shape
        zr = jnp.zeros((1, w, c), v.dtype)
        v = jnp.concatenate([zr, v, zr], axis=0)
        zc = jnp.zeros((h + 2, 1, c), v.dtype)
        return jnp.concatenate([zc, v, zc], axis=1)

    def im2col3x3(v_hwc):
        """(H, W, C) -> (H*W, 9*C) patches of the zero-padded 3x3 neighborhood."""
        c = v_hwc.shape[-1]
        vp = pad1_hw(v_hwc)
        taps = [vp[dy:dy + H, dx:dx + W, :].reshape(HW, c)
                for dy in range(3) for dx in range(3)]
        return jnp.concatenate(taps, axis=-1)

    def conv3x3_relu(v_hwc, w9_ref, b_ref):
        """3x3 conv (pad=1) + bias + ReLU as ONE matmul with K = 9*C."""
        acc = jnp.dot(im2col3x3(v_hwc), w9_ref[...],
                      preferred_element_type=jnp.float32)
        return jnp.maximum(acc + b_ref[...], 0.0)            # (H*W, Cout) f32

    def kernel(x_ref, ws_ref, bs_ref, w3_ref, b3_ref,
               w2b_ref, b2b_ref, w4b_ref, b4b_ref, w4c_ref, b4c_ref, o_ref):
        x_hwc = x_ref[...].astype(jnp.float32)               # (H, W, Cin)
        x_flat = x_hwc.reshape(HW, cin)

        # ---- fused stem: p1 / p2a / p4a 1x1 convs share one read of x ----
        stem = jnp.dot(x_flat, ws_ref[...], preferred_element_type=jnp.float32)
        stem = jnp.maximum(stem + bs_ref[...], 0.0)
        y1 = stem[:, :c1]                                    # p1 output
        y2a = stem[:, c1:c1 + c2a]                           # p2 intermediate
        y4a = stem[:, c1 + c2a:c1 + c2a + c4a]               # p4 intermediate

        # ---- p3: avgpool3x3 (count_include_pad => /9) fused with 1x1 conv ----
        xp = pad1_hw(x_hwc)
        pooled = jnp.zeros((H, W, cin), jnp.float32)
        for dy in range(3):
            for dx in range(3):
                pooled = pooled + xp[dy:dy + H, dx:dx + W, :]
        pooled = (pooled * (1.0 / 9.0)).reshape(HW, cin)
        y3 = jnp.maximum(
            jnp.dot(pooled, w3_ref[...], preferred_element_type=jnp.float32)
            + b3_ref[...], 0.0)

        # ---- p2: 1x1 -> 3x3 chain, intermediate never touches HBM ----
        y2 = conv3x3_relu(y2a.reshape(H, W, c2a), w2b_ref, b2b_ref)

        # ---- p4: 1x1 -> 3x3 -> 3x3 chain, intermediates never touch HBM ----
        t4 = conv3x3_relu(y4a.reshape(H, W, c4a), w4b_ref, b4b_ref)
        y4 = conv3x3_relu(t4.reshape(H, W, c4b), w4c_ref, b4c_ref)

        # ---- lane-dense concatenated output store (no XLA concat) ----
        out = jnp.concatenate([y1, y2, y3, y4], axis=-1)     # (H*W, Ctot)
        o_ref[...] = out.reshape(H, W, ctot).astype(o_ref.dtype)

    return kernel


# ----------------------------------------------------------------------------
# Parameter init (deterministic, mirrors normal_init(mean=0, std=0.01), bias=0)
# ----------------------------------------------------------------------------
def init_inception_params(key, in_c, c1, c2, c3, c4, dtype=jnp.float32):
    ks = jax.random.split(key, 7)

    def w1x1(k, ci, co):  # stored as (Cin, Cout)
        return (0.01 * jax.random.normal(k, (ci, co))).astype(dtype)

    def w3x3(k, ci, co):  # stored as (3, 3, Cin, Cout)  (HWIO)
        return (0.01 * jax.random.normal(k, (3, 3, ci, co))).astype(dtype)

    z = lambda co: jnp.zeros((co,), dtype)
    return {
        "p1_w": w1x1(ks[0], in_c, c1),      "p1_b": z(c1),
        "p2a_w": w1x1(ks[1], in_c, c2[0]),  "p2a_b": z(c2[0]),
        "p2b_w": w3x3(ks[2], c2[0], c2[1]), "p2b_b": z(c2[1]),
        "p3_w": w1x1(ks[3], in_c, c3),      "p3_b": z(c3),
        "p4a_w": w1x1(ks[4], in_c, c4[0]),  "p4a_b": z(c4[0]),
        "p4b_w": w3x3(ks[5], c4[0], c4[1]), "p4b_b": z(c4[1]),
        # NOTE: p4's third conv keeps PyTorch-default init in the original module
        # (normal_init never called); here it is also normal(0,0.01) for
        # deterministic synthetic weights.
        "p4c_w": w3x3(ks[6], c4[1], c4[1]), "p4c_b": z(c4[1]),
    }


# ----------------------------------------------------------------------------
# Inception forward (NCHW in -> NCHW out, channel concat order p1|p2|p3|p4)
# ----------------------------------------------------------------------------
def inception_forward(x_nchw, params):
    x = jnp.transpose(x_nchw, (0, 2, 3, 1))   # NHWC: channels on TPU lanes
    N, H, W, cin = x.shape

    c1 = params["p1_w"].shape[1]
    c2a, c2b = params["p2b_w"].shape[2], params["p2b_w"].shape[3]
    c3 = params["p3_w"].shape[1]
    c4a, c4b = params["p4b_w"].shape[2], params["p4b_w"].shape[3]
    ctot = c1 + c2b + c3 + c4b
    cstem = c1 + c2a + c4a

    # Fused stem weights: p1 / p2a / p4a read the same x -> one matmul.
    ws = jnp.concatenate([params["p1_w"], params["p2a_w"], params["p4a_w"]],
                         axis=1)
    bs = jnp.concatenate([params["p1_b"], params["p2a_b"], params["p4a_b"]]
                         ).reshape(1, cstem)
    w3 = params["p3_w"]
    b3 = params["p3_b"].reshape(1, c3)
    # (3,3,Cin,Cout) -> (9*Cin, Cout), row order matches the kernel's im2col taps.
    w2b = params["p2b_w"].reshape(9 * c2a, c2b)
    b2b = params["p2b_b"].reshape(1, c2b)
    w4b = params["p4b_w"].reshape(9 * c4a, c4b)
    b4b = params["p4b_b"].reshape(1, c4b)
    w4c = params["p4c_w"].reshape(9 * c4b, c4b)
    b4c = params["p4c_b"].reshape(1, c4b)

    kernel = _make_inception_kernel(H, W, cin, c1, c2a, c2b, c3, c4a, c4b)

    out = pl.pallas_call(
        kernel,
        out_shape=jax.ShapeDtypeStruct((N, H, W, ctot), x.dtype),
        grid=(N,),
        in_specs=[
            pl.BlockSpec((None, H, W, cin), lambda n: (n, 0, 0, 0)),
            pl.BlockSpec((cin, cstem), lambda n: (0, 0)),
            pl.BlockSpec((1, cstem), lambda n: (0, 0)),
            pl.BlockSpec((cin, c3), lambda n: (0, 0)),
            pl.BlockSpec((1, c3), lambda n: (0, 0)),
            pl.BlockSpec((9 * c2a, c2b), lambda n: (0, 0)),
            pl.BlockSpec((1, c2b), lambda n: (0, 0)),
            pl.BlockSpec((9 * c4a, c4b), lambda n: (0, 0)),
            pl.BlockSpec((1, c4b), lambda n: (0, 0)),
            pl.BlockSpec((9 * c4b, c4b), lambda n: (0, 0)),
            pl.BlockSpec((1, c4b), lambda n: (0, 0)),
        ],
        out_specs=pl.BlockSpec((None, H, W, ctot), lambda n: (n, 0, 0, 0)),
        compiler_params=pltpu.CompilerParams(
            dimension_semantics=("parallel",),      # shards images across TCs (v7x)
            vmem_limit_bytes=32 * 1024 * 1024,      # explicit budget, safe on v5e-v7x
        ),
    )(x, ws, bs, w3, b3, w2b, b2b, w4b, b4b, w4c, b4c)

    return jnp.transpose(out, (0, 3, 1, 2))   # back to NCHW (module contract)


# ----------------------------------------------------------------------------
# Pure-XLA reference of the same module (for a correctness cross-check)
# ----------------------------------------------------------------------------
def _inception_reference(x_nchw, params):
    def conv(v, w_hwio, b, pad):
        y = jax.lax.conv_general_dilated(
            v, w_hwio, window_strides=(1, 1),
            padding=[(pad, pad), (pad, pad)],
            dimension_numbers=("NCHW", "HWIO", "NCHW"))
        return y + b.reshape(1, -1, 1, 1)

    relu = lambda v: jnp.maximum(v, 0.0)
    as1x1 = lambda w: w.reshape(1, 1, *w.shape)

    x = x_nchw
    p1 = relu(conv(x, as1x1(params["p1_w"]), params["p1_b"], 0))
    p2 = relu(conv(x, as1x1(params["p2a_w"]), params["p2a_b"], 0))
    p2 = relu(conv(p2, params["p2b_w"], params["p2b_b"], 1))
    pooled = jax.lax.reduce_window(
        x, 0.0, jax.lax.add, (1, 1, 3, 3), (1, 1, 1, 1),
        [(0, 0), (0, 0), (1, 1), (1, 1)]) / 9.0
    p3 = relu(conv(pooled, as1x1(params["p3_w"]), params["p3_b"], 0))
    p4 = relu(conv(x, as1x1(params["p4a_w"]), params["p4a_b"], 0))
    p4 = relu(conv(p4, params["p4b_w"], params["p4b_b"], 1))
    p4 = relu(conv(p4, params["p4c_w"], params["p4c_b"], 1))
    return jnp.concatenate([p1, p2, p3, p4], axis=1)


if __name__ == "__main__":
    key = jax.random.PRNGKey(0)
    k_x, k_p = jax.random.split(key)

    N, in_c, H, W = 2, 8, 16, 16
    c1, c2, c3, c4 = 8, (8, 16), 8, (8, 16)

    x = jax.random.normal(k_x, (N, in_c, H, W), dtype=jnp.float32)
    params = init_inception_params(k_p, in_c, c1, c2, c3, c4)

    out = inception_forward(x, params)
    out = jax.block_until_ready(out)

    expected_c = c1 + c2[1] + c3 + c4[1]
    assert out.shape == (N, expected_c, H, W), out.shape
    assert out.dtype == jnp.float32
    assert bool(jnp.all(jnp.isfinite(out)))

    # Cross-check against a pure-XLA reference of the same module.
    ref = _inception_reference(x, params)
    max_abs_err = float(jnp.max(jnp.abs(out - ref)))
    assert max_abs_err < 2e-3, max_abs_err

    print("KERNEL_OK")
</pallas_src>

<mosaic_0001>
module attributes {stable_mosaic.version = 11 : i64} {
  func.func @kernel(%arg0: i32, %arg1: memref<1x16x16x8xf32, #tpu.memory_space<vmem>>, %arg2: memref<8x24xf32, #tpu.memory_space<vmem>>, %arg3: memref<1x24xf32, #tpu.memory_space<vmem>>, %arg4: memref<8x8xf32, #tpu.memory_space<vmem>>, %arg5: memref<1x8xf32, #tpu.memory_space<vmem>>, %arg6: memref<72x16xf32, #tpu.memory_space<vmem>>, %arg7: memref<1x16xf32, #tpu.memory_space<vmem>>, %arg8: memref<72x16xf32, #tpu.memory_space<vmem>>, %arg9: memref<1x16xf32, #tpu.memory_space<vmem>>, %arg10: memref<144x16xf32, #tpu.memory_space<vmem>>, %arg11: memref<1x16xf32, #tpu.memory_space<vmem>>, %arg12: memref<1x16x16x48xf32, #tpu.memory_space<vmem>>) attributes {dimension_semantics = [#tpu.dimension_semantics<parallel>], iteration_bounds = array<i64: 2>, scalar_prefetch = 0 : i64, scratch_operands = 0 : i64, tpu.core_type = #tpu.core_type<tc>, window_params = [{transform_indices = @transform_0, window_bounds = array<i64: 1, 16, 16, 8>}, {pipeline_mode = #tpu.pipeline_mode<synchronous>, transform_indices = @transform_1, window_bounds = array<i64: 8, 24>}, {pipeline_mode = #tpu.pipeline_mode<synchronous>, transform_indices = @transform_2, window_bounds = array<i64: 1, 24>}, {pipeline_mode = #tpu.pipeline_mode<synchronous>, transform_indices = @transform_3, window_bounds = array<i64: 8, 8>}, {pipeline_mode = #tpu.pipeline_mode<synchronous>, transform_indices = @transform_4, window_bounds = array<i64: 1, 8>}, {pipeline_mode = #tpu.pipeline_mode<synchronous>, transform_indices = @transform_5, window_bounds = array<i64: 72, 16>}, {pipeline_mode = #tpu.pipeline_mode<synchronous>, transform_indices = @transform_6, window_bounds = array<i64: 1, 16>}, {pipeline_mode = #tpu.pipeline_mode<synchronous>, transform_indices = @transform_7, window_bounds = array<i64: 72, 16>}, {pipeline_mode = #tpu.pipeline_mode<synchronous>, transform_indices = @transform_8, window_bounds = array<i64: 1, 16>}, {pipeline_mode = #tpu.pipeline_mode<synchronous>, transform_indices = @transform_9, window_bounds = array<i64: 144, 16>}, {pipeline_mode = #tpu.pipeline_mode<synchronous>, transform_indices = @transform_10, window_bounds = array<i64: 1, 16>}, {transform_indices = @transform_11, window_bounds = array<i64: 1, 16, 16, 48>}]} {
    %c0 = arith.constant 0 : index
    %c0_0 = arith.constant 0 : index
    %c0_1 = arith.constant 0 : index
    %c0_2 = arith.constant 0 : index
    %0 = vector.load %arg1[%c0, %c0_0, %c0_1, %c0_2] : memref<1x16x16x8xf32, #tpu.memory_space<vmem>>, vector<1x16x16x8xf32>
    %1 = vector.shape_cast %0 : vector<1x16x16x8xf32> to vector<16x16x8xf32>
    %2 = vector.shape_cast %1 : vector<16x16x8xf32> to vector<256x8xf32>
    %c0_3 = arith.constant 0 : index
    %c0_4 = arith.constant 0 : index
    %3 = vector.load %arg2[%c0_3, %c0_4] : memref<8x24xf32, #tpu.memory_space<vmem>>, vector<8x24xf32>
    %cst = arith.constant dense<0.000000e+00> : vector<256x24xf32>
    %4 = tpu.matmul %2, %3, %cst {dimension_numbers = #tpu.dot_dimension_numbers<[1], [0], [0], [1], [0, 0, 1, 1], [], []>} : vector<256x8xf32>, vector<8x24xf32>, vector<256x24xf32> -> vector<256x24xf32>
    %c0_5 = arith.constant 0 : index
    %c0_6 = arith.constant 0 : index
    %5 = vector.load %arg3[%c0_5, %c0_6] : memref<1x24xf32, #tpu.memory_space<vmem>>, vector<1x24xf32>
    %6 = vector.broadcast %5 : vector<1x24xf32> to vector<256x24xf32>
    %7 = arith.addf %4, %6 : vector<256x24xf32>
    %cst_7 = arith.constant 0.000000e+00 : f32
    %8 = vector.broadcast %cst_7 : f32 to vector<256x24xf32>
    %9 = arith.maximumf %7, %8 : vector<256x24xf32>
    %10 = vector.extract_strided_slice %9 {offsets = [0, 0], sizes = [256, 8], strides = [1, 1]} : vector<256x24xf32> to vector<256x8xf32>
    %11 = vector.extract_strided_slice %9 {offsets = [0, 8], sizes = [256, 8], strides = [1, 1]} : vector<256x24xf32> to vector<256x8xf32>
    %12 = vector.extract_strided_slice %9 {offsets = [0, 16], sizes = [256, 8], strides = [1, 1]} : vector<256x24xf32> to vector<256x8xf32>
    %cst_8 = arith.constant 0.000000e+00 : f32
    %13 = vector.broadcast %cst_8 : f32 to vector<1x16x8xf32>
    %14 = tpu.concatenate %13, %1, %13 in 0 : vector<1x16x8xf32>, vector<16x16x8xf32>, vector<1x16x8xf32> -> vector<18x16x8xf32>
    %cst_9 = arith.constant 0.000000e+00 : f32
    %15 = vector.broadcast %cst_9 : f32 to vector<18x1x8xf32>
    %16 = tpu.concatenate %15, %14, %15 in 1 : vector<18x1x8xf32>, vector<18x16x8xf32>, vector<18x1x8xf32> -> vector<18x18x8xf32>
    %cst_10 = arith.constant 0.000000e+00 : f32
    %17 = vector.broadcast %cst_10 : f32 to vector<16x16x8xf32>
    %18 = vector.extract_strided_slice %16 {offsets = [0, 0, 0], sizes = [16, 16, 8], strides = [1, 1, 1]} : vector<18x18x8xf32> to vector<16x16x8xf32>
    %19 = arith.addf %17, %18 : vector<16x16x8xf32>
    %20 = vector.extract_strided_slice %16 {offsets = [0, 1, 0], sizes = [16, 16, 8], strides = [1, 1, 1]} : vector<18x18x8xf32> to vector<16x16x8xf32>
    %21 = arith.addf %19, %20 : vector<16x16x8xf32>
    %22 = vector.extract_strided_slice %16 {offsets = [0, 2, 0], sizes = [16, 16, 8], strides = [1, 1, 1]} : vector<18x18x8xf32> to vector<16x16x8xf32>
    %23 = arith.addf %21, %22 : vector<16x16x8xf32>
    %24 = vector.extract_strided_slice %16 {offsets = [1, 0, 0], sizes = [16, 16, 8], strides = [1, 1, 1]} : vector<18x18x8xf32> to vector<16x16x8xf32>
    %25 = arith.addf %23, %24 : vector<16x16x8xf32>
    %26 = vector.extract_strided_slice %16 {offsets = [1, 1, 0], sizes = [16, 16, 8], strides = [1, 1, 1]} : vector<18x18x8xf32> to vector<16x16x8xf32>
    %27 = arith.addf %25, %26 : vector<16x16x8xf32>
    %28 = vector.extract_strided_slice %16 {offsets = [1, 2, 0], sizes = [16, 16, 8], strides = [1, 1, 1]} : vector<18x18x8xf32> to vector<16x16x8xf32>
    %29 = arith.addf %27, %28 : vector<16x16x8xf32>
    %30 = vector.extract_strided_slice %16 {offsets = [2, 0, 0], sizes = [16, 16, 8], strides = [1, 1, 1]} : vector<18x18x8xf32> to vector<16x16x8xf32>
    %31 = arith.addf %29, %30 : vector<16x16x8xf32>
    %32 = vector.extract_strided_slice %16 {offsets = [2, 1, 0], sizes = [16, 16, 8], strides = [1, 1, 1]} : vector<18x18x8xf32> to vector<16x16x8xf32>
    %33 = arith.addf %31, %32 : vector<16x16x8xf32>
    %34 = vector.extract_strided_slice %16 {offsets = [2, 2, 0], sizes = [16, 16, 8], strides = [1, 1, 1]} : vector<18x18x8xf32> to vector<16x16x8xf32>
    %35 = arith.addf %33, %34 : vector<16x16x8xf32>
    %cst_11 = arith.constant 0.111111112 : f32
    %36 = vector.broadcast %cst_11 : f32 to vector<16x16x8xf32>
    %37 = arith.mulf %35, %36 : vector<16x16x8xf32>
    %38 = vector.shape_cast %37 : vector<16x16x8xf32> to vector<256x8xf32>
    %c0_12 = arith.constant 0 : index
    %c0_13 = arith.constant 0 : index
    %39 = vector.load %arg4[%c0_12, %c0_13] : memref<8x8xf32, #tpu.memory_space<vmem>>, vector<8x8xf32>
    %cst_14 = arith.constant dense<0.000000e+00> : vector<256x8xf32>
    %40 = tpu.matmul %38, %39, %cst_14 {dimension_numbers = #tpu.dot_dimension_numbers<[1], [0], [0], [1], [0, 0, 1, 1], [], []>} : vector<256x8xf32>, vector<8x8xf32>, vector<256x8xf32> -> vector<256x8xf32>
    %c0_15 = arith.constant 0 : index
    %c0_16 = arith.constant 0 : index
    %41 = vector.load %arg5[%c0_15, %c0_16] : memref<1x8xf32, #tpu.memory_space<vmem>>, vector<1x8xf32>
    %42 = vector.broadcast %41 : vector<1x8xf32> to vector<256x8xf32>
    %43 = arith.addf %40, %42 : vector<256x8xf32>
    %cst_17 = arith.constant 0.000000e+00 : f32
    %44 = vector.broadcast %cst_17 : f32 to vector<256x8xf32>
    %45 = arith.maximumf %43, %44 : vector<256x8xf32>
    %46 = vector.shape_cast %11 : vector<256x8xf32> to vector<16x16x8xf32>
    %cst_18 = arith.constant 0.000000e+00 : f32
    %47 = vector.broadcast %cst_18 : f32 to vector<1x16x8xf32>
    %48 = tpu.concatenate %47, %46, %47 in 0 : vector<1x16x8xf32>, vector<16x16x8xf32>, vector<1x16x8xf32> -> vector<18x16x8xf32>
    %cst_19 = arith.constant 0.000000e+00 : f32
    %49 = vector.broadcast %cst_19 : f32 to vector<18x1x8xf32>
    %50 = tpu.concatenate %49, %48, %49 in 1 : vector<18x1x8xf32>, vector<18x16x8xf32>, vector<18x1x8xf32> -> vector<18x18x8xf32>
    %51 = vector.extract_strided_slice %50 {offsets = [0, 0, 0], sizes = [16, 16, 8], strides = [1, 1, 1]} : vector<18x18x8xf32> to vector<16x16x8xf32>
    %52 = vector.shape_cast %51 : vector<16x16x8xf32> to vector<256x8xf32>
    %53 = vector.extract_strided_slice %50 {offsets = [0, 1, 0], sizes = [16, 16, 8], strides = [1, 1, 1]} : vector<18x18x8xf32> to vector<16x16x8xf32>
    %54 = vector.shape_cast %53 : vector<16x16x8xf32> to vector<256x8xf32>
    %55 = vector.extract_strided_slice %50 {offsets = [0, 2, 0], sizes = [16, 16, 8], strides = [1, 1, 1]} : vector<18x18x8xf32> to vector<16x16x8xf32>
    %56 = vector.shape_cast %55 : vector<16x16x8xf32> to vector<256x8xf32>
    %57 = vector.extract_strided_slice %50 {offsets = [1, 0, 0], sizes = [16, 16, 8], strides = [1, 1, 1]} : vector<18x18x8xf32> to vector<16x16x8xf32>
    %58 = vector.shape_cast %57 : vector<16x16x8xf32> to vector<256x8xf32>
    %59 = vector.extract_strided_slice %50 {offsets = [1, 1, 0], sizes = [16, 16, 8], strides = [1, 1, 1]} : vector<18x18x8xf32> to vector<16x16x8xf32>
    %60 = vector.shape_cast %59 : vector<16x16x8xf32> to vector<256x8xf32>
    %61 = vector.extract_strided_slice %50 {offsets = [1, 2, 0], sizes = [16, 16, 8], strides = [1, 1, 1]} : vector<18x18x8xf32> to vector<16x16x8xf32>
    %62 = vector.shape_cast %61 : vector<16x16x8xf32> to vector<256x8xf32>
    %63 = vector.extract_strided_slice %50 {offsets = [2, 0, 0], sizes = [16, 16, 8], strides = [1, 1, 1]} : vector<18x18x8xf32> to vector<16x16x8xf32>
    %64 = vector.shape_cast %63 : vector<16x16x8xf32> to vector<256x8xf32>
    %65 = vector.extract_strided_slice %50 {offsets = [2, 1, 0], sizes = [16, 16, 8], strides = [1, 1, 1]} : vector<18x18x8xf32> to vector<16x16x8xf32>
    %66 = vector.shape_cast %65 : vector<16x16x8xf32> to vector<256x8xf32>
    %67 = vector.extract_strided_slice %50 {offsets = [2, 2, 0], sizes = [16, 16, 8], strides = [1, 1, 1]} : vector<18x18x8xf32> to vector<16x16x8xf32>
    %68 = vector.shape_cast %67 : vector<16x16x8xf32> to vector<256x8xf32>
    %69 = tpu.concatenate %52, %54, %56, %58, %60, %62, %64, %66, %68 in 1 : vector<256x8xf32>, vector<256x8xf32>, vector<256x8xf32>, vector<256x8xf32>, vector<256x8xf32>, vector<256x8xf32>, vector<256x8xf32>, vector<256x8xf32>, vector<256x8xf32> -> vector<256x72xf32>
    %c0_20 = arith.constant 0 : index
    %c0_21 = arith.constant 0 : index
    %70 = vector.load %arg6[%c0_20, %c0_21] : memref<72x16xf32, #tpu.memory_space<vmem>>, vector<72x16xf32>
    %cst_22 = arith.constant dense<0.000000e+00> : vector<256x16xf32>
    %71 = tpu.matmul %69, %70, %cst_22 {dimension_numbers = #tpu.dot_dimension_numbers<[1], [0], [0], [1], [0, 0, 1, 1], [], []>} : vector<256x72xf32>, vector<72x16xf32>, vector<256x16xf32> -> vector<256x16xf32>
    %c0_23 = arith.constant 0 : index
    %c0_24 = arith.constant 0 : index
    %72 = vector.load %arg7[%c0_23, %c0_24] : memref<1x16xf32, #tpu.memory_space<vmem>>, vector<1x16xf32>
    %73 = vector.broadcast %72 : vector<1x16xf32> to vector<256x16xf32>
    %74 = arith.addf %71, %73 : vector<256x16xf32>
    %cst_25 = arith.constant 0.000000e+00 : f32
    %75 = vector.broadcast %cst_25 : f32 to vector<256x16xf32>
    %76 = arith.maximumf %74, %75 : vector<256x16xf32>
    %77 = vector.shape_cast %12 : vector<256x8xf32> to vector<16x16x8xf32>
    %cst_26 = arith.constant 0.000000e+00 : f32
    %78 = vector.broadcast %cst_26 : f32 to vector<1x16x8xf32>
    %79 = tpu.concatenate %78, %77, %78 in 0 : vector<1x16x8xf32>, vector<16x16x8xf32>, vector<1x16x8xf32> -> vector<18x16x8xf32>
    %cst_27 = arith.constant 0.000000e+00 : f32
    %80 = vector.broadcast %cst_27 : f32 to vector<18x1x8xf32>
    %81 = tpu.concatenate %80, %79, %80 in 1 : vector<18x1x8xf32>, vector<18x16x8xf32>, vector<18x1x8xf32> -> vector<18x18x8xf32>
    %82 = vector.extract_strided_slice %81 {offsets = [0, 0, 0], sizes = [16, 16, 8], strides = [1, 1, 1]} : vector<18x18x8xf32> to vector<16x16x8xf32>
    %83 = vector.shape_cast %82 : vector<16x16x8xf32> to vector<256x8xf32>
    %84 = vector.extract_strided_slice %81 {offsets = [0, 1, 0], sizes = [16, 16, 8], strides = [1, 1, 1]} : vector<18x18x8xf32> to vector<16x16x8xf32>
    %85 = vector.shape_cast %84 : vector<16x16x8xf32> to vector<256x8xf32>
    %86 = vector.extract_strided_slice %81 {offsets = [0, 2, 0], sizes = [16, 16, 8], strides = [1, 1, 1]} : vector<18x18x8xf32> to vector<16x16x8xf32>
    %87 = vector.shape_cast %86 : vector<16x16x8xf32> to vector<256x8xf32>
    %88 = vector.extract_strided_slice %81 {offsets = [1, 0, 0], sizes = [16, 16, 8], strides = [1, 1, 1]} : vector<18x18x8xf32> to vector<16x16x8xf32>
    %89 = vector.shape_cast %88 : vector<16x16x8xf32> to vector<256x8xf32>
    %90 = vector.extract_strided_slice %81 {offsets = [1, 1, 0], sizes = [16, 16, 8], strides = [1, 1, 1]} : vector<18x18x8xf32> to vector<16x16x8xf32>
    %91 = vector.shape_cast %90 : vector<16x16x8xf32> to vector<256x8xf32>
    %92 = vector.extract_strided_slice %81 {offsets = [1, 2, 0], sizes = [16, 16, 8], strides = [1, 1, 1]} : vector<18x18x8xf32> to vector<16x16x8xf32>
    %93 = vector.shape_cast %92 : vector<16x16x8xf32> to vector<256x8xf32>
    %94 = vector.extract_strided_slice %81 {offsets = [2, 0, 0], sizes = [16, 16, 8], strides = [1, 1, 1]} : vector<18x18x8xf32> to vector<16x16x8xf32>
    %95 = vector.shape_cast %94 : vector<16x16x8xf32> to vector<256x8xf32>
    %96 = vector.extract_strided_slice %81 {offsets = [2, 1, 0], sizes = [16, 16, 8], strides = [1, 1, 1]} : vector<18x18x8xf32> to vector<16x16x8xf32>
    %97 = vector.shape_cast %96 : vector<16x16x8xf32> to vector<256x8xf32>
    %98 = vector.extract_strided_slice %81 {offsets = [2, 2, 0], sizes = [16, 16, 8], strides = [1, 1, 1]} : vector<18x18x8xf32> to vector<16x16x8xf32>
    %99 = vector.shape_cast %98 : vector<16x16x8xf32> to vector<256x8xf32>
    %100 = tpu.concatenate %83, %85, %87, %89, %91, %93, %95, %97, %99 in 1 : vector<256x8xf32>, vector<256x8xf32>, vector<256x8xf32>, vector<256x8xf32>, vector<256x8xf32>, vector<256x8xf32>, vector<256x8xf32>, vector<256x8xf32>, vector<256x8xf32> -> vector<256x72xf32>
    %c0_28 = arith.constant 0 : index
    %c0_29 = arith.constant 0 : index
    %101 = vector.load %arg8[%c0_28, %c0_29] : memref<72x16xf32, #tpu.memory_space<vmem>>, vector<72x16xf32>
    %cst_30 = arith.constant dense<0.000000e+00> : vector<256x16xf32>
    %102 = tpu.matmul %100, %101, %cst_30 {dimension_numbers = #tpu.dot_dimension_numbers<[1], [0], [0], [1], [0, 0, 1, 1], [], []>} : vector<256x72xf32>, vector<72x16xf32>, vector<256x16xf32> -> vector<256x16xf32>
    %c0_31 = arith.constant 0 : index
    %c0_32 = arith.constant 0 : index
    %103 = vector.load %arg9[%c0_31, %c0_32] : memref<1x16xf32, #tpu.memory_space<vmem>>, vector<1x16xf32>
    %104 = vector.broadcast %103 : vector<1x16xf32> to vector<256x16xf32>
    %105 = arith.addf %102, %104 : vector<256x16xf32>
    %cst_33 = arith.constant 0.000000e+00 : f32
    %106 = vector.broadcast %cst_33 : f32 to vector<256x16xf32>
    %107 = arith.maximumf %105, %106 : vector<256x16xf32>
    %108 = vector.shape_cast %107 : vector<256x16xf32> to vector<16x16x16xf32>
    %cst_34 = arith.constant 0.000000e+00 : f32
    %109 = vector.broadcast %cst_34 : f32 to vector<1x16x16xf32>
    %110 = tpu.concatenate %109, %108, %109 in 0 : vector<1x16x16xf32>, vector<16x16x16xf32>, vector<1x16x16xf32> -> vector<18x16x16xf32>
    %cst_35 = arith.constant 0.000000e+00 : f32
    %111 = vector.broadcast %cst_35 : f32 to vector<18x1x16xf32>
    %112 = tpu.concatenate %111, %110, %111 in 1 : vector<18x1x16xf32>, vector<18x16x16xf32>, vector<18x1x16xf32> -> vector<18x18x16xf32>
    %113 = vector.extract_strided_slice %112 {offsets = [0, 0, 0], sizes = [16, 16, 16], strides = [1, 1, 1]} : vector<18x18x16xf32> to vector<16x16x16xf32>
    %114 = vector.shape_cast %113 : vector<16x16x16xf32> to vector<256x16xf32>
    %115 = vector.extract_strided_slice %112 {offsets = [0, 1, 0], sizes = [16, 16, 16], strides = [1, 1, 1]} : vector<18x18x16xf32> to vector<16x16x16xf32>
    %116 = vector.shape_cast %115 : vector<16x16x16xf32> to vector<256x16xf32>
    %117 = vector.extract_strided_slice %112 {offsets = [0, 2, 0], sizes = [16, 16, 16], strides = [1, 1, 1]} : vector<18x18x16xf32> to vector<16x16x16xf32>
    %118 = vector.shape_cast %117 : vector<16x16x16xf32> to vector<256x16xf32>
    %119 = vector.extract_strided_slice %112 {offsets = [1, 0, 0], sizes = [16, 16, 16], strides = [1, 1, 1]} : vector<18x18x16xf32> to vector<16x16x16xf32>
    %120 = vector.shape_cast %119 : vector<16x16x16xf32> to vector<256x16xf32>
    %121 = vector.extract_strided_slice %112 {offsets = [1, 1, 0], sizes = [16, 16, 16], strides = [1, 1, 1]} : vector<18x18x16xf32> to vector<16x16x16xf32>
    %122 = vector.shape_cast %121 : vector<16x16x16xf32> to vector<256x16xf32>
    %123 = vector.extract_strided_slice %112 {offsets = [1, 2, 0], sizes = [16, 16, 16], strides = [1, 1, 1]} : vector<18x18x16xf32> to vector<16x16x16xf32>
    %124 = vector.shape_cast %123 : vector<16x16x16xf32> to vector<256x16xf32>
    %125 = vector.extract_strided_slice %112 {offsets = [2, 0, 0], sizes = [16, 16, 16], strides = [1, 1, 1]} : vector<18x18x16xf32> to vector<16x16x16xf32>
    %126 = vector.shape_cast %125 : vector<16x16x16xf32> to vector<256x16xf32>
    %127 = vector.extract_strided_slice %112 {offsets = [2, 1, 0], sizes = [16, 16, 16], strides = [1, 1, 1]} : vector<18x18x16xf32> to vector<16x16x16xf32>
    %128 = vector.shape_cast %127 : vector<16x16x16xf32> to vector<256x16xf32>
    %129 = vector.extract_strided_slice %112 {offsets = [2, 2, 0], sizes = [16, 16, 16], strides = [1, 1, 1]} : vector<18x18x16xf32> to vector<16x16x16xf32>
    %130 = vector.shape_cast %129 : vector<16x16x16xf32> to vector<256x16xf32>
    %131 = tpu.concatenate %114, %116, %118, %120, %122, %124, %126, %128, %130 in 1 : vector<256x16xf32>, vector<256x16xf32>, vector<256x16xf32>, vector<256x16xf32>, vector<256x16xf32>, vector<256x16xf32>, vector<256x16xf32>, vector<256x16xf32>, vector<256x16xf32> -> vector<256x144xf32>
    %c0_36 = arith.constant 0 : index
    %c0_37 = arith.constant 0 : index
    %132 = vector.load %arg10[%c0_36, %c0_37] : memref<144x16xf32, #tpu.memory_space<vmem>>, vector<144x16xf32>
    %cst_38 = arith.constant dense<0.000000e+00> : vector<256x16xf32>
    %133 = tpu.matmul %131, %132, %cst_38 {dimension_numbers = #tpu.dot_dimension_numbers<[1], [0], [0], [1], [0, 0, 1, 1], [], []>} : vector<256x144xf32>, vector<144x16xf32>, vector<256x16xf32> -> vector<256x16xf32>
    %c0_39 = arith.constant 0 : index
    %c0_40 = arith.constant 0 : index
    %134 = vector.load %arg11[%c0_39, %c0_40] : memref<1x16xf32, #tpu.memory_space<vmem>>, vector<1x16xf32>
    %135 = vector.broadcast %134 : vector<1x16xf32> to vector<256x16xf32>
    %136 = arith.addf %133, %135 : vector<256x16xf32>
    %cst_41 = arith.constant 0.000000e+00 : f32
    %137 = vector.broadcast %cst_41 : f32 to vector<256x16xf32>
    %138 = arith.maximumf %136, %137 : vector<256x16xf32>
    %139 = tpu.concatenate %10, %76, %45, %138 in 1 : vector<256x8xf32>, vector<256x16xf32>, vector<256x8xf32>, vector<256x16xf32> -> vector<256x48xf32>
    %140 = vector.shape_cast %139 : vector<256x48xf32> to vector<16x16x48xf32>
    %c0_42 = arith.constant 0 : index
    %c0_43 = arith.constant 0 : index
    %c0_44 = arith.constant 0 : index
    %c0_45 = arith.constant 0 : index
    %141 = vector.load %arg12[%c0_42, %c0_43, %c0_44, %c0_45] : memref<1x16x16x48xf32, #tpu.memory_space<vmem>>, vector<1x16x16x48xf32>
    %142 = vector.shape_cast %141 : vector<1x16x16x48xf32> to vector<16x16x48xf32>
    %143 = vector.shape_cast %140 : vector<16x16x48xf32> to vector<1x16x16x48xf32>
    tpu.vector_store %arg12[%c0_42, %c0_43, %c0_44, %c0_45], %143 {strides = array<i32>} : memref<1x16x16x48xf32, #tpu.memory_space<vmem>>, vector<1x16x16x48xf32>,
    return
  }
  func.func @transform_0(%arg0: i32) -> (i32, i32, i32, i32) {
    %c0_i32 = arith.constant 0 : i32
    %c0_i32_0 = arith.constant 0 : i32
    %c0_i32_1 = arith.constant 0 : i32
    %c0_i32_2 = arith.constant 0 : i32
    return %arg0, %c0_i32, %c0_i32_0, %c0_i32_1 : i32, i32, i32, i32
  }
  func.func @transform_1(%arg0: i32) -> (i32, i32) {
    %c0_i32 = arith.constant 0 : i32
    %c0_i32_0 = arith.constant 0 : i32
    %c0_i32_1 = arith.constant 0 : i32
    return %c0_i32, %c0_i32_0 : i32, i32
  }
  func.func @transform_2(%arg0: i32) -> (i32, i32) {
    %c0_i32 = arith.constant 0 : i32
    %c0_i32_0 = arith.constant 0 : i32
    %c0_i32_1 = arith.constant 0 : i32
    return %c0_i32, %c0_i32_0 : i32, i32
  }
  func.func @transform_3(%arg0: i32) -> (i32, i32) {
    %c0_i32 = arith.constant 0 : i32
    %c0_i32_0 = arith.constant 0 : i32
    %c0_i32_1 = arith.constant 0 : i32
    return %c0_i32, %c0_i32_0 : i32, i32
  }
  func.func @transform_4(%arg0: i32) -> (i32, i32) {
    %c0_i32 = arith.constant 0 : i32
    %c0_i32_0 = arith.constant 0 : i32
    %c0_i32_1 = arith.constant 0 : i32
    return %c0_i32, %c0_i32_0 : i32, i32
  }
  func.func @transform_5(%arg0: i32) -> (i32, i32) {
    %c0_i32 = arith.constant 0 : i32
    %c0_i32_0 = arith.constant 0 : i32
    %c0_i32_1 = arith.constant 0 : i32
    return %c0_i32, %c0_i32_0 : i32, i32
  }
  func.func @transform_6(%arg0: i32) -> (i32, i32) {
    %c0_i32 = arith.constant 0 : i32
    %c0_i32_0 = arith.constant 0 : i32
    %c0_i32_1 = arith.constant 0 : i32
    return %c0_i32, %c0_i32_0 : i32, i32
  }
  func.func @transform_7(%arg0: i32) -> (i32, i32) {
    %c0_i32 = arith.constant 0 : i32
    %c0_i32_0 = arith.constant 0 : i32
    %c0_i32_1 = arith.constant 0 : i32
    return %c0_i32, %c0_i32_0 : i32, i32
  }
  func.func @transform_8(%arg0: i32) -> (i32, i32) {
    %c0_i32 = arith.constant 0 : i32
    %c0_i32_0 = arith.constant 0 : i32
    %c0_i32_1 = arith.constant 0 : i32
    return %c0_i32, %c0_i32_0 : i32, i32
  }
  func.func @transform_9(%arg0: i32) -> (i32, i32) {
    %c0_i32 = arith.constant 0 : i32
    %c0_i32_0 = arith.constant 0 : i32
    %c0_i32_1 = arith.constant 0 : i32
    return %c0_i32, %c0_i32_0 : i32, i32
  }
  func.func @transform_10(%arg0: i32) -> (i32, i32) {
    %c0_i32 = arith.constant 0 : i32
    %c0_i32_0 = arith.constant 0 : i32
    %c0_i32_1 = arith.constant 0 : i32
    return %c0_i32, %c0_i32_0 : i32, i32
  }
  func.func @transform_11(%arg0: i32) -> (i32, i32, i32, i32) {
    %c0_i32 = arith.constant 0 : i32
    %c0_i32_0 = arith.constant 0 : i32
    %c0_i32_1 = arith.constant 0 : i32
    %c0_i32_2 = arith.constant 0 : i32
    return %arg0, %c0_i32, %c0_i32_0, %c0_i32_1 : i32, i32, i32, i32
  }
}

</mosaic_0001>

<bundles_post_ra>
// kernel: tpu_custom_call.1
= control target key start
LH: loop header
LB: loop body
LE: loop exit
PB: predicated region body
PF: predicated region fallthrough
CT: control target
= control target key end

     0   :  { %s15679_s0 = inlined_call_operand.vmem [shape: f32[2,16,16,8], index: 0, kind: input, shape index: {}]   ;;  %s15680_s1 = inlined_call_operand.vmem [shape: f32[8,24], index: 1, kind: input, shape index: {}]   ;;  %s15681_s2 = inlined_call_operand.vmem [shape: f32[1,24], index: 2, kind: input, shape index: {}]   ;;  %s15682_s3 = inlined_call_operand.vmem [shape: f32[8,8], index: 3, kind: input, shape index: {}]   ;;  %s15683_s4 = inlined_call_operand.vmem [shape: f32[1,8], index: 4, kind: input, shape index: {}]   ;;  %s15684_s5 = inlined_call_operand.vmem [shape: f32[72,16], index: 5, kind: input, shape index: {}]   ;;  %s15685_s6 = inlined_call_operand.vmem [shape: f32[1,16], index: 6, kind: input, shape index: {}]   ;;  %s15686_s7 = inlined_call_operand.vmem [shape: f32[72,16], index: 7, kind: input, shape index: {}]   ;;  %s15687_s8 = inlined_call_operand.vmem [shape: f32[1,16], index: 8, kind: input, shape index: {}]   ;;  %s15688_s9 = inlined_call_operand.vmem [shape: f32[144,16], index: 9, kind: input, shape index: {}]   ;;  %s15689_s10 = inlined_call_operand.vmem [shape: f32[1,16], index: 10, kind: input, shape index: {}]   ;;  %s15690_s11 = inlined_call_operand.hbm [shape: f32[2,16,16,48], index: 11, kind: output, shape index: {}]  }
   0x1   :  { %16212 = sst [smem:[#allocation321_spill]] %s15679_s0 }
   0x2   :  { %16213 = sst [smem:[#allocation322_spill]] %s15680_s1 }
   0x3   :  { %16 = vsyncpa [#allocation3], 0 }
   0x4   :  { %18 = vsyncpa [#allocation3 + $0x1], 0  ;;  %s8127_s17 = smov 0   ;;  %s8129_s18 = smov 0  }
   0x5   :  { %s8131_s19 = smov 0   ;;  %s8133_s20 = smov 0  }
   0x6 LB: > { %s8148_s21 = sadd.s32 4294967295, %s8051_s20   ;;  %s7152_s22 = sadd.s32 4294967294, %s8051_s20   ;;  %s8051_s20 = sphi %s8133_s20, %s17903_s20   ;;  %s8047_s19 = sphi %s8131_s19, %s17902_s19   ;;  %s8043_s18 = sphi %s8129_s18, %s17901_s18   ;;  %s8039_s17 = sphi %s8127_s17, %s17900_s17  }
   0x7   : > { %s8152_s23 = sadd.s32 1, %s8051_s20   ;;  %s267_s24 = sadd.s32 1, %s8047_s19 }
   0x8   : > { %s264_s25 = ssub.s32 %s8051_s20, %s8152_s23  ;;  %p277_p0 = scmp.ne.s32.totalorder %s8047_s19, %s8043_s18 }
   0x9   : > { %p265_p1 = scmp.eq.s32.totalorder %s264_s25, 0  ;;  %p278_p2 = scmp.eq.s32.totalorder %s8148_s21, 1 }
   0xa   : > { %p283_p3 = scmp.ne.s32.totalorder %s8043_s18, %s8039_s17  ;;  %p284_p4 = scmp.eq.s32.totalorder %s7152_s22, 1 }
   0xb   : > { %s8163_s26 = scalar_select %p265_p1, %s8047_s19, %s267_s24  }
   0xc   : > { %p8165_p5 = por %p278_p2, %p277_p0  ;;  %p8169_p6 = por %p284_p4, %p283_p3 }
   0xd   : > { %p7155_p7 = scmp.ge.s32.totalorder %s8051_s20, 1  ;;  %p340_p8 = scmp.lt.s32.totalorder %s8051_s20, 3 }
   0xf   : > { %p341_p9 = pnand %p7155_p7, %p340_p8 }
  0x11   : > { %344 = sbr.rel (%p341_p9) target bundleno = 2925 (0xb6d), region = 64 }
  0x16   : > { %s16216_s1 = sld [smem:[#allocation322_spill]]  ;;  %p380_p10 = scmp.lt.s32.totalorder %s8148_s21, 1  ;;  %vm422_vm0 = vcmask 64512   ;;  %vm665_vm1 = vcmask 1040384   ;;  %vm864_vm2 = vcmask 1046528   ;;  %vm1009_vm3 = vcmask 1045504  }
  0x17   : > { %s16217_s0 = sld [smem:[#allocation321_spill]]  ;;  %s8054_s22 = smov 16   ;;  %vm2855_vm4 = vcmask 130048   ;;  %vm2921_vm5 = vcmask 261120   ;;  %vm2888_vm6 = vcmask 195584   ;;  %vm2954_vm7 = vcmask 326656  }
  0x18   : > { %s381_s12 = scalar_select %p380_p10, %s8148_s21, 1  ;;  %vm3020_vm8 = vcmask 457728   ;;  %vm2987_vm9 = vcmask 392192   ;;  %vm3099_vm10 = vcmask 588800   ;;  %vm3053_vm11 = vcmask 523264  }
  0x19   : > { %s16082_s24 = smov 8   ;;  %s8056_s30 = smov 120   ;;  %vm6119_vm12 = vcmask 654336   ;;  %vm6152_vm13 = vcmask 785408   ;;  %vm6185_vm14 = vcmask 916480  }
  0x1a   : > { %s7324_s13 = sshll.u32 %s381_s12, 8  ;;  %s16080_s12 = smov 24  }
  0x1b   : > { %s15923_s14 = smov 40   ;;  %s15921_s15 = smov 48  }
  0x1c   : > { %v417_v0 = vld [vmem:[%s16216_s1] sm:$0xff]  ;;  %s8062_s25 = smov 64   ;;  %s17020_s29 = smov 40  }
  0x1d   : > { %534 = vmatpush.msra.mxu0 %v417_v0  ;;  %7326 = vmatpush.msra.mxu2 %v417_v0  ;;  %s8183_s16 = scalar_lea.vmem %s16217_s0, %s7324_s13  ;;  %s15925_s13 = smov 32  }
  0x1e   : > { %v385_v1 = vld [vmem:[%s8183_s16] sm:$0xff]  ;;  %v8187_v2 = vld [vmem:[%s8183_s16 + $0x88] sm:$0xff]  ;;  %v8200_v8 = vld [vmem:[%s8183_s16 + $0x90] sm:$0xff] }
  0x1f   : > { %16218 = vst [vmem:[#allocation5_spill] sm:$0xff] %v8187_v2  ;;  %v386_v3 = vld [vmem:[%s8183_s16 + $0x8] sm:$0xff]  ;;  %7159 = vmatmul.msk.f32.vlgmr.msra.gmra.mxu0 %vm422_vm0, %v385_v1  ;;  %v668_v4 = vrot.slane %v385_v1, 7  ;;  %7176 = vmatmul.msk.f32.vlgmr.msra.gmra.mxu2 %vm422_vm0, %v8187_v2  ;;  %v15715_v11 = vrot.slane %v8200_v8, 7  ;;  %v8206_v12 = vld [vmem:[%s8183_s16 + $0x98] sm:$0xff]  ;;  %v387_v16 = vld [vmem:[%s8183_s16 + $0x10] sm:$0xff] }
  0x20   : > { %v669_v5 = vrot.slane %v386_v3, 7  ;;  %16221 = vst [vmem:[#allocation8_spill] sm:$0xff] %v8200_v8  ;;  %v15714_v17 = vrot.slane %v8206_v12, 7  ;;  %v671_v20 = vrot.slane %v387_v16, 7  ;;  %v8240_v28 = vld [vmem:[%s8183_s16 + $0x18] sm:$0xff]  ;;  %v8248_v32 = vld [vmem:[%s8183_s16 + $0xa0] sm:$0xff] }
  0x21   : > { %v8194_v6 = vsel %vm665_vm1, 0.0, %v668_v4  ;;  %16222 = vst [vmem:[#allocation9_spill] sm:$0xff] %v8206_v12  ;;  %v15699_v31 = vrot.slane %v8240_v28, 7  ;;  %v8251_v33 = vld [vmem:[%s8183_s16 + $0x20] sm:$0xff]  ;;  %v8254_v34 = vld [vmem:[%s8183_s16 + $0xa8] sm:$0xff]  ;;  %v15711_v36 = vrot.slane %v8248_v32, 7 }
  0x22   : > { %16219 = vst [vmem:[#allocation6_spill] sm:$0xff] %v8194_v6  ;;  %v8197_v7 = vsel %vm665_vm1, %v668_v4, %v669_v5  ;;  %v870_v9 = vrot.slane %v8194_v6, 1  ;;  %v1015_v10 = vrot.slane %v8194_v6, 2  ;;  %v784_v13 = vsel %vm665_vm1, %v669_v5, 0.0  ;;  %v8263_v39 = vld [vmem:[%s8183_s16 + $0x28] sm:$0xff]  ;;  %v8289_v45 = vld [vmem:[%s8183_s16 + $0xb0] sm:$0xff] }
  0x23   : > { %16220 = vst [vmem:[#allocation7_spill] sm:$0xff] %v8197_v7  ;;  %v871_v14 = vrot.slane %v8197_v7, 1  ;;  %v1016_v15 = vrot.slane %v8197_v7, 2  ;;  %v873_v18 = vrot.slane %v784_v13, 1  ;;  %v1018_v19 = vrot.slane %v784_v13, 2  ;;  %v8292_v46 = vld [vmem:[%s8183_s16 + $0xb8] sm:$0xff] }
  0x24   : > { %v8237_v27 = vsel %vm665_vm1, %v15715_v11, %v15714_v17  ;;  %16228 = vst [vmem:[#allocation15_spill] sm:$0xff] %v8240_v28  ;;  %v8243_v29 = vsel %vm665_vm1, 0.0, %v671_v20  ;;  %v15698_v37 = vrot.slane %v8251_v33, 7  ;;  %v15710_v38 = vrot.slane %v8254_v34, 7  ;;  %v8307_v50 = vld [vmem:[%s8183_s16 + $0x30] sm:$0xff]  ;;  %v8311_v52 = vld [vmem:[%s8183_s16 + $0x38] sm:$0xff] }
  0x25   : > { %v8214_v21 = vsel %vm864_vm2, %v870_v9, %v871_v14  ;;  %v8217_v22 = vsel %vm864_vm2, %v871_v14, %v873_v18  ;;  %v8220_v23 = vsel %vm1009_vm3, %v1016_v15, %v1018_v19  ;;  %v8225_v25 = vsel %vm1009_vm3, %v1015_v10, %v1016_v15  ;;  %16227 = vst [vmem:[#allocation14_spill] sm:$0xff] %v8237_v27  ;;  %v8326_v55 = vld [vmem:[%s8183_s16 + $0xc0] sm:$0xff]  ;;  %v8330_v57 = vld [vmem:[%s8183_s16 + $0xc8] sm:$0xff]  ;;  %v8364_v1 = vld [vmem:[%s8183_s16 + $0xd0] sm:$0xff] }
  0x26   : > { %16223 = vst [vmem:[#allocation10_spill] sm:$0xff] %v8214_v21  ;;  %v979_v24 = vadd.f32 %v8214_v21, %v8194_v6  ;;  %v980_v26 = vadd.f32 %v8217_v22, %v8197_v7  ;;  %v8271_v41 = vsel %vm665_vm1, %v671_v20, %v15699_v31  ;;  %v15697_v42 = vrot.slane %v8263_v39, 7  ;;  %v8345_v60 = vld [vmem:[%s8183_s16 + $0x40] sm:$0xff]  ;;  %v8349_v62 = vld [vmem:[%s8183_s16 + $0x48] sm:$0xff]  ;;  %v8368_v4 = vld [vmem:[%s8183_s16 + $0xd8] sm:$0xff] }
  0x27   : > { %16224 = vst [vmem:[#allocation11_spill] sm:$0xff] %v8217_v22  ;;  %7160 = vmatmul.msk.f32.gmra.mxu0 %vm422_vm0, %v386_v3  ;;  %7177 = vmatmul.msk.f32.gmra.mxu2 %vm422_vm0, %v8200_v8  ;;  %v8279_v43 = vsel %vm665_vm1, %v15711_v36, %v15710_v38  ;;  %v15709_v47 = vrot.slane %v8289_v45, 7  ;;  %v15708_v48 = vrot.slane %v8292_v46, 7  ;;  %v15696_v51 = vrot.slane %v8307_v50, 7  ;;  %v8383_v10 = vld [vmem:[%s8183_s16 + $0x50] sm:$0xff]  ;;  %v8387_v14 = vld [vmem:[%s8183_s16 + $0x58] sm:$0xff] }
  0x28   : > { %16225 = vst [vmem:[#allocation12_spill] sm:$0xff] %v8220_v23  ;;  %v1124_v30 = vadd.f32 %v8225_v25, %v979_v24  ;;  %v8257_v35 = vadd.f32 %v8220_v23, %v980_v26  ;;  %v8286_v44 = vsel %vm665_vm1, %v15698_v37, %v15697_v42  ;;  %v15695_v53 = vrot.slane %v8311_v52, 7  ;;  %v8402_v18 = vld [vmem:[%s8183_s16 + $0xe0] sm:$0xff]  ;;  %v8406_v20 = vld [vmem:[%s8183_s16 + $0xe8] sm:$0xff]  ;;  %v8442_v42 = vld [vmem:[%s8183_s16 + $0xf0] sm:$0xff] }
  0x29   : > { %16226 = vst [vmem:[#allocation13_spill] sm:$0xff] %v8225_v25  ;;  %v8304_v49 = vsel %vm665_vm1, %v15709_v47, %v15708_v48  ;;  %v15707_v56 = vrot.slane %v8326_v55, 7  ;;  %v15706_v58 = vrot.slane %v8330_v57, 7  ;;  %v15694_v61 = vrot.slane %v8345_v60, 7  ;;  %v8476_v47 = vld [vmem:[%s8183_s16 + $0x78] sm:$0xff] }
  0x2a   : > { %16229 = vst [vmem:[#allocation16_spill] sm:$0xff] %v8243_v29  ;;  %v8266_v40 = vadd.f32 %v1124_v30, %v8243_v29  ;;  %v8323_v54 = vsel %vm665_vm1, %v15696_v51, %v15695_v53  ;;  %v15693_v63 = vrot.slane %v8349_v62, 7  ;;  %v15705_v3 = vrot.slane %v8364_v1, 7  ;;  %v8421_v30 = vld [vmem:[%s8183_s16 + $0x60] sm:$0xff] }
  0x2b   : > { %16230 = vst [vmem:[#allocation17_spill] sm:$0xff] %v8248_v32  ;;  %v8342_v59 = vsel %vm665_vm1, %v15707_v56, %v15706_v58  ;;  %v15704_v5 = vrot.slane %v8368_v4, 7  ;;  %v15692_v13 = vrot.slane %v8383_v10, 7  ;;  %v15691_v15 = vrot.slane %v8387_v14, 7  ;;  %v8472_v58 = vld [vmem:[%s8183_s16 + $0x70] sm:$0xff] }
  0x2c   : > { %16231 = vst [vmem:[#allocation18_spill] sm:$0xff] %v8251_v33  ;;  %v8361_v0 = vsel %vm665_vm1, %v15694_v61, %v15693_v63  ;;  %v15703_v19 = vrot.slane %v8402_v18, 7  ;;  %v15700_v24 = vrot.slane %v8406_v20, 7  ;;  %v8053_v61 = vmov 0.0  }
  0x2d   : > { %16232 = vst [vmem:[#allocation19_spill] sm:$0xff] %v8254_v34  ;;  %v8380_v9 = vsel %vm665_vm1, %v15705_v3, %v15704_v5  ;;  %v8432_v53 = vrot.slane %v8053_v61, 7  ;;  %v15713_v31 = vrot.slane %v8442_v42, 7  ;;  %v15718_v48 = vrot.slane %v8472_v58, 7 }
  0x2e   : > { %16233 = vst [vmem:[#allocation20_spill] sm:$0xff] %v8257_v35  ;;  %v8418_v26 = vsel %vm665_vm1, %v15703_v19, %v15700_v24  ;;  %v8450_v24 = vld [vmem:[%s8183_s16 + $0xf8] sm:$0xff] }
  0x2f   : > { %16234 = vst [vmem:[#allocation21_spill] sm:$0xff] %v8263_v39  ;;  %7161 = vmatmul.msk.f32.gmra.mxu0 %vm422_vm0, %v387_v16  ;;  %7178 = vmatmul.msk.f32.gmra.mxu2 %vm422_vm0, %v8206_v12  ;;  %v8399_v16 = vsel %vm665_vm1, %v15692_v13, %v15691_v15  ;;  %v15702_v15 = vrot.slane %v8421_v30, 7  ;;  %v8425_v13 = vld [vmem:[%s8183_s16 + $0x68] sm:$0xff]  ;;  %v8446_v37 = vsel %vm665_vm1, 0.0, %v8432_v53  ;;  %v15712_v61 = vrot.slane %v8450_v24, 7 }
  0x30   : > { %16235 = vst [vmem:[#allocation22_spill] sm:$0xff] %v8266_v40  ;;  %v15701_v63 = vrot.slane %v8425_v13, 7  ;;  %v783_v5 = vsel %vm665_vm1, %v8432_v53, 0.0  ;;  %v865_v36 = vrot.slane %v8446_v37, 1 }
  0x31   : > { %16236 = vst [vmem:[#allocation23_spill] sm:$0xff] %v8271_v41  ;;  %v8464_v19 = vsel %vm665_vm1, %v15713_v31, %v15712_v61  ;;  %v1013_v56 = vrot.slane %v783_v5, 2  ;;  %v866_v61 = vrot.slane %v8432_v53, 1  ;;  %v868_v17 = vrot.slane %v783_v5, 1  ;;  %v8519_v5 = vld [vmem:[%s8183_s16 + $0x80] sm:$0xff]  ;;  %s15919_s16 = smov 56  }
  0x32   : > { %16237 = vst [vmem:[#allocation24_spill] sm:$0xff] %v8279_v43  ;;  %v8439_v51 = vsel %vm665_vm1, %v15702_v15, %v15701_v63  ;;  %v1010_v63 = vrot.slane %v8446_v37, 2  ;;  %v1011_v15 = vrot.slane %v8432_v53, 2 }
  0x33   : > { %16238 = vst [vmem:[#allocation25_spill] sm:$0xff] %v8286_v44  ;;  %v8505_v11 = vsel %vm864_vm2, %v866_v61, %v868_v17  ;;  %v15722_v17 = vrot.slane %v8519_v5, 7 }
  0x34   : > { %16239 = vst [vmem:[#allocation26_spill] sm:$0xff] %v8289_v45  ;;  %v8469_v3 = vsel %vm1009_vm3, %v1010_v63, %v1011_v15  ;;  %v8479_v38 = vsel %vm1009_vm3, %v1011_v15, %v1013_v56  ;;  %v15717_v63 = vrot.slane %v8476_v47, 7  ;;  %v8502_v15 = vsel %vm864_vm2, %v865_v36, %v866_v61 }
  0x35   : > { %16240 = vst [vmem:[#allocation27_spill] sm:$0xff] %v8292_v46  ;;  %v8490_v31 = vpack.i.bf16 %v8479_v38, %v8469_v3  ;;  %v15721_v36 = vrot.slane %v8187_v2, 7 }
  0x36   : > { %16241 = vst [vmem:[#allocation28_spill] sm:$0xff] %v8304_v49  ;;  %v8497_v56 = vsel %vm665_vm1, %v15718_v48, %v15717_v63  ;;  %v8542_v63 = vld [vmem:[%s15681_s2] ss:$0 sm:$0xff] }
  0x37   : > { %16242 = vst [vmem:[#allocation29_spill] sm:$0xff] %v8307_v50  ;;  %7162 = vmatmul.msk.f32.gmra.mxu0 %vm422_vm0, %v8240_v28  ;;  %7179 = vmatmul.msk.f32.gmra.mxu2 %vm422_vm0, %v8248_v32  ;;  %v8531_v61 = vsel %vm665_vm1, %v15722_v17, %v15721_v36 }
  0x38   : > { %16243 = vst [vmem:[#allocation30_spill] sm:$0xff] %v8311_v52  ;;  %7403 = vrot.lane.b32.xlu0 %v8490_v31, %s8054_s22 }
  0x39   : > { %16244 = vst [vmem:[#allocation31_spill] sm:$0xff] %v8323_v54 }
  0x3a   : > { %16245 = vst [vmem:[#allocation32_spill] sm:$0xff] %v8326_v55 }
  0x3b   : > { %16246 = vst [vmem:[#allocation33_spill] sm:$0xff] %v8330_v57 }
  0x3c   : > { %16247 = vst [vmem:[#allocation34_spill] sm:$0xff] %v8342_v59 }
  0x3d   : > { %16248 = vst [vmem:[#allocation35_spill] sm:$0xff] %v8345_v60 }
  0x3e   : > { %16249 = vst [vmem:[#allocation36_spill] sm:$0xff] %v8349_v62 }
  0x3f   : > { %7163 = vmatmul.msk.f32.gmra.mxu0 %vm422_vm0, %v8251_v33  ;;  %7180 = vmatmul.msk.f32.gmra.mxu2 %vm422_vm0, %v8254_v34  ;;  %16250 = vst [vmem:[#allocation37_spill] sm:$0xff] %v8361_v0 }
  0x40   : > { %16251 = vst [vmem:[#allocation38_spill] sm:$0xff] %v8364_v1 }
  0x41   : > { %16252 = vst [vmem:[#allocation39_spill] sm:$0xff] %v8368_v4 }
  0x42   : > { %16253 = vst [vmem:[#allocation40_spill] sm:$0xff] %v8380_v9 }
  0x43   : > { %16254 = vst [vmem:[#allocation41_spill] sm:$0xff] %v8383_v10 }
  0x44   : > { %16255 = vst [vmem:[#allocation42_spill] sm:$0xff] %v8387_v14 }
  0x45   : > { %16256 = vst [vmem:[#allocation43_spill] sm:$0xff] %v8399_v16 }
  0x46   : > { %16257 = vst [vmem:[#allocation44_spill] sm:$0xff] %v8402_v18 }
  0x47   : > { %7164 = vmatmul.msk.f32.gmra.mxu0 %vm422_vm0, %v8263_v39  ;;  %7181 = vmatmul.msk.f32.gmra.mxu2 %vm422_vm0, %v8289_v45  ;;  %16258 = vst [vmem:[#allocation45_spill] sm:$0xff] %v8406_v20 }
  0x48   : > { %16259 = vst [vmem:[#allocation46_spill] sm:$0xff] %v8418_v26 }
  0x49   : > { %16260 = vst [vmem:[#allocation47_spill] sm:$0xff] %v8421_v30 }
  0x4a   : > { %16261 = vst [vmem:[#allocation48_spill] sm:$0xff] %v8425_v13 }
  0x4b   : > { %16262 = vst [vmem:[#allocation49_spill] sm:$0xff] %v8432_v53 }
  0x4c   : > { %16263 = vst [vmem:[#allocation50_spill] sm:$0xff] %v8439_v51  ;;  %v8509_v51 = vpack.i.bf16 %v8505_v11, %v8502_v15 }
  0x4d   : > { %16264 = vst [vmem:[#allocation51_spill] sm:$0xff] %v8442_v42 }
  0x4e   : > { %16265 = vst [vmem:[#allocation52_spill] sm:$0xff] %v8446_v37  ;;  %7398 = vrot.lane.b32.xlu2 %v8509_v51, %s16082_s24 }
  0x4f   : > { %7165 = vmatmul.msk.f32.gmra.mxu0 %vm422_vm0, %v8307_v50  ;;  %7182 = vmatmul.msk.f32.gmra.mxu2 %vm422_vm0, %v8292_v46  ;;  %16266 = vst [vmem:[#allocation53_spill] sm:$0xff] %v8450_v24 }
  0x50   : > { %16267 = vst [vmem:[#allocation54_spill] sm:$0xff] %v8464_v19 }
  0x51   : > { %16268 = vst [vmem:[#allocation55_spill] sm:$0xff] %v8469_v3 }
  0x52   : > { %16269 = vst [vmem:[#allocation56_spill] sm:$0xff] %v8472_v58 }
  0x53   : > { %16270 = vst [vmem:[#allocation57_spill] sm:$0xff] %v8476_v47 }
  0x54   : > { %16271 = vst [vmem:[#allocation58_spill] sm:$0xff] %v8479_v38 }
  0x55   : > { %16272 = vst [vmem:[#allocation59_spill] sm:$0xff] %v8490_v31 }
  0x56   : > { %16273 = vst [vmem:[#allocation60_spill] sm:$0xff] %v8497_v56 }
  0x57   : > { %7166 = vmatmul.msk.f32.gmra.mxu0 %vm422_vm0, %v8311_v52  ;;  %7183 = vmatmul.msk.f32.gmra.mxu2 %vm422_vm0, %v8326_v55  ;;  %16274 = vst [vmem:[#allocation61_spill] sm:$0xff] %v8502_v15 }
  0x58   : > { %16275 = vst [vmem:[#allocation62_spill] sm:$0xff] %v8505_v11 }
  0x59   : > { %16276 = vst [vmem:[#allocation63_spill] sm:$0xff] %v8509_v51 }
  0x5a   : > { %16277 = vst [vmem:[#allocation64_spill] sm:$0xff] %v8519_v5 }
  0x5b   : > { %16278 = vst [vmem:[#allocation65_spill] sm:$0xff] %v8531_v61 }
  0x5f   : > { %7167 = vmatmul.msk.f32.gmra.mxu0 %vm422_vm0, %v8345_v60  ;;  %7184 = vmatmul.msk.f32.gmra.mxu2 %vm422_vm0, %v8330_v57 }
  0x67   : > { %7168 = vmatmul.msk.f32.gmra.mxu0 %vm422_vm0, %v8349_v62  ;;  %7185 = vmatmul.msk.f32.gmra.mxu2 %vm422_vm0, %v8364_v1 }
  0x6f   : > { %7169 = vmatmul.msk.f32.gmra.mxu0 %vm422_vm0, %v8383_v10  ;;  %7186 = vmatmul.msk.f32.gmra.mxu2 %vm422_vm0, %v8368_v4 }
  0x77   : > { %7170 = vmatmul.msk.f32.gmra.mxu0 %vm422_vm0, %v8387_v14  ;;  %7187 = vmatmul.msk.f32.gmra.mxu2 %vm422_vm0, %v8402_v18 }
  0x7f   : > { %7171 = vmatmul.msk.f32.gmra.mxu0 %vm422_vm0, %v8421_v30  ;;  %7188 = vmatmul.msk.f32.gmra.mxu2 %vm422_vm0, %v8406_v20 }
  0x87   : > { %7172 = vmatmul.msk.f32.gmra.mxu0 %vm422_vm0, %v8425_v13  ;;  %7189 = vmatmul.msk.f32.gmra.mxu2 %vm422_vm0, %v8442_v42 }
  0x8f   : > { %7173 = vmatmul.msk.f32.gmra.mxu0 %vm422_vm0, %v8472_v58  ;;  %7190 = vmatmul.msk.f32.gmra.mxu2 %vm422_vm0, %v8450_v24 }
  0x97   : > { %7174 = vmatmul.msk.f32.gmra.mxu0 %vm422_vm0, %v8476_v47 }
  0x9c   : > { %v536_v48 = vpop.f32.mrf.mxu0 }
  0x9d   : > { %v537_v13 = vadd.f32 %v8542_v63, %v536_v48 }
  0x9f   : > { %v8545_v30 = vmax.f32 %v537_v13, 0.0  ;;  %7175 = vmatmul.msk.f32.gmra.mxu0 %vm422_vm0, %v8519_v5 }
  0xa1   : > { %16279 = vst [vmem:[#allocation66_spill] sm:$0xff] %v8545_v30  ;;  %1672 = vrot.lane.b32.xlu0 %v8545_v30, %s8056_s30 }
  0xa2   : > { %v587_v36 = vpop.f32.mrf.mxu2 }
  0xa3   : > { %v588_v17 = vadd.f32 %v8542_v63, %v587_v36 }
  0xa4   : > { %v539_v14 = vpop.f32.mrf.mxu0 }
  0xa5   : > { %v8552_v16 = vmax.f32 %v588_v17, 0.0  ;;  %v540_v10 = vadd.f32 %v8542_v63, %v539_v14 }
  0xa7   : > { %16280 = vst [vmem:[#allocation67_spill] sm:$0xff] %v8552_v16  ;;  %v8555_v62 = vmax.f32 %v540_v10, 0.0  ;;  %1706 = vrot.lane.b32.xlu2 %v8552_v16, %s8056_s30 }
  0xa9   : > { %16281 = vst [vmem:[#allocation68_spill] sm:$0xff] %v8555_v62  ;;  %1674 = vrot.lane.b32.xlu0 %v8555_v62, %s8056_s30 }
  0xaa   : > { %v590_v48 = vpop.f32.mrf.mxu2 }
  0xab   : > { %v591_v13 = vadd.f32 %v8542_v63, %v590_v48 }
  0xac   : > { %v542_v0 = vpop.f32.mrf.mxu0 }
  0xad   : > { %v543_v60 = vadd.f32 %v8542_v63, %v542_v0  ;;  %v8563_v36 = vmax.f32 %v591_v13, 0.0 }
  0xaf   : > { %16282 = vst [vmem:[#allocation69_spill] sm:$0xff] %v8563_v36  ;;  %v8565_v17 = vmax.f32 %v543_v60, 0.0 }
  0xb1   : > { %16283 = vst [vmem:[#allocation70_spill] sm:$0xff] %v8565_v17  ;;  %1676 = vrot.lane.b32.xlu1 %v8565_v17, %s8056_s30  ;;  %1708 = vrot.lane.b32.xlu0 %v8563_v36, %s8056_s30 }
  0xb2   : > { %v593_v10 = vpop.f32.mrf.mxu2 }
  0xb3   : > { %v594_v14 = vadd.f32 %v8542_v63, %v593_v10 }
  0xb4   : > { %v545_v52 = vpop.f32.mrf.mxu0 }
  0xb5   : > { %v8572_v54 = vmax.f32 %v594_v14, 0.0  ;;  %v546_v48 = vadd.f32 %v8542_v63, %v545_v52 }
  0xb7   : > { %16284 = vst [vmem:[#allocation71_spill] sm:$0xff] %v8572_v54  ;;  %v8580_v39 = vmax.f32 %v546_v48, 0.0 }
  0xb9   : > { %1710 = vrot.lane.b32.xlu1 %v8572_v54, %s8056_s30  ;;  %16286 = vst [vmem:[#allocation73_spill] sm:$0xff] %v8580_v39 }
  0xba   : > { %v596_v0 = vpop.f32.mrf.mxu2 }
  0xbb   : > { %v597_v60 = vadd.f32 %v8542_v63, %v596_v0 }
  0xbc   : > { %v548_v13 = vpop.f32.mrf.mxu0 }
  0xbd   : > { %v8578_v50 = vmax.f32 %v597_v60, 0.0  ;;  %v549_v44 = vadd.f32 %v8542_v63, %v548_v13 }
  0xbf   : > { %16285 = vst [vmem:[#allocation72_spill] sm:$0xff] %v8578_v50  ;;  %1712 = vrot.lane.b32.xlu2 %v8578_v50, %s8056_s30  ;;  %v8587_v14 = vmax.f32 %v549_v44, 0.0 }
  0xc1   : > { %1678 = vrot.lane.b32.xlu1 %v8580_v39, %s8056_s30  ;;  %16287 = vst [vmem:[#allocation74_spill] sm:$0xff] %v8587_v14 }
  0xc2   : > { %v599_v10 = vpop.f32.mrf.mxu2 }
  0xc3   : > { %v600_v52 = vadd.f32 %v8542_v63, %v599_v10 }
  0xc4   : > { %v551_v35 = vpop.f32.mrf.mxu0 }
  0xc5   : > { %v8590_v0 = vmax.f32 %v600_v52, 0.0  ;;  %v552_v60 = vadd.f32 %v8542_v63, %v551_v35 }
  0xc7   : > { %16288 = vst [vmem:[#allocation75_spill] sm:$0xff] %v8590_v0  ;;  %1680 = vrot.lane.b32.xlu2 %v8587_v14, %s8056_s30  ;;  %1714 = vrot.lane.b32.xlu0 %v8590_v0, %s8056_s30  ;;  %v8597_v13 = vmax.f32 %v552_v60, 0.0 }
  0xc9   : > { %16289 = vst [vmem:[#allocation76_spill] sm:$0xff] %v8597_v13 }
  0xca   : > { %v602_v48 = vpop.f32.mrf.mxu2 }
  0xcb   : > { %v603_v23 = vadd.f32 %v8542_v63, %v602_v48 }
  0xcc   : > { %v554_v44 = vpop.f32.mrf.mxu0 }
  0xcd   : > { %v8600_v22 = vmax.f32 %v603_v23, 0.0  ;;  %v555_v10 = vadd.f32 %v8542_v63, %v554_v44 }
  0xcf   : > { %16290 = vst [vmem:[#allocation77_spill] sm:$0xff] %v8600_v22  ;;  %v8603_v52 = vmax.f32 %v555_v10, 0.0  ;;  %1682 = vrot.lane.b32.xlu2 %v8597_v13, %s8056_s30  ;;  %1716 = vrot.lane.b32.xlu1 %v8600_v22, %s8056_s30 }
  0xd1   : > { %16291 = vst [vmem:[#allocation78_spill] sm:$0xff] %v8603_v52  ;;  %1684 = vrot.lane.b32.xlu0 %v8603_v52, %s8056_s30 }
  0xd2   : > { %v605_v35 = vpop.f32.mrf.mxu2 }
  0xd3   : > { %v606_v60 = vadd.f32 %v8542_v63, %v605_v35 }
  0xd4   : > { %v557_v48 = vpop.f32.mrf.mxu0 }
  0xd5   : > { %v8612_v33 = vmax.f32 %v606_v60, 0.0  ;;  %v558_v23 = vadd.f32 %v8542_v63, %v557_v48 }
  0xd7   : > { %16292 = vst [vmem:[#allocation79_spill] sm:$0xff] %v8612_v33  ;;  %v8615_v44 = vmax.f32 %v558_v23, 0.0  ;;  %1718 = vrot.lane.b32.xlu2 %v8612_v33, %s8056_s30 }
  0xd9   : > { %16293 = vst [vmem:[#allocation80_spill] sm:$0xff] %v8615_v44  ;;  %1686 = vrot.lane.b32.xlu1 %v8615_v44, %s8056_s30 }
  0xda   : > { %v608_v10 = vpop.f32.mrf.mxu2 }
  0xdb   : > { %v609_v7 = vadd.f32 %v8542_v63, %v608_v10 }
  0xdc   : > { %v560_v40 = vpop.f32.mrf.mxu0 }
  0xdd   : > { %v8622_v28 = vmax.f32 %v609_v7, 0.0  ;;  %v561_v35 = vadd.f32 %v8542_v63, %v560_v40 }
  0xdf   : > { %16294 = vst [vmem:[#allocation81_spill] sm:$0xff] %v8622_v28  ;;  %v8625_v60 = vmax.f32 %v561_v35, 0.0  ;;  %1720 = vrot.lane.b32.xlu0 %v8622_v28, %s8056_s30 }
  0xe1   : > { %16295 = vst [vmem:[#allocation82_spill] sm:$0xff] %v8625_v60  ;;  %1688 = vrot.lane.b32.xlu2 %v8625_v60, %s8056_s30 }
  0xe2   : > { %v611_v48 = vpop.f32.mrf.mxu2 }
  0xe3   : > { %v612_v23 = vadd.f32 %v8542_v63, %v611_v48 }
  0xe4   : > { %v563_v41 = vpop.f32.mrf.mxu0 }
  0xe5   : > { %v8632_v25 = vmax.f32 %v612_v23, 0.0  ;;  %v564_v10 = vadd.f32 %v8542_v63, %v563_v41 }
  0xe7   : > { %16296 = vst [vmem:[#allocation83_spill] sm:$0xff] %v8632_v25  ;;  %v8635_v7 = vmax.f32 %v564_v10, 0.0  ;;  %1722 = vrot.lane.b32.xlu1 %v8632_v25, %s8056_s30 }
  0xe9   : > { %16297 = vst [vmem:[#allocation84_spill] sm:$0xff] %v8635_v7  ;;  %1690 = vrot.lane.b32.xlu0 %v8635_v7, %s8056_s30 }
  0xea   : > { %v614_v40 = vpop.f32.mrf.mxu2 }
  0xeb   : > { %v615_v35 = vadd.f32 %v8542_v63, %v614_v40 }
  0xec   : > { %v566_v29 = vpop.f32.mrf.mxu0 }
  0xed   : > { %v8642_v21 = vmax.f32 %v615_v35, 0.0  ;;  %v567_v48 = vadd.f32 %v8542_v63, %v566_v29 }
  0xef   : > { %16298 = vst [vmem:[#allocation85_spill] sm:$0xff] %v8642_v21  ;;  %v8645_v23 = vmax.f32 %v567_v48, 0.0  ;;  %1724 = vrot.lane.b32.xlu2 %v8642_v21, %s8056_s30 }
  0xf1   : > { %16299 = vst [vmem:[#allocation86_spill] sm:$0xff] %v8645_v23  ;;  %1692 = vrot.lane.b32.xlu1 %v8645_v23, %s8056_s30 }
  0xf2   : > { %v617_v41 = vpop.f32.mrf.mxu2 }
  0xf3   : > { %v618_v10 = vadd.f32 %v8542_v63, %v617_v41 }
  0xf4   : > { %v569_v6 = vpop.f32.mrf.mxu0 }
  0xf5   : > { %v8652_v38 = vmax.f32 %v618_v10, 0.0  ;;  %v570_v40 = vadd.f32 %v8542_v63, %v569_v6 }
  0xf7   : > { %16300 = vst [vmem:[#allocation87_spill] sm:$0xff] %v8652_v38  ;;  %v8655_v35 = vmax.f32 %v570_v40, 0.0  ;;  %1726 = vrot.lane.b32.xlu0 %v8652_v38, %s8056_s30 }
  0xf9   : > { %16301 = vst [vmem:[#allocation88_spill] sm:$0xff] %v8655_v35  ;;  %1694 = vrot.lane.b32.xlu2 %v8655_v35, %s8056_s30 }
  0xfa   : > { %v620_v29 = vpop.f32.mrf.mxu2 }
  0xfb   : > { %v621_v48 = vadd.f32 %v8542_v63, %v620_v29 }
  0xfc   : > { %v572_v11 = vpop.f32.mrf.mxu0 }
  0xfd   : > { %v8662_v3 = vmax.f32 %v621_v48, 0.0  ;;  %v573_v41 = vadd.f32 %v8542_v63, %v572_v11  ;;  %v8681_v11 = vpop.permute.xlu0 %7403 }
  0xfe   : > { %16306 = vst [vmem:[#allocation93_spill] sm:$0xff] %v8681_v11 }
  0xff   : > { %16302 = vst [vmem:[#allocation89_spill] sm:$0xff] %v8662_v3  ;;  %v8665_v10 = vmax.f32 %v573_v41, 0.0  ;;  %1728 = vrot.lane.b32.xlu1 %v8662_v3, %s8056_s30 }
 0x101   : > { %16303 = vst [vmem:[#allocation90_spill] sm:$0xff] %v8665_v10  ;;  %1696 = vrot.lane.b32.xlu0 %v8665_v10, %s8056_s30 }
 0x102   : > { %v623_v6 = vpop.f32.mrf.mxu2 }
 0x103   : > { %v624_v40 = vadd.f32 %v8542_v63, %v623_v6 }
 0x104   : > { %v575_v15 = vpop.f32.mrf.mxu0 }
 0x105   : > { %v8672_v24 = vmax.f32 %v624_v40, 0.0  ;;  %v576_v29 = vadd.f32 %v8542_v63, %v575_v15 }
 0x107   : > { %16304 = vst [vmem:[#allocation91_spill] sm:$0xff] %v8672_v24  ;;  %v8675_v48 = vmax.f32 %v576_v29, 0.0  ;;  %1730 = vrot.lane.b32.xlu2 %v8672_v24, %s8056_s30  ;;  %v8693_v29 = vpop.permute.xlu2 %7398 }
 0x108   : > { %16309 = vst [vmem:[#allocation96_spill] sm:$0xff] %v8693_v29 }
 0x109   : > { %16305 = vst [vmem:[#allocation92_spill] sm:$0xff] %v8675_v48  ;;  %1698 = vrot.lane.b32.xlu1 %v8675_v48, %s8056_s30 }
 0x10a   : > { %v626_v41 = vpop.f32.mrf.mxu2 }
 0x10b   : > { %v627_v19 = vadd.f32 %v8542_v63, %v626_v41 }
 0x10c   : > { %v578_v42 = vpop.f32.mrf.mxu0 }
 0x10d   : > { %v8684_v6 = vmax.f32 %v627_v19, 0.0  ;;  %v579_v40 = vadd.f32 %v8542_v63, %v578_v42 }
 0x10f   : > { %16307 = vst [vmem:[#allocation94_spill] sm:$0xff] %v8684_v6  ;;  %v8687_v20 = vmax.f32 %v579_v40, 0.0  ;;  %1732 = vrot.lane.b32.xlu0 %v8684_v6, %s8056_s30  ;;  %v8708_v59 = vpop.permute.xlu2 %1706 }
 0x111   : > { %16308 = vst [vmem:[#allocation95_spill] sm:$0xff] %v8687_v20  ;;  %1700 = vrot.lane.b32.xlu2 %v8687_v20, %s8056_s30 }
 0x112   : > { %v629_v15 = vpop.f32.mrf.mxu2 }
 0x113   : > { %v630_v26 = vadd.f32 %v8542_v63, %v629_v15  ;;  %v1673_v18 = vpop.permute.xlu0 %1672 }
 0x114   : > { %v581_v41 = vpop.f32.mrf.mxu0  ;;  %v1736_v40 = vrot.slane %v1673_v18, 7 }
 0x115   : > { %v8696_v4 = vmax.f32 %v630_v26, 0.0  ;;  %v582_v19 = vadd.f32 %v8542_v63, %v581_v41 }
 0x116   : > { %v8706_v57 = vsel %vm665_vm1, 0.0, %v1736_v40 }
 0x117   : > { %16310 = vst [vmem:[#allocation97_spill] sm:$0xff] %v8696_v4  ;;  %v8699_v42 = vmax.f32 %v582_v19, 0.0  ;;  %1734 = vrot.lane.b32.xlu1 %v8696_v4, %s8056_s30  ;;  %v1893_v18 = vrot.slane %v8706_v57, 1 }
 0x118   : > { %16312 = vst [vmem:[#allocation99_spill] sm:$0xff] %v8706_v57 }
 0x119   : > { %16311 = vst [vmem:[#allocation98_spill] sm:$0xff] %v8699_v42  ;;  %1702 = vrot.lane.b32.xlu0 %v8699_v42, %s8056_s30  ;;  %v1713_v45 = vpop.permute.xlu2 %1712 }
 0x11a   : > { %v1766_v4 = vrot.slane %v1713_v45, 7 }
 0x11b   : > { %v1675_v9 = vpop.permute.xlu0 %1674 }
 0x11c   : > { %v1737_v1 = vrot.slane %v1675_v9, 7  ;;  %v584_v15 = vpop.f32.mrf.mxu0 }
 0x11d   : > { %v585_v9 = vadd.f32 %v8542_v63, %v584_v15 }
 0x11e   : > { %v8711_v26 = vsel %vm665_vm1, %v1736_v40, %v1737_v1  ;;  %v1847_v41 = vsel %vm665_vm1, %v1737_v1, 0.0 }
 0x11f   : > { %16313 = vst [vmem:[#allocation100_spill] sm:$0xff] %v8711_v26  ;;  %2247 = vrot.lane.b32.xlu1 %v8706_v57, %s16080_s12  ;;  %2249 = vrot.lane.b32.xlu2 %v8711_v26, %s16080_s12  ;;  %v1894_v19 = vrot.slane %v8711_v26, 1  ;;  %v1971_v46 = vrot.slane %v1847_v41, 2  ;;  %v1969_v1 = vrot.slane %v8711_v26, 2  ;;  %v8724_v40 = vmax.f32 %v585_v9, 0.0 }
 0x120   : > { %v1896_v15 = vrot.slane %v1847_v41, 1 }
 0x121   : > { %v1895_v55 = vsel %vm864_vm2, %v1893_v18, %v1894_v19  ;;  %16314 = vst [vmem:[#allocation101_spill] sm:$0xff] %v8724_v40  ;;  %v8727_v34 = vsel %vm1009_vm3, %v1969_v1, %v1971_v46  ;;  %v8738_v27 = vpop.permute.xlu2 %1680 }
 0x122   : > { %2059 = vrot.lane.b32.xlu0 %v1895_v55, %s16082_s24  ;;  %v1897_v12 = vsel %vm864_vm2, %v1894_v19, %v1896_v15  ;;  %v1742_v58 = vrot.slane %v8738_v27, 7 }
 0x123   : > { %v1677_v49 = vpop.permute.xlu1 %1676  ;;  %v1709_v63 = vpop.permute.xlu0 %1708 }
 0x124   : > { %v1763_v43 = vrot.slane %v1709_v63, 7  ;;  %v1739_v32 = vrot.slane %v1677_v49, 7  ;;  %v8801_v24 = vsel %vm665_vm1, 0.0, %v1742_v58 }
 0x125   : > { %16320 = vst [vmem:[#allocation107_spill] sm:$0xff] %v8801_v24  ;;  %v1978_v16 = vrot.slane %v8801_v24, 2 }
 0x126   : > { %v8751_v63 = vsel %vm665_vm1, 0.0, %v1763_v43 }
 0x127   : > { %1704 = vrot.lane.b32.xlu1 %v8724_v40, %s8056_s30  ;;  %2157 = vrot.lane.b32.xlu2 %v8727_v34, %s8054_s22  ;;  %16316 = vst [vmem:[#allocation103_spill] sm:$0xff] %v8751_v63  ;;  %s17071_s30 = smov 48  }
 0x12a   : > { %2343 = vrot.lane.b32.xlu0 %v1895_v55, %s15925_s13  ;;  %v8745_v55 = vsel %vm665_vm1, 0.0, %v1739_v32 }
 0x12b   : > { %v1711_v18 = vpop.permute.xlu1 %1710  ;;  %v1973_v27 = vrot.slane %v8745_v55, 2 }
 0x12c   : > { %v1764_v9 = vrot.slane %v1711_v18, 7  ;;  %v1968_v18 = vrot.slane %v8706_v57, 2 }
 0x12e   : > { %v8736_v46 = vsel %vm665_vm1, %v1763_v43, %v1764_v9  ;;  %v1856_v2 = vsel %vm665_vm1, %v1764_v9, 0.0  ;;  %v8756_v8 = vsel %vm1009_vm3, %v1968_v18, %v1969_v1  ;;  %v1938_v43 = vrot.slane %v8751_v63, 1 }
 0x12f   : > { %16315 = vst [vmem:[#allocation102_spill] sm:$0xff] %v8736_v46  ;;  %2061 = vrot.lane.b32.xlu1 %v1897_v12, %s16082_s24  ;;  %2285 = vrot.lane.b32.xlu2 %v8736_v46, %s16080_s12  ;;  %v2016_v41 = vrot.slane %v1856_v2, 2  ;;  %v2014_v49 = vrot.slane %v8736_v46, 2  ;;  %v1939_v9 = vrot.slane %v8736_v46, 1 }
 0x131   : > { %v8759_v61 = vsel %vm1009_vm3, %v2014_v49, %v2016_v41  ;;  %v8770_v47 = vsel %vm864_vm2, %v1938_v43, %v1939_v9 }
 0x132   : > { %2251 = vrot.lane.b32.xlu0 %v8745_v55, %s16080_s12  ;;  %16317 = vst [vmem:[#allocation104_spill] sm:$0xff] %v8770_v47 }
 0x133   : > { %v1679_v19 = vpop.permute.xlu1 %1678 }
 0x134   : > { %v1740_v15 = vrot.slane %v1679_v19, 7  ;;  %v1683_v19 = vpop.permute.xlu2 %1682 }
 0x136   : > { %v8762_v5 = vsel %vm665_vm1, %v1739_v32, %v1740_v15  ;;  %v1898_v32 = vrot.slane %v8745_v55, 1  ;;  %v1848_v18 = vsel %vm665_vm1, %v1740_v15, 0.0 }
 0x137   : > { %2155 = vrot.lane.b32.xlu1 %v8756_v8, %s8054_s22  ;;  %2193 = vrot.lane.b32.xlu2 %v8759_v61, %s8054_s22  ;;  %v1899_v1 = vrot.slane %v8762_v5, 1  ;;  %v1901_v56 = vrot.slane %v1848_v18, 1  ;;  %v1974_v38 = vrot.slane %v8762_v5, 2  ;;  %v1976_v54 = vrot.slane %v1848_v18, 2 }
 0x139   : > { %v8777_v41 = vsel %vm864_vm2, %v1898_v32, %v1899_v1  ;;  %v1715_v32 = vpop.permute.xlu0 %1714  ;;  %v8815_v45 = vsel %vm1009_vm3, %v1973_v27, %v1974_v38  ;;  %v1743_v27 = vrot.slane %v1683_v19, 7  ;;  %v8879_v10 = vsel %vm1009_vm3, %v1974_v38, %v1976_v54 }
 0x13a   : > { %2095 = vrot.lane.b32.xlu0 %v8770_v47, %s16082_s24  ;;  %16318 = vst [vmem:[#allocation105_spill] sm:$0xff] %v8777_v41  ;;  %v1767_v15 = vrot.slane %v1715_v32, 7 }
 0x13b   : > { %v8846_v33 = vsel %vm665_vm1, %v1742_v58, %v1743_v27  ;;  %v1849_v22 = vsel %vm665_vm1, %v1743_v27, 0.0 }
 0x13c   : > { %v8785_v43 = vpop.permute.xlu2 %1718  ;;  %v8804_v3 = vsel %vm665_vm1, %v1766_v4, %v1767_v15  ;;  %16325 = vst [vmem:[#allocation112_spill] sm:$0xff] %v8846_v33  ;;  %v1906_v50 = vrot.slane %v1849_v22, 1  ;;  %v1857_v42 = vsel %vm665_vm1, %v1767_v15, 0.0  ;;  %v1981_v52 = vrot.slane %v1849_v22, 2 }
 0x13d   : > { %16321 = vst [vmem:[#allocation108_spill] sm:$0xff] %v8804_v3  ;;  %v1944_v32 = vrot.slane %v8804_v3, 1  ;;  %v1946_v40 = vrot.slane %v1857_v42, 1  ;;  %v2019_v38 = vrot.slane %v8804_v3, 2  ;;  %v1770_v29 = vrot.slane %v8785_v43, 7 }
 0x13f   : > { %2345 = vrot.lane.b32.xlu1 %v1897_v12, %s15925_s13  ;;  %2063 = vrot.lane.b32.xlu2 %v8777_v41, %s16082_s24  ;;  %v8792_v12 = vsel %vm864_vm2, %v1899_v1, %v1901_v56  ;;  %v8812_v56 = vsel %vm665_vm1, 0.0, %v1766_v4  ;;  %v1941_v1 = vrot.slane %v1856_v2, 1  ;;  %v8895_v48 = vsel %vm864_vm2, %v1944_v32, %v1946_v40 }
 0x140   : > { %16319 = vst [vmem:[#allocation106_spill] sm:$0xff] %v8792_v12  ;;  %v1943_v28 = vrot.slane %v8812_v56, 1  ;;  %v2018_v54 = vrot.slane %v8812_v56, 2 }
 0x141   : > { %16322 = vst [vmem:[#allocation109_spill] sm:$0xff] %v8812_v56  ;;  %v8824_v25 = vsel %vm864_vm2, %v1939_v9, %v1941_v1  ;;  %v8835_v2 = vpop.permute.xlu1 %1716  ;;  %v2013_v9 = vrot.slane %v8751_v63, 2 }
 0x142   : > { %2379 = vrot.lane.b32.xlu0 %v8770_v47, %s15925_s13  ;;  %16323 = vst [vmem:[#allocation110_spill] sm:$0xff] %v8824_v25  ;;  %v8827_v0 = vsel %vm864_vm2, %v1943_v28, %v1944_v32  ;;  %v8912_v40 = vsel %vm1009_vm3, %v2018_v54, %v2019_v38  ;;  %v2021_v32 = vrot.slane %v1857_v42, 2  ;;  %v1769_v23 = vrot.slane %v8835_v2, 7 }
 0x143   : > { %16324 = vst [vmem:[#allocation111_spill] sm:$0xff] %v8827_v0  ;;  %v8829_v4 = vpop.permute.xlu0 %1684  ;;  %v8843_v28 = vsel %vm1009_vm3, %v2013_v9, %v2014_v49  ;;  %v1904_v49 = vrot.slane %v8846_v33, 1 }
 0x144   : > { %v8797_v6 = vpop.permute.xlu2 %1688  ;;  %v8918_v11 = vsel %vm665_vm1, 0.0, %v1769_v23  ;;  %v8921_v60 = vsel %vm1009_vm3, %v2019_v38, %v2021_v32  ;;  %v1745_v32 = vrot.slane %v8829_v4, 7 }
 0x145   : > { %v8861_v58 = vsel %vm864_vm2, %v1904_v49, %v1906_v50  ;;  %v1979_v50 = vrot.slane %v8846_v33, 2  ;;  %16328 = vst [vmem:[#allocation115_spill] sm:$0xff] %v8918_v11 }
 0x146   : > { %16326 = vst [vmem:[#allocation113_spill] sm:$0xff] %v8861_v58 }
 0x147   : > { %2283 = vrot.lane.b32.xlu1 %v8751_v63, %s16080_s12  ;;  %2347 = vrot.lane.b32.xlu2 %v8777_v41, %s15925_s13  ;;  %v8882_v57 = vsel %vm1009_vm3, %v1978_v16, %v1979_v50  ;;  %v8932_v2 = vsel %vm1009_vm3, %v1979_v50, %v1981_v52  ;;  %v1858_v52 = vsel %vm665_vm1, %v1770_v29, 0.0 }
 0x148   : > { %v1951_v50 = vrot.slane %v1858_v52, 1 }
 0x14a   : > { %2065 = vrot.lane.b32.xlu0 %v8792_v12, %s16082_s24 }
 0x14b   : > { %v8853_v36 = vpop.permute.xlu1 %1686 }
 0x14c   : > { %v8821_v21 = vpop.permute.xlu2 %1724  ;;  %v1746_v22 = vrot.slane %v8853_v36, 7  ;;  %v8953_v36 = vsel %vm665_vm1, %v1769_v23, %v1770_v29  ;;  %v2026_v23 = vrot.slane %v1858_v52, 2  ;;  %v8984_v52 = vsel %vm665_vm1, 0.0, %v1745_v32 }
 0x14d   : > { %16332 = vst [vmem:[#allocation119_spill] sm:$0xff] %v8953_v36  ;;  %v2024_v39 = vrot.slane %v8953_v36, 2 }
 0x14e   : > { %16336 = vst [vmem:[#allocation123_spill] sm:$0xff] %v8984_v52 }
 0x14f   : > { %2253 = vrot.lane.b32.xlu1 %v8762_v5, %s16080_s12  ;;  %2255 = vrot.lane.b32.xlu2 %v8801_v24, %s16080_s12  ;;  %v8978_v14 = vsel %vm1009_vm3, %v2024_v39, %v2026_v23  ;;  %v1908_v23 = vrot.slane %v8984_v52, 1 }
 0x151   : > { %v8855_v19 = vpop.permute.xlu0 %1720 }
 0x152   : > { %2159 = vrot.lane.b32.xlu0 %v8815_v45, %s8054_s22 }
 0x154   : > { %v8840_v1 = vpop.permute.xlu2 %1694 }
 0x157   : > { %2097 = vrot.lane.b32.xlu1 %v8824_v25, %s16082_s24  ;;  %2099 = vrot.lane.b32.xlu2 %v8827_v0, %s16082_s24 }
 0x159   : > { %v8869_v9 = vpop.permute.xlu1 %1722 }
 0x15a   : > { %2349 = vrot.lane.b32.xlu0 %v8792_v12, %s15925_s13  ;;  %v1773_v47 = vrot.slane %v8869_v9, 7 }
 0x15b   : > { %v8871_v26 = vpop.permute.xlu0 %1690 }
 0x15f   : > { %2191 = vrot.lane.b32.xlu1 %v8843_v28, %s8054_s22  ;;  %2383 = vrot.lane.b32.xlu2 %v8827_v0, %s15925_s13 }
 0x161   : > { %v8863_v27 = vpop.permute.xlu2 %1730 }
 0x162   : > { %2287 = vrot.lane.b32.xlu0 %v8812_v56, %s16080_s12 }
 0x163   : > { %v8890_v15 = vpop.permute.xlu1 %1692 }
 0x167   : > { %2381 = vrot.lane.b32.xlu1 %v8824_v25, %s15925_s13  ;;  %2069 = vrot.lane.b32.xlu2 %v8861_v58, %s16082_s24 }
 0x169   : > { %v8892_v20 = vpop.permute.xlu0 %1726 }
 0x16a   : > { %2257 = vrot.lane.b32.xlu0 %v8846_v33, %s16080_s12 }
 0x16b   : > { %v8888_v18 = vpop.permute.xlu2 %1700 }
 0x16f   : > { %2161 = vrot.lane.b32.xlu1 %v8879_v10, %s8054_s22  ;;  %2163 = vrot.lane.b32.xlu2 %v8882_v57, %s8054_s22 }
 0x171   : > { %v8905_v16 = vpop.permute.xlu1 %1728 }
 0x172   : > { %2101 = vrot.lane.b32.xlu0 %v8895_v48, %s16082_s24 }
 0x173   : > { %v8909_v35 = vpop.permute.xlu0 %1696 }
 0x177   : > { %2289 = vrot.lane.b32.xlu1 %v8804_v3, %s16080_s12  ;;  %2353 = vrot.lane.b32.xlu2 %v8861_v58, %s15925_s13 }
 0x179   : > { %v8907_v7 = vpop.permute.xlu2 %2249 }
 0x17a   : > { %16327 = vst [vmem:[#allocation114_spill] sm:$0xff] %v8907_v7  ;;  %2195 = vrot.lane.b32.xlu0 %v8912_v40, %s8054_s22  ;;  %v1903_v7 = vrot.slane %v8801_v24, 1 }
 0x17b   : > { %v8927_v54 = vpop.permute.xlu1 %1698 }
 0x17c   : > { %v8943_v44 = vsel %vm864_vm2, %v1903_v7, %v1904_v49  ;;  %v1949_v7 = vrot.slane %v8953_v36, 1 }
 0x17d   : > { %16330 = vst [vmem:[#allocation117_spill] sm:$0xff] %v8943_v44 }
 0x17e   : > { %v8967_v13 = vsel %vm864_vm2, %v1949_v7, %v1951_v50  ;;  %v2023_v50 = vrot.slane %v8918_v11, 2 }
 0x17f   : > { %2197 = vrot.lane.b32.xlu1 %v8921_v60, %s8054_s22  ;;  %2291 = vrot.lane.b32.xlu2 %v8918_v11, %s16080_s12 }
 0x180   : > { %v8990_v62 = vsel %vm1009_vm3, %v2023_v50, %v2024_v39  ;;  %v1948_v39 = vrot.slane %v8918_v11, 1 }
 0x181   : > { %v8929_v42 = vpop.permute.xlu2 %2157  ;;  %v8937_v38 = vpop.permute.xlu0 %1732 }
 0x182   : > { %16329 = vst [vmem:[#allocation116_spill] sm:$0xff] %v8929_v42  ;;  %2165 = vrot.lane.b32.xlu0 %v8932_v2, %s8054_s22  ;;  %v8946_v42 = vsel %vm665_vm1, %v1745_v32, %v1746_v22  ;;  %v9012_v51 = vsel %vm864_vm2, %v1948_v39, %v1949_v7  ;;  %v1772_v7 = vrot.slane %v8855_v19, 7  ;;  %v1748_v39 = vrot.slane %v8797_v6, 7 }
 0x183   : > { %16331 = vst [vmem:[#allocation118_spill] sm:$0xff] %v8946_v42  ;;  %v1909_v17 = vrot.slane %v8946_v42, 1 }
 0x184   : > { %v9046_v19 = vsel %vm665_vm1, 0.0, %v1748_v39 }
 0x185   : > { %16346 = vst [vmem:[#allocation133_spill] sm:$0xff] %v9046_v19 }
 0x187   : > { %2067 = vrot.lane.b32.xlu1 %v8943_v44, %s16082_s24  ;;  %2261 = vrot.lane.b32.xlu2 %v8946_v42, %s16080_s12 }
 0x189   : > { %v8956_v4 = vpop.permute.xlu1 %1734  ;;  %v8958_v43 = vpop.permute.xlu2 %2285 }
 0x18a   : > { %16333 = vst [vmem:[#allocation120_spill] sm:$0xff] %v8958_v43  ;;  %2293 = vrot.lane.b32.xlu0 %v8953_v36, %s16080_s12  ;;  %v1752_v36 = vrot.slane %v8840_v1, 7  ;;  %v15896_v63 = vrot.slane %v8956_v4, 7 }
 0x18b   : > { %v8963_v49 = vpop.permute.xlu0 %1702 }
 0x18f   : > { %2351 = vrot.lane.b32.xlu1 %v8943_v44, %s15925_s13  ;;  %2105 = vrot.lane.b32.xlu2 %v8967_v13, %s16082_s24  ;;  %v9036_v44 = vsel %vm665_vm1, %v1772_v7, %v1773_v47 }
 0x190   : > { %16345 = vst [vmem:[#allocation132_spill] sm:$0xff] %v9036_v44 }
 0x191   : > { %v8973_v29 = vpop.permute.xlu1 %2247  ;;  %v8975_v43 = vpop.permute.xlu2 %2193 }
 0x192   : > { %16334 = vst [vmem:[#allocation121_spill] sm:$0xff] %v8973_v29  ;;  %2201 = vrot.lane.b32.xlu0 %v8978_v14, %s8054_s22 }
 0x193   : > { %16335 = vst [vmem:[#allocation122_spill] sm:$0xff] %v8975_v43  ;;  %v1850_v43 = vsel %vm665_vm1, %v1746_v22, 0.0  ;;  %v1984_v22 = vrot.slane %v8946_v42, 2 }
 0x194   : > { %v8986_v30 = vpop.permute.xlu0 %2059  ;;  %v1986_v31 = vrot.slane %v1850_v43, 2  ;;  %v1911_v0 = vrot.slane %v1850_v43, 1  ;;  %v9058_v43 = vsel %vm665_vm1, 0.0, %v1772_v7 }
 0x195   : > { %16337 = vst [vmem:[#allocation124_spill] sm:$0xff] %v8986_v30  ;;  %v9003_v30 = vsel %vm864_vm2, %v1908_v23, %v1909_v17 }
 0x196   : > { %16339 = vst [vmem:[#allocation126_spill] sm:$0xff] %v9003_v30  ;;  %v9015_v25 = vsel %vm1009_vm3, %v1984_v22, %v1986_v31 }
 0x197   : > { %2259 = vrot.lane.b32.xlu1 %v8984_v52, %s16080_s12  ;;  %2199 = vrot.lane.b32.xlu2 %v8990_v62, %s8054_s22  ;;  %16349 = vst [vmem:[#allocation136_spill] sm:$0xff] %v9058_v43 }
 0x199   : > { %v8998_v29 = vpop.permute.xlu1 %1704  ;;  %v9000_v32 = vpop.permute.xlu2 %2063 }
 0x19a   : > { %16338 = vst [vmem:[#allocation125_spill] sm:$0xff] %v9000_v32  ;;  %2071 = vrot.lane.b32.xlu0 %v9003_v30, %s16082_s24 }
 0x19c   : > { %v9009_v50 = vpop.permute.xlu0 %2343 }
 0x19d   : > { %16340 = vst [vmem:[#allocation127_spill] sm:$0xff] %v9009_v50  ;;  %v9033_v50 = vsel %vm864_vm2, %v1909_v17, %v1911_v0  ;;  %v1749_v0 = vrot.slane %v8871_v26, 7  ;;  %v1953_v26 = vrot.slane %v9058_v43, 1 }
 0x19e   : > { %16344 = vst [vmem:[#allocation131_spill] sm:$0xff] %v9033_v50 }
 0x19f   : > { %2103 = vrot.lane.b32.xlu1 %v9012_v51, %s16082_s24  ;;  %2169 = vrot.lane.b32.xlu2 %v9015_v25, %s8054_s22  ;;  %v9073_v58 = vsel %vm665_vm1, %v1748_v39, %v1749_v0 }
 0x1a0   : > { %16351 = vst [vmem:[#allocation138_spill] sm:$0xff] %v9073_v58  ;;  %v1914_v39 = vrot.slane %v9073_v58, 1 }
 0x1a1   : > { %v9021_v23 = vpop.permute.xlu1 %2061  ;;  %v9023_v32 = vpop.permute.xlu2 %2347 }
 0x1a2   : > { %16341 = vst [vmem:[#allocation128_spill] sm:$0xff] %v9021_v23  ;;  %2355 = vrot.lane.b32.xlu0 %v9003_v30, %s15925_s13  ;;  %v9039_v23 = vsel %vm665_vm1, %v1773_v47, 0.0  ;;  %v15858_v47 = vrot.slane %v9036_v44, 2 }
 0x1a3   : > { %16342 = vst [vmem:[#allocation129_spill] sm:$0xff] %v9023_v32  ;;  %v2031_v17 = vrot.slane %v9039_v23, 2 }
 0x1a4   : > { %v9029_v31 = vpop.permute.xlu0 %2251 }
 0x1a5   : > { %16343 = vst [vmem:[#allocation130_spill] sm:$0xff] %v9029_v31  ;;  %v1983_v31 = vrot.slane %v8984_v52, 2  ;;  %v9070_v30 = vsel %vm1009_vm3, %v15858_v47, %v2031_v17  ;;  %v9088_v17 = vsel %vm665_vm1, %v1749_v0, 0.0 }
 0x1a6   : > { %v1916_v53 = vrot.slane %v9088_v17, 1 }
 0x1a7   : > { %2073 = vrot.lane.b32.xlu1 %v9033_v50, %s16082_s24  ;;  %2297 = vrot.lane.b32.xlu2 %v9036_v44, %s16080_s12 }
 0x1a9   : > { %v9048_v9 = vpop.permute.xlu1 %2155  ;;  %v9050_v6 = vpop.permute.xlu2 %2255 }
 0x1aa   : > { %16347 = vst [vmem:[#allocation134_spill] sm:$0xff] %v9048_v9  ;;  %2263 = vrot.lane.b32.xlu0 %v9046_v19, %s16080_s12  ;;  %v1954_v9 = vrot.slane %v9036_v44, 1 }
 0x1ab   : > { %16348 = vst [vmem:[#allocation135_spill] sm:$0xff] %v9050_v6  ;;  %v9065_v6 = vsel %vm1009_vm3, %v1983_v31, %v1984_v22 }
 0x1ac   : > { %v9060_v32 = vpop.permute.xlu0 %2095  ;;  %v9085_v31 = vsel %vm864_vm2, %v1953_v26, %v1954_v9 }
 0x1ad   : > { %16350 = vst [vmem:[#allocation137_spill] sm:$0xff] %v9060_v32  ;;  %v1913_v32 = vrot.slane %v9046_v19, 1 }
 0x1af   : > { %2167 = vrot.lane.b32.xlu1 %v9065_v6, %s8054_s22  ;;  %2205 = vrot.lane.b32.xlu2 %v9070_v30, %s8054_s22 }
 0x1b1   : > { %v9080_v7 = vpop.permute.xlu1 %2345  ;;  %v9082_v22 = vpop.permute.xlu2 %2099 }
 0x1b2   : > { %16352 = vst [vmem:[#allocation139_spill] sm:$0xff] %v9080_v7  ;;  %2107 = vrot.lane.b32.xlu0 %v9085_v31, %s16082_s24  ;;  %v9098_v7 = vsel %vm864_vm2, %v1913_v32, %v1914_v39  ;;  %v1989_v32 = vrot.slane %v9073_v58, 2 }
 0x1b3   : > { %16353 = vst [vmem:[#allocation140_spill] sm:$0xff] %v9082_v22  ;;  %v9109_v22 = vsel %vm864_vm2, %v1914_v39, %v1916_v53  ;;  %v1751_v39 = vrot.slane %v8890_v15, 7 }
 0x1b4   : > { %v9093_v47 = vpop.permute.xlu0 %2379  ;;  %16355 = vst [vmem:[#allocation142_spill] sm:$0xff] %v9098_v7 }
 0x1b5   : > { %16354 = vst [vmem:[#allocation141_spill] sm:$0xff] %v9093_v47  ;;  %v9136_v12 = vsel %vm665_vm1, 0.0, %v1751_v39 }
 0x1b6   : > { %16358 = vst [vmem:[#allocation145_spill] sm:$0xff] %v9109_v22 }
 0x1b7   : > { %2357 = vrot.lane.b32.xlu1 %v9033_v50, %s15925_s13  ;;  %2075 = vrot.lane.b32.xlu2 %v9098_v7, %s16082_s24  ;;  %16363 = vst [vmem:[#allocation150_spill] sm:$0xff] %v9136_v12 }
 0x1b9   : > { %v9104_v0 = vpop.permute.xlu1 %2283  ;;  %v9106_v26 = vpop.permute.xlu2 %2383 }
 0x1ba   : > { %16356 = vst [vmem:[#allocation143_spill] sm:$0xff] %v9104_v0  ;;  %2077 = vrot.lane.b32.xlu0 %v9109_v22, %s16082_s24  ;;  %v1988_v0 = vrot.slane %v9046_v19, 2 }
 0x1bb   : > { %16357 = vst [vmem:[#allocation144_spill] sm:$0xff] %v9106_v26 }
 0x1bc   : > { %v9113_v47 = vpop.permute.xlu0 %2065  ;;  %v9126_v53 = vsel %vm1009_vm3, %v1988_v0, %v1989_v32 }
 0x1bd   : > { %16359 = vst [vmem:[#allocation146_spill] sm:$0xff] %v9113_v47  ;;  %v1776_v47 = vrot.slane %v8892_v20, 7 }
 0x1bf   : > { %2295 = vrot.lane.b32.xlu1 %v9058_v43, %s16080_s12  ;;  %2359 = vrot.lane.b32.xlu2 %v9098_v7, %s15925_s13  ;;  %v1775_v7 = vrot.slane %v8821_v21, 7  ;;  %v1956_v21 = vrot.slane %v9039_v23, 1  ;;  %v1852_v23 = vsel %vm665_vm1, %v1752_v36, 0.0 }
 0x1c1   : > { %v9121_v50 = vpop.permute.xlu1 %2253  ;;  %v9123_v26 = vpop.permute.xlu2 %2069  ;;  %v9146_v15 = vsel %vm665_vm1, 0.0, %v1775_v7 }
 0x1c2   : > { %16360 = vst [vmem:[#allocation147_spill] sm:$0xff] %v9121_v50  ;;  %2171 = vrot.lane.b32.xlu0 %v9126_v53, %s8054_s22  ;;  %v9139_v50 = vsel %vm665_vm1, %v1775_v7, %v1776_v47  ;;  %v1958_v41 = vrot.slane %v9146_v15, 1  ;;  %v9161_v7 = vsel %vm864_vm2, %v1954_v9, %v1956_v21  ;;  %v1921_v9 = vrot.slane %v1852_v23, 1 }
 0x1c3   : > { %16361 = vst [vmem:[#allocation148_spill] sm:$0xff] %v9123_v26  ;;  %v1959_v26 = vrot.slane %v9139_v50, 1  ;;  %v2028_v21 = vrot.slane %v9058_v43, 2 }
 0x1c4   : > { %v9132_v37 = vpop.permute.xlu0 %2159  ;;  %16364 = vst [vmem:[#allocation151_spill] sm:$0xff] %v9139_v50 }
 0x1c5   : > { %16362 = vst [vmem:[#allocation149_spill] sm:$0xff] %v9132_v37 }
 0x1c6   : > { %16365 = vst [vmem:[#allocation152_spill] sm:$0xff] %v9146_v15 }
 0x1c7   : > { %2265 = vrot.lane.b32.xlu1 %v9073_v58, %s16080_s12  ;;  %2267 = vrot.lane.b32.xlu2 %v9136_v12, %s16080_s12 }
 0x1c9   : > { %v9148_v20 = vpop.permute.xlu1 %2097  ;;  %v9150_v0 = vpop.permute.xlu2 %2163 }
 0x1ca   : > { %16366 = vst [vmem:[#allocation153_spill] sm:$0xff] %v9148_v20  ;;  %2361 = vrot.lane.b32.xlu0 %v9109_v22, %s15925_s13  ;;  %v9164_v20 = vsel %vm864_vm2, %v1958_v41, %v1959_v26  ;;  %v16373_v22 = vrot.slane %v9036_v44, 2  ;;  %v1860_v44 = vsel %vm665_vm1, %v1776_v47, 0.0 }
 0x1cb   : > { %16367 = vst [vmem:[#allocation154_spill] sm:$0xff] %v9150_v0  ;;  %v9167_v0 = vsel %vm665_vm1, %v1751_v39, %v1752_v36  ;;  %v1961_v43 = vrot.slane %v1860_v44, 1 }
 0x1cc   : > { %v9156_v37 = vpop.permute.xlu0 %2349  ;;  %16369 = vst [vmem:[#allocation156_spill] sm:$0xff] %v9167_v0  ;;  %v1919_v41 = vrot.slane %v9167_v0, 1  ;;  %v9187_v56 = vsel %vm1009_vm3, %v2028_v21, %v16373_v22  ;;  %v1993_v22 = vrot.slane %v9136_v12, 2 }
 0x1cd   : > { %16368 = vst [vmem:[#allocation155_spill] sm:$0xff] %v9156_v37 }
 0x1ce   : > { %v9190_v36 = vsel %vm864_vm2, %v1919_v41, %v1921_v9  ;;  %v1994_v9 = vrot.slane %v9167_v0, 2 }
 0x1cf   : > { %2109 = vrot.lane.b32.xlu1 %v9161_v7, %s16082_s24  ;;  %2111 = vrot.lane.b32.xlu2 %v9164_v20, %s16082_s24  ;;  %16374 = vst [vmem:[#allocation160_spill] sm:$0xff] %v9190_v36 }
 0x1d1   : > { %v9174_v37 = vpop.permute.xlu1 %2191  ;;  %v9176_v1 = vpop.permute.xlu2 %2353 }
 0x1d2   : > { %16370 = vst [vmem:[#allocation157_spill] sm:$0xff] %v9174_v37  ;;  %2299 = vrot.lane.b32.xlu0 %v9146_v15, %s16080_s12 }
 0x1d3   : > { %16371 = vst [vmem:[#allocation158_spill] sm:$0xff] %v9176_v1 }
 0x1d4   : > { %v9181_v39 = vpop.permute.xlu0 %2287 }
 0x1d5   : > { %16372 = vst [vmem:[#allocation159_spill] sm:$0xff] %v9181_v39  ;;  %v1991_v39 = vrot.slane %v9088_v17, 2 }
 0x1d7   : > { %2203 = vrot.lane.b32.xlu1 %v9187_v56, %s8054_s22  ;;  %2081 = vrot.lane.b32.xlu2 %v9190_v36, %s16082_s24  ;;  %v9209_v11 = vsel %vm1009_vm3, %v1989_v32, %v1991_v39  ;;  %v2034_v39 = vrot.slane %v9139_v50, 2 }
 0x1d9   : > { %v9196_v37 = vpop.permute.xlu1 %2381  ;;  %v9198_v1 = vpop.permute.xlu2 %2291 }
 0x1da   : > { %16375 = vst [vmem:[#allocation161_spill] sm:$0xff] %v9196_v37  ;;  %2269 = vrot.lane.b32.xlu0 %v9167_v0, %s16080_s12  ;;  %v9212_v37 = vsel %vm1009_vm3, %v1993_v22, %v1994_v9  ;;  %v2033_v22 = vrot.slane %v9146_v15, 2 }
 0x1db   : > { %16376 = vst [vmem:[#allocation162_spill] sm:$0xff] %v9198_v1  ;;  %v9223_v1 = vsel %vm864_vm2, %v1959_v26, %v1961_v43  ;;  %v2036_v26 = vrot.slane %v1860_v44, 2 }
 0x1dc   : > { %v9206_v21 = vpop.permute.xlu0 %2257  ;;  %v9240_v43 = vsel %vm1009_vm3, %v2033_v22, %v2034_v39 }
 0x1dd   : > { %16377 = vst [vmem:[#allocation163_spill] sm:$0xff] %v9206_v21 }
 0x1df   : > { %2173 = vrot.lane.b32.xlu1 %v9209_v11, %s8054_s22  ;;  %2175 = vrot.lane.b32.xlu2 %v9212_v37, %s8054_s22 }
 0x1e1   : > { %v9218_v47 = vpop.permute.xlu1 %2161  ;;  %v9220_v17 = vpop.permute.xlu2 %2261 }
 0x1e2   : > { %16378 = vst [vmem:[#allocation164_spill] sm:$0xff] %v9218_v47  ;;  %2113 = vrot.lane.b32.xlu0 %v9223_v1, %s16082_s24 }
 0x1e3   : > { %16379 = vst [vmem:[#allocation165_spill] sm:$0xff] %v9220_v17 }
 0x1e4   : > { %v9227_v32 = vpop.permute.xlu0 %2101 }
 0x1e5   : > { %16380 = vst [vmem:[#allocation166_spill] sm:$0xff] %v9227_v32  ;;  %v1778_v32 = vrot.slane %v8905_v16, 7 }
 0x1e7   : > { %2301 = vrot.lane.b32.xlu1 %v9139_v50, %s16080_s12  ;;  %2365 = vrot.lane.b32.xlu2 %v9190_v36, %s15925_s13  ;;  %v9248_v50 = vsel %vm665_vm1, 0.0, %v1778_v32  ;;  %v9251_v36 = vsel %vm1009_vm3, %v2034_v39, %v2036_v26  ;;  %v1754_v39 = vrot.slane %v8909_v35, 7 }
 0x1e8   : > { %16384 = vst [vmem:[#allocation170_spill] sm:$0xff] %v9248_v50 }
 0x1e9   : > { %v9235_v21 = vpop.permute.xlu1 %2289  ;;  %v9237_v17 = vpop.permute.xlu2 %2105 }
 0x1ea   : > { %16381 = vst [vmem:[#allocation167_spill] sm:$0xff] %v9235_v21  ;;  %2207 = vrot.lane.b32.xlu0 %v9240_v43, %s8054_s22  ;;  %v1996_v21 = vrot.slane %v1852_v23, 2  ;;  %v1918_v23 = vrot.slane %v9136_v12, 1 }
 0x1eb   : > { %16382 = vst [vmem:[#allocation168_spill] sm:$0xff] %v9237_v17  ;;  %v1755_v17 = vrot.slane %v8927_v54, 7 }
 0x1ec   : > { %v9245_v47 = vpop.permute.xlu0 %2195  ;;  %v9262_v22 = vsel %vm1009_vm3, %v1994_v9, %v1996_v21 }
 0x1ed   : > { %16383 = vst [vmem:[#allocation169_spill] sm:$0xff] %v9245_v47  ;;  %v1779_v47 = vrot.slane %v8863_v27, 7 }
 0x1ef   : > { %2209 = vrot.lane.b32.xlu1 %v9251_v36, %s8054_s22  ;;  %2303 = vrot.lane.b32.xlu2 %v9248_v50, %s16080_s12  ;;  %v9283_v54 = vsel %vm665_vm1, %v1778_v32, %v1779_v47  ;;  %v1861_v35 = vsel %vm665_vm1, %v1779_v47, 0.0 }
 0x1f0   : > { %16390 = vst [vmem:[#allocation176_spill] sm:$0xff] %v9283_v54  ;;  %v1966_v21 = vrot.slane %v1861_v35, 1  ;;  %v2041_v32 = vrot.slane %v1861_v35, 2  ;;  %v9314_v35 = vsel %vm665_vm1, 0.0, %v1754_v39 }
 0x1f1   : > { %v9257_v44 = vpop.permute.xlu1 %2197  ;;  %v9259_v16 = vpop.permute.xlu2 %2199  ;;  %16396 = vst [vmem:[#allocation182_spill] sm:$0xff] %v9314_v35 }
 0x1f2   : > { %16385 = vst [vmem:[#allocation171_spill] sm:$0xff] %v9257_v44  ;;  %2177 = vrot.lane.b32.xlu0 %v9262_v22, %s8054_s22  ;;  %v9273_v44 = vsel %vm864_vm2, %v1918_v23, %v1919_v41  ;;  %v1964_v41 = vrot.slane %v9283_v54, 1 }
 0x1f3   : > { %16386 = vst [vmem:[#allocation172_spill] sm:$0xff] %v9259_v16  ;;  %v9276_v16 = vsel %vm665_vm1, %v1754_v39, %v1755_v17 }
 0x1f4   : > { %v9269_v26 = vpop.permute.xlu0 %2165  ;;  %16388 = vst [vmem:[#allocation174_spill] sm:$0xff] %v9273_v44  ;;  %v9297_v15 = vsel %vm864_vm2, %v1964_v41, %v1966_v21  ;;  %v2038_v21 = vrot.slane %v9248_v50, 2 }
 0x1f5   : > { %16387 = vst [vmem:[#allocation173_spill] sm:$0xff] %v9269_v26  ;;  %v2039_v26 = vrot.slane %v9283_v54, 2 }
 0x1f6   : > { %16389 = vst [vmem:[#allocation175_spill] sm:$0xff] %v9276_v16 }
 0x1f7   : > { %2079 = vrot.lane.b32.xlu1 %v9273_v44, %s16082_s24  ;;  %2273 = vrot.lane.b32.xlu2 %v9276_v16, %s16080_s12 }
 0x1f9   : > { %v9286_v9 = vpop.permute.xlu1 %2067  ;;  %v9288_v27 = vpop.permute.xlu2 %2169 }
 0x1fa   : > { %16391 = vst [vmem:[#allocation177_spill] sm:$0xff] %v9286_v9  ;;  %2305 = vrot.lane.b32.xlu0 %v9283_v54, %s16080_s12  ;;  %v9308_v9 = vsel %vm1009_vm3, %v2039_v26, %v2041_v32  ;;  %v9320_v54 = vsel %vm1009_vm3, %v2038_v21, %v2039_v26  ;;  %v1923_v32 = vrot.slane %v9314_v35, 1  ;;  %v1999_v26 = vrot.slane %v9276_v16, 2 }
 0x1fb   : > { %16392 = vst [vmem:[#allocation178_spill] sm:$0xff] %v9288_v27 }
 0x1fc   : > { %v9293_v23 = vpop.permute.xlu0 %2293 }
 0x1fd   : > { %16393 = vst [vmem:[#allocation179_spill] sm:$0xff] %v9293_v23 }
 0x1ff   : > { %2363 = vrot.lane.b32.xlu1 %v9273_v44, %s15925_s13  ;;  %2117 = vrot.lane.b32.xlu2 %v9297_v15, %s16082_s24  ;;  %v1924_v44 = vrot.slane %v9276_v16, 1 }
 0x201   : > { %v9303_v47 = vpop.permute.xlu1 %2351  ;;  %v9305_v27 = vpop.permute.xlu2 %2297 }
 0x202   : > { %16394 = vst [vmem:[#allocation180_spill] sm:$0xff] %v9303_v47  ;;  %2213 = vrot.lane.b32.xlu0 %v9308_v9, %s8054_s22 }
 0x203   : > { %16395 = vst [vmem:[#allocation181_spill] sm:$0xff] %v9305_v27  ;;  %v1853_v27 = vsel %vm665_vm1, %v1755_v17, 0.0  ;;  %v1963_v17 = vrot.slane %v9248_v50, 1 }
 0x204   : > { %v9316_v23 = vpop.permute.xlu0 %2201  ;;  %v2001_v3 = vrot.slane %v1853_v27, 2  ;;  %v1926_v50 = vrot.slane %v1853_v27, 1 }
 0x205   : > { %16397 = vst [vmem:[#allocation183_spill] sm:$0xff] %v9316_v23  ;;  %v9333_v23 = vsel %vm864_vm2, %v1923_v32, %v1924_v44  ;;  %v9342_v46 = vsel %vm864_vm2, %v1963_v17, %v1964_v41  ;;  %v1758_v41 = vrot.slane %v8963_v49, 7 }
 0x206   : > { %16400 = vst [vmem:[#allocation186_spill] sm:$0xff] %v9333_v23  ;;  %v9364_v0 = vsel %vm864_vm2, %v1924_v44, %v1926_v50 }
 0x207   : > { %2271 = vrot.lane.b32.xlu1 %v9314_v35, %s16080_s12  ;;  %2211 = vrot.lane.b32.xlu2 %v9320_v54, %s8054_s22  ;;  %16405 = vst [vmem:[#allocation191_spill] sm:$0xff] %v9364_v0  ;;  %v1854_v50 = vsel %vm665_vm1, %v1758_v41, 0.0 }
 0x209   : > { %v9328_v47 = vpop.permute.xlu1 %2259  ;;  %v9330_v39 = vpop.permute.xlu2 %2205 }
 0x20a   : > { %16398 = vst [vmem:[#allocation184_spill] sm:$0xff] %v9328_v47  ;;  %2083 = vrot.lane.b32.xlu0 %v9333_v23, %s16082_s24  ;;  %v9345_v47 = vsel %vm1009_vm3, %v1999_v26, %v2001_v3  ;;  %v1781_v3 = vrot.slane %v8937_v38, 7 }
 0x20b   : > { %16399 = vst [vmem:[#allocation185_spill] sm:$0xff] %v9330_v39 }
 0x20c   : > { %v9339_v21 = vpop.permute.xlu0 %2071  ;;  %v9369_v27 = vsel %vm665_vm1, %v1781_v3, %v15896_v63 }
 0x20d   : > { %16401 = vst [vmem:[#allocation187_spill] sm:$0xff] %v9339_v21  ;;  %v1757_v21 = vrot.slane %v8888_v18, 7 }
 0x20f   : > { %2115 = vrot.lane.b32.xlu1 %v9342_v46, %s16082_s24  ;;  %2181 = vrot.lane.b32.xlu2 %v9345_v47, %s8054_s22  ;;  %v9379_v38 = vsel %vm665_vm1, 0.0, %v1757_v21 }
 0x210   : > { %16407 = vst [vmem:[#allocation193_spill] sm:$0xff] %v9379_v38 }
 0x211   : > { %v9351_v32 = vpop.permute.xlu1 %2103  ;;  %v9353_v39 = vpop.permute.xlu2 %2075 }
 0x212   : > { %16402 = vst [vmem:[#allocation188_spill] sm:$0xff] %v9351_v32  ;;  %2367 = vrot.lane.b32.xlu0 %v9333_v23, %s15925_s13  ;;  %v9372_v32 = vsel %vm665_vm1, %v1757_v21, %v1758_v41  ;;  %v1931_v23 = vrot.slane %v1854_v50, 1 }
 0x213   : > { %16403 = vst [vmem:[#allocation189_spill] sm:$0xff] %v9353_v39  ;;  %v1929_v44 = vrot.slane %v9372_v32, 1  ;;  %v1998_v39 = vrot.slane %v9314_v35, 2 }
 0x214   : > { %v9360_v17 = vpop.permute.xlu0 %2355  ;;  %16406 = vst [vmem:[#allocation192_spill] sm:$0xff] %v9372_v32 }
 0x215   : > { %16404 = vst [vmem:[#allocation190_spill] sm:$0xff] %v9360_v17  ;;  %v1928_v17 = vrot.slane %v9379_v38, 1  ;;  %v9394_v21 = vsel %vm1009_vm3, %v1998_v39, %v1999_v26  ;;  %v2004_v26 = vrot.slane %v9372_v32, 2 }
 0x217   : > { %2085 = vrot.lane.b32.xlu1 %v9364_v0, %s16082_s24  ;;  %2309 = vrot.lane.b32.xlu2 %v9369_v27, %s16080_s12 }
 0x219   : > { %v9381_v18 = vpop.permute.xlu1 %2073  ;;  %v9383_v49 = vpop.permute.xlu2 %2359 }
 0x21a   : > { %16408 = vst [vmem:[#allocation194_spill] sm:$0xff] %v9381_v18  ;;  %2275 = vrot.lane.b32.xlu0 %v9379_v38, %s16080_s12  ;;  %v9397_v18 = vsel %vm864_vm2, %v1928_v17, %v1929_v44  ;;  %v2003_v17 = vrot.slane %v9379_v38, 2  ;;  %v9437_v38 = vsel %vm665_vm1, 0.0, %v1781_v3 }
 0x21b   : > { %16409 = vst [vmem:[#allocation195_spill] sm:$0xff] %v9383_v49 }
 0x21c   : > { %v9389_v63 = vpop.permute.xlu0 %2263  ;;  %16411 = vst [vmem:[#allocation197_spill] sm:$0xff] %v9397_v18 }
 0x21d   : > { %16410 = vst [vmem:[#allocation196_spill] sm:$0xff] %v9389_v63  ;;  %v9408_v63 = vsel %vm864_vm2, %v1929_v44, %v1931_v23  ;;  %v9425_v23 = vsel %vm1009_vm3, %v2003_v17, %v2004_v26  ;;  %v1760_v44 = vrot.slane %v8998_v29, 7 }
 0x21e   : > { %16414 = vst [vmem:[#allocation200_spill] sm:$0xff] %v9408_v63 }
 0x21f   : > { %2179 = vrot.lane.b32.xlu1 %v9394_v21, %s8054_s22  ;;  %2087 = vrot.lane.b32.xlu2 %v9397_v18, %s16082_s24 }
 0x221   : > { %v9403_v41 = vpop.permute.xlu1 %2167  ;;  %v9405_v49 = vpop.permute.xlu2 %2267 }
 0x222   : > { %16412 = vst [vmem:[#allocation198_spill] sm:$0xff] %v9403_v41  ;;  %2089 = vrot.lane.b32.xlu0 %v9408_v63, %s16082_s24 }
 0x223   : > { %16413 = vst [vmem:[#allocation199_spill] sm:$0xff] %v9405_v49 }
 0x224   : > { %v9412_v39 = vpop.permute.xlu0 %2107 }
 0x225   : > { %16415 = vst [vmem:[#allocation201_spill] sm:$0xff] %v9412_v39 }
 0x227   : > { %2369 = vrot.lane.b32.xlu1 %v9364_v0, %s15925_s13  ;;  %2371 = vrot.lane.b32.xlu2 %v9397_v18, %s15925_s13  ;;  %v1761_v0 = vrot.slane %v8708_v59, 7  ;;  %v9434_v18 = vsel %vm665_vm1, 0.0, %v1760_v44 }
 0x228   : > { %16419 = vst [vmem:[#allocation205_spill] sm:$0xff] %v9434_v18 }
 0x229   : > { %v9420_v41 = vpop.permute.xlu1 %2357  ;;  %v9422_v49 = vpop.permute.xlu2 %2111  ;;  %v1855_v29 = vsel %vm665_vm1, %v1761_v0, 0.0 }
 0x22a   : > { %16416 = vst [vmem:[#allocation202_spill] sm:$0xff] %v9420_v41  ;;  %2183 = vrot.lane.b32.xlu0 %v9425_v23, %s8054_s22  ;;  %v2011_v35 = vrot.slane %v1855_v29, 2 }
 0x22b   : > { %16417 = vst [vmem:[#allocation203_spill] sm:$0xff] %v9422_v49  ;;  %v9440_v49 = vsel %vm665_vm1, %v1760_v44, %v1761_v0 }
 0x22c   : > { %v9430_v39 = vpop.permute.xlu0 %2077  ;;  %16420 = vst [vmem:[#allocation206_spill] sm:$0xff] %v9440_v49  ;;  %v1934_v3 = vrot.slane %v9440_v49, 1 }
 0x22d   : > { %16418 = vst [vmem:[#allocation204_spill] sm:$0xff] %v9430_v39  ;;  %v1936_v39 = vrot.slane %v1855_v29, 1 }
 0x22f   : > { %2307 = vrot.lane.b32.xlu1 %v9437_v38, %s16080_s12  ;;  %2279 = vrot.lane.b32.xlu2 %v9434_v18, %s16080_s12  ;;  %v9457_v41 = vsel %vm864_vm2, %v1934_v3, %v1936_v39 }
 0x231   : > { %v9447_v17 = vpop.permute.xlu1 %2295  ;;  %v9449_v59 = vpop.permute.xlu2 %2081 }
 0x232   : > { %16421 = vst [vmem:[#allocation207_spill] sm:$0xff] %v9447_v17  ;;  %2373 = vrot.lane.b32.xlu0 %v9408_v63, %s15925_s13  ;;  %v2008_v63 = vrot.slane %v9434_v18, 2 }
 0x233   : > { %16422 = vst [vmem:[#allocation208_spill] sm:$0xff] %v9449_v59  ;;  %v2006_v59 = vrot.slane %v1854_v50, 2 }
 0x234   : > { %v9454_v44 = vpop.permute.xlu0 %2171 }
 0x235   : > { %16423 = vst [vmem:[#allocation209_spill] sm:$0xff] %v9454_v44  ;;  %v2009_v44 = vrot.slane %v9440_v49, 2  ;;  %v9474_v16 = vsel %vm1009_vm3, %v2004_v26, %v2006_v59 }
 0x237   : > { %2277 = vrot.lane.b32.xlu1 %v9372_v32, %s16080_s12  ;;  %2093 = vrot.lane.b32.xlu2 %v9457_v41, %s16082_s24  ;;  %v9477_v32 = vsel %vm1009_vm3, %v2008_v63, %v2009_v44  ;;  %v1933_v63 = vrot.slane %v9434_v18, 1 }
 0x239   : > { %v9463_v0 = vpop.permute.xlu1 %2265  ;;  %v9465_v17 = vpop.permute.xlu2 %2175  ;;  %v9496_v29 = vsel %vm864_vm2, %v1933_v63, %v1934_v3 }
 0x23a   : > { %16424 = vst [vmem:[#allocation210_spill] sm:$0xff] %v9463_v0  ;;  %2281 = vrot.lane.b32.xlu0 %v9440_v49, %s16080_s12  ;;  %v9488_v0 = vsel %vm1009_vm3, %v2009_v44, %v2011_v35 }
 0x23b   : > { %16425 = vst [vmem:[#allocation211_spill] sm:$0xff] %v9465_v17 }
 0x23c   : > { %v9471_v39 = vpop.permute.xlu0 %2361 }
 0x23d   : > { %16426 = vst [vmem:[#allocation212_spill] sm:$0xff] %v9471_v39 }
 0x23f   : > { %2185 = vrot.lane.b32.xlu1 %v9474_v16, %s8054_s22  ;;  %2187 = vrot.lane.b32.xlu2 %v9477_v32, %s8054_s22 }
 0x241   : > { %v9483_v50 = vpop.permute.xlu1 %2109  ;;  %v9485_v17 = vpop.permute.xlu2 %2365 }
 0x242   : > { %16427 = vst [vmem:[#allocation213_spill] sm:$0xff] %v9483_v50  ;;  %2189 = vrot.lane.b32.xlu0 %v9488_v0, %s8054_s22 }
 0x243   : > { %16428 = vst [vmem:[#allocation214_spill] sm:$0xff] %v9485_v17  ;;  %v2045_v17 = vrot.slane %v9437_v38, 1 }
 0x244   : > { %v9493_v26 = vpop.permute.xlu0 %2299 }
 0x245   : > { %16429 = vst [vmem:[#allocation215_spill] sm:$0xff] %v9493_v26 }
 0x247   : > { %2091 = vrot.lane.b32.xlu1 %v9496_v29, %s16082_s24  ;;  %2377 = vrot.lane.b32.xlu2 %v9457_v41, %s15925_s13 }
 0x249   : > { %v9502_v59 = vpop.permute.xlu1 %2203  ;;  %v9504_v35 = vpop.permute.xlu2 %2303 }
 0x24a   : > { %16430 = vst [vmem:[#allocation216_spill] sm:$0xff] %v9502_v59  ;;  %2385 = vrot.lane.b32.xlu0 %v8895_v48, %s15925_s13 }
 0x24b   : > { %16431 = vst [vmem:[#allocation217_spill] sm:$0xff] %v9504_v35 }
 0x24c   : > { %v9508_v44 = vpop.permute.xlu0 %2269 }
 0x24d   : > { %16432 = vst [vmem:[#allocation218_spill] sm:$0xff] %v9508_v44  ;;  %v16442_v44 = vrot.slane %v8956_v4, 7 }
 0x24f   : > { %2375 = vrot.lane.b32.xlu1 %v9496_v29, %s15925_s13  ;;  %2389 = vrot.lane.b32.xlu2 %v8967_v13, %s15925_s13 }
 0x251   : > { %v9514_v3 = vpop.permute.xlu1 %2173  ;;  %v9516_v63 = vpop.permute.xlu2 %2273 }
 0x252   : > { %16433 = vst [vmem:[#allocation219_spill] sm:$0xff] %v9514_v3  ;;  %2391 = vrot.lane.b32.xlu0 %v9085_v31, %s15925_s13  ;;  %v9554_v3 = vsel %vm665_vm1, %v16442_v44, 0.0 }
 0x253   : > { %16434 = vst [vmem:[#allocation220_spill] sm:$0xff] %v9516_v63  ;;  %v2046_v63 = vrot.slane %v9369_v27, 1 }
 0x254   : > { %v9520_v50 = vpop.permute.xlu0 %2113 }
 0x255   : > { %16435 = vst [vmem:[#allocation221_spill] sm:$0xff] %v9520_v50 }
 0x257   : > { %2387 = vrot.lane.b32.xlu1 %v9012_v51, %s15925_s13  ;;  %2395 = vrot.lane.b32.xlu2 %v9164_v20, %s15925_s13 }
 0x259   : > { %v9526_v35 = vpop.permute.xlu1 %2301  ;;  %v9528_v26 = vpop.permute.xlu2 %2117 }
 0x25a   : > { %16436 = vst [vmem:[#allocation222_spill] sm:$0xff] %v9526_v35  ;;  %2397 = vrot.lane.b32.xlu0 %v9223_v1, %s15925_s13 }
 0x25b   : > { %16437 = vst [vmem:[#allocation223_spill] sm:$0xff] %v9528_v26  ;;  %v9545_v26 = vsel %vm864_vm2, %v2045_v17, %v2046_v63 }
 0x25c   : > { %v9532_v59 = vpop.permute.xlu0 %2207 }
 0x25d   : > { %16438 = vst [vmem:[#allocation224_spill] sm:$0xff] %v9532_v59 }
 0x25f   : > { %2393 = vrot.lane.b32.xlu1 %v9161_v7, %s15925_s13  ;;  %2401 = vrot.lane.b32.xlu2 %v9297_v15, %s15925_s13 }
 0x261   : > { %v9540_v50 = vpop.permute.xlu1 %2209  ;;  %v9542_v35 = vpop.permute.xlu2 %2211 }
 0x262   : > { %16439 = vst [vmem:[#allocation225_spill] sm:$0xff] %v9540_v50  ;;  %2403 = vrot.lane.b32.xlu0 %v9545_v26, %s15925_s13  ;;  %v2048_v50 = vrot.slane %v9554_v3, 1 }
 0x263   : > { %16440 = vst [vmem:[#allocation226_spill] sm:$0xff] %v9542_v35 }
 0x264   : > { %v9549_v59 = vpop.permute.xlu0 %2177  ;;  %v9570_v44 = vsel %vm864_vm2, %v2046_v63, %v2048_v50 }
 0x265   : > { %16441 = vst [vmem:[#allocation227_spill] sm:$0xff] %v9549_v59 }
 0x267   : > { %2399 = vrot.lane.b32.xlu1 %v9342_v46, %s15925_s13  ;;  %2439 = vrot.lane.b32.xlu2 %v8756_v8, %s15923_s14 }
 0x269   : > { %v9560_v35 = vpop.permute.xlu1 %2079  ;;  %v9562_v17 = vpop.permute.xlu2 %2181 }
 0x26a   : > { %16443 = vst [vmem:[#allocation228_spill] sm:$0xff] %v9560_v35  ;;  %2441 = vrot.lane.b32.xlu0 %v8727_v34, %s15923_s14 }
 0x26b   : > { %16444 = vst [vmem:[#allocation229_spill] sm:$0xff] %v9562_v17 }
 0x26c   : > { %v9567_v4 = vpop.permute.xlu0 %2305 }
 0x26d   : > { %16445 = vst [vmem:[#allocation230_spill] sm:$0xff] %v9567_v4 }
 0x26f   : > { %2405 = vrot.lane.b32.xlu1 %v9570_v44, %s15925_s13  ;;  %2445 = vrot.lane.b32.xlu2 %v8879_v10, %s15923_s14  ;;  %s17094_s13 = smov 56  }
 0x271   : > { %v9576_v8 = vpop.permute.xlu1 %2363  ;;  %v9578_v59 = vpop.permute.xlu2 %2309 }
 0x272   : > { %16446 = vst [vmem:[#allocation231_spill] sm:$0xff] %v9576_v8  ;;  %2447 = vrot.lane.b32.xlu0 %v8882_v57, %s15923_s14 }
 0x273   : > { %16447 = vst [vmem:[#allocation232_spill] sm:$0xff] %v9578_v59 }
 0x274   : > { %v9582_v17 = vpop.permute.xlu0 %2213 }
 0x275   : > { %16448 = vst [vmem:[#allocation233_spill] sm:$0xff] %v9582_v17 }
 0x277   : > { %2443 = vrot.lane.b32.xlu1 %v8815_v45, %s15923_s14  ;;  %2451 = vrot.lane.b32.xlu2 %v9065_v6, %s15923_s14 }
 0x279   : > { %v9588_v34 = vpop.permute.xlu1 %2271  ;;  %v9590_v50 = vpop.permute.xlu2 %2087 }
 0x27a   : > { %16449 = vst [vmem:[#allocation234_spill] sm:$0xff] %v9588_v34  ;;  %2453 = vrot.lane.b32.xlu0 %v9015_v25, %s15923_s14  ;;  %v2051_v34 = vrot.slane %v9369_v27, 2 }
 0x27b   : > { %16450 = vst [vmem:[#allocation235_spill] sm:$0xff] %v9590_v50 }
 0x27c   : > { %v9594_v63 = vpop.permute.xlu0 %2083 }
 0x27d   : > { %16451 = vst [vmem:[#allocation236_spill] sm:$0xff] %v9594_v63 }
 0x27f   : > { %2449 = vrot.lane.b32.xlu1 %v8932_v2, %s15923_s14  ;;  %2457 = vrot.lane.b32.xlu2 %v9209_v11, %s15923_s14 }
 0x281   : > { %v9600_v59 = vpop.permute.xlu1 %2115  ;;  %v9602_v17 = vpop.permute.xlu2 %2371 }
 0x282   : > { %16452 = vst [vmem:[#allocation237_spill] sm:$0xff] %v9600_v59  ;;  %2459 = vrot.lane.b32.xlu0 %v9212_v37, %s15923_s14 }
 0x283   : > { %16453 = vst [vmem:[#allocation238_spill] sm:$0xff] %v9602_v17 }
 0x284   : > { %v9606_v4 = vpop.permute.xlu0 %2367 }
 0x285   : > { %16454 = vst [vmem:[#allocation239_spill] sm:$0xff] %v9606_v4 }
 0x287   : > { %2455 = vrot.lane.b32.xlu1 %v9126_v53, %s15923_s14  ;;  %2463 = vrot.lane.b32.xlu2 %v9394_v21, %s15923_s14 }
 0x289   : > { %v9612_v50 = vpop.permute.xlu1 %2085  ;;  %v9614_v63 = vpop.permute.xlu2 %2279 }
 0x28a   : > { %16455 = vst [vmem:[#allocation240_spill] sm:$0xff] %v9612_v50  ;;  %2465 = vrot.lane.b32.xlu0 %v9345_v47, %s15923_s14 }
 0x28b   : > { %16456 = vst [vmem:[#allocation241_spill] sm:$0xff] %v9614_v63 }
 0x28c   : > { %v9618_v59 = vpop.permute.xlu0 %2275 }
 0x28d   : > { %16457 = vst [vmem:[#allocation242_spill] sm:$0xff] %v9618_v59 }
 0x28f   : > { %2461 = vrot.lane.b32.xlu1 %v9262_v22, %s15923_s14  ;;  %2469 = vrot.lane.b32.xlu2 %v9474_v16, %s15923_s14 }
 0x291   : > { %v9624_v17 = vpop.permute.xlu1 %2179  ;;  %v9626_v4 = vpop.permute.xlu2 %2093 }
 0x292   : > { %16458 = vst [vmem:[#allocation243_spill] sm:$0xff] %v9624_v17  ;;  %2471 = vrot.lane.b32.xlu0 %v9477_v32, %s15923_s14 }
 0x293   : > { %16459 = vst [vmem:[#allocation244_spill] sm:$0xff] %v9626_v4 }
 0x294   : > { %v9630_v50 = vpop.permute.xlu0 %2089 }
 0x295   : > { %16460 = vst [vmem:[#allocation245_spill] sm:$0xff] %v9630_v50 }
 0x297   : > { %2467 = vrot.lane.b32.xlu1 %v9425_v23, %s15923_s14  ;;  %2475 = vrot.lane.b32.xlu2 %v8843_v28, %s15923_s14 }
 0x299   : > { %v9636_v63 = vpop.permute.xlu1 %2369  ;;  %v9638_v59 = vpop.permute.xlu2 %2187 }
 0x29a   : > { %16461 = vst [vmem:[#allocation246_spill] sm:$0xff] %v9636_v63  ;;  %2477 = vrot.lane.b32.xlu0 %v8759_v61, %s15923_s14 }
 0x29b   : > { %16462 = vst [vmem:[#allocation247_spill] sm:$0xff] %v9638_v59 }
 0x29c   : > { %v9642_v17 = vpop.permute.xlu0 %2183 }
 0x29d   : > { %16463 = vst [vmem:[#allocation248_spill] sm:$0xff] %v9642_v17 }
 0x29f   : > { %2473 = vrot.lane.b32.xlu1 %v9488_v0, %s15923_s14  ;;  %2481 = vrot.lane.b32.xlu2 %v8921_v60, %s15923_s14 }
 0x2a1   : > { %v9648_v4 = vpop.permute.xlu1 %2307  ;;  %v9650_v50 = vpop.permute.xlu2 %2377 }
 0x2a2   : > { %16464 = vst [vmem:[#allocation249_spill] sm:$0xff] %v9648_v4  ;;  %2483 = vrot.lane.b32.xlu0 %v8990_v62, %s15923_s14 }
 0x2a3   : > { %16465 = vst [vmem:[#allocation250_spill] sm:$0xff] %v9650_v50 }
 0x2a4   : > { %v9654_v63 = vpop.permute.xlu0 %2373 }
 0x2a5   : > { %16466 = vst [vmem:[#allocation251_spill] sm:$0xff] %v9654_v63 }
 0x2a7   : > { %2479 = vrot.lane.b32.xlu1 %v8912_v40, %s15923_s14  ;;  %2487 = vrot.lane.b32.xlu2 %v9187_v56, %s15923_s14 }
 0x2a9   : > { %v9660_v59 = vpop.permute.xlu1 %2277  ;;  %v9662_v17 = vpop.permute.xlu2 %2389 }
 0x2aa   : > { %16467 = vst [vmem:[#allocation252_spill] sm:$0xff] %v9660_v59  ;;  %2489 = vrot.lane.b32.xlu0 %v9070_v30, %s15923_s14 }
 0x2ab   : > { %16468 = vst [vmem:[#allocation253_spill] sm:$0xff] %v9662_v17  ;;  %v2050_v17 = vrot.slane %v9437_v38, 2 }
 0x2ac   : > { %v9666_v4 = vpop.permute.xlu0 %2281 }
 0x2ad   : > { %16469 = vst [vmem:[#allocation254_spill] sm:$0xff] %v9666_v4  ;;  %v2053_v4 = vrot.slane %v9554_v3, 2  ;;  %v9684_v35 = vsel %vm1009_vm3, %v2050_v17, %v2051_v34 }
 0x2af   : > { %2485 = vrot.lane.b32.xlu1 %v8978_v14, %s15923_s14  ;;  %2493 = vrot.lane.b32.xlu2 %v9251_v36, %s15923_s14  ;;  %v9695_v8 = vsel %vm1009_vm3, %v2051_v34, %v2053_v4 }
 0x2b1   : > { %v9672_v50 = vpop.permute.xlu1 %2185  ;;  %v9674_v63 = vpop.permute.xlu2 %2395 }
 0x2b2   : > { %16470 = vst [vmem:[#allocation255_spill] sm:$0xff] %v9672_v50  ;;  %2495 = vrot.lane.b32.xlu0 %v9320_v54, %s15923_s14 }
 0x2b3   : > { %16471 = vst [vmem:[#allocation256_spill] sm:$0xff] %v9674_v63 }
 0x2b4   : > { %v9680_v59 = vpop.permute.xlu0 %2189 }
 0x2b5   : > { %16472 = vst [vmem:[#allocation257_spill] sm:$0xff] %v9680_v59 }
 0x2b7   : > { %2491 = vrot.lane.b32.xlu1 %v9240_v43, %s15923_s14  ;;  %2499 = vrot.lane.b32.xlu2 %v9684_v35, %s15923_s14 }
 0x2b9   : > { %v9690_v63 = vpop.permute.xlu1 %2091  ;;  %v9692_v50 = vpop.permute.xlu2 %2401 }
 0x2ba   : > { %16473 = vst [vmem:[#allocation258_spill] sm:$0xff] %v9690_v63  ;;  %2501 = vrot.lane.b32.xlu0 %v9695_v8, %s15923_s14 }
 0x2bb   : > { %16474 = vst [vmem:[#allocation259_spill] sm:$0xff] %v9692_v50 }
 0x2bc   : > { %v9699_v3 = vpop.permute.xlu0 %2385 }
 0x2bd   : > { %16475 = vst [vmem:[#allocation260_spill] sm:$0xff] %v9699_v3 }
 0x2bf   : > { %2497 = vrot.lane.b32.xlu1 %v9308_v9, %s15923_s14  ;;  %2537 = vrot.lane.b32.xlu2 %v8762_v5, %s15921_s15 }
 0x2c1   : > { %v9705_v17 = vpop.permute.xlu1 %2375  ;;  %v9707_v59 = vpop.permute.xlu2 %2439 }
 0x2c2   : > { %16476 = vst [vmem:[#allocation261_spill] sm:$0xff] %v9705_v17  ;;  %2539 = vrot.lane.b32.xlu0 %v8801_v24, %s15921_s15  ;;  %v16540_v24 = vld [vmem:[#allocation174_spill] sm:$0xff] }
 0x2c4   : > { %v9711_v4 = vpop.permute.xlu0 %2391 }
 0x2c5   : > { %16477 = vst [vmem:[#allocation262_spill] sm:$0xff] %v9711_v4 }
 0x2c7   : > { %2535 = vrot.lane.b32.xlu1 %v8745_v55, %s15921_s15  ;;  %2543 = vrot.lane.b32.xlu2 %v8984_v52, %s15921_s15 }
 0x2c9   : > { %v9717_v34 = vpop.permute.xlu1 %2387  ;;  %v9719_v50 = vpop.permute.xlu2 %2445 }
 0x2ca   : > { %16478 = vst [vmem:[#allocation263_spill] sm:$0xff] %v9717_v34  ;;  %2545 = vrot.lane.b32.xlu0 %v8946_v42, %s15921_s15  ;;  %v16487_v42 = vld [vmem:[#allocation156_spill] sm:$0xff] }
 0x2cc   : > { %v9723_v3 = vpop.permute.xlu0 %2397 }
 0x2cd   : > { %16479 = vst [vmem:[#allocation264_spill] sm:$0xff] %v9723_v3  ;;  %v16483_v3 = vld [vmem:[#allocation182_spill] sm:$0xff] }
 0x2cf   : > { %2541 = vrot.lane.b32.xlu1 %v8846_v33, %s15921_s15  ;;  %2549 = vrot.lane.b32.xlu2 %v9073_v58, %s15921_s15  ;;  %v16486_v58 = vld [vmem:[#allocation175_spill] sm:$0xff] }
 0x2d1   : > { %v9729_v4 = vpop.permute.xlu1 %2393  ;;  %v9731_v63 = vpop.permute.xlu2 %2451 }
 0x2d2   : > { %16480 = vst [vmem:[#allocation265_spill] sm:$0xff] %v9729_v4  ;;  %2551 = vrot.lane.b32.xlu0 %v9136_v12, %s15921_s15 }
 0x2d3   : > { %16481 = vst [vmem:[#allocation266_spill] sm:$0xff] %v9731_v63  ;;  %v16534_v63 = vld [vmem:[#allocation131_spill] sm:$0xff] }
 0x2d4   : > { %v9735_v34 = vpop.permute.xlu0 %2403 }
 0x2d5   : > { %16482 = vst [vmem:[#allocation267_spill] sm:$0xff] %v9735_v34  ;;  %v16488_v34 = vld [vmem:[#allocation192_spill] sm:$0xff] }
 0x2d7   : > { %2547 = vrot.lane.b32.xlu1 %v9046_v19, %s15921_s15  ;;  %2555 = vrot.lane.b32.xlu2 %v16483_v3, %s15921_s15  ;;  %v16491_v3 = vld [vmem:[#allocation193_spill] sm:$0xff] }
 0x2d9   : > { %v9741_v17 = vpop.permute.xlu1 %2399  ;;  %v9743_v39 = vpop.permute.xlu2 %2457 }
 0x2da   : > { %16484 = vst [vmem:[#allocation268_spill] sm:$0xff] %v9741_v17  ;;  %2557 = vrot.lane.b32.xlu0 %v16486_v58, %s15921_s15  ;;  %v16492_v58 = vld [vmem:[#allocation103_spill] sm:$0xff] }
 0x2db   : > { %16485 = vst [vmem:[#allocation269_spill] sm:$0xff] %v9743_v39 }
 0x2dc   : > { %v9747_v4 = vpop.permute.xlu0 %2441 }
 0x2df   : > { %2553 = vrot.lane.b32.xlu1 %v16487_v42, %s15921_s15  ;;  %2561 = vrot.lane.b32.xlu2 %v16488_v34, %s15921_s15  ;;  %v16494_v34 = vld [vmem:[#allocation102_spill] sm:$0xff] }
 0x2e1   : > { %v9753_v12 = vpop.permute.xlu1 %2405  ;;  %v9755_v19 = vpop.permute.xlu2 %2463 }
 0x2e2   : > { %16489 = vst [vmem:[#allocation270_spill] sm:$0xff] %v9753_v12  ;;  %2563 = vrot.lane.b32.xlu0 %v9434_v18, %s15921_s15  ;;  %v16496_v18 = vld [vmem:[#allocation108_spill] sm:$0xff] }
 0x2e3   : > { %16490 = vst [vmem:[#allocation271_spill] sm:$0xff] %v9755_v19 }
 0x2e4   : > { %v9759_v17 = vpop.permute.xlu0 %2447 }
 0x2e7   : > { %2559 = vrot.lane.b32.xlu1 %v16491_v3, %s15921_s15  ;;  %2567 = vrot.lane.b32.xlu2 %v16492_v58, %s15921_s15  ;;  %v16498_v58 = vld [vmem:[#allocation115_spill] sm:$0xff] }
 0x2e9   : > { %v9765_v39 = vpop.permute.xlu1 %2443  ;;  %v9767_v42 = vpop.permute.xlu2 %2469 }
 0x2ea   : > { %16493 = vst [vmem:[#allocation272_spill] sm:$0xff] %v9767_v42  ;;  %2569 = vrot.lane.b32.xlu0 %v16494_v34, %s15921_s15  ;;  %v16500_v42 = vld [vmem:[#allocation109_spill] sm:$0xff]  ;;  %v16501_v34 = vld [vmem:[#allocation136_spill] sm:$0xff] }
 0x2ec   : > { %v9771_v12 = vpop.permute.xlu0 %2453 }
 0x2ed   : > { %16495 = vst [vmem:[#allocation273_spill] sm:$0xff] %v9771_v12 }
 0x2ef   : > { %2565 = vrot.lane.b32.xlu1 %v9440_v49, %s15921_s15  ;;  %2573 = vrot.lane.b32.xlu2 %v16496_v18, %s15921_s15  ;;  %v16504_v18 = vld [vmem:[#allocation132_spill] sm:$0xff] }
 0x2f1   : > { %v9777_v19 = vpop.permute.xlu1 %2449  ;;  %v9779_v3 = vpop.permute.xlu2 %2475 }
 0x2f2   : > { %16497 = vst [vmem:[#allocation274_spill] sm:$0xff] %v9779_v3  ;;  %2575 = vrot.lane.b32.xlu0 %v16498_v58, %s15921_s15  ;;  %v16506_v3 = vld [vmem:[#allocation119_spill] sm:$0xff] }
 0x2f3   : > { %v16507_v58 = vld [vmem:[#allocation151_spill] sm:$0xff] }
 0x2f4   : > { %v9783_v52 = vpop.permute.xlu0 %2459 }
 0x2f5   : > { %16499 = vst [vmem:[#allocation275_spill] sm:$0xff] %v9783_v52 }
 0x2f7   : > { %2571 = vrot.lane.b32.xlu1 %v16500_v42, %s15921_s15  ;;  %2579 = vrot.lane.b32.xlu2 %v16501_v34, %s15921_s15  ;;  %v16510_v34 = vld [vmem:[#allocation170_spill] sm:$0xff] }
 0x2f9   : > { %v9789_v12 = vpop.permute.xlu1 %2455  ;;  %v9791_v49 = vpop.permute.xlu2 %2481 }
 0x2fa   : > { %16502 = vst [vmem:[#allocation276_spill] sm:$0xff] %v9789_v12  ;;  %2581 = vrot.lane.b32.xlu0 %v16504_v18, %s15921_s15 }
 0x2fb   : > { %16503 = vst [vmem:[#allocation277_spill] sm:$0xff] %v9791_v49  ;;  %v16512_v49 = vld [vmem:[#allocation152_spill] sm:$0xff] }
 0x2fc   : > { %v9795_v33 = vpop.permute.xlu0 %2465 }
 0x2fd   : > { %16505 = vst [vmem:[#allocation278_spill] sm:$0xff] %v9795_v33 }
 0x2ff   : > { %2577 = vrot.lane.b32.xlu1 %v16506_v3, %s15921_s15  ;;  %2585 = vrot.lane.b32.xlu2 %v16507_v58, %s15921_s15 }
 0x301   : > { %v9801_v52 = vpop.permute.xlu1 %2461  ;;  %v9803_v42 = vpop.permute.xlu2 %2487 }
 0x302   : > { %16508 = vst [vmem:[#allocation279_spill] sm:$0xff] %v9801_v52  ;;  %2587 = vrot.lane.b32.xlu0 %v16510_v34, %s15921_s15  ;;  %v16517_v34 = vld [vmem:[#allocation105_spill] sm:$0xff] }
 0x303   : > { %16509 = vst [vmem:[#allocation280_spill] sm:$0xff] %v9803_v42  ;;  %v16516_v42 = vld [vmem:[#allocation176_spill] sm:$0xff] }
 0x304   : > { %v9807_v12 = vpop.permute.xlu0 %2471 }
 0x305   : > { %16511 = vst [vmem:[#allocation281_spill] sm:$0xff] %v9807_v12 }
 0x307   : > { %2583 = vrot.lane.b32.xlu1 %v16512_v49, %s15921_s15  ;;  %2591 = vrot.lane.b32.xlu2 %v9437_v38, %s15921_s15  ;;  %v16520_v38 = vld [vmem:[#allocation106_spill] sm:$0xff] }
 0x309   : > { %v9813_v18 = vpop.permute.xlu1 %2467  ;;  %v9815_v3 = vpop.permute.xlu2 %2493 }
 0x30a   : > { %16513 = vst [vmem:[#allocation282_spill] sm:$0xff] %v9813_v18  ;;  %2593 = vrot.lane.b32.xlu0 %v9369_v27, %s15921_s15  ;;  %v16522_v18 = vld [vmem:[#allocation49_spill] sm:$0xff] }
 0x30b   : > { %16514 = vst [vmem:[#allocation283_spill] sm:$0xff] %v9815_v3  ;;  %v16521_v3 = vld [vmem:[#allocation52_spill] sm:$0xff] }
 0x30c   : > { %v9819_v58 = vpop.permute.xlu0 %2477  ;;  %v9833_v33 = vpack.i.bf16 %v16522_v18, %v16521_v3 }
 0x30d   : > { %16515 = vst [vmem:[#allocation284_spill] sm:$0xff] %v9819_v58 }
 0x30e   : > { %16523 = vst [vmem:[#allocation106_spill] sm:$0xff] %v9833_v33 }
 0x30f   : > { %2589 = vrot.lane.b32.xlu1 %v16516_v42, %s15921_s15  ;;  %2631 = vrot.lane.b32.xlu2 %v16517_v34, %s15919_s16  ;;  %v16525_v42 = vld [vmem:[#allocation113_spill] sm:$0xff] }
 0x311   : > { %v9825_v49 = vpop.permute.xlu1 %2473  ;;  %v9827_v12 = vpop.permute.xlu2 %2499 }
 0x312   : > { %16518 = vst [vmem:[#allocation105_spill] sm:$0xff] %v9825_v49  ;;  %2633 = vrot.lane.b32.xlu0 %v16520_v38, %s15919_s16  ;;  %v16529_v49 = vld [vmem:[#allocation117_spill] sm:$0xff] }
 0x313   : > { %16519 = vst [vmem:[#allocation285_spill] sm:$0xff] %v9827_v12  ;;  %v16527_v12 = vld [vmem:[#allocation126_spill] sm:$0xff] }
 0x314   : > { %v9835_v27 = vpop.permute.xlu0 %2483 }
 0x315   : > { %16524 = vst [vmem:[#allocation286_spill] sm:$0xff] %v9835_v27  ;;  %v16530_v27 = vld [vmem:[#allocation142_spill] sm:$0xff] }
 0x317   : > { %7408 = vrot.lane.b32.xlu1 %v9833_v33, %s15921_s15  ;;  %2637 = vrot.lane.b32.xlu2 %v16525_v42, %s15919_s16  ;;  %v16532_v42 = vld [vmem:[#allocation145_spill] sm:$0xff]  ;;  %s8063_s15 = smov 112  }
 0x319   : > { %v9841_v34 = vpop.permute.xlu1 %2479  ;;  %v9843_v58 = vpop.permute.xlu2 %2537 }
 0x31a   : > { %16526 = vst [vmem:[#allocation113_spill] sm:$0xff] %v9841_v34  ;;  %2639 = vrot.lane.b32.xlu0 %v16527_v12, %s15919_s16  ;;  %v16535_v12 = vld [vmem:[#allocation160_spill] sm:$0xff] }
 0x31c   : > { %v9847_v38 = vpop.permute.xlu0 %2489 }
 0x31d   : > { %16528 = vst [vmem:[#allocation126_spill] sm:$0xff] %v9847_v38 }
 0x31f   : > { %2635 = vrot.lane.b32.xlu1 %v16529_v49, %s15919_s16  ;;  %2643 = vrot.lane.b32.xlu2 %v16530_v27, %s15919_s16  ;;  %v16538_v27 = vld [vmem:[#allocation186_spill] sm:$0xff] }
 0x321   : > { %v9853_v52 = vpop.permute.xlu1 %2485  ;;  %v9855_v33 = vpop.permute.xlu2 %2543 }
 0x322   : > { %16531 = vst [vmem:[#allocation117_spill] sm:$0xff] %v9853_v52  ;;  %2645 = vrot.lane.b32.xlu0 %v16532_v42, %s15919_s16  ;;  %v16541_v42 = vld [vmem:[#allocation197_spill] sm:$0xff] }
 0x324   : > { %v9859_v34 = vpop.permute.xlu0 %2495 }
 0x325   : > { %16533 = vst [vmem:[#allocation142_spill] sm:$0xff] %v9859_v34 }
 0x327   : > { %2641 = vrot.lane.b32.xlu1 %v16534_v63, %s15919_s16  ;;  %2649 = vrot.lane.b32.xlu2 %v16535_v12, %s15919_s16  ;;  %v16543_v12 = vld [vmem:[#allocation200_spill] sm:$0xff] }
 0x329   : > { %v9865_v38 = vpop.permute.xlu1 %2491  ;;  %v9867_v49 = vpop.permute.xlu2 %2549 }
 0x32a   : > { %16536 = vst [vmem:[#allocation145_spill] sm:$0xff] %v9865_v38  ;;  %2651 = vrot.lane.b32.xlu0 %v16538_v27, %s15919_s16 }
 0x32b   : > { %16537 = vst [vmem:[#allocation131_spill] sm:$0xff] %v9867_v49  ;;  %v16544_v49 = vld [vmem:[#allocation191_spill] sm:$0xff] }
 0x32c   : > { %v9871_v52 = vpop.permute.xlu0 %2501 }
 0x32d   : > { %16539 = vst [vmem:[#allocation160_spill] sm:$0xff] %v9871_v52 }
 0x32f   : > { %2647 = vrot.lane.b32.xlu1 %v16540_v24, %s15919_s16  ;;  %2655 = vrot.lane.b32.xlu2 %v16541_v42, %s15919_s16  ;;  %v16546_v42 = vld [vmem:[#allocation104_spill] sm:$0xff] }
 0x331   : > { %v9877_v34 = vpop.permute.xlu1 %2497  ;;  %v9879_v63 = vpop.permute.xlu2 %2555 }
 0x332   : > { %16542 = vst [vmem:[#allocation186_spill] sm:$0xff] %v9877_v34  ;;  %2657 = vrot.lane.b32.xlu0 %v16543_v12, %s15919_s16  ;;  %v16547_v12 = vld [vmem:[#allocation111_spill] sm:$0xff] }
 0x334   : > { %v9883_v38 = vpop.permute.xlu0 %2539 }
 0x337   : > { %2653 = vrot.lane.b32.xlu1 %v16544_v49, %s15919_s16  ;;  %2661 = vrot.lane.b32.xlu2 %v9457_v41, %s15919_s16 }
 0x339   : > { %v9889_v27 = vpop.permute.xlu1 %2535  ;;  %v9891_v24 = vpop.permute.xlu2 %2561 }
 0x33a   : > { %16545 = vst [vmem:[#allocation174_spill] sm:$0xff] %v9891_v24  ;;  %2663 = vrot.lane.b32.xlu0 %v16546_v42, %s15919_s16  ;;  %v16548_v24 = vld [vmem:[#allocation110_spill] sm:$0xff] }
 0x33c   : > { %v9895_v52 = vpop.permute.xlu0 %2545 }
 0x33f   : > { %2659 = vrot.lane.b32.xlu1 %v9496_v29, %s15919_s16  ;;  %2667 = vrot.lane.b32.xlu2 %v16547_v12, %s15919_s16 }
 0x341   : > { %v9901_v34 = vpop.permute.xlu1 %2541  ;;  %v9903_v49 = vpop.permute.xlu2 %2567 }
 0x342   : > { %2669 = vrot.lane.b32.xlu0 %v8895_v48, %s15919_s16 }
 0x344   : > { %v9907_v41 = vpop.permute.xlu0 %2551 }
 0x347   : > { %2665 = vrot.lane.b32.xlu1 %v16548_v24, %s15919_s16  ;;  %2673 = vrot.lane.b32.xlu2 %v8967_v13, %s15919_s16 }
 0x349   : > { %v9913_v42 = vpop.permute.xlu1 %2547  ;;  %v9915_v29 = vpop.permute.xlu2 %2573 }
 0x34a   : > { %2675 = vrot.lane.b32.xlu0 %v9085_v31, %s15919_s16 }
 0x34c   : > { %v9919_v12 = vpop.permute.xlu0 %2557 }
 0x34f   : > { %2671 = vrot.lane.b32.xlu1 %v9012_v51, %s15919_s16  ;;  %2679 = vrot.lane.b32.xlu2 %v9164_v20, %s15919_s16 }
 0x351   : > { %v9925_v48 = vpop.permute.xlu1 %2553  ;;  %v9927_v24 = vpop.permute.xlu2 %2579 }
 0x352   : > { %16549 = vst [vmem:[#allocation197_spill] sm:$0xff] %v9927_v24  ;;  %2681 = vrot.lane.b32.xlu0 %v9223_v1, %s15919_s16  ;;  %v16551_v1 = vld [vmem:[#allocation63_spill] sm:$0xff] }
 0x354   : > { %v9931_v13 = vpop.permute.xlu0 %2563 }
 0x357   : > { %2677 = vrot.lane.b32.xlu1 %v9161_v7, %s15919_s16  ;;  %2685 = vrot.lane.b32.xlu2 %v9297_v15, %s15919_s16 }
 0x359   : > { %v9937_v31 = vpop.permute.xlu1 %2559  ;;  %v9939_v51 = vpop.permute.xlu2 %2585 }
 0x35a   : > { %16550 = vst [vmem:[#allocation200_spill] sm:$0xff] %v9939_v51  ;;  %2687 = vrot.lane.b32.xlu0 %v9545_v26, %s15919_s16  ;;  %v16574_v51 = vld [vmem:[#allocation96_spill] sm:$0xff] }
 0x35c   : > { %v9943_v20 = vpop.permute.xlu0 %2569 }
 0x35f   : > { %2683 = vrot.lane.b32.xlu1 %v9342_v46, %s15919_s16  ;;  %7413 = vrot.lane.b32.xlu2 %v16551_v1, %s15919_s16 }
 0x361   : > { %v9949_v24 = vpop.permute.xlu1 %2565  ;;  %v9951_v7 = vpop.permute.xlu2 %2591 }
 0x362   : > { %16552 = vst [vmem:[#allocation191_spill] sm:$0xff] %v9951_v7  ;;  %2727 = vrot.lane.b32.xlu0 %v8815_v45, %s8062_s25  ;;  %v16566_v7 = vld [vmem:[#allocation70_spill] sm:$0xff] }
 0x364   : > { %v9955_v15 = vpop.permute.xlu0 %2575 }
 0x367   : > { %2689 = vrot.lane.b32.xlu1 %v9570_v44, %s15919_s16  ;;  %2731 = vrot.lane.b32.xlu2 %v8882_v57, %s8062_s25  ;;  %s16961_s16 = smov 32  }
 0x369   : > { %v9961_v46 = vpop.permute.xlu1 %2571  ;;  %v9963_v26 = vpop.permute.xlu2 %2631 }
 0x36a   : > { %2733 = vrot.lane.b32.xlu0 %v8932_v2, %s8062_s25 }
 0x36c   : > { %v9967_v1 = vpop.permute.xlu0 %2581 }
 0x36d   : > { %16553 = vst [vmem:[#allocation104_spill] sm:$0xff] %v9967_v1  ;;  %v16577_v1 = vld [vmem:[#allocation93_spill] sm:$0xff] }
 0x36f   : > { %2729 = vrot.lane.b32.xlu1 %v8879_v10, %s8062_s25  ;;  %2737 = vrot.lane.b32.xlu2 %v9015_v25, %s8062_s25 }
 0x371   : > { %v9973_v45 = vpop.permute.xlu1 %2577  ;;  %v9975_v44 = vpop.permute.xlu2 %2637 }
 0x372   : > { %16554 = vst [vmem:[#allocation111_spill] sm:$0xff] %v9973_v45  ;;  %2739 = vrot.lane.b32.xlu0 %v9126_v53, %s8062_s25  ;;  %v16583_v45 = vld [vmem:[#allocation127_spill] sm:$0xff] }
 0x374   : > { %v9979_v57 = vpop.permute.xlu0 %2587 }
 0x375   : > { %16555 = vst [vmem:[#allocation110_spill] sm:$0xff] %v9979_v57 }
 0x377   : > { %2735 = vrot.lane.b32.xlu1 %v9065_v6, %s8062_s25  ;;  %2743 = vrot.lane.b32.xlu2 %v9212_v37, %s8062_s25 }
 0x379   : > { %v9985_v2 = vpop.permute.xlu1 %2583  ;;  %v9987_v10 = vpop.permute.xlu2 %2643 }
 0x37a   : > { %16556 = vst [vmem:[#allocation287_spill] sm:$0xff] %v9985_v2  ;;  %2745 = vrot.lane.b32.xlu0 %v9262_v22, %s8062_s25  ;;  %v16576_v2 = vld [vmem:[#allocation82_spill] sm:$0xff] }
 0x37c   : > { %v9991_v25 = vpop.permute.xlu0 %2593 }
 0x37d   : > { %16557 = vst [vmem:[#allocation288_spill] sm:$0xff] %v9991_v25  ;;  %v16563_v25 = vld [vmem:[#allocation59_spill] sm:$0xff] }
 0x37f   : > { %2741 = vrot.lane.b32.xlu1 %v9209_v11, %s8062_s25  ;;  %2749 = vrot.lane.b32.xlu2 %v9345_v47, %s8062_s25 }
 0x381   : > { %v9997_v53 = vpop.permute.xlu1 %2589  ;;  %v9999_v6 = vpop.permute.xlu2 %2649 }
 0x382   : > { %16558 = vst [vmem:[#allocation289_spill] sm:$0xff] %v9997_v53  ;;  %2751 = vrot.lane.b32.xlu0 %v9425_v23, %s8062_s25 }
 0x384   : > { %v10003_v37 = vpop.permute.xlu0 %2633 }
 0x387   : > { %2747 = vrot.lane.b32.xlu1 %v9394_v21, %s8062_s25  ;;  %2755 = vrot.lane.b32.xlu2 %v9477_v32, %s8062_s25 }
 0x389   : > { %v10009_v22 = vpop.permute.xlu1 %7408  ;;  %v10011_v11 = vpop.permute.xlu2 %2655 }
 0x38a   : > { %16559 = vst [vmem:[#allocation290_spill] sm:$0xff] %v10009_v22  ;;  %2757 = vrot.lane.b32.xlu0 %v9488_v0, %s8062_s25 }
 0x38c   : > { %v10015_v47 = vpop.permute.xlu0 %2639 }
 0x38f   : > { %2753 = vrot.lane.b32.xlu1 %v9474_v16, %s8062_s25  ;;  %2761 = vrot.lane.b32.xlu2 %v8759_v61, %s8062_s25 }
 0x391   : > { %v10021_v23 = vpop.permute.xlu1 %2635  ;;  %v10023_v21 = vpop.permute.xlu2 %2661 }
 0x392   : > { %2763 = vrot.lane.b32.xlu0 %v8912_v40, %s8062_s25 }
 0x394   : > { %v10027_v32 = vpop.permute.xlu0 %2645 }
 0x397   : > { %2759 = vrot.lane.b32.xlu1 %v8843_v28, %s8062_s25  ;;  %2767 = vrot.lane.b32.xlu2 %v8990_v62, %s8062_s25 }
 0x399   : > { %v10033_v0 = vpop.permute.xlu1 %2641  ;;  %v10035_v16 = vpop.permute.xlu2 %2667 }
 0x39a   : > { %2769 = vrot.lane.b32.xlu0 %v8978_v14, %s8062_s25  ;;  %v3094_v14 = vld [vmem:[%s15684_s5 + $0x40] sm:$0xff] }
 0x39b   : > { %3203 = vmatpush.msrb.mxu2 %v3094_v14 }
 0x39c   : > { %v10039_v61 = vpop.permute.xlu0 %2651 }
 0x39f   : > { %2765 = vrot.lane.b32.xlu1 %v8921_v60, %s8062_s25  ;;  %2773 = vrot.lane.b32.xlu2 %v9070_v30, %s8062_s25  ;;  %v3093_v60 = vld [vmem:[%s15684_s5 + $0x38] sm:$0xff]  ;;  %v3092_v30 = vld [vmem:[%s15684_s5 + $0x30] sm:$0xff] }
 0x3a0   : > { %3204 = vmatpush.msrb.mxu2 %v3093_v60  ;;  %v3089_v60 = vld [vmem:[%s15684_s5 + $0x18] sm:$0xff] }
 0x3a1   : > { %v10045_v40 = vpop.permute.xlu1 %2647  ;;  %v10047_v28 = vpop.permute.xlu2 %2673 }
 0x3a2   : > { %16560 = vst [vmem:[#allocation291_spill] sm:$0xff] %v10047_v28  ;;  %2775 = vrot.lane.b32.xlu0 %v9240_v43, %s8062_s25  ;;  %3205 = vmatpush.msrb.mxu2 %v3092_v30 }
 0x3a4   : > { %v10051_v62 = vpop.permute.xlu0 %2657 }
 0x3a7   : > { %2771 = vrot.lane.b32.xlu1 %v9187_v56, %s8062_s25  ;;  %2779 = vrot.lane.b32.xlu2 %v9320_v54, %s8062_s25  ;;  %v3091_v56 = vld [vmem:[%s15684_s5 + $0x28] sm:$0xff]  ;;  %v3090_v54 = vld [vmem:[%s15684_s5 + $0x20] sm:$0xff] }
 0x3a8   : > { %3206 = vmatpush.msrb.mxu2 %v3091_v56 }
 0x3a9   : > { %v10066_v43 = vpop.permute.xlu1 %2653  ;;  %v10068_v22 = vpop.permute.xlu2 %2679 }
 0x3aa   : > { %16561 = vst [vmem:[#allocation292_spill] sm:$0xff] %v10068_v22  ;;  %2781 = vrot.lane.b32.xlu0 %v9308_v9, %s8062_s25  ;;  %3207 = vmatpush.msrb.mxu2 %v3090_v54  ;;  %v3088_v9 = vld [vmem:[%s15684_s5 + $0x10] sm:$0xff] }
 0x3ac   : > { %v10075_v14 = vpop.permute.xlu0 %2663  ;;  %3208 = vmatpush.msrb.mxu2 %v3089_v60  ;;  %v16564_v60 = vld [vmem:[#allocation68_spill] sm:$0xff] }
 0x3ae   : > { %3209 = vmatpush.msrb.mxu2 %v3088_v9 }
 0x3af   : > { %2777 = vrot.lane.b32.xlu1 %v9251_v36, %s8062_s25  ;;  %2785 = vrot.lane.b32.xlu2 %v9695_v8, %s8062_s25  ;;  %v3087_v36 = vld [vmem:[%s15684_s5 + $0x8] sm:$0xff]  ;;  %v3086_v8 = vld [vmem:[%s15684_s5] sm:$0xff] }
 0x3b0   : > { %3210 = vmatpush.msrb.mxu2 %v3087_v36 }
 0x3b1   : > { %v10090_v30 = vpop.permute.xlu1 %2659  ;;  %v10092_v56 = vpop.permute.xlu2 %2685 }
 0x3b2   : > { %16562 = vst [vmem:[#allocation293_spill] sm:$0xff] %v10092_v56  ;;  %7418 = vrot.lane.b32.xlu0 %v16563_v25, %s8062_s25  ;;  %3211 = vmatpush.msrb.mxu2 %v3086_v8  ;;  %v16568_v56 = vld [vmem:[#allocation66_spill] sm:$0xff] }
 0x3b3   : > { %v16569_v8 = vld [vmem:[#allocation74_spill] sm:$0xff] }
 0x3b4   : > { %v10099_v54 = vpop.permute.xlu0 %2669 }
 0x3b7   : > { %2783 = vrot.lane.b32.xlu1 %v9684_v35, %s8062_s25  ;;  %3343 = vrot.lane.b32.xlu2 %v16564_v60, %s8063_s15  ;;  %v16570_v60 = vld [vmem:[#allocation76_spill] sm:$0xff] }
 0x3b9   : > { %v10108_v9 = vpop.permute.xlu1 %2665  ;;  %v10110_v25 = vpop.permute.xlu2 %7413 }
 0x3ba   : > { %16565 = vst [vmem:[#allocation294_spill] sm:$0xff] %v10110_v25  ;;  %3345 = vrot.lane.b32.xlu0 %v16566_v7, %s8063_s15  ;;  %v16572_v25 = vld [vmem:[#allocation73_spill] sm:$0xff]  ;;  %v16573_v7 = vld [vmem:[#allocation80_spill] sm:$0xff] }
 0x3bc   : > { %v10114_v36 = vpop.permute.xlu0 %2675 }
 0x3bd   : > { %16567 = vst [vmem:[#allocation295_spill] sm:$0xff] %v10114_v36  ;;  %v7405_v36 = vunpack.i.l.bf16 %v16577_v1 }
 0x3bf   : > { %3341 = vrot.lane.b32.xlu1 %v16568_v56, %s8063_s15  ;;  %3349 = vrot.lane.b32.xlu2 %v16569_v8, %s8063_s15  ;;  %v7400_v56 = vunpack.i.l.bf16 %v16574_v51 }
 0x3c1   : > { %v10120_v35 = vpop.permute.xlu1 %2671  ;;  %v10122_v53 = vpop.permute.xlu2 %2731 }
 0x3c2   : > { %3351 = vrot.lane.b32.xlu0 %v16570_v60, %s8063_s15  ;;  %v2823_v60 = vsel %vm422_vm0, %v16521_v3, %v7400_v56 }
 0x3c4   : > { %v10126_v57 = vpop.permute.xlu0 %2681 }
 0x3c5   : > { %16571 = vst [vmem:[#allocation296_spill] sm:$0xff] %v10126_v57 }
 0x3c7   : > { %3347 = vrot.lane.b32.xlu1 %v16572_v25, %s8063_s15  ;;  %3355 = vrot.lane.b32.xlu2 %v16573_v7, %s8063_s15  ;;  %v10145_v25 = vsel %vm2855_vm4, %v2823_v60, %v7405_v36  ;;  %v16580_v7 = vld [vmem:[#allocation78_spill] sm:$0xff]  ;;  %v16584_v36 = vld [vmem:[#allocation88_spill] sm:$0xff] }
 0x3c8   : > { %16579 = vst [vmem:[#allocation297_spill] sm:$0xff] %v10145_v25 }
 0x3c9   : > { %v10133_v22 = vpop.permute.xlu1 %2677  ;;  %v10135_v8 = vpop.permute.xlu2 %2737 }
 0x3ca   : > { %16575 = vst [vmem:[#allocation96_spill] sm:$0xff] %v10133_v22  ;;  %3357 = vrot.lane.b32.xlu0 %v16576_v2, %s8063_s15  ;;  %v16581_v22 = vld [vmem:[#allocation86_spill] sm:$0xff]  ;;  %v16582_v2 = vld [vmem:[#allocation121_spill] sm:$0xff] }
 0x3cb   : > { %v2889_v28 = vsel %vm2888_vm6, %v10145_v25, %v16582_v2 }
 0x3cc   : > { %v10142_v57 = vpop.permute.xlu0 %2687  ;;  %v2922_v56 = vsel %vm2921_vm5, %v2889_v28, %v16583_v45  ;;  %v7401_v28 = vunpack.i.h.bf16 %v16574_v51  ;;  %v16588_v51 = vld [vmem:[#allocation95_spill] sm:$0xff] }
 0x3cd   : > { %16578 = vst [vmem:[#allocation93_spill] sm:$0xff] %v10142_v57  ;;  %v2955_v60 = vsel %vm2954_vm7, %v2922_v56, %v9707_v59  ;;  %v16585_v59 = vld [vmem:[#allocation84_spill] sm:$0xff] }
 0x3ce   : > { %v16586_v56 = vld [vmem:[#allocation92_spill] sm:$0xff] }
 0x3cf   : > { %3353 = vrot.lane.b32.xlu1 %v16580_v7, %s8063_s15  ;;  %3361 = vrot.lane.b32.xlu2 %v16581_v22, %s8063_s15  ;;  %v2988_v7 = vsel %vm2987_vm9, %v2955_v60, %v9889_v27  ;;  %v7406_v27 = vunpack.i.h.bf16 %v16577_v1  ;;  %v2824_v60 = vsel %vm422_vm0, %v16522_v18, %v7401_v28  ;;  %v16593_v28 = vld [vmem:[#allocation99_spill] sm:$0xff] }
 0x3d0   : > { %v3021_v2 = vsel %vm3020_vm8, %v2988_v7, %v9963_v26 }
 0x3d1   : > { %v10156_v3 = vpop.permute.xlu1 %2683  ;;  %v10158_v57 = vpop.permute.xlu2 %2743 }
 0x3d2   : > { %3363 = vrot.lane.b32.xlu0 %v16584_v36, %s8063_s15  ;;  %v16592_v36 = vld [vmem:[#allocation124_spill] sm:$0xff] }
 0x3d3   : > { %v2825_v25 = vsel %vm422_vm0, %v16593_v28, %v16592_v36  ;;  %v16598_v28 = vld [vmem:[#allocation130_spill] sm:$0xff] }
 0x3d4   : > { %v2728_v45 = vpop.permute.xlu0 %2727 }
 0x3d5   : > { %v3054_v22 = vsel %vm3053_vm11, %v3021_v2, %v2728_v45  ;;  %v16590_v45 = vld [vmem:[#allocation114_spill] sm:$0xff] }
 0x3d6   : > { %7223 = vmatmul.msk.f32.vlgmr.msrb.gmra.mxu2 %vm3099_vm10, %v3054_v22  ;;  %v10185_v22 = vsel %vm2855_vm4, %v2824_v60, %v7406_v27  ;;  %v16595_v27 = vld [vmem:[#allocation101_spill] sm:$0xff]  ;;  %v16596_v60 = vld [vmem:[#allocation134_spill] sm:$0xff] }
 0x3d7   : > { %3359 = vrot.lane.b32.xlu1 %v16585_v59, %s8063_s15  ;;  %3367 = vrot.lane.b32.xlu2 %v16586_v56, %s8063_s15  ;;  %16589 = vst [vmem:[#allocation127_spill] sm:$0xff] %v10185_v22  ;;  %v2890_v59 = vsel %vm2888_vm6, %v10185_v22, %v16590_v45  ;;  %v16591_v56 = vld [vmem:[#allocation139_spill] sm:$0xff] }
 0x3d8   : > { %v2923_v1 = vsel %vm2921_vm5, %v2890_v59, %v16591_v56 }
 0x3d9   : > { %v10178_v7 = vpop.permute.xlu1 %2689  ;;  %v10180_v26 = vpop.permute.xlu2 %2749  ;;  %v2956_v18 = vsel %vm2954_vm7, %v2923_v1, %v9747_v4  ;;  %v16597_v4 = vld [vmem:[#allocation67_spill] sm:$0xff] }
 0x3da   : > { %16587 = vst [vmem:[#allocation121_spill] sm:$0xff] %v10178_v7  ;;  %3369 = vrot.lane.b32.xlu0 %v16588_v51, %s8063_s15  ;;  %v16594_v51 = vld [vmem:[#allocation90_spill] sm:$0xff]  ;;  %v2858_v7 = vsel %vm2855_vm4, %v2825_v25, %v16596_v60  ;;  %v2989_v45 = vsel %vm2987_vm9, %v2956_v18, %v9843_v58  ;;  %v16599_v60 = vld [vmem:[#allocation129_spill] sm:$0xff] }
 0x3db   : > { %v3022_v59 = vsel %vm3020_vm8, %v2989_v45, %v10003_v37  ;;  %v16600_v37 = vld [vmem:[#allocation98_spill] sm:$0xff]  ;;  %v16601_v45 = vld [vmem:[#allocation71_spill] sm:$0xff] }
 0x3dc   : > { %v2734_v2 = vpop.permute.xlu0 %2733 }
 0x3df   : > { %3365 = vrot.lane.b32.xlu1 %v16594_v51, %s8063_s15  ;;  %3373 = vrot.lane.b32.xlu2 %v16595_v27, %s8063_s15  ;;  %v2891_v51 = vsel %vm2888_vm6, %v2858_v7, %v16598_v28  ;;  %v16602_v7 = vld [vmem:[#allocation128_spill] sm:$0xff]  ;;  %v16686_v27 = vld [vmem:[#allocation278_spill] sm:$0xff] }
 0x3e0   : > { %v2924_v58 = vsel %vm2921_vm5, %v2891_v51, %v16599_v60 }
 0x3e1   : > { %v2730_v56 = vpop.permute.xlu1 %2729  ;;  %v10207_v36 = vpop.permute.xlu2 %2755  ;;  %v2957_v18 = vsel %vm2954_vm7, %v2924_v58, %v9765_v39  ;;  %v16604_v39 = vld [vmem:[#allocation72_spill] sm:$0xff] }
 0x3e2   : > { %3375 = vrot.lane.b32.xlu0 %v16597_v4, %s8063_s15  ;;  %v3055_v1 = vsel %vm3053_vm11, %v3022_v59, %v2730_v56  ;;  %v2990_v59 = vsel %vm2987_vm9, %v2957_v18, %v9883_v38  ;;  %v16603_v56 = vld [vmem:[#allocation100_spill] sm:$0xff] }
 0x3e3   : > { %7224 = vmatmul.msk.f32.gmra.mxu2 %vm3099_vm10, %v3055_v1  ;;  %v2826_v1 = vsel %vm422_vm0, %v16603_v56, %v16602_v7  ;;  %v3023_v28 = vsel %vm3020_vm8, %v2990_v59, %v10021_v23  ;;  %v16606_v7 = vld [vmem:[#allocation147_spill] sm:$0xff] }
 0x3e4   : > { %v10215_v25 = vpop.permute.xlu0 %2739  ;;  %v3056_v58 = vsel %vm3053_vm11, %v3023_v28, %v10122_v53  ;;  %v16607_v23 = vld [vmem:[#allocation155_spill] sm:$0xff]  ;;  %v16609_v53 = vld [vmem:[#allocation77_spill] sm:$0xff] }
 0x3e7   : > { %3371 = vrot.lane.b32.xlu1 %v16600_v37, %s8063_s15  ;;  %3379 = vrot.lane.b32.xlu2 %v16601_v45, %s8063_s15  ;;  %v16605_v37 = vld [vmem:[#allocation116_spill] sm:$0xff] }
 0x3e8   : > { %v2859_v38 = vsel %vm2855_vm4, %v2826_v1, %v16605_v37  ;;  %v16610_v1 = vld [vmem:[#allocation125_spill] sm:$0xff] }
 0x3e9   : > { %v2736_v51 = vpop.permute.xlu1 %2735  ;;  %v10232_v60 = vpop.permute.xlu2 %2761  ;;  %v2892_v56 = vsel %vm2888_vm6, %v2859_v38, %v16606_v7  ;;  %v2827_v28 = vsel %vm422_vm0, %v8745_v55, %v16610_v1  ;;  %v16611_v7 = vld [vmem:[#allocation149_spill] sm:$0xff]  ;;  %v16614_v1 = vld [vmem:[#allocation180_spill] sm:$0xff] }
 0x3ea   : > { %3381 = vrot.lane.b32.xlu0 %v16604_v39, %s8063_s15  ;;  %v2925_v59 = vsel %vm2921_vm5, %v2892_v56, %v16607_v23  ;;  %v16608_v39 = vld [vmem:[#allocation69_spill] sm:$0xff]  ;;  %v16612_v56 = vld [vmem:[#allocation79_spill] sm:$0xff] }
 0x3eb   : > { %7225 = vmatmul.msk.f32.gmra.mxu2 %vm3099_vm10, %v3056_v58  ;;  %v2958_v45 = vsel %vm2954_vm7, %v2925_v59, %v9719_v50  ;;  %v2860_v50 = vsel %vm2855_vm4, %v2827_v28, %v16611_v7 }
 0x3ec   : > { %v10241_v18 = vpop.permute.xlu0 %2745  ;;  %v2991_v37 = vsel %vm2987_vm9, %v2958_v45, %v9901_v34  ;;  %v16613_v45 = vld [vmem:[#allocation135_spill] sm:$0xff] }
 0x3ed   : > { %v3024_v58 = vsel %vm3020_vm8, %v2991_v37, %v9975_v44  ;;  %v2893_v55 = vsel %vm2888_vm6, %v2860_v50, %v16613_v45  ;;  %v16615_v37 = vld [vmem:[#allocation146_spill] sm:$0xff] }
 0x3ee   : > { %v3057_v23 = vsel %vm3053_vm11, %v3024_v58, %v2734_v2  ;;  %v2926_v44 = vsel %vm2921_vm5, %v2893_v55, %v16614_v1  ;;  %v2828_v28 = vsel %vm422_vm0, %v8762_v5, %v16615_v37  ;;  %v16616_v2 = vld [vmem:[#allocation75_spill] sm:$0xff]  ;;  %v16619_v5 = vld [vmem:[#allocation85_spill] sm:$0xff] }
 0x3ef   : > { %3377 = vrot.lane.b32.xlu1 %v16608_v39, %s8063_s15  ;;  %3385 = vrot.lane.b32.xlu2 %v16609_v53, %s8063_s15  ;;  %v2959_v7 = vsel %vm2954_vm7, %v2926_v44, %v9759_v17  ;;  %v16617_v58 = vld [vmem:[#allocation83_spill] sm:$0xff]  ;;  %v16685_v53 = vld [vmem:[#allocation246_spill] sm:$0xff] }
 0x3f0   : > { %v2992_v50 = vsel %vm2987_vm9, %v2959_v7, %v9855_v33  ;;  %v16620_v1 = vld [vmem:[#allocation163_spill] sm:$0xff]  ;;  %v16621_v33 = vld [vmem:[#allocation158_spill] sm:$0xff] }
 0x3f1   : > { %v2742_v38 = vpop.permute.xlu1 %2741  ;;  %v10265_v59 = vpop.permute.xlu2 %2767  ;;  %v3025_v45 = vsel %vm3020_vm8, %v2992_v50, %v10015_v47  ;;  %v16624_v50 = vld [vmem:[#allocation177_spill] sm:$0xff] }
 0x3f2   : > { %3387 = vrot.lane.b32.xlu0 %v16612_v56, %s8063_s15  ;;  %v3058_v17 = vsel %vm3053_vm11, %v3025_v45, %v2736_v51  ;;  %v16623_v51 = vld [vmem:[#allocation89_spill] sm:$0xff]  ;;  %v16625_v45 = vld [vmem:[#allocation107_spill] sm:$0xff] }
 0x3f3   : > { %7226 = vmatmul.msk.f32.gmra.mxu2 %vm3099_vm10, %v3057_v23  ;;  %v16618_v23 = vld [vmem:[#allocation164_spill] sm:$0xff] }
 0x3f4   : > { %v10268_v34 = vpop.permute.xlu0 %2751  ;;  %v2861_v39 = vsel %vm2855_vm4, %v2828_v28, %v16618_v23  ;;  %v16622_v23 = vld [vmem:[#allocation81_spill] sm:$0xff] }
 0x3f5   : > { %v2894_v44 = vsel %vm2888_vm6, %v2861_v39, %v16620_v1 }
 0x3f6   : > { %v2927_v7 = vsel %vm2921_vm5, %v2894_v44, %v16621_v33 }
 0x3f7   : > { %3383 = vrot.lane.b32.xlu1 %v16616_v2, %s8063_s15  ;;  %3391 = vrot.lane.b32.xlu2 %v16617_v58, %s8063_s15  ;;  %v2960_v47 = vsel %vm2954_vm7, %v2927_v7, %v9777_v19  ;;  %v16626_v19 = vld [vmem:[#allocation91_spill] sm:$0xff]  ;;  %v16627_v7 = vld [vmem:[#allocation154_spill] sm:$0xff] }
 0x3f8   : > { %v2993_v39 = vsel %vm2987_vm9, %v2960_v47, %v9895_v52 }
 0x3f9   : > { %v10289_v55 = vpop.permute.xlu1 %2747  ;;  %v10299_v28 = vpop.permute.xlu2 %2773  ;;  %v3026_v1 = vsel %vm3020_vm8, %v2993_v39, %v10033_v0  ;;  %v16630_v39 = vld [vmem:[#allocation266_spill] sm:$0xff] }
 0x3fa   : > { %3393 = vrot.lane.b32.xlu0 %v16619_v5, %s8063_s15  ;;  %v3059_v33 = vsel %vm3053_vm11, %v3026_v1, %v10135_v8  ;;  %v16631_v8 = vld [vmem:[#allocation87_spill] sm:$0xff]  ;;  %v16632_v1 = vld [vmem:[#allocation97_spill] sm:$0xff] }
 0x3fb   : > { %7227 = vmatmul.msk.f32.gmra.mxu2 %vm3099_vm10, %v3058_v17  ;;  %v2829_v17 = vsel %vm422_vm0, %v16625_v45, %v16624_v50  ;;  %v16629_v45 = vld [vmem:[#allocation190_spill] sm:$0xff] }
 0x3fc   : > { %v10297_v37 = vpop.permute.xlu0 %2757  ;;  %v2862_v52 = vsel %vm2855_vm4, %v2829_v17, %v16627_v7  ;;  %v16634_v7 = vld [vmem:[#allocation112_spill] sm:$0xff] }
 0x3ff   : > { %3389 = vrot.lane.b32.xlu1 %v16622_v23, %s8063_s15  ;;  %3397 = vrot.lane.b32.xlu2 %v16623_v51, %s8063_s15  ;;  %v16628_v23 = vld [vmem:[#allocation184_spill] sm:$0xff] }
 0x400   : > { %v2895_v50 = vsel %vm2888_vm6, %v2862_v52, %v16628_v23 }
 0x401   : > { %v10316_v44 = vpop.permute.xlu1 %2753  ;;  %v2928_v0 = vsel %vm2921_vm5, %v2895_v50, %v16629_v45  ;;  %v10333_v51 = vpop.permute.xlu2 %2779  ;;  %v16635_v45 = vld [vmem:[#allocation173_spill] sm:$0xff] }
 0x402   : > { %3399 = vrot.lane.b32.xlu0 %v16626_v19, %s8063_s15  ;;  %v2961_v2 = vsel %vm2954_vm7, %v2928_v0, %v16630_v39  ;;  %v16640_v19 = vld [vmem:[#allocation273_spill] sm:$0xff] }
 0x403   : > { %7228 = vmatmul.msk.f32.gmra.mxu2 %vm3099_vm10, %v3059_v33  ;;  %v2994_v17 = vsel %vm2987_vm9, %v2961_v2, %v9913_v42  ;;  %v16633_v33 = vld [vmem:[#allocation148_spill] sm:$0xff]  ;;  %v16636_v42 = vld [vmem:[#allocation165_spill] sm:$0xff] }
 0x404   : > { %v10325_v47 = vpop.permute.xlu0 %2763  ;;  %v2830_v23 = vsel %vm422_vm0, %v16634_v7, %v16633_v33  ;;  %v3027_v52 = vsel %vm3020_vm8, %v2994_v17, %v9987_v10  ;;  %v16638_v7 = vld [vmem:[#allocation187_spill] sm:$0xff] }
 0x405   : > { %v2863_v0 = vsel %vm2855_vm4, %v2830_v23, %v16635_v45  ;;  %v3060_v39 = vsel %vm3053_vm11, %v3027_v52, %v10215_v25  ;;  %v16639_v10 = vld [vmem:[#allocation123_spill] sm:$0xff]  ;;  %v16641_v45 = vld [vmem:[#allocation94_spill] sm:$0xff] }
 0x406   : > { %v2896_v2 = vsel %vm2888_vm6, %v2863_v0, %v16636_v42  ;;  %v2831_v17 = vsel %vm422_vm0, %v16639_v10, %v16638_v7  ;;  %v16642_v25 = vld [vmem:[#allocation198_spill] sm:$0xff]  ;;  %v16645_v7 = vld [vmem:[#allocation196_spill] sm:$0xff]  ;;  %v16646_v10 = vld [vmem:[#allocation195_spill] sm:$0xff] }
 0x407   : > { %3395 = vrot.lane.b32.xlu1 %v16631_v8, %s8063_s15  ;;  %3403 = vrot.lane.b32.xlu2 %v16632_v1, %s8063_s15  ;;  %v16637_v1 = vld [vmem:[#allocation202_spill] sm:$0xff]  ;;  %v2864_v52 = vsel %vm2855_vm4, %v2831_v17, %v16642_v25 }
 0x408   : > { %v2929_v33 = vsel %vm2921_vm5, %v2896_v2, %v16637_v1 }
 0x409   : > { %v10346_v50 = vpop.permute.xlu1 %2759  ;;  %v2962_v23 = vsel %vm2954_vm7, %v2929_v33, %v16640_v19  ;;  %v10372_v1 = vpop.permute.xlu2 %2785  ;;  %v2897_v19 = vsel %vm2888_vm6, %v2864_v52, %v16645_v7 }
 0x40a   : > { %16644 = vst [vmem:[#allocation114_spill] sm:$0xff] %v10372_v1  ;;  %v2930_v17 = vsel %vm2921_vm5, %v2897_v19, %v16646_v10  ;;  %v16650_v19 = vld [vmem:[#allocation178_spill] sm:$0xff] }
 0x40b   : > { %7229 = vmatmul.msk.f32.gmra.mxu2 %vm3099_vm10, %v3060_v39  ;;  %v16643_v39 = vld [vmem:[#allocation131_spill] sm:$0xff] }
 0x40c   : > { %v10353_v8 = vpop.permute.xlu0 %2769  ;;  %v2995_v58 = vsel %vm2987_vm9, %v2962_v23, %v16643_v39  ;;  %v16647_v23 = vld [vmem:[#allocation276_spill] sm:$0xff]  ;;  %v16649_v39 = vld [vmem:[#allocation118_spill] sm:$0xff] }
 0x40d   : > { %v3028_v0 = vsel %vm3020_vm8, %v2995_v58, %v10027_v32  ;;  %v2963_v25 = vsel %vm2954_vm7, %v2930_v17, %v16647_v23  ;;  %v16648_v58 = vld [vmem:[#allocation194_spill] sm:$0xff] }
 0x40e   : > { %v3061_v2 = vsel %vm3053_vm11, %v3028_v0, %v2742_v38  ;;  %v2996_v32 = vsel %vm2987_vm9, %v2963_v25, %v9907_v41  ;;  %v2832_v38 = vsel %vm422_vm0, %v16649_v39, %v16648_v58  ;;  %v16652_v41 = vld [vmem:[#allocation210_spill] sm:$0xff]  ;;  %v16653_v25 = vld [vmem:[#allocation212_spill] sm:$0xff]  ;;  %v16655_v39 = vld [vmem:[#allocation189_spill] sm:$0xff] }
 0x40f   : > { %3401 = vrot.lane.b32.xlu1 %v16641_v45, %s8063_s15  ;;  %v3029_v52 = vsel %vm3020_vm8, %v2996_v32, %v10045_v40  ;;  %v2865_v10 = vsel %vm2855_vm4, %v2832_v38, %v16650_v19  ;;  %v16654_v40 = vld [vmem:[#allocation269_spill] sm:$0xff] }
 0x410   : > { %v2898_v23 = vsel %vm2888_vm6, %v2865_v10, %v16652_v41  ;;  %v16657_v45 = vld [vmem:[#allocation209_spill] sm:$0xff] }
 0x411   : > { %v10374_v42 = vpop.permute.xlu1 %2765  ;;  %v3344_v7 = vpop.permute.xlu2 %3343  ;;  %v2931_v58 = vsel %vm2921_vm5, %v2898_v23, %v16653_v25 }
 0x412   : > { %v2964_v32 = vsel %vm2954_vm7, %v2931_v58, %v16654_v40  ;;  %v16660_v40 = vld [vmem:[#allocation231_spill] sm:$0xff] }
 0x413   : > { %7230 = vmatmul.msk.f32.gmra.mxu2 %vm3099_vm10, %v3061_v2  ;;  %v3062_v2 = vsel %vm3053_vm11, %v3029_v52, %v10158_v57  ;;  %v2997_v57 = vsel %vm2987_vm9, %v2964_v32, %v9925_v48  ;;  %v16656_v52 = vld [vmem:[#allocation133_spill] sm:$0xff]  ;;  %v16659_v48 = vld [vmem:[#allocation199_spill] sm:$0xff] }
 0x414   : > { %v10380_v33 = vpop.permute.xlu0 %2775  ;;  %v3030_v38 = vsel %vm3020_vm8, %v2997_v57, %v9999_v6  ;;  %v16661_v6 = vld [vmem:[#allocation204_spill] sm:$0xff]  ;;  %v16662_v57 = vld [vmem:[#allocation138_spill] sm:$0xff] }
 0x415   : > { %v3063_v41 = vsel %vm3053_vm11, %v3030_v38, %v10241_v18 }
 0x419   : > { %v10393_v0 = vpop.permute.xlu1 %2771  ;;  %v3350_v58 = vpop.permute.xlu2 %3349 }
 0x41b   : > { %7231 = vmatmul.msk.f32.gmra.mxu2 %vm3099_vm10, %v3062_v2  ;;  %v2833_v2 = vsel %vm422_vm0, %v16656_v52, %v16655_v39  ;;  %v2834_v39 = vsel %vm422_vm0, %v16662_v57, %v16661_v6  ;;  %v16663_v52 = vld [vmem:[#allocation275_spill] sm:$0xff]  ;;  %v16667_v6 = vld [vmem:[#allocation214_spill] sm:$0xff] }
 0x41c   : > { %v10400_v17 = vpop.permute.xlu0 %2781  ;;  %v2866_v10 = vsel %vm2855_vm4, %v2833_v2, %v16657_v45  ;;  %v16664_v2 = vld [vmem:[#allocation219_spill] sm:$0xff] }
 0x41d   : > { %16651 = vst [vmem:[#allocation139_spill] sm:$0xff] %v10400_v17  ;;  %v2899_v25 = vsel %vm2888_vm6, %v2866_v10, %v16659_v48  ;;  %v2867_v18 = vsel %vm2855_vm4, %v2834_v39, %v16664_v2  ;;  %v16668_v39 = vld [vmem:[#allocation279_spill] sm:$0xff]  ;;  %v16670_v2 = vld [vmem:[#allocation150_spill] sm:$0xff] }
 0x41e   : > { %v2932_v32 = vsel %vm2921_vm5, %v2899_v25, %v16660_v40  ;;  %v16666_v25 = vld [vmem:[#allocation218_spill] sm:$0xff] }
 0x41f   : > { %v2965_v45 = vsel %vm2954_vm7, %v2932_v32, %v16663_v52  ;;  %v2900_v40 = vsel %vm2888_vm6, %v2867_v18, %v16666_v25  ;;  %v3406_v52 = vrot.slane %v3344_v7, 7 }
 0x420   : > { %v2998_v38 = vsel %vm2987_vm9, %v2965_v45, %v9879_v63  ;;  %v2933_v57 = vsel %vm2921_vm5, %v2900_v40, %v16667_v6  ;;  %v16671_v40 = vld [vmem:[#allocation211_spill] sm:$0xff] }
 0x421   : > { %v10415_v19 = vpop.permute.xlu1 %2777  ;;  %v3031_v10 = vsel %vm3020_vm8, %v2998_v38, %v10039_v61  ;;  %v2966_v63 = vsel %vm2954_vm7, %v2933_v57, %v16668_v39  ;;  %v10450_v45 = vpop.permute.xlu2 %3355  ;;  %v16669_v61 = vld [vmem:[#allocation228_spill] sm:$0xff]  ;;  %v10464_v6 = vsel %vm665_vm1, %v3406_v52, 0.0  ;;  %v16672_v57 = vld [vmem:[#allocation234_spill] sm:$0xff] }
 0x422   : > { %v3064_v48 = vsel %vm3053_vm11, %v3031_v10, %v10289_v55  ;;  %v2835_v38 = vsel %vm422_vm0, %v16670_v2, %v16669_v61  ;;  %v2999_v55 = vsel %vm2987_vm9, %v2966_v63, %v9919_v12 }
 0x423   : > { %7232 = vmatmul.msk.f32.gmra.mxu2 %vm3099_vm10, %v3063_v41  ;;  %v3032_v18 = vsel %vm3020_vm8, %v2999_v55, %v10066_v43  ;;  %v2868_v7 = vsel %vm2855_vm4, %v2835_v38, %v16671_v40  ;;  %v3565_v38 = vrot.slane %v10464_v6, 1 }
 0x424   : > { %v10422_v23 = vpop.permute.xlu0 %7418  ;;  %v2901_v39 = vsel %vm2888_vm6, %v2868_v7, %v16672_v57 }
 0x425   : > { %16658 = vst [vmem:[#allocation124_spill] sm:$0xff] %v10422_v23 }
 0x429   : > { %v10439_v41 = vpop.permute.xlu1 %2783  ;;  %v10495_v5 = vpop.permute.xlu2 %3361 }
 0x42a   : > { %16665 = vst [vmem:[#allocation99_spill] sm:$0xff] %v10439_v41  ;;  %v16723_v41 = vld [vmem:[#allocation281_spill] sm:$0xff] }
 0x42b   : > { %7233 = vmatmul.msk.f32.gmra.mxu2 %vm3099_vm10, %v3064_v48  ;;  %v3065_v48 = vsel %vm3053_vm11, %v3032_v18, %v10180_v26  ;;  %v16675_v26 = vld [vmem:[#allocation239_spill] sm:$0xff] }
 0x42c   : > { %v3346_v32 = vpop.permute.xlu0 %3345  ;;  %v2934_v61 = vsel %vm2921_vm5, %v2901_v39, %v16675_v26  ;;  %v16679_v39 = vld [vmem:[#allocation208_spill] sm:$0xff] }
 0x42d   : > { %v3408_v55 = vrot.slane %v3346_v32, 7  ;;  %v16680_v26 = vld [vmem:[#allocation156_spill] sm:$0xff] }
 0x42e   : > { %v2836_v32 = vsel %vm422_vm0, %v16680_v26, %v16679_v39 }
 0x431   : > { %v3342_v10 = vpop.permute.xlu1 %3341 }
 0x432   : > { %v3405_v25 = vrot.slane %v3342_v10, 7 }
 0x433   : > { %7234 = vmatmul.msk.f32.gmra.mxu2 %vm3099_vm10, %v3065_v48  ;;  %v16676_v48 = vld [vmem:[#allocation271_spill] sm:$0xff] }
 0x434   : > { %v10470_v12 = vsel %vm665_vm1, %v3405_v25, %v3406_v52  ;;  %v10473_v43 = vsel %vm665_vm1, 0.0, %v3405_v25  ;;  %v3352_v63 = vpop.permute.xlu0 %3351  ;;  %v2967_v40 = vsel %vm2954_vm7, %v2934_v61, %v16676_v48  ;;  %v3411_v52 = vrot.slane %v3350_v58, 7  ;;  %v16681_v61 = vld [vmem:[#allocation227_spill] sm:$0xff] }
 0x435   : > { %16673 = vst [vmem:[#allocation134_spill] sm:$0xff] %v10470_v12  ;;  %v3562_v2 = vrot.slane %v10473_v43, 1  ;;  %v3412_v18 = vrot.slane %v3352_v63, 7  ;;  %v3563_v10 = vrot.slane %v10470_v12, 1  ;;  %v3000_v25 = vsel %vm2987_vm9, %v2967_v40, %v9937_v31 }
 0x436   : > { %16674 = vst [vmem:[#allocation130_spill] sm:$0xff] %v10473_v43  ;;  %v3033_v63 = vsel %vm3020_vm8, %v3000_v25, %v10011_v11  ;;  %v10509_v11 = vsel %vm665_vm1, 0.0, %v3408_v55  ;;  %v10512_v48 = vsel %vm665_vm1, 0.0, %v3411_v52 }
 0x437   : > { %v10485_v7 = vsel %vm864_vm2, %v3563_v10, %v3565_v38  ;;  %v10488_v57 = vsel %vm864_vm2, %v3562_v2, %v3563_v10  ;;  %v10498_v58 = vsel %vm665_vm1, %v3411_v52, %v3412_v18  ;;  %v2869_v2 = vsel %vm2855_vm4, %v2836_v32, %v16681_v61  ;;  %v16682_v32 = vld [vmem:[#allocation220_spill] sm:$0xff] }
 0x438   : > { %16677 = vst [vmem:[#allocation129_spill] sm:$0xff] %v10485_v7  ;;  %3726 = vrot.lane.b32.xlu1 %v10485_v7, %s16082_s24  ;;  %3724 = vrot.lane.b32.xlu0 %v10488_v57, %s16082_s24  ;;  %v3066_v38 = vsel %vm3053_vm11, %v3033_v63, %v10268_v34  ;;  %v3573_v26 = vrot.slane %v10498_v58, 1  ;;  %v2902_v34 = vsel %vm2888_vm6, %v2869_v2, %v16682_v32  ;;  %v3567_v52 = vrot.slane %v10509_v11, 1  ;;  %v16683_v61 = vld [vmem:[#allocation236_spill] sm:$0xff] }
 0x439   : > { %16678 = vst [vmem:[#allocation128_spill] sm:$0xff] %v10488_v57  ;;  %v3348_v31 = vpop.permute.xlu1 %3347  ;;  %v3572_v56 = vrot.slane %v10512_v48, 1  ;;  %v3415_v2 = vrot.slane %v10450_v45, 7  ;;  %v16689_v57 = vld [vmem:[#allocation243_spill] sm:$0xff] }
 0x43a   : > { %v3409_v10 = vrot.slane %v3348_v31, 7 }
 0x43b   : > { %7235 = vmatmul.msk.f32.gmra.mxu2 %vm3099_vm10, %v3066_v38  ;;  %v16684_v38 = vld [vmem:[#allocation182_spill] sm:$0xff] }
 0x43c   : > { %v10516_v40 = vsel %vm665_vm1, %v3408_v55, %v3409_v10  ;;  %v10519_v25 = vsel %vm665_vm1, %v3409_v10, 0.0  ;;  %v3358_v39 = vpop.permute.xlu0 %3357  ;;  %v2837_v55 = vsel %vm422_vm0, %v16684_v38, %v16683_v61  ;;  %v2935_v10 = vsel %vm2921_vm5, %v2902_v34, %v16685_v53  ;;  %v16690_v61 = vld [vmem:[#allocation174_spill] sm:$0xff] }
 0x43d   : > { %v3570_v63 = vrot.slane %v10519_v25, 1  ;;  %v3568_v31 = vrot.slane %v10516_v40, 1  ;;  %v2968_v4 = vsel %vm2954_vm7, %v2935_v10, %v16686_v27  ;;  %v2870_v7 = vsel %vm2855_vm4, %v2837_v55, %v16689_v57  ;;  %v16692_v34 = vld [vmem:[#allocation242_spill] sm:$0xff] }
 0x43e   : > { %v3001_v38 = vsel %vm2987_vm9, %v2968_v4, %v16690_v61  ;;  %v10547_v53 = vsel %vm665_vm1, %v3412_v18, 0.0  ;;  %v10552_v27 = vsel %vm864_vm2, %v3572_v56, %v3573_v26  ;;  %v10565_v56 = vsel %vm665_vm1, %v3415_v2, 0.0 }
 0x43f   : > { %v10537_v32 = vsel %vm864_vm2, %v3568_v31, %v3570_v63  ;;  %v10540_v22 = vsel %vm864_vm2, %v3567_v52, %v3568_v31  ;;  %16691 = vst [vmem:[#allocation147_spill] sm:$0xff] %v10552_v27  ;;  %v3034_v45 = vsel %vm3020_vm8, %v3001_v38, %v10051_v62  ;;  %v2903_v63 = vsel %vm2888_vm6, %v2870_v7, %v16692_v34  ;;  %v10567_v31 = vpop.permute.xlu2 %3367  ;;  %v16695_v7 = vld [vmem:[#allocation238_spill] sm:$0xff] }
 0x440   : > { %16687 = vst [vmem:[#allocation100_spill] sm:$0xff] %v10537_v32  ;;  %3728 = vrot.lane.b32.xlu2 %v10540_v22, %s16082_s24  ;;  %3730 = vrot.lane.b32.xlu0 %v10537_v32, %s16082_s24  ;;  %v3067_v4 = vsel %vm3053_vm11, %v3034_v45, %v10316_v44  ;;  %v3575_v62 = vrot.slane %v10547_v53, 1  ;;  %v2936_v38 = vsel %vm2921_vm5, %v2903_v63, %v16695_v7  ;;  %v3580_v45 = vrot.slane %v10565_v56, 1  ;;  %v16696_v32 = vld [vmem:[#allocation240_spill] sm:$0xff] }
 0x441   : > { %16688 = vst [vmem:[#allocation116_spill] sm:$0xff] %v10540_v22  ;;  %3732 = vrot.lane.b32.xlu1 %v10552_v27, %s16082_s24  ;;  %v3354_v57 = vpop.permute.xlu1 %3353  ;;  %v16698_v27 = vld [vmem:[#allocation282_spill] sm:$0xff]  ;;  %v3420_v22 = vrot.slane %v10495_v5, 7 }
 0x442   : > { %v3414_v18 = vrot.slane %v3354_v57, 7  ;;  %v3417_v57 = vrot.slane %v3358_v39, 7 }
 0x443   : > { %7236 = vmatmul.msk.f32.gmra.mxu2 %vm3099_vm10, %v3067_v4  ;;  %v16697_v4 = vld [vmem:[#allocation175_spill] sm:$0xff] }
 0x444   : > { %v10572_v52 = vsel %vm665_vm1, %v3414_v18, %v3415_v2  ;;  %v10575_v55 = vsel %vm665_vm1, 0.0, %v3414_v18  ;;  %v3364_v44 = vpop.permute.xlu0 %3363  ;;  %v2838_v2 = vsel %vm422_vm0, %v16697_v4, %v16696_v32  ;;  %v2969_v18 = vsel %vm2954_vm7, %v2936_v38, %v16698_v27  ;;  %v16705_v38 = vld [vmem:[#allocation252_spill] sm:$0xff] }
 0x445   : > { %16693 = vst [vmem:[#allocation155_spill] sm:$0xff] %v10572_v52  ;;  %v3421_v10 = vrot.slane %v3364_v44, 7  ;;  %v3577_v61 = vrot.slane %v10575_v55, 1  ;;  %v3578_v34 = vrot.slane %v10572_v52, 1  ;;  %v10589_v44 = vsel %vm864_vm2, %v3573_v26, %v3575_v62  ;;  %v16703_v26 = vld [vmem:[#allocation229_spill] sm:$0xff] }
 0x446   : > { %16694 = vst [vmem:[#allocation125_spill] sm:$0xff] %v10575_v55  ;;  %v3002_v63 = vsel %vm2987_vm9, %v2969_v18, %v9931_v13  ;;  %v2871_v27 = vsel %vm2855_vm4, %v2838_v2, %v16703_v26 }
 0x447   : > { %16699 = vst [vmem:[#allocation149_spill] sm:$0xff] %v10589_v44  ;;  %v10594_v7 = vsel %vm864_vm2, %v3577_v61, %v3578_v34  ;;  %v10599_v39 = vsel %vm864_vm2, %v3578_v34, %v3580_v45  ;;  %v3035_v32 = vsel %vm3020_vm8, %v3002_v63, %v10090_v30  ;;  %v10604_v5 = vsel %vm665_vm1, %v3420_v22, %v3421_v10  ;;  %v3374_v63 = vpop.permute.xlu2 %3373 }
 0x448   : > { %16700 = vst [vmem:[#allocation135_spill] sm:$0xff] %v10594_v7  ;;  %3734 = vrot.lane.b32.xlu2 %v10589_v44, %s16082_s24  ;;  %3736 = vrot.lane.b32.xlu0 %v10594_v7, %s16082_s24  ;;  %v3068_v62 = vsel %vm3053_vm11, %v3035_v32, %v10207_v36  ;;  %v10615_v61 = vsel %vm665_vm1, 0.0, %v3417_v57  ;;  %v2904_v45 = vsel %vm2888_vm6, %v2871_v27, %v16705_v38  ;;  %v10620_v34 = vsel %vm665_vm1, 0.0, %v3420_v22  ;;  %v16708_v22 = vld [vmem:[#allocation251_spill] sm:$0xff] }
 0x449   : > { %16701 = vst [vmem:[#allocation180_spill] sm:$0xff] %v10599_v39  ;;  %3738 = vrot.lane.b32.xlu1 %v10599_v39, %s16082_s24  ;;  %v3360_v13 = vpop.permute.xlu1 %3359  ;;  %v3588_v36 = vrot.slane %v10604_v5, 1  ;;  %v3582_v26 = vrot.slane %v10615_v61, 1  ;;  %v2937_v27 = vsel %vm2921_vm5, %v2904_v45, %v16708_v22  ;;  %v10648_v23 = vsel %vm665_vm1, %v3421_v10, 0.0  ;;  %v16713_v22 = vld [vmem:[#allocation235_spill] sm:$0xff]  ;;  %v16715_v10 = vld [vmem:[#allocation248_spill] sm:$0xff] }
 0x44a   : > { %16702 = vst [vmem:[#allocation146_spill] sm:$0xff] %v10604_v5  ;;  %v3418_v30 = vrot.slane %v3360_v13, 7 }
 0x44b   : > { %16704 = vst [vmem:[#allocation164_spill] sm:$0xff] %v10615_v61  ;;  %7237 = vmatmul.msk.f32.gmra.mxu2 %vm3099_vm10, %v3068_v62  ;;  %v3587_v62 = vrot.slane %v10620_v34, 1 }
 0x44c   : > { %16706 = vst [vmem:[#allocation163_spill] sm:$0xff] %v10620_v34  ;;  %v10624_v4 = vsel %vm665_vm1, %v3417_v57, %v3418_v30  ;;  %v10627_v2 = vsel %vm665_vm1, %v3418_v30, 0.0  ;;  %v3370_v18 = vpop.permute.xlu0 %3369  ;;  %v16709_v57 = vld [vmem:[#allocation272_spill] sm:$0xff]  ;;  %v3424_v30 = vrot.slane %v10567_v31, 7  ;;  %v16714_v31 = vld [vmem:[#allocation193_spill] sm:$0xff] }
 0x44d   : > { %16707 = vst [vmem:[#allocation158_spill] sm:$0xff] %v10624_v4  ;;  %v3585_v32 = vrot.slane %v10627_v2, 1  ;;  %v3583_v13 = vrot.slane %v10624_v4, 1  ;;  %v2970_v38 = vsel %vm2954_vm7, %v2937_v27, %v16709_v57  ;;  %v10653_v45 = vsel %vm864_vm2, %v3587_v62, %v3588_v36 }
 0x44e   : > { %v3003_v44 = vsel %vm2987_vm9, %v2970_v38, %v9949_v24  ;;  %16712 = vst [vmem:[#allocation154_spill] sm:$0xff] %v10653_v45  ;;  %v10669_v57 = vsel %vm665_vm1, %v3424_v30, 0.0  ;;  %v3590_v38 = vrot.slane %v10648_v23, 1 }
 0x44f   : > { %v10640_v7 = vsel %vm864_vm2, %v3583_v13, %v3585_v32  ;;  %v10643_v39 = vsel %vm864_vm2, %v3582_v26, %v3583_v13  ;;  %v2839_v32 = vsel %vm422_vm0, %v16714_v31, %v16713_v22  ;;  %v3036_v13 = vsel %vm3020_vm8, %v3003_v44, %v10023_v21  ;;  %v16718_v31 = vld [vmem:[#allocation245_spill] sm:$0xff] }
 0x450   : > { %16710 = vst [vmem:[#allocation177_spill] sm:$0xff] %v10640_v7  ;;  %3740 = vrot.lane.b32.xlu2 %v10643_v39, %s16082_s24  ;;  %3742 = vrot.lane.b32.xlu0 %v10640_v7, %s16082_s24  ;;  %v2872_v26 = vsel %vm2855_vm4, %v2839_v32, %v16715_v10  ;;  %v3069_v27 = vsel %vm3053_vm11, %v3036_v13, %v10297_v37  ;;  %v16719_v32 = vld [vmem:[#allocation192_spill] sm:$0xff]  ;;  %v16720_v37 = vld [vmem:[#allocation241_spill] sm:$0xff] }
 0x451   : > { %16711 = vst [vmem:[#allocation107_spill] sm:$0xff] %v10643_v39  ;;  %3744 = vrot.lane.b32.xlu1 %v10653_v45, %s16082_s24  ;;  %v3366_v24 = vpop.permute.xlu1 %3365  ;;  %v2840_v10 = vsel %vm422_vm0, %v16719_v32, %v16718_v31  ;;  %v2905_v13 = vsel %vm2888_vm6, %v2872_v26, %v16720_v37  ;;  %v16721_v7 = vld [vmem:[#allocation261_spill] sm:$0xff]  ;;  %v3380_v31 = vpop.permute.xlu2 %3379  ;;  %v3426_v32 = vrot.slane %v3370_v18, 7  ;;  %v10694_v26 = vsel %vm864_vm2, %v3588_v36, %v3590_v38 }
 0x452   : > { %v3423_v62 = vrot.slane %v3366_v24, 7  ;;  %v2938_v45 = vsel %vm2921_vm5, %v2905_v13, %v16721_v7  ;;  %16724 = vst [vmem:[#allocation266_spill] sm:$0xff] %v10694_v26  ;;  %v3429_v7 = vrot.slane %v3374_v63, 7  ;;  %v16728_v63 = vld [vmem:[#allocation254_spill] sm:$0xff]  ;;  %v16730_v38 = vld [vmem:[#allocation205_spill] sm:$0xff] }
 0x453   : > { %7238 = vmatmul.msk.f32.gmra.mxu2 %vm3099_vm10, %v3069_v27  ;;  %v3595_v27 = vrot.slane %v10669_v57, 1  ;;  %v2971_v17 = vsel %vm2954_vm7, %v2938_v45, %v16723_v41  ;;  %v16729_v45 = vld [vmem:[#allocation258_spill] sm:$0xff] }
 0x454   : > { %v10674_v21 = vsel %vm665_vm1, %v3423_v62, %v3424_v30  ;;  %v10677_v44 = vsel %vm665_vm1, 0.0, %v3423_v62  ;;  %v3376_v22 = vpop.permute.xlu0 %3375  ;;  %v16722_v62 = vld [vmem:[#allocation255_spill] sm:$0xff]  ;;  %v3004_v37 = vsel %vm2987_vm9, %v2971_v17, %v9903_v49 }
 0x455   : > { %16716 = vst [vmem:[#allocation184_spill] sm:$0xff] %v10674_v21  ;;  %v3592_v24 = vrot.slane %v10677_v44, 1  ;;  %v3430_v30 = vrot.slane %v3376_v22, 7  ;;  %v3593_v39 = vrot.slane %v10674_v21, 1  ;;  %v2873_v1 = vsel %vm2855_vm4, %v2840_v10, %v16722_v62 }
 0x456   : > { %16717 = vst [vmem:[#allocation190_spill] sm:$0xff] %v10677_v44  ;;  %v3037_v41 = vsel %vm3020_vm8, %v3004_v37, %v10075_v14  ;;  %v2841_v14 = vsel %vm422_vm0, %v16730_v38, %v16729_v45  ;;  %v10723_v10 = vsel %vm665_vm1, 0.0, %v3426_v32 }
 0x457   : > { %v10699_v13 = vsel %vm864_vm2, %v3592_v24, %v3593_v39  ;;  %v10704_v22 = vsel %vm864_vm2, %v3593_v39, %v3595_v27  ;;  %v3070_v17 = vsel %vm3053_vm11, %v3037_v41, %v10346_v50  ;;  %v10715_v18 = vsel %vm665_vm1, %v3429_v7, %v3430_v30  ;;  %16731 = vst [vmem:[#allocation165_spill] sm:$0xff] %v10723_v10  ;;  %v16734_v41 = vld [vmem:[#allocation247_spill] sm:$0xff] }
 0x458   : > { %16725 = vst [vmem:[#allocation148_spill] sm:$0xff] %v10699_v13  ;;  %3746 = vrot.lane.b32.xlu2 %v10694_v26, %s16082_s24  ;;  %3748 = vrot.lane.b32.xlu0 %v10699_v13, %s16082_s24  ;;  %v2906_v39 = vsel %vm2888_vm6, %v2873_v1, %v16728_v63  ;;  %v10727_v24 = vsel %vm665_vm1, 0.0, %v3429_v7  ;;  %v3603_v37 = vrot.slane %v10715_v18, 1  ;;  %v16735_v63 = vld [vmem:[#allocation250_spill] sm:$0xff]  ;;  %v3597_v45 = vrot.slane %v10723_v10, 1 }
 0x459   : > { %16726 = vst [vmem:[#allocation112_spill] sm:$0xff] %v10704_v22  ;;  %3750 = vrot.lane.b32.xlu1 %v10704_v22, %s16082_s24  ;;  %v3372_v49 = vpop.permute.xlu1 %3371  ;;  %v3602_v13 = vrot.slane %v10727_v24, 1  ;;  %v3386_v10 = vpop.permute.xlu2 %3385 }
 0x45a   : > { %16727 = vst [vmem:[#allocation173_spill] sm:$0xff] %v10715_v18  ;;  %v3427_v36 = vrot.slane %v3372_v49, 7  ;;  %v2874_v49 = vsel %vm2855_vm4, %v2841_v14, %v16734_v41 }
 0x45b   : > { %7239 = vmatmul.msk.f32.gmra.mxu2 %vm3099_vm10, %v3070_v17  ;;  %16732 = vst [vmem:[#allocation202_spill] sm:$0xff] %v10727_v24  ;;  %v2939_v17 = vsel %vm2921_vm5, %v2906_v39, %v16735_v63  ;;  %v16739_v39 = vld [vmem:[#allocation143_spill] sm:$0xff] }
 0x45c   : > { %v10730_v50 = vsel %vm665_vm1, %v3426_v32, %v3427_v36  ;;  %v10733_v27 = vsel %vm665_vm1, %v3427_v36, 0.0  ;;  %v3382_v62 = vpop.permute.xlu0 %3381  ;;  %v16736_v32 = vld [vmem:[#allocation105_spill] sm:$0xff]  ;;  %v3433_v36 = vrot.slane %v3380_v31, 7  ;;  %v2907_v41 = vsel %vm2888_vm6, %v2874_v49, %v16739_v39 }
 0x45d   : > { %16733 = vst [vmem:[#allocation187_spill] sm:$0xff] %v10730_v50  ;;  %v3600_v1 = vrot.slane %v10733_v27, 1  ;;  %v3598_v7 = vrot.slane %v10730_v50, 1  ;;  %v2972_v38 = vsel %vm2954_vm7, %v2939_v17, %v16736_v32  ;;  %v10759_v31 = vsel %vm665_vm1, %v3430_v30, 0.0  ;;  %v16742_v30 = vld [vmem:[#allocation206_spill] sm:$0xff] }
 0x45e   : > { %v3005_v22 = vsel %vm2987_vm9, %v2972_v38, %v9943_v20  ;;  %v10766_v20 = vsel %vm864_vm2, %v3602_v13, %v3603_v37  ;;  %v3605_v32 = vrot.slane %v10759_v31, 1 }
 0x45f   : > { %v10749_v26 = vsel %vm864_vm2, %v3598_v7, %v3600_v1  ;;  %v10752_v14 = vsel %vm864_vm2, %v3597_v45, %v3598_v7  ;;  %v3038_v63 = vsel %vm3020_vm8, %v3005_v22, %v10108_v9  ;;  %16740 = vst [vmem:[#allocation198_spill] sm:$0xff] %v10766_v20  ;;  %v16741_v22 = vld [vmem:[#allocation244_spill] sm:$0xff]  ;;  %v10776_v7 = vsel %vm665_vm1, %v3433_v36, 0.0  ;;  %v16743_v45 = vld [vmem:[#allocation141_spill] sm:$0xff] }
 0x460   : > { %16737 = vst [vmem:[#allocation123_spill] sm:$0xff] %v10749_v26  ;;  %3754 = vrot.lane.b32.xlu0 %v10749_v26, %s16082_s24  ;;  %3752 = vrot.lane.b32.xlu2 %v10752_v14, %s16082_s24  ;;  %v3071_v49 = vsel %vm3053_vm11, %v3038_v63, %v10232_v60  ;;  %v2842_v17 = vsel %vm422_vm0, %v16742_v30, %v16741_v22  ;;  %v16746_v63 = vld [vmem:[#allocation257_spill] sm:$0xff]  ;;  %v16747_v22 = vld [vmem:[#allocation274_spill] sm:$0xff]  ;;  %v3610_v26 = vrot.slane %v10776_v7, 1 }
 0x461   : > { %16738 = vst [vmem:[#allocation273_spill] sm:$0xff] %v10752_v14  ;;  %v3378_v1 = vpop.permute.xlu1 %3377  ;;  %3756 = vrot.lane.b32.xlu1 %v10766_v20, %s16082_s24  ;;  %v2940_v13 = vsel %vm2921_vm5, %v2907_v41, %v16743_v45  ;;  %v3435_v41 = vrot.slane %v3382_v62, 7 }
 0x462   : > { %v3432_v9 = vrot.slane %v3378_v1, 7  ;;  %v2875_v1 = vsel %vm2855_vm4, %v2842_v17, %v16746_v63  ;;  %v2973_v30 = vsel %vm2954_vm7, %v2940_v13, %v16747_v22  ;;  %v10801_v17 = vsel %vm864_vm2, %v3603_v37, %v3605_v32  ;;  %v16751_v63 = vld [vmem:[#allocation120_spill] sm:$0xff]  ;;  %v16754_v32 = vld [vmem:[#allocation161_spill] sm:$0xff] }
 0x463   : > { %7240 = vmatmul.msk.f32.gmra.mxu2 %vm3099_vm10, %v3071_v49  ;;  %16749 = vst [vmem:[#allocation276_spill] sm:$0xff] %v10801_v17  ;;  %v2908_v22 = vsel %vm2888_vm6, %v2875_v1, %v16751_v63  ;;  %v10817_v37 = vsel %vm665_vm1, 0.0, %v3435_v41 }
 0x464   : > { %v10783_v60 = vsel %vm665_vm1, %v3432_v9, %v3433_v36  ;;  %v10786_v38 = vsel %vm665_vm1, 0.0, %v3432_v9  ;;  %v3388_v39 = vpop.permute.xlu0 %3387  ;;  %v3006_v36 = vsel %vm2987_vm9, %v2973_v30, %v9961_v46  ;;  %v3438_v9 = vrot.slane %v3386_v10, 7  ;;  %16752 = vst [vmem:[#allocation118_spill] sm:$0xff] %v10817_v37 }
 0x465   : > { %16744 = vst [vmem:[#allocation131_spill] sm:$0xff] %v10783_v60  ;;  %v3607_v49 = vrot.slane %v10786_v38, 1  ;;  %v3439_v45 = vrot.slane %v3388_v39, 7  ;;  %v3608_v20 = vrot.slane %v10783_v60, 1  ;;  %v3039_v62 = vsel %vm3020_vm8, %v3006_v36, %v10035_v16 }
 0x466   : > { %16745 = vst [vmem:[#allocation196_spill] sm:$0xff] %v10786_v38  ;;  %v3072_v10 = vsel %vm3053_vm11, %v3039_v62, %v10325_v47  ;;  %v2941_v39 = vsel %vm2921_vm5, %v2908_v22, %v16754_v32  ;;  %v10828_v1 = vsel %vm665_vm1, 0.0, %v3438_v9  ;;  %v3612_v62 = vrot.slane %v10817_v37, 1 }
 0x467   : > { %v10798_v14 = vsel %vm864_vm2, %v3607_v49, %v3608_v20  ;;  %v10804_v13 = vsel %vm864_vm2, %v3608_v20, %v3610_v26  ;;  %v10820_v26 = vsel %vm665_vm1, %v3438_v9, %v3439_v45  ;;  %v3392_v20 = vpop.permute.xlu2 %3391  ;;  %16755 = vst [vmem:[#allocation210_spill] sm:$0xff] %v10828_v1 }
 0x468   : > { %16748 = vst [vmem:[#allocation195_spill] sm:$0xff] %v10798_v14  ;;  %3760 = vrot.lane.b32.xlu0 %v10798_v14, %s16082_s24  ;;  %3758 = vrot.lane.b32.xlu2 %v10801_v17, %s16082_s24  ;;  %v3442_v9 = vrot.slane %v3392_v20, 7  ;;  %v16761_v17 = vld [vmem:[#allocation103_spill] sm:$0xff]  ;;  %v10857_v20 = vsel %vm665_vm1, %v3439_v45, 0.0 }
 0x469   : > { %16750 = vst [vmem:[#allocation194_spill] sm:$0xff] %v10804_v13  ;;  %v3384_v46 = vpop.permute.xlu1 %3383  ;;  %3762 = vrot.lane.b32.xlu1 %v10804_v13, %s16082_s24  ;;  %v16760_v13 = vld [vmem:[#allocation137_spill] sm:$0xff] }
 0x46a   : > { %16753 = vst [vmem:[#allocation178_spill] sm:$0xff] %v10820_v26  ;;  %v3436_v16 = vrot.slane %v3384_v46, 7  ;;  %v3618_v46 = vrot.slane %v10820_v26, 1  ;;  %v2843_v37 = vsel %vm422_vm0, %v16761_v17, %v16760_v13  ;;  %v10875_v13 = vsel %vm665_vm1, %v3442_v9, 0.0 }
 0x46b   : > { %7241 = vmatmul.msk.f32.gmra.mxu2 %vm3099_vm10, %v3072_v10  ;;  %v16757_v10 = vld [vmem:[#allocation284_spill] sm:$0xff]  ;;  %16762 = vst [vmem:[#allocation133_spill] sm:$0xff] %v10857_v20 }
 0x46c   : > { %v10831_v47 = vsel %vm665_vm1, %v3435_v41, %v3436_v16  ;;  %v10834_v30 = vsel %vm665_vm1, %v3436_v16, 0.0  ;;  %v3394_v49 = vpop.permute.xlu0 %3393  ;;  %v2974_v22 = vsel %vm2954_vm7, %v2941_v39, %v16757_v10  ;;  %v3617_v16 = vrot.slane %v10828_v1, 1 }
 0x46d   : > { %16756 = vst [vmem:[#allocation212_spill] sm:$0xff] %v10831_v47  ;;  %v3615_v36 = vrot.slane %v10834_v30, 1  ;;  %v3613_v63 = vrot.slane %v10831_v47, 1  ;;  %v3007_v14 = vsel %vm2987_vm9, %v2974_v22, %v9915_v29 }
 0x46e   : > { %v3040_v26 = vsel %vm3020_vm8, %v3007_v14, %v10099_v54  ;;  %v10864_v39 = vsel %vm864_vm2, %v3617_v16, %v3618_v46  ;;  %v16765_v14 = vld [vmem:[#allocation159_spill] sm:$0xff] }
 0x46f   : > { %v10843_v32 = vsel %vm864_vm2, %v3613_v63, %v3615_v36  ;;  %v10846_v41 = vsel %vm864_vm2, %v3612_v62, %v3613_v63  ;;  %16763 = vst [vmem:[#allocation209_spill] sm:$0xff] %v10864_v39  ;;  %v16764_v36 = vld [vmem:[#allocation157_spill] sm:$0xff]  ;;  %v3073_v17 = vsel %vm3053_vm11, %v3040_v26, %v10374_v42  ;;  %v3620_v62 = vrot.slane %v10857_v20, 1  ;;  %v3398_v26 = vpop.permute.xlu2 %3397 }
 0x470   : > { %16758 = vst [vmem:[#allocation269_spill] sm:$0xff] %v10843_v32  ;;  %3766 = vrot.lane.b32.xlu0 %v10843_v32, %s16082_s24  ;;  %3764 = vrot.lane.b32.xlu2 %v10846_v41, %s16082_s24  ;;  %v2876_v63 = vsel %vm2855_vm4, %v2843_v37, %v16764_v36  ;;  %v16769_v32 = vld [vmem:[#allocation153_spill] sm:$0xff] }
 0x471   : > { %16759 = vst [vmem:[#allocation189_spill] sm:$0xff] %v10846_v41  ;;  %v3390_v29 = vpop.permute.xlu1 %3389  ;;  %3768 = vrot.lane.b32.xlu1 %v10864_v39, %s16082_s24  ;;  %v2909_v45 = vsel %vm2888_vm6, %v2876_v63, %v16765_v14  ;;  %v3625_v63 = vrot.slane %v10875_v13, 1  ;;  %v16770_v39 = vld [vmem:[#allocation102_spill] sm:$0xff]  ;;  %v16771_v41 = vld [vmem:[#allocation113_spill] sm:$0xff] }
 0x472   : > { %v3441_v54 = vrot.slane %v3390_v29, 7  ;;  %v16768_v29 = vld [vmem:[#allocation144_spill] sm:$0xff] }
 0x473   : > { %7242 = vmatmul.msk.f32.gmra.mxu2 %vm3099_vm10, %v3073_v17  ;;  %v2942_v36 = vsel %vm2921_vm5, %v2909_v45, %v16768_v29  ;;  %v3444_v17 = vrot.slane %v3394_v49, 7  ;;  %v10901_v45 = vsel %vm864_vm2, %v3618_v46, %v3620_v62 }
 0x474   : > { %v10880_v10 = vsel %vm665_vm1, %v3441_v54, %v3442_v9  ;;  %v10883_v37 = vsel %vm665_vm1, 0.0, %v3441_v54  ;;  %v3400_v42 = vpop.permute.xlu0 %3399  ;;  %v2844_v9 = vsel %vm422_vm0, %v16770_v39, %v16769_v32  ;;  %v2975_v54 = vsel %vm2954_vm7, %v2942_v36, %v16771_v41  ;;  %16773 = vst [vmem:[#allocation138_spill] sm:$0xff] %v10901_v45  ;;  %v16777_v39 = vld [vmem:[#allocation122_spill] sm:$0xff] }
 0x475   : > { %16766 = vst [vmem:[#allocation199_spill] sm:$0xff] %v10880_v10  ;;  %v3622_v22 = vrot.slane %v10883_v37, 1  ;;  %v3623_v16 = vrot.slane %v10880_v10, 1  ;;  %v3448_v14 = vrot.slane %v3400_v42, 7  ;;  %v3008_v10 = vsel %vm2987_vm9, %v2975_v54, %v9955_v15  ;;  %v16781_v54 = vld [vmem:[#allocation260_spill] sm:$0xff] }
 0x476   : > { %16767 = vst [vmem:[#allocation231_spill] sm:$0xff] %v10883_v37  ;;  %v3447_v37 = vrot.slane %v3398_v26, 7  ;;  %v3041_v42 = vsel %vm3020_vm8, %v3008_v10, %v10120_v35  ;;  %v10915_v41 = vsel %vm665_vm1, 0.0, %v3444_v17  ;;  %v2877_v62 = vsel %vm2855_vm4, %v2844_v9, %v16777_v39  ;;  %v16778_v10 = vld [vmem:[#allocation167_spill] sm:$0xff] }
 0x477   : > { %v10896_v20 = vsel %vm864_vm2, %v3622_v22, %v3623_v16  ;;  %v10904_v49 = vsel %vm864_vm2, %v3623_v16, %v3625_v63  ;;  %v3074_v15 = vsel %vm3053_vm11, %v3041_v42, %v10265_v59  ;;  %16775 = vst [vmem:[#allocation219_spill] sm:$0xff] %v10915_v41  ;;  %v2910_v26 = vsel %vm2888_vm6, %v2877_v62, %v16778_v10  ;;  %v16785_v39 = vld [vmem:[#allocation111_spill] sm:$0xff]  ;;  %v16786_v10 = vld [vmem:[#allocation140_spill] sm:$0xff] }
 0x478   : > { %16772 = vst [vmem:[#allocation204_spill] sm:$0xff] %v10896_v20  ;;  %3772 = vrot.lane.b32.xlu0 %v10896_v20, %s16082_s24  ;;  %3770 = vrot.lane.b32.xlu2 %v10901_v45, %s16082_s24  ;;  %v10918_v46 = vsel %vm665_vm1, %v3447_v37, %v3448_v14  ;;  %v10928_v59 = vsel %vm665_vm1, 0.0, %v3447_v37  ;;  %v3627_v63 = vrot.slane %v10915_v41, 1  ;;  %v2943_v42 = vsel %vm2921_vm5, %v2910_v26, %v16781_v54  ;;  %v16787_v20 = vld [vmem:[#allocation109_spill] sm:$0xff]  ;;  %v16788_v45 = vld [vmem:[#allocation291_spill] sm:$0xff] }
 0x479   : > { %16774 = vst [vmem:[#allocation275_spill] sm:$0xff] %v10904_v49  ;;  %v3396_v32 = vpop.permute.xlu1 %3395  ;;  %3774 = vrot.lane.b32.xlu1 %v10904_v49, %s16082_s24  ;;  %v3633_v9 = vrot.slane %v10918_v46, 1  ;;  %v2845_v49 = vsel %vm422_vm0, %v16787_v20, %v16786_v10  ;;  %v10959_v54 = vsel %vm665_vm1, %v3448_v14, 0.0  ;;  %v3637_v14 = vrot.slane %v10473_v43, 2  ;;  %v16794_v10 = vld [vmem:[#allocation197_spill] sm:$0xff] }
 0x47a   : > { %16776 = vst [vmem:[#allocation218_spill] sm:$0xff] %v10918_v46  ;;  %v3445_v35 = vrot.slane %v3396_v32, 7  ;;  %v16782_v32 = vld [vmem:[#allocation277_spill] sm:$0xff] }
 0x47b   : > { %7243 = vmatmul.msk.f32.gmra.mxu2 %vm3099_vm10, %v3074_v15  ;;  %16779 = vst [vmem:[#allocation214_spill] sm:$0xff] %v10928_v59  ;;  %v2976_v37 = vsel %vm2954_vm7, %v2943_v42, %v16782_v32  ;;  %v3638_v42 = vrot.slane %v10470_v12, 2  ;;  %v16791_v32 = vld [vmem:[#allocation162_spill] sm:$0xff] }
 0x47c   : > { %v10931_v22 = vsel %vm665_vm1, %v3444_v17, %v3445_v35  ;;  %v10934_v16 = vsel %vm665_vm1, %v3445_v35, 0.0  ;;  %v3632_v35 = vrot.slane %v10928_v59, 1  ;;  %v3009_v62 = vsel %vm2987_vm9, %v2976_v37, %v16785_v39  ;;  %v16793_v39 = vld [vmem:[#allocation286_spill] sm:$0xff] }
 0x47d   : > { %16780 = vst [vmem:[#allocation279_spill] sm:$0xff] %v10931_v22  ;;  %v3630_v29 = vrot.slane %v10934_v16, 1  ;;  %v3628_v36 = vrot.slane %v10931_v22, 1  ;;  %v3042_v26 = vsel %vm3020_vm8, %v3009_v62, %v16788_v45  ;;  %v3635_v45 = vrot.slane %v10959_v54, 1 }
 0x47e   : > { %v3075_v20 = vsel %vm3053_vm11, %v3042_v26, %v10353_v8  ;;  %v3640_v62 = vrot.slane %v10464_v6, 2 }
 0x47f   : > { %v10945_v17 = vsel %vm864_vm2, %v3628_v36, %v3630_v29  ;;  %v10948_v15 = vsel %vm864_vm2, %v3627_v63, %v3628_v36  ;;  %v10966_v29 = vsel %vm864_vm2, %v3632_v35, %v3633_v9  ;;  %v16790_v36 = vld [vmem:[#allocation169_spill] sm:$0xff]  ;;  %v16792_v35 = vld [vmem:[#allocation263_spill] sm:$0xff] }
 0x480   : > { %16783 = vst [vmem:[#allocation228_spill] sm:$0xff] %v10945_v17  ;;  %3778 = vrot.lane.b32.xlu0 %v10945_v17, %s16082_s24  ;;  %3776 = vrot.lane.b32.xlu2 %v10948_v15, %s16082_s24  ;;  %v2878_v63 = vsel %vm2855_vm4, %v2845_v49, %v16790_v36  ;;  %v10988_v36 = vsel %vm1009_vm3, %v3637_v14, %v3638_v42  ;;  %v16797_v14 = vld [vmem:[#allocation108_spill] sm:$0xff] }
 0x481   : > { %16784 = vst [vmem:[#allocation150_spill] sm:$0xff] %v10948_v15  ;;  %3780 = vrot.lane.b32.xlu1 %v10966_v29, %s16082_s24  ;;  %v2911_v37 = vsel %vm2888_vm6, %v2878_v63, %v16791_v32  ;;  %v11000_v6 = vsel %vm1009_vm3, %v3638_v42, %v3640_v62  ;;  %v3643_v42 = vrot.slane %v10516_v40, 2 }
 0x482   : > { %16789 = vst [vmem:[#allocation211_spill] sm:$0xff] %v10966_v29  ;;  %v2944_v49 = vsel %vm2921_vm5, %v2911_v37, %v16792_v35  ;;  %v16795_v29 = vld [vmem:[#allocation295_spill] sm:$0xff]  ;;  %v3645_v35 = vrot.slane %v10519_v25, 2  ;;  %v16803_v25 = vld [vmem:[#allocation104_spill] sm:$0xff] }
 0x483   : > { %7244 = vmatmul.msk.f32.gmra.mxu2 %vm3099_vm10, %v3075_v20  ;;  %v2977_v8 = vsel %vm2954_vm7, %v2944_v49, %v16793_v39  ;;  %v10991_v20 = vsel %vm864_vm2, %v3633_v9, %v3635_v45  ;;  %v16796_v9 = vld [vmem:[#allocation166_spill] sm:$0xff]  ;;  %v16799_v49 = vld [vmem:[#allocation179_spill] sm:$0xff] }
 0x484   : > { %v3010_v26 = vsel %vm2987_vm9, %v2977_v8, %v16794_v10  ;;  %v2846_v45 = vsel %vm422_vm0, %v16797_v14, %v16796_v9  ;;  %v16800_v8 = vld [vmem:[#allocation253_spill] sm:$0xff]  ;;  %v11019_v10 = vpop.f32.mrf.mxu2  ;;  %v3647_v9 = vrot.slane %v10512_v48, 2 }
 0x485   : > { %v3043_v63 = vsel %vm3020_vm8, %v3010_v26, %v16795_v29  ;;  %v16798_v29 = vld [vmem:[#allocation171_spill] sm:$0xff]  ;;  %16801 = vst [vmem:[#allocation234_spill] sm:$0xff] %v11019_v10  ;;  %v3642_v26 = vrot.slane %v10509_v11, 2 }
 0x486   : > { %v3076_v32 = vsel %vm3053_vm11, %v3043_v63, %v10393_v0  ;;  %v2879_v37 = vsel %vm2855_vm4, %v2846_v45, %v16798_v29  ;;  %v3648_v0 = vrot.slane %v10498_v58, 2  ;;  %v16802_v63 = vld [vmem:[#allocation117_spill] sm:$0xff]  ;;  %v11028_v45 = vsel %vm1009_vm3, %v3643_v42, %v3645_v35 }
 0x487   : > { %v2912_v39 = vsel %vm2888_vm6, %v2879_v37, %v16799_v49  ;;  %16804 = vst [vmem:[#allocation239_spill] sm:$0xff] %v11028_v45  ;;  %v11031_v29 = vsel %vm1009_vm3, %v3642_v26, %v3643_v42  ;;  %v16805_v37 = vld [vmem:[#allocation188_spill] sm:$0xff]  ;;  %v16806_v49 = vld [vmem:[#allocation115_spill] sm:$0xff]  ;;  %v11047_v42 = vpop.permute.xlu2 %3403 }
 0x488   : > { %3814 = vrot.lane.b32.xlu0 %v10988_v36, %s8054_s22  ;;  %3782 = vrot.lane.b32.xlu2 %v10991_v20, %s16082_s24  ;;  %v2945_v62 = vsel %vm2921_vm5, %v2912_v39, %v16800_v8  ;;  %v2847_v39 = vsel %vm422_vm0, %v16806_v49, %v16805_v37  ;;  %v16807_v8 = vld [vmem:[#allocation96_spill] sm:$0xff] }
 0x489   : > { %3816 = vrot.lane.b32.xlu1 %v11000_v6, %s8054_s22  ;;  %v16809_v26 = vld [vmem:[#allocation172_spill] sm:$0xff] }
 0x48b   : > { %7245 = vmatmul.msk.f32.gmra.mxu2 %vm3099_vm10, %v3076_v32  ;;  %v2978_v32 = vsel %vm2954_vm7, %v2945_v62, %v16802_v63  ;;  %v11043_v62 = vsel %vm1009_vm3, %v3647_v9, %v3648_v0  ;;  %v2880_v63 = vsel %vm2855_vm4, %v2847_v39, %v16809_v26  ;;  %v3653_v9 = vrot.slane %v10572_v52, 2  ;;  %v16814_v39 = vld [vmem:[#allocation287_spill] sm:$0xff] }
 0x48c   : > { %v3011_v14 = vsel %vm2987_vm9, %v2978_v32, %v16803_v25  ;;  %16808 = vst [vmem:[#allocation271_spill] sm:$0xff] %v11043_v62  ;;  %v3650_v32 = vrot.slane %v10547_v53, 2  ;;  %v3652_v25 = vrot.slane %v10575_v55, 2  ;;  %v11061_v49 = vpop.f32.mrf.mxu2 }
 0x48d   : > { %v3044_v10 = vsel %vm3020_vm8, %v3011_v14, %v16807_v8  ;;  %v16810_v14 = vld [vmem:[#allocation207_spill] sm:$0xff]  ;;  %16812 = vst [vmem:[#allocation208_spill] sm:$0xff] %v11061_v49  ;;  %v16813_v8 = vld [vmem:[#allocation280_spill] sm:$0xff] }
 0x48e   : > { %v3077_v35 = vsel %vm3053_vm11, %v3044_v10, %v10299_v28  ;;  %v2913_v37 = vsel %vm2888_vm6, %v2880_v63, %v16810_v14  ;;  %v16811_v28 = vld [vmem:[#allocation262_spill] sm:$0xff]  ;;  %v11069_v26 = vsel %vm1009_vm3, %v3652_v25, %v3653_v9  ;;  %v16816_v63 = vld [vmem:[#allocation168_spill] sm:$0xff]  ;;  %v16817_v14 = vld [vmem:[#allocation119_spill] sm:$0xff] }
 0x48f   : > { %v2946_v10 = vsel %vm2921_vm5, %v2913_v37, %v16811_v28  ;;  %16815 = vst [vmem:[#allocation156_spill] sm:$0xff] %v11069_v26  ;;  %v2848_v37 = vsel %vm422_vm0, %v16817_v14, %v16816_v63  ;;  %v16818_v28 = vld [vmem:[#allocation292_spill] sm:$0xff]  ;;  %v16820_v25 = vld [vmem:[#allocation183_spill] sm:$0xff] }
 0x490   : > { %3820 = vrot.lane.b32.xlu0 %v11028_v45, %s8054_s22  ;;  %3818 = vrot.lane.b32.xlu2 %v11031_v29, %s8054_s22  ;;  %v11072_v45 = vsel %vm1009_vm3, %v3648_v0, %v3650_v32  ;;  %v2881_v0 = vsel %vm2855_vm4, %v2848_v37, %v16820_v25  ;;  %v3662_v37 = vrot.slane %v10620_v34, 2 }
 0x491   : > { %3822 = vrot.lane.b32.xlu1 %v11043_v62, %s8054_s22  ;;  %v3655_v62 = vrot.slane %v10565_v56, 2 }
 0x493   : > { %7246 = vmatmul.msk.f32.gmra.mxu2 %vm3099_vm10, %v3077_v35  ;;  %v2979_v35 = vsel %vm2954_vm7, %v2946_v10, %v16813_v8  ;;  %v11084_v56 = vsel %vm1009_vm3, %v3653_v9, %v3655_v62  ;;  %v3660_v8 = vrot.slane %v10627_v2, 2  ;;  %v3663_v9 = vrot.slane %v10604_v5, 2 }
 0x494   : > { %v3012_v53 = vsel %vm2987_vm9, %v2979_v35, %v16814_v39  ;;  %16819 = vst [vmem:[#allocation227_spill] sm:$0xff] %v11084_v56  ;;  %v3658_v35 = vrot.slane %v10624_v4, 2  ;;  %v16822_v39 = vld [vmem:[#allocation181_spill] sm:$0xff]  ;;  %v11108_v25 = vpop.f32.mrf.mxu2 }
 0x495   : > { %v3045_v49 = vsel %vm3020_vm8, %v3012_v53, %v16818_v28  ;;  %v2914_v62 = vsel %vm2888_vm6, %v2881_v0, %v16822_v39  ;;  %v16823_v53 = vld [vmem:[#allocation265_spill] sm:$0xff]  ;;  %v16825_v28 = vld [vmem:[#allocation200_spill] sm:$0xff]  ;;  %16826 = vst [vmem:[#allocation236_spill] sm:$0xff] %v11108_v25  ;;  %v3670_v25 = vrot.slane %v10669_v57, 2 }
 0x496   : > { %v3078_v32 = vsel %vm3053_vm11, %v3045_v49, %v10380_v33  ;;  %v2947_v63 = vsel %vm2921_vm5, %v2914_v62, %v16823_v53  ;;  %v3657_v33 = vrot.slane %v10615_v61, 2  ;;  %v16824_v49 = vld [vmem:[#allocation126_spill] sm:$0xff]  ;;  %v16829_v39 = vld [vmem:[#allocation201_spill] sm:$0xff]  ;;  %v16830_v62 = vld [vmem:[#allocation136_spill] sm:$0xff] }
 0x497   : > { %v2980_v14 = vsel %vm2954_vm7, %v2947_v63, %v16824_v49  ;;  %v2849_v53 = vsel %vm422_vm0, %v16830_v62, %v16829_v39  ;;  %v11126_v49 = vsel %vm1009_vm3, %v3662_v37, %v3663_v9  ;;  %v3667_v37 = vrot.slane %v10677_v44, 2  ;;  %v16835_v39 = vld [vmem:[#allocation215_spill] sm:$0xff] }
 0x498   : > { %3826 = vrot.lane.b32.xlu0 %v11069_v26, %s8054_s22  ;;  %3824 = vrot.lane.b32.xlu2 %v11072_v45, %s8054_s22  ;;  %v3013_v2 = vsel %vm2987_vm9, %v2980_v14, %v16825_v28  ;;  %v11114_v0 = vsel %vm1009_vm3, %v3657_v33, %v3658_v35  ;;  %16832 = vst [vmem:[#allocation278_spill] sm:$0xff] %v11126_v49  ;;  %v3665_v28 = vrot.slane %v10648_v23, 2 }
 0x499   : > { %3828 = vrot.lane.b32.xlu1 %v11084_v56, %s8054_s22  ;;  %16828 = vst [vmem:[#allocation246_spill] sm:$0xff] %v11114_v0 }
 0x49a   : > { %v11092_v10 = vpop.permute.xlu2 %3728 }
 0x49b   : > { %16821 = vst [vmem:[#allocation220_spill] sm:$0xff] %v11092_v10  ;;  %7247 = vmatmul.msk.f32.gmra.mxu2 %vm3099_vm10, %v3078_v32  ;;  %v11111_v32 = vsel %vm1009_vm3, %v3658_v35, %v3660_v8  ;;  %v16831_v10 = vld [vmem:[#allocation296_spill] sm:$0xff] }
 0x49c   : > { %16827 = vst [vmem:[#allocation182_spill] sm:$0xff] %v11111_v32  ;;  %v3046_v63 = vsel %vm3020_vm8, %v3013_v2, %v16831_v10  ;;  %v16833_v8 = vld [vmem:[#allocation216_spill] sm:$0xff]  ;;  %v11136_v10 = vpop.permute.xlu1 %3401  ;;  %v3668_v2 = vrot.slane %v10674_v21, 2 }
 0x49d   : > { %v2882_v35 = vsel %vm2855_vm4, %v2849_v53, %v16833_v8  ;;  %v3079_v33 = vsel %vm3053_vm11, %v3046_v63, %v10415_v19  ;;  %v16836_v53 = vld [vmem:[#allocation256_spill] sm:$0xff]  ;;  %v16837_v63 = vld [vmem:[#allocation145_spill] sm:$0xff] }
 0x49e   : > { %v2915_v62 = vsel %vm2888_vm6, %v2882_v35, %v16835_v39  ;;  %v11152_v23 = vsel %vm1009_vm3, %v3667_v37, %v3668_v2  ;;  %v11167_v57 = vsel %vm1009_vm3, %v3668_v2, %v3670_v25  ;;  %v3675_v37 = vrot.slane %v10733_v27, 2  ;;  %v16849_v2 = vld [vmem:[#allocation222_spill] sm:$0xff] }
 0x49f   : > { %v2948_v19 = vsel %vm2921_vm5, %v2915_v62, %v16836_v53  ;;  %16839 = vst [vmem:[#allocation174_spill] sm:$0xff] %v11152_v23  ;;  %v3678_v53 = vrot.slane %v10715_v18, 2 }
 0x4a0   : > { %3832 = vrot.lane.b32.xlu0 %v11111_v32, %s8054_s22  ;;  %3830 = vrot.lane.b32.xlu2 %v11114_v0, %s8054_s22  ;;  %v2981_v8 = vsel %vm2954_vm7, %v2948_v19, %v16837_v63  ;;  %v16841_v32 = vld [vmem:[#allocation213_spill] sm:$0xff]  ;;  %v16842_v0 = vld [vmem:[#allocation132_spill] sm:$0xff]  ;;  %16843 = vst [vmem:[#allocation238_spill] sm:$0xff] %v11167_v57 }
 0x4a1   : > { %3834 = vrot.lane.b32.xlu1 %v11126_v49, %s8054_s22  ;;  %v11155_v49 = vsel %vm1009_vm3, %v3663_v9, %v3665_v28  ;;  %v2850_v35 = vsel %vm422_vm0, %v16842_v0, %v16841_v32  ;;  %v16848_v28 = vld [vmem:[#allocation185_spill] sm:$0xff]  ;;  %v16850_v19 = vld [vmem:[#allocation264_spill] sm:$0xff] }
 0x4a2   : > { %v11134_v14 = vpop.permute.xlu2 %3734  ;;  %16840 = vst [vmem:[#allocation242_spill] sm:$0xff] %v11155_v49  ;;  %v2883_v25 = vsel %vm2855_vm4, %v2850_v35, %v16848_v28  ;;  %v16853_v35 = vld [vmem:[#allocation289_spill] sm:$0xff] }
 0x4a3   : > { %16834 = vst [vmem:[#allocation243_spill] sm:$0xff] %v11134_v14  ;;  %7248 = vmatmul.msk.f32.gmra.mxu2 %vm3099_vm10, %v3079_v33  ;;  %v16838_v14 = vld [vmem:[#allocation110_spill] sm:$0xff]  ;;  %v2916_v62 = vsel %vm2888_vm6, %v2883_v25, %v16849_v2  ;;  %v16856_v2 = vld [vmem:[#allocation203_spill] sm:$0xff] }
 0x4a4   : > { %v3014_v33 = vsel %vm2987_vm9, %v2981_v8, %v16838_v14  ;;  %v11171_v14 = vpop.f32.mrf.mxu2  ;;  %v2949_v63 = vsel %vm2921_vm5, %v2916_v62, %v16850_v19  ;;  %v16851_v8 = vld [vmem:[#allocation165_spill] sm:$0xff] }
 0x4a5   : > { %v3047_v39 = vsel %vm3020_vm8, %v3014_v33, %v10156_v3  ;;  %16844 = vst [vmem:[#allocation240_spill] sm:$0xff] %v11171_v14  ;;  %v3672_v33 = vrot.slane %v16851_v8, 2  ;;  %v3677_v14 = vrot.slane %v10727_v24, 2  ;;  %v16858_v19 = vld [vmem:[#allocation293_spill] sm:$0xff] }
 0x4a6   : > { %v3080_v9 = vsel %vm3053_vm11, %v3047_v39, %v10333_v51  ;;  %v3673_v51 = vrot.slane %v10730_v50, 2  ;;  %v16852_v39 = vld [vmem:[#allocation283_spill] sm:$0xff] }
 0x4a8   : > { %3838 = vrot.lane.b32.xlu0 %v11152_v23, %s8054_s22  ;;  %3836 = vrot.lane.b32.xlu2 %v11155_v49, %s8054_s22  ;;  %v11198_v28 = vsel %vm1009_vm3, %v3673_v51, %v3675_v37  ;;  %v11201_v25 = vsel %vm1009_vm3, %v3672_v33, %v3673_v51  ;;  %v16860_v37 = vld [vmem:[#allocation224_spill] sm:$0xff]  ;;  %v16861_v33 = vld [vmem:[#allocation139_spill] sm:$0xff] }
 0x4a9   : > { %3840 = vrot.lane.b32.xlu1 %v11167_v57, %s8054_s22  ;;  %16854 = vst [vmem:[#allocation252_spill] sm:$0xff] %v11198_v28  ;;  %v16907_v57 = vld [vmem:[#allocation285_spill] sm:$0xff]  ;;  %v16910_v49 = vld [vmem:[#allocation176_spill] sm:$0xff] }
 0x4aa   : > { %v11175_v32 = vpop.permute.xlu2 %3740  ;;  %v11177_v3 = vpop.permute.xlu1 %3726  ;;  %16855 = vst [vmem:[#allocation251_spill] sm:$0xff] %v11201_v25 }
 0x4ab   : > { %16845 = vst [vmem:[#allocation175_spill] sm:$0xff] %v11175_v32  ;;  %v11179_v0 = vpop.permute.xlu0 %3724  ;;  %7249 = vmatmul.msk.f32.gmra.mxu2 %vm3099_vm10, %v3080_v9  ;;  %v2982_v9 = vsel %vm2954_vm7, %v2949_v63, %v16852_v39  ;;  %v16857_v32 = vld [vmem:[#allocation152_spill] sm:$0xff]  ;;  %v11213_v63 = vsel %vm1009_vm3, %v3677_v14, %v3678_v53  ;;  %v3680_v14 = vrot.slane %v10759_v31, 2 }
 0x4ac   : > { %16846 = vst [vmem:[#allocation282_spill] sm:$0xff] %v11177_v3  ;;  %v3015_v27 = vsel %vm2987_vm9, %v2982_v9, %v16853_v35  ;;  %v2851_v62 = vsel %vm422_vm0, %v16857_v32, %v16856_v2  ;;  %v3683_v2 = vrot.slane %v10783_v60, 2 }
 0x4ad   : > { %16847 = vst [vmem:[#allocation229_spill] sm:$0xff] %v11179_v0  ;;  %v3048_v3 = vsel %vm3020_vm8, %v3015_v27, %v16858_v19  ;;  %v2884_v51 = vsel %vm2855_vm4, %v2851_v62, %v16860_v37  ;;  %v3682_v27 = vrot.slane %v10786_v38, 2  ;;  %v16865_v62 = vld [vmem:[#allocation217_spill] sm:$0xff]  ;;  %v11233_v19 = vpop.f32.mrf.mxu2  ;;  %v16867_v37 = vld [vmem:[#allocation268_spill] sm:$0xff] }
 0x4ae   : > { %16859 = vst [vmem:[#allocation272_spill] sm:$0xff] %v11213_v63  ;;  %v3081_v39 = vsel %vm3053_vm11, %v3048_v3, %v16861_v33  ;;  %v2917_v3 = vsel %vm2888_vm6, %v2884_v51, %v16865_v62  ;;  %v16872_v51 = vld [vmem:[#allocation93_spill] sm:$0xff] }
 0x4af   : > { %16866 = vst [vmem:[#allocation245_spill] sm:$0xff] %v11233_v19  ;;  %v2950_v33 = vsel %vm2921_vm5, %v2917_v3, %v16867_v37  ;;  %v11243_v0 = vsel %vm1009_vm3, %v3682_v27, %v3683_v2 }
 0x4b0   : > { %3844 = vrot.lane.b32.xlu0 %v11198_v28, %s8054_s22  ;;  %3842 = vrot.lane.b32.xlu2 %v11201_v25, %s8054_s22  ;;  %16870 = vst [vmem:[#allocation192_spill] sm:$0xff] %v11243_v0  ;;  %v16906_v25 = vld [vmem:[#allocation124_spill] sm:$0xff] }
 0x4b1   : > { %3846 = vrot.lane.b32.xlu1 %v11213_v63, %s8054_s22  ;;  %v11246_v63 = vsel %vm1009_vm3, %v3678_v53, %v3680_v14  ;;  %v16875_v53 = vld [vmem:[#allocation221_spill] sm:$0xff]  ;;  %v16876_v14 = vld [vmem:[#allocation151_spill] sm:$0xff] }
 0x4b2   : > { %v11221_v32 = vpop.permute.xlu2 %3746  ;;  %16871 = vst [vmem:[#allocation241_spill] sm:$0xff] %v11246_v63  ;;  %v2852_v27 = vsel %vm422_vm0, %v16876_v14, %v16875_v53  ;;  %v16883_v14 = vld [vmem:[#allocation259_spill] sm:$0xff] }
 0x4b3   : > { %16862 = vst [vmem:[#allocation235_spill] sm:$0xff] %v11221_v32  ;;  %v11223_v9 = vpop.permute.xlu1 %3732  ;;  %v11225_v35 = vpop.permute.xlu0 %3730  ;;  %7250 = vmatmul.msk.f32.gmra.mxu2 %vm3099_vm10, %v3081_v39  ;;  %v16868_v32 = vld [vmem:[#allocation142_spill] sm:$0xff]  ;;  %v16869_v39 = vld [vmem:[#allocation191_spill] sm:$0xff] }
 0x4b4   : > { %16863 = vst [vmem:[#allocation193_spill] sm:$0xff] %v11223_v9  ;;  %v2983_v9 = vsel %vm2954_vm7, %v2950_v33, %v16868_v32  ;;  %v16874_v32 = vld [vmem:[#allocation99_spill] sm:$0xff]  ;;  %v16879_v33 = vld [vmem:[#allocation225_spill] sm:$0xff] }
 0x4b5   : > { %16864 = vst [vmem:[#allocation248_spill] sm:$0xff] %v11225_v35  ;;  %v3685_v35 = vrot.slane %v10776_v7, 2  ;;  %v3016_v31 = vsel %vm2987_vm9, %v2983_v9, %v16869_v39 }
 0x4b6   : > { %v3049_v62 = vsel %vm3020_vm8, %v3016_v31, %v16872_v51  ;;  %v3688_v31 = vrot.slane %v10831_v47, 2  ;;  %v16881_v51 = vld [vmem:[#allocation230_spill] sm:$0xff] }
 0x4b7   : > { %v11255_v7 = vsel %vm1009_vm3, %v3683_v2, %v3685_v35  ;;  %v3082_v9 = vsel %vm3053_vm11, %v3049_v62, %v16874_v32  ;;  %v2885_v35 = vsel %vm2855_vm4, %v2852_v27, %v16879_v33  ;;  %v3690_v2 = vrot.slane %v10834_v30, 2  ;;  %v16882_v32 = vld [vmem:[#allocation178_spill] sm:$0xff]  ;;  %v11283_v27 = vpop.f32.mrf.mxu2  ;;  %v16887_v33 = vld [vmem:[#allocation237_spill] sm:$0xff] }
 0x4b8   : > { %3850 = vrot.lane.b32.xlu0 %v11243_v0, %s8054_s22  ;;  %3848 = vrot.lane.b32.xlu2 %v11246_v63, %s8054_s22  ;;  %16873 = vst [vmem:[#allocation261_spill] sm:$0xff] %v11255_v7  ;;  %v2918_v62 = vsel %vm2888_vm6, %v2885_v35, %v16881_v51  ;;  %v3693_v53 = vrot.slane %v16882_v32, 2  ;;  %v3692_v30 = vrot.slane %v10828_v1, 2  ;;  %v16889_v63 = vld [vmem:[#allocation288_spill] sm:$0xff] }
 0x4b9   : > { %3852 = vrot.lane.b32.xlu1 %v11255_v7, %s8054_s22  ;;  %v2951_v19 = vsel %vm2921_vm5, %v2918_v62, %v16883_v14  ;;  %16886 = vst [vmem:[#allocation258_spill] sm:$0xff] %v11283_v27  ;;  %v11292_v51 = vsel %vm1009_vm3, %v3688_v31, %v3690_v2  ;;  %v16892_v14 = vld [vmem:[#allocation121_spill] sm:$0xff] }
 0x4ba   : > { %v11266_v37 = vpop.permute.xlu2 %3752  ;;  %16890 = vst [vmem:[#allocation205_spill] sm:$0xff] %v11292_v51 }
 0x4bb   : > { %v11264_v3 = vpop.permute.xlu1 %3738  ;;  %16878 = vst [vmem:[#allocation281_spill] sm:$0xff] %v11266_v37  ;;  %7251 = vmatmul.msk.f32.gmra.mxu2 %vm3099_vm10, %v3082_v9  ;;  %v11272_v39 = vpop.permute.xlu0 %3736  ;;  %v16884_v37 = vld [vmem:[#allocation118_spill] sm:$0xff] }
 0x4bc   : > { %16877 = vst [vmem:[#allocation255_spill] sm:$0xff] %v11264_v3  ;;  %v3687_v3 = vrot.slane %v16884_v37, 2  ;;  %v16885_v9 = vld [vmem:[#allocation186_spill] sm:$0xff] }
 0x4bd   : > { %16880 = vst [vmem:[#allocation254_spill] sm:$0xff] %v11272_v39  ;;  %v2984_v7 = vsel %vm2954_vm7, %v2951_v19, %v16885_v9  ;;  %v16888_v39 = vld [vmem:[#allocation170_spill] sm:$0xff] }
 0x4be   : > { %v2853_v0 = vsel %vm422_vm0, %v16888_v39, %v16887_v33  ;;  %v3017_v35 = vsel %vm2987_vm9, %v2984_v7, %v16889_v63  ;;  %v11295_v62 = vsel %vm1009_vm3, %v3687_v3, %v3688_v31  ;;  %v11304_v39 = vsel %vm1009_vm3, %v3692_v30, %v3693_v53  ;;  %v16894_v9 = vld [vmem:[#allocation114_spill] sm:$0xff] }
 0x4bf   : > { %16891 = vst [vmem:[#allocation247_spill] sm:$0xff] %v11295_v62  ;;  %v3050_v19 = vsel %vm3020_vm8, %v3017_v35, %v16892_v14  ;;  %v16895_v7 = vld [vmem:[#allocation226_spill] sm:$0xff]  ;;  %v16899_v14 = vld [vmem:[#allocation133_spill] sm:$0xff] }
 0x4c0   : > { %3856 = vrot.lane.b32.xlu0 %v11292_v51, %s8054_s22  ;;  %3854 = vrot.lane.b32.xlu2 %v11295_v62, %s8054_s22  ;;  %16893 = vst [vmem:[#allocation250_spill] sm:$0xff] %v11304_v39  ;;  %v3083_v63 = vsel %vm3053_vm11, %v3050_v19, %v16894_v9  ;;  %v2886_v3 = vsel %vm2855_vm4, %v2853_v0, %v16895_v7  ;;  %v16898_v33 = vld [vmem:[#allocation290_spill] sm:$0xff]  ;;  %v3695_v30 = vrot.slane %v16899_v14, 2  ;;  %v16901_v51 = vld [vmem:[#allocation231_spill] sm:$0xff]  ;;  %v3700_v14 = vrot.slane %v10875_v13, 2 }
 0x4c1   : > { %3858 = vrot.lane.b32.xlu1 %v11304_v39, %s8054_s22  ;;  %v3697_v19 = vrot.slane %v16901_v51, 2  ;;  %v16902_v9 = vld [vmem:[#allocation199_spill] sm:$0xff]  ;;  %v16903_v39 = vld [vmem:[#allocation249_spill] sm:$0xff]  ;;  %v16904_v0 = vld [vmem:[#allocation294_spill] sm:$0xff] }
 0x4c2   : > { %v11314_v31 = vpop.permute.xlu2 %3758  ;;  %v3698_v62 = vrot.slane %v16902_v9, 2  ;;  %v2919_v28 = vsel %vm2888_vm6, %v2886_v3, %v16903_v39  ;;  %v11336_v23 = vsel %vm1009_vm3, %v3693_v53, %v3695_v30  ;;  %v16908_v39 = vunpack.i.l.bf16 %v16898_v33  ;;  %v16909_v7 = vld [vmem:[#allocation223_spill] sm:$0xff] }
 0x4c3   : > { %v11312_v2 = vpop.permute.xlu1 %3744  ;;  %16897 = vst [vmem:[#allocation143_spill] sm:$0xff] %v11314_v31  ;;  %7252 = vmatmul.msk.f32.gmra.mxu2 %vm3099_vm10, %v3083_v63  ;;  %v11319_v27 = vpop.permute.xlu0 %3742  ;;  %v16031_v63 = vunpack.i.l.bf16 %v16906_v25 }
 0x4c4   : > { %16896 = vst [vmem:[#allocation105_spill] sm:$0xff] %v11312_v2  ;;  %v16905_v2 = vld [vmem:[#allocation267_spill] sm:$0xff]  ;;  %v11351_v13 = vsel %vm1009_vm3, %v3698_v62, %v3700_v14 }
 0x4c5   : > { %16900 = vst [vmem:[#allocation244_spill] sm:$0xff] %v11319_v27  ;;  %v2952_v31 = vsel %vm2921_vm5, %v2919_v28, %v16905_v2  ;;  %v11333_v27 = vsel %vm1009_vm3, %v3697_v19, %v3698_v62  ;;  %v2854_v28 = vsel %vm422_vm0, %v16910_v49, %v16909_v7  ;;  %v11344_v2 = vpop.f32.mrf.mxu2  ;;  %v3705_v7 = vrot.slane %v10934_v16, 2 }
 0x4c6   : > { %v2985_v35 = vsel %vm2954_vm7, %v2952_v31, %v16907_v57  ;;  %16911 = vst [vmem:[#allocation206_spill] sm:$0xff] %v11344_v2  ;;  %v16912_v57 = vunpack.i.l.bf16 %v16904_v0  ;;  %v16913_v31 = vld [vmem:[#allocation233_spill] sm:$0xff]  ;;  %v3702_v62 = vrot.slane %v10915_v41, 2  ;;  %v16919_v2 = vld [vmem:[#allocation160_spill] sm:$0xff] }
 0x4c7   : > { %v3018_v3 = vsel %vm2987_vm9, %v2985_v35, %v16908_v39  ;;  %v2887_v35 = vsel %vm2855_vm4, %v2854_v28, %v16913_v31  ;;  %v3703_v39 = vrot.slane %v10931_v22, 2  ;;  %v16918_v31 = vld [vmem:[#allocation270_spill] sm:$0xff] }
 0x4c8   : > { %3862 = vrot.lane.b32.xlu0 %v11333_v27, %s8054_s22  ;;  %3860 = vrot.lane.b32.xlu2 %v11336_v23, %s8054_s22  ;;  %v3051_v53 = vsel %vm3020_vm8, %v3018_v3, %v16912_v57  ;;  %v16917_v3 = vld [vmem:[#allocation232_spill] sm:$0xff] }
 0x4c9   : > { %3864 = vrot.lane.b32.xlu1 %v11351_v13, %s8054_s22  ;;  %v3084_v49 = vsel %vm3053_vm11, %v3051_v53, %v16031_v63  ;;  %v2920_v28 = vsel %vm2888_vm6, %v2887_v35, %v16917_v3  ;;  %v3708_v53 = vrot.slane %v10918_v46, 2  ;;  %v11388_v35 = vsel %vm1009_vm3, %v3702_v62, %v3703_v39 }
 0x4ca   : > { %v11365_v19 = vpop.permute.xlu2 %3764  ;;  %v2953_v63 = vsel %vm2921_vm5, %v2920_v28, %v16918_v31  ;;  %16921 = vst [vmem:[#allocation161_spill] sm:$0xff] %v11388_v35  ;;  %v16922_v3 = vunpack.i.h.bf16 %v16898_v33 }
 0x4cb   : > { %v11363_v30 = vpop.permute.xlu1 %3750  ;;  %16915 = vst [vmem:[#allocation257_spill] sm:$0xff] %v11365_v19  ;;  %7253 = vmatmul.msk.f32.gmra.mxu2 %vm3099_vm10, %v3084_v49  ;;  %v11370_v14 = vpop.permute.xlu0 %3748  ;;  %v16032_v49 = vunpack.i.h.bf16 %v16906_v25  ;;  %v2986_v16 = vsel %vm2954_vm7, %v2953_v63, %v16919_v2  ;;  %v3707_v19 = vrot.slane %v10928_v59, 2  ;;  %v16923_v2 = vunpack.i.h.bf16 %v16904_v0 }
 0x4cc   : > { %16914 = vst [vmem:[#allocation141_spill] sm:$0xff] %v11363_v30  ;;  %v11385_v30 = vsel %vm1009_vm3, %v3703_v39, %v3705_v7  ;;  %v3019_v57 = vsel %vm2987_vm9, %v2986_v16, %v16922_v3 }
 0x4cd   : > { %16916 = vst [vmem:[#allocation274_spill] sm:$0xff] %v11370_v14  ;;  %v11398_v63 = vsel %vm1009_vm3, %v3707_v19, %v3708_v53  ;;  %v3052_v7 = vsel %vm3020_vm8, %v3019_v57, %v16923_v2  ;;  %v11408_v39 = vpop.f32.mrf.mxu2  ;;  %v3710_v19 = vrot.slane %v10959_v54, 2 }
 0x4ce   : > { %16920 = vst [vmem:[#allocation120_spill] sm:$0xff] %v11385_v30  ;;  %v3085_v62 = vsel %vm3053_vm11, %v3052_v7, %v16032_v49 }
 0x4cf   : > { %16924 = vst [vmem:[#allocation284_spill] sm:$0xff] %v11408_v39  ;;  %v11419_v57 = vsel %vm1009_vm3, %v3708_v53, %v3710_v19 }
 0x4d0   : > { %3868 = vrot.lane.b32.xlu0 %v11385_v30, %s8054_s22  ;;  %3866 = vrot.lane.b32.xlu2 %v11388_v35, %s8054_s22 }
 0x4d1   : > { %3870 = vrot.lane.b32.xlu1 %v11398_v63, %s8054_s22 }
 0x4d2   : > { %v11410_v28 = vpop.permute.xlu2 %3770 }
 0x4d3   : > { %16925 = vst [vmem:[#allocation137_spill] sm:$0xff] %v11410_v28  ;;  %7254 = vmatmul.msk.f32.gmra.mxu2 %vm3099_vm10, %v3085_v62  ;;  %v11414_v31 = vpop.permute.xlu1 %3756  ;;  %v11416_v16 = vpop.permute.xlu0 %3754 }
 0x4d4   : > { %16926 = vst [vmem:[#allocation103_spill] sm:$0xff] %v11414_v31 }
 0x4d5   : > { %16927 = vst [vmem:[#allocation157_spill] sm:$0xff] %v11416_v16 }
 0x4d8   : > { %3904 = vrot.lane.b32.xlu0 %v10473_v43, %s16080_s12  ;;  %3872 = vrot.lane.b32.xlu2 %v11419_v57, %s8054_s22 }
 0x4d9   : > { %3906 = vrot.lane.b32.xlu1 %v10470_v12, %s16080_s12 }
 0x4da   : > { %v11427_v3 = vpop.permute.xlu2 %3776 }
 0x4db   : > { %16928 = vst [vmem:[#allocation159_spill] sm:$0xff] %v11427_v3  ;;  %v11429_v2 = vpop.permute.xlu1 %3762  ;;  %v11431_v54 = vpop.permute.xlu0 %3760 }
 0x4dc   : > { %16929 = vst [vmem:[#allocation144_spill] sm:$0xff] %v11429_v2 }
 0x4dd   : > { %16930 = vst [vmem:[#allocation153_spill] sm:$0xff] %v11431_v54 }
 0x4e0   : > { %3910 = vrot.lane.b32.xlu0 %v10516_v40, %s16080_s12  ;;  %3908 = vrot.lane.b32.xlu2 %v10509_v11, %s16080_s12 }
 0x4e1   : > { %3912 = vrot.lane.b32.xlu1 %v10512_v48, %s16080_s12 }
 0x4e2   : > { %v11439_v53 = vpop.permute.xlu2 %3782 }
 0x4e3   : > { %16931 = vst [vmem:[#allocation102_spill] sm:$0xff] %v11439_v53  ;;  %v11441_v7 = vpop.permute.xlu1 %3768  ;;  %v11443_v62 = vpop.permute.xlu0 %3766 }
 0x4e4   : > { %16932 = vst [vmem:[#allocation113_spill] sm:$0xff] %v11441_v7 }
 0x4e5   : > { %16933 = vst [vmem:[#allocation122_spill] sm:$0xff] %v11443_v62 }
 0x4e8   : > { %3916 = vrot.lane.b32.xlu0 %v10575_v55, %s16080_s12  ;;  %3914 = vrot.lane.b32.xlu2 %v10498_v58, %s16080_s12 }
 0x4e9   : > { %3918 = vrot.lane.b32.xlu1 %v10572_v52, %s16080_s12 }
 0x4ea   : > { %v11451_v19 = vpop.permute.xlu2 %3818 }
 0x4eb   : > { %16934 = vst [vmem:[#allocation167_spill] sm:$0xff] %v11451_v19  ;;  %v11453_v49 = vpop.permute.xlu1 %3774  ;;  %v11455_v39 = vpop.permute.xlu0 %3772 }
 0x4ec   : > { %16935 = vst [vmem:[#allocation260_spill] sm:$0xff] %v11453_v49 }
 0x4ed   : > { %16936 = vst [vmem:[#allocation277_spill] sm:$0xff] %v11455_v39 }
 0x4f0   : > { %3922 = vrot.lane.b32.xlu0 %v10624_v4, %s16080_s12  ;;  %3920 = vrot.lane.b32.xlu2 %v10615_v61, %s16080_s12 }
 0x4f1   : > { %3924 = vrot.lane.b32.xlu1 %v10620_v34, %s16080_s12 }
 0x4f2   : > { %v11463_v25 = vpop.permute.xlu2 %3824 }
 0x4f3   : > { %16937 = vst [vmem:[#allocation111_spill] sm:$0xff] %v11463_v25  ;;  %v11465_v0 = vpop.permute.xlu1 %3780  ;;  %v11467_v53 = vpop.permute.xlu0 %3778 }
 0x4f4   : > { %16938 = vst [vmem:[#allocation140_spill] sm:$0xff] %v11465_v0 }
 0x4f5   : > { %16939 = vst [vmem:[#allocation109_spill] sm:$0xff] %v11467_v53 }
 0x4f8   : > { %3928 = vrot.lane.b32.xlu0 %v10677_v44, %s16080_s12  ;;  %3926 = vrot.lane.b32.xlu2 %v10604_v5, %s16080_s12 }
 0x4f9   : > { %3930 = vrot.lane.b32.xlu1 %v10674_v21, %s16080_s12 }
 0x4fa   : > { %v11475_v33 = vpop.permute.xlu2 %3830 }
 0x4fb   : > { %16940 = vst [vmem:[#allocation291_spill] sm:$0xff] %v11475_v33  ;;  %v11477_v3 = vpop.permute.xlu1 %3816  ;;  %v11479_v49 = vpop.permute.xlu0 %3814  ;;  %v16963_v33 = vld [vmem:[#allocation128_spill] sm:$0xff] }
 0x4fc   : > { %16941 = vst [vmem:[#allocation169_spill] sm:$0xff] %v11477_v3  ;;  %v16980_v3 = vld [vmem:[#allocation154_spill] sm:$0xff] }
 0x4fd   : > { %16942 = vst [vmem:[#allocation162_spill] sm:$0xff] %v11479_v49 }
 0x500   : > { %3934 = vrot.lane.b32.xlu0 %v10730_v50, %s16080_s12  ;;  %3932 = vrot.lane.b32.xlu2 %v16851_v8, %s16080_s12 }
 0x501   : > { %3936 = vrot.lane.b32.xlu1 %v10727_v24, %s16080_s12 }
 0x502   : > { %v11487_v0 = vpop.permute.xlu2 %3836 }
 0x503   : > { %16943 = vst [vmem:[#allocation263_spill] sm:$0xff] %v11487_v0  ;;  %v11489_v53 = vpop.permute.xlu1 %3822  ;;  %v11491_v39 = vpop.permute.xlu0 %3820  ;;  %v3450_v0 = vrot.slane %v11136_v10, 7 }
 0x504   : > { %16944 = vst [vmem:[#allocation286_spill] sm:$0xff] %v11489_v53 }
 0x505   : > { %16945 = vst [vmem:[#allocation197_spill] sm:$0xff] %v11491_v39 }
 0x508   : > { %3940 = vrot.lane.b32.xlu0 %v10786_v38, %s16080_s12  ;;  %3938 = vrot.lane.b32.xlu2 %v10715_v18, %s16080_s12 }
 0x509   : > { %3942 = vrot.lane.b32.xlu1 %v10783_v60, %s16080_s12 }
 0x50a   : > { %v11499_v28 = vpop.permute.xlu2 %3842 }
 0x50b   : > { %16946 = vst [vmem:[#allocation295_spill] sm:$0xff] %v11499_v28  ;;  %v11501_v7 = vpop.permute.xlu1 %3828  ;;  %v11503_v62 = vpop.permute.xlu0 %3826 }
 0x50c   : > { %16947 = vst [vmem:[#allocation166_spill] sm:$0xff] %v11501_v7  ;;  %v16964_v7 = vld [vmem:[#allocation116_spill] sm:$0xff] }
 0x50d   : > { %16948 = vst [vmem:[#allocation108_spill] sm:$0xff] %v11503_v62 }
 0x510   : > { %3946 = vrot.lane.b32.xlu0 %v10831_v47, %s16080_s12  ;;  %3944 = vrot.lane.b32.xlu2 %v16884_v37, %s16080_s12 }
 0x511   : > { %3948 = vrot.lane.b32.xlu1 %v10828_v1, %s16080_s12 }
 0x512   : > { %v11511_v2 = vpop.permute.xlu2 %3848 }
 0x513   : > { %16949 = vst [vmem:[#allocation171_spill] sm:$0xff] %v11511_v2  ;;  %v11513_v54 = vpop.permute.xlu1 %3834  ;;  %v11515_v31 = vpop.permute.xlu0 %3832 }
 0x514   : > { %16950 = vst [vmem:[#allocation179_spill] sm:$0xff] %v11513_v54 }
 0x515   : > { %16951 = vst [vmem:[#allocation253_spill] sm:$0xff] %v11515_v31  ;;  %v16962_v31 = vld [vmem:[#allocation129_spill] sm:$0xff] }
 0x518   : > { %3952 = vrot.lane.b32.xlu0 %v16901_v51, %s16080_s12  ;;  %3950 = vrot.lane.b32.xlu2 %v16882_v32, %s16080_s12 }
 0x519   : > { %3954 = vrot.lane.b32.xlu1 %v16902_v9, %s16080_s12 }
 0x51a   : > { %v11523_v16 = vpop.permute.xlu2 %3854 }
 0x51b   : > { %16952 = vst [vmem:[#allocation117_spill] sm:$0xff] %v11523_v16  ;;  %v11525_v28 = vpop.permute.xlu1 %3840  ;;  %v11527_v14 = vpop.permute.xlu0 %3838 }
 0x51c   : > { %16953 = vst [vmem:[#allocation104_spill] sm:$0xff] %v11525_v28  ;;  %v16036_v28 = vrot.slane %v11047_v42, 7 }
 0x51d   : > { %16954 = vst [vmem:[#allocation188_spill] sm:$0xff] %v11527_v14  ;;  %v11544_v14 = vsel %vm665_vm1, 0.0, %v3450_v0 }
 0x520   : > { %3958 = vrot.lane.b32.xlu0 %v10931_v22, %s16080_s12  ;;  %3956 = vrot.lane.b32.xlu2 %v10915_v41, %s16080_s12 }
 0x521   : > { %3960 = vrot.lane.b32.xlu1 %v10928_v59, %s16080_s12 }
 0x522   : > { %v11535_v2 = vpop.permute.xlu2 %3860 }
 0x523   : > { %16955 = vst [vmem:[#allocation115_spill] sm:$0xff] %v11535_v2  ;;  %v11538_v54 = vpop.permute.xlu1 %3846  ;;  %v11540_v16 = vpop.permute.xlu0 %3844  ;;  %v11553_v2 = vsel %vm665_vm1, %v3450_v0, %v16036_v28 }
 0x524   : > { %16956 = vst [vmem:[#allocation96_spill] sm:$0xff] %v11538_v54 }
 0x525   : > { %16957 = vst [vmem:[#allocation172_spill] sm:$0xff] %v11540_v16 }
 0x528   : > { %3964 = vrot.lane.b32.xlu0 %v11544_v14, %s16080_s12  ;;  %3962 = vrot.lane.b32.xlu2 %v10918_v46, %s16080_s12 }
 0x529   : > { %3966 = vrot.lane.b32.xlu1 %v11553_v2, %s16080_s12  ;;  %s17695_s12 = smov 8  }
 0x52a   : > { %v11557_v10 = vpop.permute.xlu2 %3866 }
 0x52b   : > { %16958 = vst [vmem:[#allocation207_spill] sm:$0xff] %v11557_v10  ;;  %v11559_v54 = vpop.permute.xlu1 %3852  ;;  %v11561_v16 = vpop.permute.xlu0 %3850  ;;  %v16968_v10 = vld [vmem:[#allocation147_spill] sm:$0xff] }
 0x52c   : > { %16959 = vst [vmem:[#allocation262_spill] sm:$0xff] %v11559_v54  ;;  %v16969_v54 = vld [vmem:[#allocation100_spill] sm:$0xff] }
 0x52d   : > { %16960 = vst [vmem:[#allocation280_spill] sm:$0xff] %v11561_v16 }
 0x530   : > { %4002 = vrot.lane.b32.xlu0 %v16962_v31, %s16961_s16  ;;  %4000 = vrot.lane.b32.xlu2 %v16963_v33, %s16961_s16  ;;  %v16970_v31 = vld [vmem:[#allocation149_spill] sm:$0xff] }
 0x531   : > { %4004 = vrot.lane.b32.xlu1 %v16964_v7, %s16961_s16 }
 0x532   : > { %v11569_v0 = vpop.permute.xlu2 %3872 }
 0x533   : > { %16965 = vst [vmem:[#allocation287_spill] sm:$0xff] %v11569_v0  ;;  %v11571_v28 = vpop.permute.xlu1 %3858  ;;  %v11573_v62 = vpop.permute.xlu0 %3856  ;;  %v16974_v0 = vld [vmem:[#allocation180_spill] sm:$0xff] }
 0x534   : > { %16966 = vst [vmem:[#allocation168_spill] sm:$0xff] %v11571_v28  ;;  %v16975_v28 = vld [vmem:[#allocation135_spill] sm:$0xff] }
 0x535   : > { %16967 = vst [vmem:[#allocation119_spill] sm:$0xff] %v11573_v62  ;;  %v16976_v62 = vld [vmem:[#allocation107_spill] sm:$0xff] }
 0x538   : > { %4008 = vrot.lane.b32.xlu0 %v16968_v10, %s16961_s16  ;;  %4006 = vrot.lane.b32.xlu2 %v16969_v54, %s16961_s16 }
 0x539   : > { %4010 = vrot.lane.b32.xlu1 %v16970_v31, %s16961_s16 }
 0x53a   : > { %v11581_v16 = vpop.permute.xlu2 %3908 }
 0x53b   : > { %16971 = vst [vmem:[#allocation292_spill] sm:$0xff] %v11581_v16  ;;  %v11583_v33 = vpop.permute.xlu1 %3864  ;;  %v11585_v25 = vpop.permute.xlu0 %3862 }
 0x53c   : > { %16972 = vst [vmem:[#allocation183_spill] sm:$0xff] %v11583_v33  ;;  %v16981_v33 = vld [vmem:[#allocation177_spill] sm:$0xff] }
 0x53d   : > { %16973 = vst [vmem:[#allocation181_spill] sm:$0xff] %v11585_v25  ;;  %v16982_v25 = vld [vmem:[#allocation266_spill] sm:$0xff] }
 0x540   : > { %4014 = vrot.lane.b32.xlu0 %v16974_v0, %s16961_s16  ;;  %4012 = vrot.lane.b32.xlu2 %v16975_v28, %s16961_s16 }
 0x541   : > { %4016 = vrot.lane.b32.xlu1 %v16976_v62, %s16961_s16 }
 0x542   : > { %v11593_v53 = vpop.permute.xlu2 %3914 }
 0x543   : > { %16977 = vst [vmem:[#allocation265_spill] sm:$0xff] %v11593_v53  ;;  %v11595_v39 = vpop.permute.xlu1 %3870  ;;  %v11597_v19 = vpop.permute.xlu0 %3868  ;;  %v16986_v53 = vld [vmem:[#allocation112_spill] sm:$0xff] }
 0x544   : > { %16978 = vst [vmem:[#allocation126_spill] sm:$0xff] %v11595_v39  ;;  %v16987_v39 = vld [vmem:[#allocation148_spill] sm:$0xff] }
 0x545   : > { %16979 = vst [vmem:[#allocation200_spill] sm:$0xff] %v11597_v19  ;;  %v16988_v19 = vld [vmem:[#allocation273_spill] sm:$0xff] }
 0x548   : > { %4020 = vrot.lane.b32.xlu0 %v16980_v3, %s16961_s16  ;;  %4018 = vrot.lane.b32.xlu2 %v16981_v33, %s16961_s16 }
 0x549   : > { %4022 = vrot.lane.b32.xlu1 %v16982_v25, %s16961_s16 }
 0x54a   : > { %v11605_v12 = vpop.permute.xlu2 %3920 }
 0x54b   : > { %16983 = vst [vmem:[#allocation201_spill] sm:$0xff] %v11605_v12  ;;  %v11607_v16 = vpop.permute.xlu1 %3906  ;;  %v11609_v49 = vpop.permute.xlu0 %3904  ;;  %v16992_v12 = vld [vmem:[#allocation198_spill] sm:$0xff] }
 0x54c   : > { %16984 = vst [vmem:[#allocation136_spill] sm:$0xff] %v11607_v16  ;;  %v16993_v16 = vld [vmem:[#allocation123_spill] sm:$0xff] }
 0x54d   : > { %16985 = vst [vmem:[#allocation296_spill] sm:$0xff] %v11609_v49  ;;  %v16994_v49 = vld [vmem:[#allocation276_spill] sm:$0xff] }
 0x550   : > { %4026 = vrot.lane.b32.xlu0 %v16986_v53, %s16961_s16  ;;  %4024 = vrot.lane.b32.xlu2 %v16987_v39, %s16961_s16 }
 0x551   : > { %4028 = vrot.lane.b32.xlu1 %v16988_v19, %s16961_s16 }
 0x552   : > { %v11617_v43 = vpop.permute.xlu2 %3926 }
 0x553   : > { %16989 = vst [vmem:[#allocation216_spill] sm:$0xff] %v11617_v43  ;;  %v11619_v3 = vpop.permute.xlu1 %3912  ;;  %v11621_v25 = vpop.permute.xlu0 %3910  ;;  %v16998_v43 = vld [vmem:[#allocation194_spill] sm:$0xff] }
 0x554   : > { %16990 = vst [vmem:[#allocation215_spill] sm:$0xff] %v11619_v3  ;;  %v16999_v3 = vld [vmem:[#allocation195_spill] sm:$0xff] }
 0x555   : > { %16991 = vst [vmem:[#allocation256_spill] sm:$0xff] %v11621_v25  ;;  %v17000_v25 = vld [vmem:[#allocation189_spill] sm:$0xff] }
 0x558   : > { %4032 = vrot.lane.b32.xlu0 %v16992_v12, %s16961_s16  ;;  %4030 = vrot.lane.b32.xlu2 %v16993_v16, %s16961_s16 }
 0x559   : > { %4034 = vrot.lane.b32.xlu1 %v16994_v49, %s16961_s16 }
 0x55a   : > { %v11629_v53 = vpop.permute.xlu2 %3932 }
 0x55b   : > { %16995 = vst [vmem:[#allocation145_spill] sm:$0xff] %v11629_v53  ;;  %v11631_v39 = vpop.permute.xlu1 %3918  ;;  %v11633_v19 = vpop.permute.xlu0 %3916  ;;  %v17004_v53 = vld [vmem:[#allocation209_spill] sm:$0xff] }
 0x55c   : > { %16996 = vst [vmem:[#allocation110_spill] sm:$0xff] %v11631_v39  ;;  %v17005_v39 = vld [vmem:[#allocation269_spill] sm:$0xff] }
 0x55d   : > { %16997 = vst [vmem:[#allocation213_spill] sm:$0xff] %v11633_v19  ;;  %v17006_v19 = vld [vmem:[#allocation138_spill] sm:$0xff] }
 0x560   : > { %4038 = vrot.lane.b32.xlu0 %v16998_v43, %s16961_s16  ;;  %4036 = vrot.lane.b32.xlu2 %v16999_v3, %s16961_s16 }
 0x561   : > { %4040 = vrot.lane.b32.xlu1 %v17000_v25, %s16961_s16 }
 0x562   : > { %v11641_v12 = vpop.permute.xlu2 %3938 }
 0x563   : > { %17001 = vst [vmem:[#allocation132_spill] sm:$0xff] %v11641_v12  ;;  %v11643_v16 = vpop.permute.xlu1 %3924  ;;  %v11645_v49 = vpop.permute.xlu0 %3922  ;;  %v17010_v12 = vld [vmem:[#allocation275_spill] sm:$0xff] }
 0x564   : > { %17002 = vst [vmem:[#allocation185_spill] sm:$0xff] %v11643_v16  ;;  %v17011_v16 = vld [vmem:[#allocation204_spill] sm:$0xff] }
 0x565   : > { %17003 = vst [vmem:[#allocation222_spill] sm:$0xff] %v11645_v49 }
 0x568   : > { %4044 = vrot.lane.b32.xlu0 %v17004_v53, %s16961_s16  ;;  %4042 = vrot.lane.b32.xlu2 %v17005_v39, %s16961_s16 }
 0x569   : > { %4046 = vrot.lane.b32.xlu1 %v17006_v19, %s16961_s16 }
 0x56a   : > { %v11653_v43 = vpop.permute.xlu2 %3944 }
 0x56b   : > { %17007 = vst [vmem:[#allocation264_spill] sm:$0xff] %v11653_v43  ;;  %v11655_v3 = vpop.permute.xlu1 %3930  ;;  %v11657_v25 = vpop.permute.xlu0 %3928  ;;  %v17015_v43 = vld [vmem:[#allocation211_spill] sm:$0xff] }
 0x56c   : > { %17008 = vst [vmem:[#allocation283_spill] sm:$0xff] %v11655_v3  ;;  %v17016_v3 = vrot.slane %v11047_v42, 7 }
 0x56d   : > { %17009 = vst [vmem:[#allocation289_spill] sm:$0xff] %v11657_v25 }
 0x56e   : > { %v11680_v25 = vsel %vm665_vm1, %v17016_v3, 0.0 }
 0x570   : > { %4050 = vrot.lane.b32.xlu0 %v17010_v12, %s16961_s16  ;;  %4048 = vrot.lane.b32.xlu2 %v17011_v16, %s16961_s16 }
 0x571   : > { %4052 = vrot.lane.b32.xlu1 %v10948_v15, %s16961_s16 }
 0x572   : > { %v11665_v49 = vpop.permute.xlu2 %3950 }
 0x573   : > { %17012 = vst [vmem:[#allocation203_spill] sm:$0xff] %v11665_v49  ;;  %v11667_v53 = vpop.permute.xlu1 %3936  ;;  %v11669_v19 = vpop.permute.xlu0 %3934  ;;  %v3714_v49 = vrot.slane %v11544_v14, 1 }
 0x574   : > { %17013 = vst [vmem:[#allocation152_spill] sm:$0xff] %v11667_v53  ;;  %v3715_v53 = vrot.slane %v11553_v2, 1 }
 0x575   : > { %17014 = vst [vmem:[#allocation293_spill] sm:$0xff] %v11669_v19 }
 0x576   : > { %v11692_v12 = vsel %vm864_vm2, %v3714_v49, %v3715_v53 }
 0x578   : > { %4054 = vrot.lane.b32.xlu2 %v10945_v17, %s16961_s16  ;;  %4056 = vrot.lane.b32.xlu0 %v17015_v43, %s16961_s16  ;;  %v3717_v43 = vrot.slane %v11680_v25, 1 }
 0x579   : > { %4058 = vrot.lane.b32.xlu1 %v10991_v20, %s16961_s16 }
 0x57a   : > { %v11682_v15 = vpop.permute.xlu2 %3956  ;;  %v11695_v42 = vsel %vm864_vm2, %v3715_v53, %v3717_v43  ;;  %v17024_v43 = vld [vmem:[#allocation239_spill] sm:$0xff] }
 0x57b   : > { %17017 = vst [vmem:[#allocation224_spill] sm:$0xff] %v11682_v15  ;;  %v11686_v19 = vpop.permute.xlu1 %3942  ;;  %v11688_v17 = vpop.permute.xlu0 %3940 }
 0x57c   : > { %17018 = vst [vmem:[#allocation139_spill] sm:$0xff] %v11686_v19 }
 0x57d   : > { %17019 = vst [vmem:[#allocation217_spill] sm:$0xff] %v11688_v17 }
 0x580   : > { %4060 = vrot.lane.b32.xlu2 %v11692_v12, %s16961_s16  ;;  %4062 = vrot.lane.b32.xlu0 %v11695_v42, %s16961_s16 }
 0x581   : > { %4096 = vrot.lane.b32.xlu1 %v10988_v36, %s17020_s29 }
 0x582   : > { %v11703_v3 = vpop.permute.xlu2 %3962 }
 0x583   : > { %17021 = vst [vmem:[#allocation268_spill] sm:$0xff] %v11703_v3  ;;  %v11705_v15 = vpop.permute.xlu1 %3948  ;;  %v11707_v19 = vpop.permute.xlu0 %3946  ;;  %v17028_v3 = vld [vmem:[#allocation271_spill] sm:$0xff] }
 0x584   : > { %17022 = vst [vmem:[#allocation142_spill] sm:$0xff] %v11705_v15 }
 0x585   : > { %17023 = vst [vmem:[#allocation191_spill] sm:$0xff] %v11707_v19 }
 0x588   : > { %4098 = vrot.lane.b32.xlu2 %v11000_v6, %s17020_s29  ;;  %4100 = vrot.lane.b32.xlu0 %v11031_v29, %s17020_s29 }
 0x589   : > { %4102 = vrot.lane.b32.xlu1 %v17024_v43, %s17020_s29 }
 0x58a   : > { %v11715_v49 = vpop.permute.xlu2 %4000 }
 0x58b   : > { %17025 = vst [vmem:[#allocation93_spill] sm:$0xff] %v11715_v49  ;;  %v11717_v53 = vpop.permute.xlu1 %3954  ;;  %v11719_v36 = vpop.permute.xlu0 %3952 }
 0x58c   : > { %17026 = vst [vmem:[#allocation99_spill] sm:$0xff] %v11717_v53  ;;  %v17032_v53 = vld [vmem:[#allocation246_spill] sm:$0xff] }
 0x58d   : > { %17027 = vst [vmem:[#allocation221_spill] sm:$0xff] %v11719_v36  ;;  %v17033_v36 = vld [vmem:[#allocation182_spill] sm:$0xff] }
 0x590   : > { %4104 = vrot.lane.b32.xlu2 %v17028_v3, %s17020_s29  ;;  %4106 = vrot.lane.b32.xlu0 %v11072_v45, %s17020_s29 }
 0x591   : > { %4108 = vrot.lane.b32.xlu1 %v11069_v26, %s17020_s29 }
 0x592   : > { %v11727_v6 = vpop.permute.xlu2 %4006 }
 0x593   : > { %17029 = vst [vmem:[#allocation151_spill] sm:$0xff] %v11727_v6  ;;  %v11729_v15 = vpop.permute.xlu1 %3960  ;;  %v11731_v19 = vpop.permute.xlu0 %3958  ;;  %v17037_v6 = vld [vmem:[#allocation278_spill] sm:$0xff] }
 0x594   : > { %17030 = vst [vmem:[#allocation225_spill] sm:$0xff] %v11729_v15  ;;  %v17038_v15 = vld [vmem:[#allocation242_spill] sm:$0xff] }
 0x595   : > { %17031 = vst [vmem:[#allocation230_spill] sm:$0xff] %v11731_v19  ;;  %v17039_v19 = vld [vmem:[#allocation174_spill] sm:$0xff] }
 0x598   : > { %4110 = vrot.lane.b32.xlu2 %v11084_v56, %s17020_s29  ;;  %4112 = vrot.lane.b32.xlu0 %v17032_v53, %s17020_s29 }
 0x599   : > { %4114 = vrot.lane.b32.xlu1 %v17033_v36, %s17020_s29 }
 0x59a   : > { %v11739_v17 = vpop.permute.xlu2 %4012 }
 0x59b   : > { %17034 = vst [vmem:[#allocation259_spill] sm:$0xff] %v11739_v17  ;;  %v11741_v49 = vpop.permute.xlu1 %3966  ;;  %v11743_v26 = vpop.permute.xlu0 %3964  ;;  %v17043_v17 = vld [vmem:[#allocation238_spill] sm:$0xff] }
 0x59c   : > { %17035 = vst [vmem:[#allocation186_spill] sm:$0xff] %v11741_v49  ;;  %v17044_v49 = vld [vmem:[#allocation251_spill] sm:$0xff] }
 0x59d   : > { %17036 = vst [vmem:[#allocation237_spill] sm:$0xff] %v11743_v26  ;;  %v17045_v26 = vld [vmem:[#allocation252_spill] sm:$0xff] }
 0x5a0   : > { %4116 = vrot.lane.b32.xlu2 %v17037_v6, %s17020_s29  ;;  %4118 = vrot.lane.b32.xlu0 %v17038_v15, %s17020_s29 }
 0x5a1   : > { %4120 = vrot.lane.b32.xlu1 %v17039_v19, %s17020_s29 }
 0x5a2   : > { %v11751_v56 = vpop.permute.xlu2 %4018 }
 0x5a3   : > { %17040 = vst [vmem:[#allocation170_spill] sm:$0xff] %v11751_v56  ;;  %v11753_v53 = vpop.permute.xlu1 %4004  ;;  %v11755_v36 = vpop.permute.xlu0 %4002  ;;  %v17049_v56 = vld [vmem:[#allocation272_spill] sm:$0xff] }
 0x5a4   : > { %17041 = vst [vmem:[#allocation288_spill] sm:$0xff] %v11753_v53  ;;  %v17050_v53 = vld [vmem:[#allocation241_spill] sm:$0xff] }
 0x5a5   : > { %17042 = vst [vmem:[#allocation121_spill] sm:$0xff] %v11755_v36  ;;  %v17051_v36 = vld [vmem:[#allocation192_spill] sm:$0xff] }
 0x5a8   : > { %4122 = vrot.lane.b32.xlu2 %v17043_v17, %s17020_s29  ;;  %4124 = vrot.lane.b32.xlu0 %v17044_v49, %s17020_s29 }
 0x5a9   : > { %4126 = vrot.lane.b32.xlu1 %v17045_v26, %s17020_s29 }
 0x5aa   : > { %v11763_v6 = vpop.permute.xlu2 %4024 }
 0x5ab   : > { %17046 = vst [vmem:[#allocation114_spill] sm:$0xff] %v11763_v6  ;;  %v11765_v15 = vpop.permute.xlu1 %4010  ;;  %v11767_v19 = vpop.permute.xlu0 %4008  ;;  %v17055_v6 = vld [vmem:[#allocation261_spill] sm:$0xff] }
 0x5ac   : > { %17047 = vst [vmem:[#allocation226_spill] sm:$0xff] %v11765_v15  ;;  %v17056_v15 = vld [vmem:[#allocation247_spill] sm:$0xff] }
 0x5ad   : > { %17048 = vst [vmem:[#allocation133_spill] sm:$0xff] %v11767_v19  ;;  %v17057_v19 = vld [vmem:[#allocation205_spill] sm:$0xff] }
 0x5b0   : > { %4128 = vrot.lane.b32.xlu2 %v17049_v56, %s17020_s29  ;;  %4130 = vrot.lane.b32.xlu0 %v17050_v53, %s17020_s29 }
 0x5b1   : > { %4132 = vrot.lane.b32.xlu1 %v17051_v36, %s17020_s29 }
 0x5b2   : > { %v11775_v17 = vpop.permute.xlu2 %4030 }
 0x5b3   : > { %17052 = vst [vmem:[#allocation249_spill] sm:$0xff] %v11775_v17  ;;  %v11777_v49 = vpop.permute.xlu1 %4016  ;;  %v11779_v26 = vpop.permute.xlu0 %4014  ;;  %v17061_v17 = vld [vmem:[#allocation250_spill] sm:$0xff] }
 0x5b4   : > { %17053 = vst [vmem:[#allocation267_spill] sm:$0xff] %v11777_v49 }
 0x5b5   : > { %17054 = vst [vmem:[#allocation285_spill] sm:$0xff] %v11779_v26 }
 0x5b8   : > { %4134 = vrot.lane.b32.xlu2 %v17055_v6, %s17020_s29  ;;  %4136 = vrot.lane.b32.xlu0 %v17056_v15, %s17020_s29 }
 0x5b9   : > { %4138 = vrot.lane.b32.xlu1 %v17057_v19, %s17020_s29 }
 0x5ba   : > { %v11787_v56 = vpop.permute.xlu2 %4036 }
 0x5bb   : > { %17058 = vst [vmem:[#allocation223_spill] sm:$0xff] %v11787_v56  ;;  %v11789_v53 = vpop.permute.xlu1 %4022  ;;  %v11791_v36 = vpop.permute.xlu0 %4020 }
 0x5bc   : > { %17059 = vst [vmem:[#allocation176_spill] sm:$0xff] %v11789_v53 }
 0x5bd   : > { %17060 = vst [vmem:[#allocation233_spill] sm:$0xff] %v11791_v36 }
 0x5c0   : > { %4140 = vrot.lane.b32.xlu2 %v17061_v17, %s17020_s29  ;;  %4142 = vrot.lane.b32.xlu0 %v11336_v23, %s17020_s29 }
 0x5c1   : > { %4144 = vrot.lane.b32.xlu1 %v11333_v27, %s17020_s29 }
 0x5c2   : > { %v11799_v49 = vpop.permute.xlu2 %4042 }
 0x5c3   : > { %17062 = vst [vmem:[#allocation232_spill] sm:$0xff] %v11799_v49  ;;  %v11801_v26 = vpop.permute.xlu1 %4028  ;;  %v11803_v19 = vpop.permute.xlu0 %4026  ;;  %v3719_v49 = vrot.slane %v11544_v14, 2 }
 0x5c4   : > { %17063 = vst [vmem:[#allocation270_spill] sm:$0xff] %v11801_v26  ;;  %v3720_v26 = vrot.slane %v11553_v2, 2 }
 0x5c5   : > { %17064 = vst [vmem:[#allocation160_spill] sm:$0xff] %v11803_v19 }
 0x5c6   : > { %v11822_v19 = vsel %vm1009_vm3, %v3719_v49, %v3720_v26 }
 0x5c8   : > { %4146 = vrot.lane.b32.xlu2 %v11351_v13, %s17020_s29  ;;  %4148 = vrot.lane.b32.xlu0 %v11388_v35, %s17020_s29 }
 0x5c9   : > { %4150 = vrot.lane.b32.xlu1 %v11385_v30, %s17020_s29  ;;  %v3722_v30 = vrot.slane %v11680_v25, 2 }
 0x5ca   : > { %v11811_v56 = vpop.permute.xlu2 %4048 }
 0x5cb   : > { %17065 = vst [vmem:[#allocation129_spill] sm:$0xff] %v11811_v56  ;;  %v11813_v53 = vpop.permute.xlu1 %4034  ;;  %v11815_v36 = vpop.permute.xlu0 %4032  ;;  %v11836_v35 = vsel %vm1009_vm3, %v3720_v26, %v3722_v30 }
 0x5cc   : > { %17066 = vst [vmem:[#allocation128_spill] sm:$0xff] %v11813_v53 }
 0x5cd   : > { %17067 = vst [vmem:[#allocation116_spill] sm:$0xff] %v11815_v36 }
 0x5d0   : > { %4152 = vrot.lane.b32.xlu2 %v11398_v63, %s17020_s29  ;;  %4154 = vrot.lane.b32.xlu0 %v11419_v57, %s17020_s29 }
 0x5d1   : > { %4156 = vrot.lane.b32.xlu1 %v11822_v19, %s17020_s29 }
 0x5d2   : > { %v11828_v56 = vpop.permute.xlu2 %4054 }
 0x5d3   : > { %17068 = vst [vmem:[#allocation147_spill] sm:$0xff] %v11828_v56  ;;  %v11830_v53 = vpop.permute.xlu1 %4040  ;;  %v11832_v36 = vpop.permute.xlu0 %4038 }
 0x5d4   : > { %17069 = vst [vmem:[#allocation100_spill] sm:$0xff] %v11830_v53 }
 0x5d5   : > { %17070 = vst [vmem:[#allocation149_spill] sm:$0xff] %v11832_v36 }
 0x5d8   : > { %4158 = vrot.lane.b32.xlu2 %v11836_v35, %s17020_s29  ;;  %4192 = vrot.lane.b32.xlu0 %v10509_v11, %s17071_s30 }
 0x5d9   : > { %4194 = vrot.lane.b32.xlu1 %v10516_v40, %s17071_s30 }
 0x5da   : > { %v11844_v49 = vpop.permute.xlu2 %4060 }
 0x5db   : > { %17072 = vst [vmem:[#allocation180_spill] sm:$0xff] %v11844_v49  ;;  %v11846_v56 = vpop.permute.xlu1 %4046  ;;  %v11848_v53 = vpop.permute.xlu0 %4044 }
 0x5dc   : > { %17073 = vst [vmem:[#allocation135_spill] sm:$0xff] %v11846_v56 }
 0x5dd   : > { %17074 = vst [vmem:[#allocation107_spill] sm:$0xff] %v11848_v53 }
 0x5e0   : > { %4196 = vrot.lane.b32.xlu2 %v10512_v48, %s17071_s30  ;;  %4198 = vrot.lane.b32.xlu0 %v10498_v58, %s17071_s30 }
 0x5e1   : > { %4200 = vrot.lane.b32.xlu1 %v10575_v55, %s17071_s30 }
 0x5e2   : > { %v11856_v26 = vpop.permute.xlu2 %4098 }
 0x5e3   : > { %v11858_v25 = vpop.permute.xlu1 %4052  ;;  %v11860_v30 = vpop.permute.xlu0 %4050 }
 0x5e4   : > { %17075 = vst [vmem:[#allocation177_spill] sm:$0xff] %v11858_v25 }
 0x5e5   : > { %17076 = vst [vmem:[#allocation269_spill] sm:$0xff] %v11860_v30 }
 0x5e8   : > { %4202 = vrot.lane.b32.xlu2 %v10572_v52, %s17071_s30  ;;  %4204 = vrot.lane.b32.xlu0 %v10615_v61, %s17071_s30 }
 0x5e9   : > { %4206 = vrot.lane.b32.xlu1 %v10624_v4, %s17071_s30 }
 0x5ea   : > { %v11868_v49 = vpop.permute.xlu2 %4104 }
 0x5eb   : > { %v11870_v56 = vpop.permute.xlu1 %4058  ;;  %v11872_v53 = vpop.permute.xlu0 %4056 }
 0x5ec   : > { %17077 = vst [vmem:[#allocation204_spill] sm:$0xff] %v11870_v56 }
 0x5ed   : > { %17078 = vst [vmem:[#allocation239_spill] sm:$0xff] %v11872_v53 }
 0x5f0   : > { %4208 = vrot.lane.b32.xlu2 %v10620_v34, %s17071_s30  ;;  %4210 = vrot.lane.b32.xlu0 %v10604_v5, %s17071_s30  ;;  %v17128_v34 = vld [vmem:[#allocation14_spill] sm:$0xff] }
 0x5f1   : > { %4212 = vrot.lane.b32.xlu1 %v10677_v44, %s17071_s30 }
 0x5f2   : > { %v11880_v25 = vpop.permute.xlu2 %4110 }
 0x5f3   : > { %v11882_v30 = vpop.permute.xlu1 %4096  ;;  %v11884_v36 = vpop.permute.xlu0 %4062 }
 0x5f4   : > { %17079 = vst [vmem:[#allocation271_spill] sm:$0xff] %v11884_v36 }
 0x5f8   : > { %4214 = vrot.lane.b32.xlu2 %v10674_v21, %s17071_s30  ;;  %4216 = vrot.lane.b32.xlu0 %v16851_v8, %s17071_s30  ;;  %v17115_v21 = vld [vmem:[#allocation65_spill] sm:$0xff] }
 0x5f9   : > { %4218 = vrot.lane.b32.xlu1 %v10730_v50, %s17071_s30 }
 0x5fa   : > { %v11892_v56 = vpop.permute.xlu2 %4116 }
 0x5fb   : > { %17080 = vst [vmem:[#allocation261_spill] sm:$0xff] %v11892_v56  ;;  %v11894_v53 = vpop.permute.xlu1 %4102  ;;  %v11896_v44 = vpop.permute.xlu0 %4100 }
 0x600   : > { %4220 = vrot.lane.b32.xlu2 %v10727_v24, %s17071_s30  ;;  %4222 = vrot.lane.b32.xlu0 %v10715_v18, %s17071_s30 }
 0x601   : > { %4224 = vrot.lane.b32.xlu1 %v10786_v38, %s17071_s30 }
 0x602   : > { %v11904_v36 = vpop.permute.xlu2 %4122 }
 0x603   : > { %17081 = vst [vmem:[#allocation247_spill] sm:$0xff] %v11904_v36  ;;  %v11906_v8 = vpop.permute.xlu1 %4108  ;;  %v11908_v50 = vpop.permute.xlu0 %4106 }
 0x608   : > { %4226 = vrot.lane.b32.xlu2 %v10783_v60, %s17071_s30  ;;  %4228 = vrot.lane.b32.xlu0 %v16884_v37, %s17071_s30 }
 0x609   : > { %4230 = vrot.lane.b32.xlu1 %v10831_v47, %s17071_s30 }
 0x60a   : > { %v11916_v24 = vpop.permute.xlu2 %4128 }
 0x60b   : > { %17082 = vst [vmem:[#allocation250_spill] sm:$0xff] %v11916_v24  ;;  %v11918_v18 = vpop.permute.xlu1 %4114  ;;  %v11920_v38 = vpop.permute.xlu0 %4112 }
 0x60c   : > { %17083 = vst [vmem:[#allocation298_spill] sm:$0xff] %v11918_v18 }
 0x60d   : > { %17084 = vst [vmem:[#allocation299_spill] sm:$0xff] %v11920_v38 }
 0x610   : > { %4232 = vrot.lane.b32.xlu2 %v10828_v1, %s17071_s30  ;;  %4234 = vrot.lane.b32.xlu0 %v16882_v32, %s17071_s30 }
 0x611   : > { %4236 = vrot.lane.b32.xlu1 %v16901_v51, %s17071_s30 }
 0x612   : > { %v11928_v60 = vpop.permute.xlu2 %4134 }
 0x613   : > { %17085 = vst [vmem:[#allocation300_spill] sm:$0xff] %v11928_v60  ;;  %v11930_v37 = vpop.permute.xlu1 %4120  ;;  %v11932_v47 = vpop.permute.xlu0 %4118 }
 0x614   : > { %17086 = vst [vmem:[#allocation301_spill] sm:$0xff] %v11930_v37 }
 0x615   : > { %17087 = vst [vmem:[#allocation302_spill] sm:$0xff] %v11932_v47 }
 0x618   : > { %4238 = vrot.lane.b32.xlu2 %v16902_v9, %s17071_s30  ;;  %4240 = vrot.lane.b32.xlu0 %v10915_v41, %s17071_s30 }
 0x619   : > { %4242 = vrot.lane.b32.xlu1 %v10931_v22, %s17071_s30 }
 0x61a   : > { %v11940_v1 = vpop.permute.xlu2 %4140 }
 0x61b   : > { %17088 = vst [vmem:[#allocation303_spill] sm:$0xff] %v11940_v1  ;;  %v11942_v32 = vpop.permute.xlu1 %4126  ;;  %v11944_v51 = vpop.permute.xlu0 %4124 }
 0x61c   : > { %17089 = vst [vmem:[#allocation304_spill] sm:$0xff] %v11942_v32 }
 0x61d   : > { %17090 = vst [vmem:[#allocation305_spill] sm:$0xff] %v11944_v51 }
 0x620   : > { %4244 = vrot.lane.b32.xlu2 %v10928_v59, %s17071_s30  ;;  %4246 = vrot.lane.b32.xlu0 %v10918_v46, %s17071_s30 }
 0x621   : > { %4248 = vrot.lane.b32.xlu1 %v11544_v14, %s17071_s30 }
 0x622   : > { %v11952_v9 = vpop.permute.xlu2 %4146 }
 0x623   : > { %17091 = vst [vmem:[#allocation306_spill] sm:$0xff] %v11952_v9  ;;  %v11954_v41 = vpop.permute.xlu1 %4132  ;;  %v11956_v22 = vpop.permute.xlu0 %4130  ;;  %v17098_v9 = vld [vmem:[#allocation56_spill] sm:$0xff] }
 0x624   : > { %17092 = vst [vmem:[#allocation307_spill] sm:$0xff] %v11954_v41  ;;  %v17099_v1 = vrot.slane %v17098_v9, 7 }
 0x625   : > { %17093 = vst [vmem:[#allocation308_spill] sm:$0xff] %v11956_v22 }
 0x626   : > { %v11973_v60 = vsel %vm665_vm1, 0.0, %v17099_v1 }
 0x627   : > { %17100 = vst [vmem:[#allocation56_spill] sm:$0xff] %v11973_v60  ;;  %v905_v41 = vrot.slane %v11973_v60, 1  ;;  %v1050_v1 = vrot.slane %v11973_v60, 2 }
 0x628   : > { %4250 = vrot.lane.b32.xlu2 %v11553_v2, %s17071_s30  ;;  %4282 = vrot.lane.b32.xlu0 %v16964_v7, %s17094_s13  ;;  %v17101_v2 = vld [vmem:[#allocation60_spill] sm:$0xff] }
 0x629   : > { %4284 = vrot.lane.b32.xlu1 %v16969_v54, %s17094_s13  ;;  %v906_v22 = vrot.slane %v17101_v2, 1 }
 0x62a   : > { %v11964_v59 = vpop.permute.xlu2 %4152 }
 0x62b   : > { %17095 = vst [vmem:[#allocation309_spill] sm:$0xff] %v11964_v59  ;;  %v11966_v46 = vpop.permute.xlu1 %4138  ;;  %v11968_v14 = vpop.permute.xlu0 %4136  ;;  %v1051_v59 = vrot.slane %v17101_v2, 2 }
 0x62c   : > { %17096 = vst [vmem:[#allocation310_spill] sm:$0xff] %v11966_v46  ;;  %v11992_v46 = vsel %vm864_vm2, %v905_v41, %v906_v22 }
 0x62d   : > { %17097 = vst [vmem:[#allocation311_spill] sm:$0xff] %v11968_v14 }
 0x62e   : > { %17105 = vst [vmem:[#allocation315_spill] sm:$0xff] %v11992_v46 }
 0x630   : > { %4286 = vrot.lane.b32.xlu2 %v16968_v10, %s17094_s13  ;;  %4288 = vrot.lane.b32.xlu0 %v16970_v31, %s17094_s13  ;;  %v17106_v10 = vld [vmem:[#allocation57_spill] sm:$0xff] }
 0x631   : > { %4290 = vrot.lane.b32.xlu1 %v16975_v28, %s17094_s13  ;;  %v17107_v14 = vrot.slane %v17106_v10, 7  ;;  %v993_v28 = vadd.f32 %v11992_v46, %v11973_v60 }
 0x632   : > { %v11983_v54 = vpop.permute.xlu2 %4158 }
 0x633   : > { %17102 = vst [vmem:[#allocation312_spill] sm:$0xff] %v11983_v54  ;;  %v11985_v7 = vpop.permute.xlu1 %4144  ;;  %v11987_v9 = vpop.permute.xlu0 %4142  ;;  %v791_v31 = vsel %vm665_vm1, %v17107_v14, 0.0  ;;  %v12000_v54 = vsel %vm1009_vm3, %v1050_v1, %v1051_v59 }
 0x634   : > { %17103 = vst [vmem:[#allocation313_spill] sm:$0xff] %v11985_v7  ;;  %v908_v24 = vrot.slane %v791_v31, 1  ;;  %v17109_v7 = vld [vmem:[#allocation64_spill] sm:$0xff]  ;;  %v1138_v10 = vadd.f32 %v12000_v54, %v993_v28 }
 0x635   : > { %17104 = vst [vmem:[#allocation314_spill] sm:$0xff] %v11987_v9  ;;  %v17110_v41 = vrot.slane %v17109_v7, 7 }
 0x636   : > { %17108 = vst [vmem:[#allocation57_spill] sm:$0xff] %v12000_v54 }
 0x637   : > { %v12009_v9 = vsel %vm665_vm1, 0.0, %v17110_v41  ;;  %v911_v41 = vrot.slane %v17115_v21, 1 }
 0x638   : > { %4292 = vrot.lane.b32.xlu2 %v16974_v0, %s17094_s13  ;;  %4294 = vrot.lane.b32.xlu0 %v16976_v62, %s17094_s13  ;;  %17111 = vst [vmem:[#allocation64_spill] sm:$0xff] %v12009_v9  ;;  %v12021_v0 = vsel %vm864_vm2, %v906_v22, %v908_v24  ;;  %v1053_v62 = vrot.slane %v791_v31, 2  ;;  %v910_v7 = vrot.slane %v12009_v9, 1  ;;  %v1056_v24 = vrot.slane %v17115_v21, 2  ;;  %v17118_v22 = vld [vmem:[#allocation154_spill] sm:$0xff] }
 0x639   : > { %4296 = vrot.lane.b32.xlu1 %v16981_v33, %s17094_s13  ;;  %17114 = vst [vmem:[#allocation318_spill] sm:$0xff] %v12021_v0  ;;  %v994_v51 = vadd.f32 %v12021_v0, %v17101_v2  ;;  %v1170_v33 = vadd.f32 %v1138_v10, %v12009_v9  ;;  %v17119_v31 = vld [vmem:[#allocation266_spill] sm:$0xff] }
 0x63a   : > { %v12013_v14 = vpop.permute.xlu2 %4196  ;;  %v12029_v36 = vsel %vm1009_vm3, %v1051_v59, %v1053_v62  ;;  %v12032_v28 = vsel %vm864_vm2, %v910_v7, %v911_v41  ;;  %v17122_v59 = vld [vmem:[#allocation148_spill] sm:$0xff]  ;;  %v17123_v7 = vld [vmem:[#allocation5_spill] sm:$0xff] }
 0x63b   : > { %v12016_v1 = vpop.permute.xlu1 %4150  ;;  %v12018_v32 = vpop.permute.xlu0 %4148  ;;  %17116 = vst [vmem:[#allocation319_spill] sm:$0xff] %v12029_v36  ;;  %v17124_v2 = vrot.slane %v17123_v7, 7  ;;  %v1139_v46 = vadd.f32 %v12029_v36, %v994_v51  ;;  %v916_v7 = vrot.slane %v17128_v34, 1  ;;  %v995_v51 = vadd.f32 %v12032_v28, %v12009_v9  ;;  %v17131_v36 = vld [vmem:[#allocation9_spill] sm:$0xff] }
 0x63c   : > { %17112 = vst [vmem:[#allocation316_spill] sm:$0xff] %v12016_v1  ;;  %v1055_v1 = vrot.slane %v12009_v9, 2  ;;  %v17132_v4 = vrot.slane %v17131_v36, 7 }
 0x63d   : > { %17113 = vst [vmem:[#allocation317_spill] sm:$0xff] %v12018_v32  ;;  %v17120_v32 = vld [vmem:[#allocation8_spill] sm:$0xff]  ;;  %v792_v54 = vsel %vm665_vm1, %v17124_v2, 0.0  ;;  %v1171_v2 = vadd.f32 %v1139_v46, %v17115_v21  ;;  %v17133_v46 = vld [vmem:[#allocation123_spill] sm:$0xff] }
 0x63e   : > { %17117 = vst [vmem:[#allocation320_spill] sm:$0xff] %v12032_v28  ;;  %v17121_v0 = vrot.slane %v17120_v32, 7  ;;  %v913_v5 = vrot.slane %v792_v54, 1  ;;  %v793_v56 = vsel %vm665_vm1, %v17132_v4, 0.0  ;;  %v1394_v4 = vld [vmem:[%s15682_s3] sm:$0xff] }
 0x63f   : > { %v918_v61 = vrot.slane %v793_v56, 1  ;;  %7327 = vmatpush.msra.mxu3 %v1394_v4  ;;  %1510 = vmatpush.msra.mxu1 %v1394_v4 }
 0x640   : > { %4298 = vrot.lane.b32.xlu2 %v17118_v22, %s17094_s13  ;;  %4300 = vrot.lane.b32.xlu0 %v17119_v31, %s17094_s13  ;;  %v776_v10 = vsel %vm665_vm1, 0.0, %v17121_v0  ;;  %v1211_v31 = vadd.f32 %v1170_v33, %v12032_v28  ;;  %v12057_v0 = vsel %vm1009_vm3, %v1055_v1, %v1056_v24  ;;  %v17130_v33 = vld [vmem:[#allocation273_spill] sm:$0xff]  ;;  %v12079_v9 = vsel %vm864_vm2, %v911_v41, %v913_v5 }
 0x641   : > { %4302 = vrot.lane.b32.xlu1 %v17122_v59, %s17094_s13  ;;  %v915_v32 = vrot.slane %v776_v10, 1  ;;  %17127 = vst [vmem:[#allocation8_spill] sm:$0xff] %v12057_v0  ;;  %v1060_v37 = vrot.slane %v776_v10, 2  ;;  %v1212_v36 = vadd.f32 %v1171_v2, %v12079_v9  ;;  %v4722_v5 = vld [vmem:[%s15686_s7 + $0x40] sm:$0xff] }
 0x642   : > { %v12045_v62 = vpop.permute.xlu2 %4202  ;;  %v1250_v59 = vadd.f32 %v1211_v31, %v12057_v0  ;;  %v1061_v31 = vrot.slane %v17128_v34, 2  ;;  %17135 = vst [vmem:[#allocation5_spill] sm:$0xff] %v12079_v9  ;;  %4830 = vmatpush.msrb.mxu3 %v4722_v5 }
 0x643   : > { %v12051_v60 = vpop.permute.xlu1 %4156  ;;  %v12053_v22 = vpop.permute.xlu0 %4154  ;;  %v917_v1 = vsel %vm864_vm2, %v915_v32, %v916_v7 }
 0x644   : > { %17125 = vst [vmem:[#allocation154_spill] sm:$0xff] %v12051_v60  ;;  %v1282_v47 = vadd.f32 %v1250_v59, %v776_v10  ;;  %v17129_v60 = vld [vmem:[#allocation112_spill] sm:$0xff] }
 0x645   : > { %17126 = vst [vmem:[#allocation266_spill] sm:$0xff] %v12053_v22  ;;  %v1058_v22 = vrot.slane %v792_v54, 2 }
 0x646   : > { %v1314_v59 = vadd.f32 %v1282_v47, %v917_v1  ;;  %v997_v47 = vadd.f32 %v917_v1, %v776_v10 }
 0x647   : > { %v12094_v41 = vsel %vm1009_vm3, %v1056_v24, %v1058_v22 }
 0x648   : > { %4304 = vrot.lane.b32.xlu2 %v17129_v60, %s17094_s13  ;;  %4306 = vrot.lane.b32.xlu0 %v17130_v33, %s17094_s13  ;;  %v1062_v60 = vsel %vm1009_vm3, %v1060_v37, %v1061_v31  ;;  %17136 = vst [vmem:[#allocation14_spill] sm:$0xff] %v12094_v41  ;;  %v1251_v52 = vadd.f32 %v1212_v36, %v12094_v41 }
 0x649   : > { %4308 = vrot.lane.b32.xlu1 %v17133_v46, %s17094_s13  ;;  %v1346_v54 = vadd.f32 %v1314_v59, %v1062_v60  ;;  %v1140_v46 = vadd.f32 %v12057_v0, %v995_v51  ;;  %v1063_v59 = vrot.slane %v793_v56, 2  ;;  %v1142_v2 = vadd.f32 %v1062_v60, %v997_v47  ;;  %v17139_v0 = vld [vmem:[#allocation198_spill] sm:$0xff] }
 0x64a   : > { %v12075_v28 = vpop.permute.xlu2 %4208  ;;  %v919_v56 = vsel %vm864_vm2, %v916_v7, %v918_v61  ;;  %v1283_v36 = vadd.f32 %v1251_v52, %v17128_v34 }
 0x64b   : > { %17134 = vst [vmem:[#allocation148_spill] sm:$0xff] %v12075_v28  ;;  %v12081_v33 = vpop.permute.xlu1 %4194  ;;  %v12083_v32 = vpop.permute.xlu0 %4192  ;;  %v1378_v37 = vmul.f32 0.11111111, %v1346_v54  ;;  %v1172_v18 = vadd.f32 %v1140_v46, %v776_v10  ;;  %v17137_v28 = vld [vmem:[#allocation17_spill] sm:$0xff]  ;;  %v17140_v54 = vld [vmem:[#allocation276_spill] sm:$0xff]  ;;  %v17141_v10 = vld [vmem:[#allocation195_spill] sm:$0xff]  ;;  %v1064_v4 = vsel %vm1009_vm3, %v1061_v31, %v1063_v59  ;;  %v998_v61 = vadd.f32 %v919_v56, %v17128_v34 }
 0x64c   : > { %v17138_v38 = vrot.slane %v17137_v28, 7  ;;  %v1315_v46 = vadd.f32 %v1283_v36, %v919_v56  ;;  %v17144_v59 = vld [vmem:[#allocation194_spill] sm:$0xff] }
 0x64d   : > { %7207 = vmatmul.msk.f32.vlgmr.msra.gmra.mxu3 %vm422_vm0, %v1378_v37  ;;  %v1213_v22 = vadd.f32 %v1172_v18, %v917_v1  ;;  %v996_v18 = vadd.f32 %v12079_v9, %v17115_v21  ;;  %v1143_v37 = vadd.f32 %v1064_v4, %v998_v61 }
 0x64e   : > { %v777_v51 = vsel %vm665_vm1, 0.0, %v17138_v38  ;;  %v1347_v7 = vadd.f32 %v1315_v46, %v1064_v4 }
 0x64f   : > { %v1174_v24 = vadd.f32 %v1142_v2, %v777_v51  ;;  %v1252_v38 = vadd.f32 %v1213_v22, %v1062_v60  ;;  %v920_v5 = vrot.slane %v777_v51, 1  ;;  %v1065_v1 = vrot.slane %v777_v51, 2  ;;  %v17143_v2 = vld [vmem:[#allocation24_spill] sm:$0xff]  ;;  %v17145_v22 = vld [vmem:[#allocation189_spill] sm:$0xff] }
 0x650   : > { %4310 = vrot.lane.b32.xlu2 %v17139_v0, %s17094_s13  ;;  %4312 = vrot.lane.b32.xlu0 %v17140_v54, %s17094_s13  ;;  %v1141_v52 = vadd.f32 %v12094_v41, %v996_v18  ;;  %v921_v60 = vrot.slane %v17143_v2, 1  ;;  %v1379_v54 = vmul.f32 0.11111111, %v1347_v7  ;;  %v1175_v36 = vadd.f32 %v1143_v37, %v17143_v2  ;;  %v17146_v18 = vld [vmem:[#allocation19_spill] sm:$0xff] }
 0x651   : > { %4314 = vrot.lane.b32.xlu1 %v17141_v10, %s17094_s13  ;;  %v1284_v31 = vadd.f32 %v1252_v38, %v777_v51  ;;  %v1066_v9 = vrot.slane %v17143_v2, 2  ;;  %v17147_v61 = vrot.slane %v17146_v18, 7 }
 0x652   : > { %v12109_v28 = vpop.permute.xlu2 %4214  ;;  %v1173_v10 = vadd.f32 %v1141_v52, %v17128_v34  ;;  %v922_v46 = vsel %vm864_vm2, %v920_v5, %v921_v60 }
 0x653   : > { %17142 = vst [vmem:[#allocation112_spill] sm:$0xff] %v12109_v28  ;;  %v12112_v47 = vpop.permute.xlu1 %4200  ;;  %v12114_v0 = vpop.permute.xlu0 %4198  ;;  %v794_v41 = vsel %vm665_vm1, %v17147_v61, 0.0  ;;  %v1316_v38 = vadd.f32 %v1284_v31, %v922_v46  ;;  %v1067_v34 = vsel %vm1009_vm3, %v1065_v1, %v1066_v9  ;;  %v4721_v61 = vld [vmem:[%s15686_s7 + $0x38] sm:$0xff] }
 0x654   : > { %4831 = vmatpush.msrb.mxu3 %v4721_v61  ;;  %v1068_v21 = vrot.slane %v794_v41, 2 }
 0x655   : > { %7208 = vmatmul.msk.f32.gmra.mxu3 %vm422_vm0, %v1379_v54  ;;  %v1348_v37 = vadd.f32 %v1316_v38, %v1067_v34  ;;  %v1215_v54 = vadd.f32 %v1174_v24, %v922_v46  ;;  %v17151_v38 = vld [vmem:[#allocation209_spill] sm:$0xff] }
 0x657   : > { %v1380_v31 = vmul.f32 0.11111111, %v1348_v37  ;;  %v1254_v28 = vadd.f32 %v1215_v54, %v1067_v34 }
 0x658   : > { %4316 = vrot.lane.b32.xlu2 %v17144_v59, %s17094_s13  ;;  %4318 = vrot.lane.b32.xlu0 %v17145_v22, %s17094_s13  ;;  %v1214_v59 = vadd.f32 %v1173_v10, %v919_v56  ;;  %v923_v22 = vrot.slane %v794_v41, 1  ;;  %v17149_v56 = vld [vmem:[#allocation26_spill] sm:$0xff] }
 0x659   : > { %4320 = vrot.lane.b32.xlu1 %v17005_v39, %s17094_s13  ;;  %v999_v39 = vadd.f32 %v922_v46, %v777_v51  ;;  %v17150_v10 = vrot.slane %v17149_v56, 7  ;;  %v1069_v46 = vsel %vm1009_vm3, %v1066_v9, %v1068_v21  ;;  %v17156_v56 = vld [vmem:[#allocation28_spill] sm:$0xff]  ;;  %v17158_v21 = vld [vmem:[#allocation150_spill] sm:$0xff] }
 0x65a   : > { %v12135_v7 = vpop.permute.xlu2 %4220  ;;  %v1253_v18 = vadd.f32 %v1214_v59, %v1064_v4  ;;  %v17152_v4 = vld [vmem:[#allocation138_spill] sm:$0xff]  ;;  %v924_v51 = vsel %vm864_vm2, %v921_v60, %v923_v22 }
 0x65b   : > { %17148 = vst [vmem:[#allocation273_spill] sm:$0xff] %v12135_v7  ;;  %v12138_v52 = vpop.permute.xlu1 %4206  ;;  %v12140_v5 = vpop.permute.xlu0 %4204  ;;  %v1144_v7 = vadd.f32 %v1067_v34, %v999_v39  ;;  %v778_v1 = vsel %vm665_vm1, 0.0, %v17150_v10  ;;  %v1216_v39 = vadd.f32 %v1175_v36, %v924_v51  ;;  %v17157_v10 = vld [vmem:[#allocation275_spill] sm:$0xff] }
 0x65c   : > { %v1285_v55 = vadd.f32 %v1253_v18, %v17143_v2  ;;  %v925_v61 = vrot.slane %v778_v1, 1  ;;  %v1070_v22 = vrot.slane %v778_v1, 2  ;;  %v17159_v36 = vld [vmem:[#allocation27_spill] sm:$0xff] }
 0x65d   : > { %v1176_v59 = vadd.f32 %v1144_v7, %v778_v1  ;;  %7209 = vmatmul.msk.f32.gmra.mxu3 %vm422_vm0, %v1380_v31  ;;  %v1000_v7 = vadd.f32 %v924_v51, %v17143_v2  ;;  %v926_v31 = vrot.slane %v17156_v56, 1  ;;  %v1071_v2 = vrot.slane %v17156_v56, 2 }
 0x65e   : > { %v1317_v41 = vadd.f32 %v1285_v55, %v924_v51  ;;  %v1286_v55 = vadd.f32 %v1254_v28, %v778_v1  ;;  %v4720_v28 = vld [vmem:[%s15686_s7 + $0x30] sm:$0xff] }
 0x65f   : > { %v1145_v54 = vadd.f32 %v1069_v46, %v1000_v7  ;;  %4832 = vmatpush.msrb.mxu3 %v4720_v28  ;;  %v17165_v28 = vld [vmem:[#allocation211_spill] sm:$0xff] }
 0x660   : > { %4322 = vrot.lane.b32.xlu2 %v17151_v38, %s17094_s13  ;;  %4324 = vrot.lane.b32.xlu0 %v17152_v4, %s17094_s13  ;;  %v1349_v18 = vadd.f32 %v1317_v41, %v1069_v46  ;;  %v927_v38 = vsel %vm864_vm2, %v925_v61, %v926_v31  ;;  %v17160_v4 = vrot.slane %v17159_v36, 7  ;;  %v17161_v41 = vld [vmem:[#allocation228_spill] sm:$0xff] }
 0x661   : > { %4326 = vrot.lane.b32.xlu1 %v17011_v16, %s17094_s13  ;;  %v1255_v16 = vadd.f32 %v1216_v39, %v1069_v46  ;;  %v1177_v9 = vadd.f32 %v1145_v54, %v17156_v56  ;;  %v1318_v46 = vadd.f32 %v1286_v55, %v927_v38  ;;  %v1217_v36 = vadd.f32 %v1176_v59, %v927_v38 }
 0x662   : > { %v12157_v24 = vpop.permute.xlu2 %4226  ;;  %v1381_v60 = vmul.f32 0.11111111, %v1349_v18  ;;  %v795_v51 = vsel %vm665_vm1, %v17160_v4, 0.0  ;;  %v1072_v18 = vsel %vm1009_vm3, %v1070_v22, %v1071_v2 }
 0x663   : > { %17153 = vst [vmem:[#allocation9_spill] sm:$0xff] %v12157_v24  ;;  %v12160_v34 = vpop.permute.xlu1 %4212  ;;  %v12162_v37 = vpop.permute.xlu0 %4210  ;;  %v1350_v39 = vadd.f32 %v1318_v46, %v1072_v18  ;;  %v928_v54 = vrot.slane %v795_v51, 1  ;;  %v1256_v24 = vadd.f32 %v1217_v36, %v1072_v18  ;;  %v1287_v22 = vadd.f32 %v1255_v16, %v17156_v56  ;;  %v17168_v36 = vld [vmem:[#allocation34_spill] sm:$0xff] }
 0x664   : > { %17154 = vst [vmem:[#allocation123_spill] sm:$0xff] %v12160_v34  ;;  %v17163_v34 = vld [vmem:[#allocation32_spill] sm:$0xff] }
 0x665   : > { %17155 = vst [vmem:[#allocation17_spill] sm:$0xff] %v12162_v37  ;;  %7210 = vmatmul.msk.f32.gmra.mxu3 %vm422_vm0, %v1381_v60  ;;  %v1382_v4 = vmul.f32 0.11111111, %v1350_v39  ;;  %v1073_v60 = vrot.slane %v795_v51, 2  ;;  %v17164_v37 = vrot.slane %v17163_v34, 7 }
 0x667   : > { %v779_v55 = vsel %vm665_vm1, 0.0, %v17164_v37  ;;  %v1074_v34 = vsel %vm1009_vm3, %v1071_v2, %v1073_v60 }
 0x668   : > { %4328 = vrot.lane.b32.xlu2 %v17157_v10, %s17094_s13  ;;  %4330 = vrot.lane.b32.xlu0 %v17158_v21, %s17094_s13  ;;  %v1001_v21 = vadd.f32 %v927_v38, %v778_v1  ;;  %v929_v1 = vsel %vm864_vm2, %v926_v31, %v928_v54  ;;  %v930_v51 = vrot.slane %v779_v55, 1  ;;  %v4719_v31 = vld [vmem:[%s15686_s7 + $0x28] sm:$0xff]  ;;  %v1288_v60 = vadd.f32 %v1256_v24, %v779_v55 }
 0x669   : > { %4332 = vrot.lane.b32.xlu1 %v17161_v41, %s17094_s13  ;;  %v1319_v59 = vadd.f32 %v1287_v22, %v929_v1  ;;  %4833 = vmatpush.msrb.mxu3 %v4719_v31  ;;  %v17169_v22 = vld [vmem:[#allocation33_spill] sm:$0xff] }
 0x66a   : > { %v12187_v10 = vpop.permute.xlu2 %4232  ;;  %v1146_v41 = vadd.f32 %v1072_v18, %v1001_v21  ;;  %v1002_v18 = vadd.f32 %v929_v1, %v17156_v56 }
 0x66b   : > { %v12183_v61 = vpop.permute.xlu1 %4218  ;;  %v12185_v7 = vpop.permute.xlu0 %4216  ;;  %17162 = vst [vmem:[#allocation198_spill] sm:$0xff] %v12187_v10  ;;  %v1351_v38 = vadd.f32 %v1319_v59, %v1074_v34 }
 0x66c   : > { %v1178_v46 = vadd.f32 %v1146_v41, %v779_v55  ;;  %v1147_v21 = vadd.f32 %v1074_v34, %v1002_v18  ;;  %v1076_v41 = vrot.slane %v17168_v36, 2 }
 0x66d   : > { %7211 = vmatmul.msk.f32.gmra.mxu3 %vm422_vm0, %v1382_v4  ;;  %v1383_v39 = vmul.f32 0.11111111, %v1351_v38  ;;  %v931_v4 = vrot.slane %v17168_v36, 1 }
 0x66e   : > { %v1179_v56 = vadd.f32 %v1147_v21, %v17168_v36 }
 0x670   : > { %4334 = vrot.lane.b32.xlu2 %v17165_v28, %s17094_s13  ;;  %4336 = vrot.lane.b32.xlu0 %v10991_v20, %s17094_s13  ;;  %v1218_v20 = vadd.f32 %v1177_v9, %v929_v1  ;;  %v932_v9 = vsel %vm864_vm2, %v930_v51, %v931_v4  ;;  %v17170_v28 = vrot.slane %v17169_v22, 7 }
 0x671   : > { %4338 = vrot.lane.b32.xlu1 %v11692_v12, %s17094_s13  ;;  %v1075_v12 = vrot.slane %v779_v55, 2  ;;  %v1320_v24 = vadd.f32 %v1288_v60, %v932_v9  ;;  %v1003_v51 = vadd.f32 %v932_v9, %v779_v55  ;;  %v1219_v18 = vadd.f32 %v1178_v46, %v932_v9 }
 0x672   : > { %v12210_v54 = vpop.permute.xlu2 %4238  ;;  %v1257_v2 = vadd.f32 %v1218_v20, %v1074_v34  ;;  %v796_v1 = vsel %vm665_vm1, %v17170_v28, 0.0  ;;  %v17173_v28 = vld [vmem:[#allocation38_spill] sm:$0xff] }
 0x673   : > { %v12202_v37 = vpop.permute.xlu1 %4224  ;;  %v12204_v16 = vpop.permute.xlu0 %4222  ;;  %17167 = vst [vmem:[#allocation195_spill] sm:$0xff] %v12210_v54  ;;  %v933_v38 = vrot.slane %v796_v1, 1  ;;  %v1078_v31 = vrot.slane %v796_v1, 2  ;;  %v17174_v54 = vrot.slane %v17173_v28, 7  ;;  %v17181_v28 = vld [vmem:[#allocation246_spill] sm:$0xff] }
 0x674   : > { %17166 = vst [vmem:[#allocation276_spill] sm:$0xff] %v12202_v37  ;;  %v17253_v37 = vld [vmem:[#allocation11_spill] sm:$0xff] }
 0x675   : > { %7212 = vmatmul.msk.f32.gmra.mxu3 %vm422_vm0, %v1383_v39  ;;  %v1289_v39 = vadd.f32 %v1257_v2, %v17168_v36  ;;  %v934_v46 = vsel %vm864_vm2, %v931_v4, %v933_v38  ;;  %v4718_v4 = vld [vmem:[%s15686_s7 + $0x20] sm:$0xff] }
 0x676   : > { %4834 = vmatpush.msrb.mxu3 %v4718_v4 }
 0x677   : > { %v1321_v9 = vadd.f32 %v1289_v39, %v934_v46 }
 0x678   : > { %4340 = vrot.lane.b32.xlu2 %v11695_v42, %s17094_s13  ;;  %4372 = vrot.lane.b32.xlu0 %v11031_v29, %s8062_s25  ;;  %v1077_v42 = vsel %vm1009_vm3, %v1075_v12, %v1076_v41  ;;  %v17176_v12 = vld [vmem:[#allocation156_spill] sm:$0xff]  ;;  %s8065_s13 = smov 96  }
 0x679   : > { %4374 = vrot.lane.b32.xlu1 %v17024_v43, %s8062_s25  ;;  %v1352_v34 = vadd.f32 %v1320_v24, %v1077_v42  ;;  %v1148_v21 = vadd.f32 %v1077_v42, %v1003_v51  ;;  %v1258_v22 = vadd.f32 %v1219_v18, %v1077_v42  ;;  %v780_v43 = vsel %vm665_vm1, 0.0, %v17174_v54 }
 0x67a   : > { %v12235_v60 = vpop.permute.xlu2 %4244  ;;  %v1079_v54 = vsel %vm1009_vm3, %v1076_v41, %v1078_v31  ;;  %v1004_v42 = vadd.f32 %v934_v46, %v17168_v36  ;;  %v1080_v38 = vrot.slane %v780_v43, 2 }
 0x67b   : > { %v12227_v59 = vpop.permute.xlu1 %4230  ;;  %v12229_v29 = vpop.permute.xlu0 %4228  ;;  %v1384_v20 = vmul.f32 0.11111111, %v1352_v34  ;;  %17175 = vst [vmem:[#allocation189_spill] sm:$0xff] %v12235_v60  ;;  %v1180_v55 = vadd.f32 %v1148_v21, %v780_v43  ;;  %v1353_v24 = vadd.f32 %v1321_v9, %v1079_v54  ;;  %v1290_v31 = vadd.f32 %v1258_v22, %v780_v43  ;;  %v17180_v21 = vld [vmem:[#allocation227_spill] sm:$0xff] }
 0x67c   : > { %17171 = vst [vmem:[#allocation24_spill] sm:$0xff] %v12227_v59  ;;  %v1149_v51 = vadd.f32 %v1079_v54, %v1004_v42 }
 0x67d   : > { %17172 = vst [vmem:[#allocation194_spill] sm:$0xff] %v12229_v29  ;;  %7213 = vmatmul.msk.f32.gmra.mxu3 %vm422_vm0, %v1384_v20  ;;  %v1385_v34 = vmul.f32 0.11111111, %v1353_v24  ;;  %v17179_v20 = vld [vmem:[#allocation40_spill] sm:$0xff] }
 0x67e   : > { %v936_v41 = vrot.slane %v17179_v20, 1  ;;  %v1181_v36 = vadd.f32 %v1149_v51, %v17179_v20  ;;  %v1081_v39 = vrot.slane %v17179_v20, 2 }
 0x680   : > { %4376 = vrot.lane.b32.xlu2 %v17028_v3, %s8062_s25  ;;  %4378 = vrot.lane.b32.xlu0 %v11072_v45, %s8062_s25  ;;  %v935_v3 = vrot.slane %v780_v43, 1  ;;  %v1220_v45 = vadd.f32 %v1179_v56, %v934_v46  ;;  %v17182_v46 = vld [vmem:[#allocation39_spill] sm:$0xff]  ;;  %v1082_v42 = vsel %vm1009_vm3, %v1080_v38, %v1081_v39  ;;  %v17190_v38 = vld [vmem:[#allocation278_spill] sm:$0xff] }
 0x681   : > { %4380 = vrot.lane.b32.xlu1 %v17176_v12, %s8062_s25  ;;  %v17183_v12 = vrot.slane %v17182_v46, 7 }
 0x682   : > { %v1259_v18 = vadd.f32 %v1220_v45, %v1079_v54  ;;  %v937_v56 = vsel %vm864_vm2, %v935_v3, %v936_v41  ;;  %v17184_v54 = vld [vmem:[#allocation182_spill] sm:$0xff]  ;;  %v12268_v24 = vpop.permute.xlu2 %4250 }
 0x683   : > { %v12246_v2 = vpop.permute.xlu1 %4236  ;;  %v12248_v1 = vpop.permute.xlu0 %4234  ;;  %v797_v9 = vsel %vm665_vm1, %v17183_v12, 0.0  ;;  %v1322_v22 = vadd.f32 %v1290_v31, %v937_v56  ;;  %17185 = vst [vmem:[#allocation209_spill] sm:$0xff] %v12268_v24  ;;  %v17191_v24 = vld [vmem:[#allocation242_spill] sm:$0xff] }
 0x684   : > { %17177 = vst [vmem:[#allocation19_spill] sm:$0xff] %v12246_v2  ;;  %v938_v51 = vrot.slane %v797_v9, 1  ;;  %v1083_v12 = vrot.slane %v797_v9, 2  ;;  %v1291_v31 = vadd.f32 %v1259_v18, %v17179_v20 }
 0x685   : > { %17178 = vst [vmem:[#allocation26_spill] sm:$0xff] %v12248_v1  ;;  %7214 = vmatmul.msk.f32.gmra.mxu3 %vm422_vm0, %v1385_v34  ;;  %v1354_v3 = vadd.f32 %v1322_v22, %v1082_v42 }
 0x686   : > { %v1084_v9 = vsel %vm1009_vm3, %v1081_v39, %v1083_v12  ;;  %v17195_v12 = vld [vmem:[#allocation46_spill] sm:$0xff] }
 0x687   : > { %v1386_v46 = vmul.f32 0.11111111, %v1354_v3 }
 0x688   : > { %4382 = vrot.lane.b32.xlu2 %v17180_v21, %s8062_s25  ;;  %4384 = vrot.lane.b32.xlu0 %v17181_v28, %s8062_s25  ;;  %v1005_v21 = vadd.f32 %v937_v56, %v780_v43  ;;  %v1221_v28 = vadd.f32 %v1180_v55, %v937_v56  ;;  %v939_v43 = vsel %vm864_vm2, %v936_v41, %v938_v51  ;;  %v17192_v55 = vld [vmem:[#allocation174_spill] sm:$0xff]  ;;  %v4717_v41 = vld [vmem:[%s15686_s7 + $0x18] sm:$0xff] }
 0x689   : > { %4386 = vrot.lane.b32.xlu1 %v17184_v54, %s8062_s25  ;;  %v17188_v54 = vld [vmem:[#allocation44_spill] sm:$0xff]  ;;  %v1323_v56 = vadd.f32 %v1291_v31, %v939_v43  ;;  %4835 = vmatpush.msrb.mxu3 %v4717_v41 }
 0x68a   : > { %v1150_v60 = vadd.f32 %v1082_v42, %v1005_v21  ;;  %v1260_v2 = vadd.f32 %v1221_v28, %v1082_v42  ;;  %v17189_v1 = vrot.slane %v17188_v54, 7  ;;  %v12292_v21 = vpop.permute.xlu2 %4286  ;;  %v941_v54 = vrot.slane %v17195_v12, 1 }
 0x68b   : > { %v12271_v45 = vpop.permute.xlu1 %4242  ;;  %v12273_v4 = vpop.permute.xlu0 %4240  ;;  %v1355_v42 = vadd.f32 %v1323_v56, %v1084_v9  ;;  %v17198_v56 = vld [vmem:[#allocation45_spill] sm:$0xff] }
 0x68c   : > { %17186 = vst [vmem:[#allocation138_spill] sm:$0xff] %v12271_v45  ;;  %v781_v34 = vsel %vm665_vm1, 0.0, %v17189_v1 }
 0x68d   : > { %17187 = vst [vmem:[#allocation28_spill] sm:$0xff] %v12273_v4  ;;  %v1182_v22 = vadd.f32 %v1150_v60, %v781_v34  ;;  %7215 = vmatmul.msk.f32.gmra.mxu3 %vm422_vm0, %v1386_v46  ;;  %v940_v3 = vrot.slane %v781_v34, 1  ;;  %v1006_v60 = vadd.f32 %v939_v43, %v17179_v20  ;;  %v1387_v51 = vmul.f32 0.11111111, %v1355_v42 }
 0x68e   : > { %v1085_v28 = vrot.slane %v781_v34, 2  ;;  %v1292_v31 = vadd.f32 %v1260_v2, %v781_v34  ;;  %v17199_v42 = vrot.slane %v17198_v56, 7 }
 0x68f   : > { %v1151_v46 = vadd.f32 %v1084_v9, %v1006_v60 }
 0x690   : > { %4388 = vrot.lane.b32.xlu2 %v17190_v38, %s8062_s25  ;;  %4390 = vrot.lane.b32.xlu0 %v17191_v24, %s8062_s25  ;;  %v1222_v24 = vadd.f32 %v1181_v36, %v939_v43  ;;  %v17196_v38 = vld [vmem:[#allocation238_spill] sm:$0xff]  ;;  %v942_v36 = vsel %vm864_vm2, %v940_v3, %v941_v54  ;;  %v1086_v43 = vrot.slane %v17195_v12, 2  ;;  %v798_v60 = vsel %vm665_vm1, %v17199_v42, 0.0 }
 0x691   : > { %4392 = vrot.lane.b32.xlu1 %v17192_v55, %s8062_s25  ;;  %v17197_v55 = vld [vmem:[#allocation251_spill] sm:$0xff]  ;;  %v1183_v20 = vadd.f32 %v1151_v46, %v17195_v12  ;;  %v1324_v2 = vadd.f32 %v1292_v31, %v942_v36  ;;  %v943_v3 = vrot.slane %v798_v60, 1  ;;  %v1088_v56 = vrot.slane %v798_v60, 2 }
 0x692   : > { %v1261_v39 = vadd.f32 %v1222_v24, %v1084_v9  ;;  %v17200_v9 = vld [vmem:[#allocation252_spill] sm:$0xff]  ;;  %v1087_v24 = vsel %vm1009_vm3, %v1085_v28, %v1086_v43  ;;  %v12317_v45 = vpop.permute.xlu2 %4292  ;;  %v17202_v28 = vld [vmem:[#allocation241_spill] sm:$0xff] }
 0x693   : > { %v12288_v1 = vpop.permute.xlu1 %4248  ;;  %v12290_v18 = vpop.permute.xlu0 %4246  ;;  %v1356_v46 = vadd.f32 %v1324_v2, %v1087_v24  ;;  %v944_v31 = vsel %vm864_vm2, %v941_v54, %v943_v3  ;;  %v17203_v2 = vld [vmem:[#allocation51_spill] sm:$0xff] }
 0x694   : > { %17193 = vst [vmem:[#allocation275_spill] sm:$0xff] %v12288_v1  ;;  %v1223_v1 = vadd.f32 %v1182_v22, %v942_v36  ;;  %v17204_v10 = vrot.slane %v17203_v2, 7  ;;  %v17205_v22 = vld [vmem:[#allocation192_spill] sm:$0xff] }
 0x695   : > { %17194 = vst [vmem:[#allocation150_spill] sm:$0xff] %v12290_v18  ;;  %7216 = vmatmul.msk.f32.gmra.mxu3 %vm422_vm0, %v1387_v51  ;;  %v1388_v18 = vmul.f32 0.11111111, %v1356_v46  ;;  %v17201_v51 = vld [vmem:[#allocation272_spill] sm:$0xff] }
 0x696   : > { %v1262_v4 = vadd.f32 %v1223_v1, %v1087_v24  ;;  %v4716_v1 = vld [vmem:[%s15686_s7 + $0x10] sm:$0xff] }
 0x697   : > { %4836 = vmatpush.msrb.mxu3 %v4716_v1  ;;  %v17207_v1 = vld [vmem:[#allocation53_spill] sm:$0xff] }
 0x698   : > { %4394 = vrot.lane.b32.xlu2 %v17196_v38, %s8062_s25  ;;  %4396 = vrot.lane.b32.xlu0 %v17197_v55, %s8062_s25  ;;  %v1007_v55 = vadd.f32 %v942_v36, %v781_v34  ;;  %v782_v34 = vsel %vm665_vm1, 0.0, %v17204_v10  ;;  %v1089_v36 = vsel %vm1009_vm3, %v1086_v43, %v1088_v56  ;;  %v17206_v10 = vld [vmem:[#allocation54_spill] sm:$0xff] }
 0x699   : > { %4398 = vrot.lane.b32.xlu1 %v17200_v9, %s8062_s25  ;;  %v1293_v9 = vadd.f32 %v1261_v39, %v17195_v12  ;;  %v1188_v46 = vrot.slane %v782_v34, 1  ;;  %v1189_v3 = vrot.slane %v17206_v10, 1  ;;  %v1294_v59 = vadd.f32 %v1262_v4, %v782_v34 }
 0x69a   : > { %v1152_v42 = vadd.f32 %v1087_v24, %v1007_v55  ;;  %v1008_v55 = vadd.f32 %v944_v31, %v17195_v12  ;;  %v1228_v56 = vrot.slane %v17206_v10, 2  ;;  %v17208_v12 = vrot.slane %v17207_v1, 7 }
 0x69b   : > { %v12313_v41 = vpop.permute.xlu1 %4284  ;;  %v12315_v38 = vpop.permute.xlu0 %4282  ;;  %v1325_v39 = vadd.f32 %v1293_v9, %v944_v31  ;;  %v1190_v43 = vsel %vm864_vm2, %v1188_v46, %v1189_v3 }
 0x69c   : > { %v1153_v2 = vadd.f32 %v1089_v36, %v1008_v55  ;;  %v12341_v9 = vpop.permute.xlu2 %4298  ;;  %v1326_v4 = vadd.f32 %v1294_v59, %v1190_v43  ;;  %v1184_v46 = vadd.f32 %v1152_v42, %v782_v34  ;;  %v4715_v55 = vld [vmem:[%s15686_s7 + $0x8] sm:$0xff] }
 0x69d   : > { %7217 = vmatmul.msk.f32.gmra.mxu3 %vm422_vm0, %v1388_v18  ;;  %v1357_v24 = vadd.f32 %v1325_v39, %v1089_v36 }
 0x69e   : > { %4837 = vmatpush.msrb.mxu3 %v4715_v55 }
 0x69f   : > { %v1389_v18 = vmul.f32 0.11111111, %v1357_v24 }
 0x6a0   : > { %4400 = vrot.lane.b32.xlu2 %v17201_v51, %s8062_s25  ;;  %4402 = vrot.lane.b32.xlu0 %v17202_v28, %s8062_s25  ;;  %v1224_v51 = vadd.f32 %v1183_v20, %v944_v31  ;;  %v1227_v28 = vrot.slane %v782_v34, 2  ;;  %v799_v20 = vsel %vm665_vm1, %v17208_v12, 0.0  ;;  %v17209_v31 = vld [vmem:[#allocation205_spill] sm:$0xff]  ;;  %v1225_v12 = vadd.f32 %v1190_v43, %v1184_v46 }
 0x6a1   : > { %4404 = vrot.lane.b32.xlu1 %v17205_v22, %s8062_s25  ;;  %v1191_v24 = vrot.slane %v799_v20, 1  ;;  %v1230_v1 = vrot.slane %v799_v20, 2 }
 0x6a2   : > { %v1263_v22 = vadd.f32 %v1224_v51, %v1089_v36  ;;  %v1229_v39 = vsel %vm1009_vm3, %v1227_v28, %v1228_v56 }
 0x6a3   : > { %v12335_v60 = vpop.permute.xlu1 %4290  ;;  %v12337_v54 = vpop.permute.xlu0 %4288  ;;  %v1264_v59 = vadd.f32 %v1229_v39, %v1225_v12  ;;  %v1192_v28 = vsel %vm864_vm2, %v1189_v3, %v1191_v24  ;;  %v1231_v43 = vsel %vm1009_vm3, %v1228_v56, %v1230_v1  ;;  %v17210_v3 = vld [vmem:[#allocation52_spill] sm:$0xff]  ;;  %v17213_v24 = vld [vmem:[#allocation61_spill] sm:$0xff] }
 0x6a4   : > { %v12372_v34 = vpop.permute.xlu2 %4304  ;;  %v17212_v56 = vld [vmem:[#allocation120_spill] sm:$0xff] }
 0x6a5   : > { %7218 = vmatmul.msk.f32.gmra.mxu3 %vm422_vm0, %v1389_v18  ;;  %v1295_v18 = vadd.f32 %v1263_v22, %v17206_v10 }
 0x6a7   : > { %v1327_v42 = vadd.f32 %v1295_v18, %v1192_v28  ;;  %v17215_v18 = vld [vmem:[#allocation49_spill] sm:$0xff] }
 0x6a8   : > { %4406 = vrot.lane.b32.xlu2 %v17055_v6, %s8062_s25  ;;  %4408 = vrot.lane.b32.xlu0 %v17056_v15, %s8062_s25  ;;  %v1358_v15 = vadd.f32 %v1326_v4, %v1229_v39  ;;  %v1296_v39 = vadd.f32 %v1264_v59, %v17210_v3 }
 0x6a9   : > { %4410 = vrot.lane.b32.xlu1 %v17209_v31, %s8062_s25 }
 0x6aa   : > { %v1390_v51 = vmul.f32 0.11111111, %v1358_v15  ;;  %v1328_v46 = vadd.f32 %v1296_v39, %v17213_v24 }
 0x6ab   : > { %v12356_v6 = vpop.permute.xlu1 %4296  ;;  %v12358_v36 = vpop.permute.xlu0 %4294 }
 0x6ac   : > { %v12397_v1 = vpop.permute.xlu2 %4310 }
 0x6ad   : > { %7219 = vmatmul.msk.f32.gmra.mxu3 %vm422_vm0, %v1390_v51 }
 0x6b0   : > { %4412 = vrot.lane.b32.xlu2 %v17061_v17, %s8062_s25  ;;  %4414 = vrot.lane.b32.xlu0 %v11336_v23, %s8062_s25  ;;  %v1359_v17 = vadd.f32 %v1327_v42, %v1231_v43  ;;  %v1185_v23 = vadd.f32 %v1153_v2, %v17206_v10  ;;  %v17214_v2 = vld [vmem:[#allocation55_spill] sm:$0xff] }
 0x6b1   : > { %4416 = vrot.lane.b32.xlu1 %v11333_v27, %s8062_s25  ;;  %v17211_v27 = vld [vmem:[#allocation161_spill] sm:$0xff]  ;;  %v1360_v51 = vadd.f32 %v1328_v46, %v17214_v2 }
 0x6b2   : > { %v1391_v31 = vmul.f32 0.11111111, %v1359_v17  ;;  %v1226_v4 = vadd.f32 %v1192_v28, %v1185_v23  ;;  %v17216_v28 = vld [vmem:[#allocation62_spill] sm:$0xff] }
 0x6b3   : > { %v12375_v22 = vpop.permute.xlu1 %4302  ;;  %v12377_v20 = vpop.permute.xlu0 %4300  ;;  %v1392_v12 = vmul.f32 0.11111111, %v1360_v51  ;;  %v17218_v23 = vld [vmem:[#allocation58_spill] sm:$0xff] }
 0x6b4   : > { %v1265_v15 = vadd.f32 %v1231_v43, %v1226_v4  ;;  %v12413_v39 = vpop.permute.xlu2 %4316 }
 0x6b5   : > { %7220 = vmatmul.msk.f32.gmra.mxu3 %vm422_vm0, %v1391_v31  ;;  %17219 = vst [vmem:[#allocation228_spill] sm:$0xff] %v12413_v39  ;;  %v17251_v39 = vld [vmem:[#allocation18_spill] sm:$0xff] }
 0x6b6   : > { %v1297_v59 = vadd.f32 %v1265_v15, %v17215_v18 }
 0x6b8   : > { %4418 = vrot.lane.b32.xlu2 %v11351_v13, %s8062_s25  ;;  %4420 = vrot.lane.b32.xlu0 %v17211_v27, %s8062_s25  ;;  %v4714_v13 = vld [vmem:[%s15686_s7] sm:$0xff]  ;;  %v1329_v42 = vadd.f32 %v1297_v59, %v17216_v28 }
 0x6b9   : > { %4422 = vrot.lane.b32.xlu1 %v17212_v56, %s8062_s25  ;;  %4838 = vmatpush.msrb.mxu3 %v4714_v13 }
 0x6ba   : > { %v1361_v31 = vadd.f32 %v1329_v42, %v17218_v23 }
 0x6bb   : > { %v12389_v55 = vpop.permute.xlu1 %4308  ;;  %v12391_v10 = vpop.permute.xlu0 %4306 }
 0x6bc   : > { %v1393_v4 = vmul.f32 0.11111111, %v1361_v31 }
 0x6bd   : > { %7221 = vmatmul.msk.f32.gmra.mxu3 %vm422_vm0, %v1392_v12 }
 0x6c0   : > { %4424 = vrot.lane.b32.xlu2 %v11398_v63, %s8062_s25  ;;  %4426 = vrot.lane.b32.xlu0 %v11419_v57, %s8062_s25 }
 0x6c1   : > { %4428 = vrot.lane.b32.xlu1 %v11822_v19, %s8062_s25  ;;  %v12422_v19 = vpop.permute.xlu2 %4322 }
 0x6c2   : > { %17222 = vst [vmem:[#allocation34_spill] sm:$0xff] %v12422_v19  ;;  %v17237_v19 = vld [vmem:[#allocation93_spill] sm:$0xff] }
 0x6c3   : > { %v12408_v43 = vpop.permute.xlu1 %4314  ;;  %v12410_v17 = vpop.permute.xlu0 %4312 }
 0x6c4   : > { %17217 = vst [vmem:[#allocation27_spill] sm:$0xff] %v12408_v43 }
 0x6c5   : > { %7222 = vmatmul.msk.f32.gmra.mxu3 %vm422_vm0, %v1393_v4  ;;  %v17232_v4 = vld [vmem:[#allocation6_spill] sm:$0xff] }
 0x6c8   : > { %4430 = vrot.lane.b32.xlu2 %v11836_v35, %s8062_s25  ;;  %v977_v35 = vadd.f32 %v17213_v24, %v17210_v3  ;;  %v17238_v3 = vld [vmem:[#allocation10_spill] sm:$0xff] }
 0x6c9   : > { %v12430_v46 = vpop.permute.xlu2 %4328 }
 0x6ca   : > { %17226 = vst [vmem:[#allocation40_spill] sm:$0xff] %v12430_v46  ;;  %v1122_v59 = vadd.f32 %v17214_v2, %v977_v35  ;;  %v17234_v46 = vld [vmem:[#allocation296_spill] sm:$0xff] }
 0x6cb   : > { %v12418_v63 = vpop.permute.xlu1 %4320  ;;  %v12420_v57 = vpop.permute.xlu0 %4318 }
 0x6cc   : > { %17220 = vst [vmem:[#allocation32_spill] sm:$0xff] %v12418_v63 }
 0x6cd   : > { %17221 = vst [vmem:[#allocation211_spill] sm:$0xff] %v12420_v57 }
 0x6d0   : > { %v12424_v27 = vpop.f32.mrf.mxu3 }
 0x6d1   : > { %17223 = vst [vmem:[#allocation33_spill] sm:$0xff] %v12424_v27  ;;  %v1154_v27 = vadd.f32 %v1122_v59, %v17232_v4 }
 0x6d3   : > { %v12426_v15 = vpop.permute.xlu1 %4326  ;;  %v12428_v56 = vpop.permute.xlu0 %4324  ;;  %v1195_v2 = vadd.f32 %v1154_v27, %v17238_v3  ;;  %v17242_v27 = vld [vmem:[#allocation15_spill] sm:$0xff] }
 0x6d4   : > { %17224 = vst [vmem:[#allocation38_spill] sm:$0xff] %v12426_v15  ;;  %v12446_v15 = vpop.permute.xlu2 %4334 }
 0x6d5   : > { %17225 = vst [vmem:[#allocation156_spill] sm:$0xff] %v12428_v56  ;;  %v17235_v56 = vld [vmem:[#allocation297_spill] sm:$0xff] }
 0x6d6   : > { %17233 = vst [vmem:[#allocation278_spill] sm:$0xff] %v12446_v15 }
 0x6d8   : > { %v12434_v13 = vpop.f32.mrf.mxu3 }
 0x6d9   : > { %17228 = vst [vmem:[#allocation246_spill] sm:$0xff] %v12434_v13 }
 0x6db   : > { %v12432_v51 = vpop.permute.xlu0 %4330  ;;  %v12438_v12 = vpop.permute.xlu1 %4332 }
 0x6dc   : > { %17227 = vst [vmem:[#allocation227_spill] sm:$0xff] %v12432_v51  ;;  %v4522_v51 = vsel %vm2888_vm6, %v17235_v56, %v17234_v46 }
 0x6dd   : > { %17229 = vst [vmem:[#allocation39_spill] sm:$0xff] %v12438_v12  ;;  %v4554_v24 = vsel %vm2921_vm5, %v4522_v51, %v17237_v19  ;;  %v978_v19 = vadd.f32 %v17216_v28, %v17215_v18  ;;  %v17241_v51 = vld [vmem:[#allocation23_spill] sm:$0xff] }
 0x6de   : > { %v4586_v35 = vsel %vm2954_vm7, %v4554_v24, %v11882_v30  ;;  %v876_v3 = vrot.slane %v17241_v51, 1  ;;  %v17243_v24 = vrot.slane %v17242_v27, 7 }
 0x6df   : > { %v4618_v59 = vsel %vm2987_vm9, %v4586_v35, %v12083_v32  ;;  %v1021_v32 = vrot.slane %v17241_v51, 2  ;;  %v1123_v35 = vadd.f32 %v17218_v23, %v978_v19 }
 0x6e0   : > { %v12443_v31 = vpop.f32.mrf.mxu3  ;;  %v4650_v56 = vsel %vm3020_vm8, %v4618_v59, %v12315_v38  ;;  %v785_v12 = vsel %vm665_vm1, %v17243_v24, 0.0  ;;  %v17246_v59 = vld [vmem:[#allocation127_spill] sm:$0xff]  ;;  %v17248_v24 = vld [vmem:[#allocation22_spill] sm:$0xff] }
 0x6e1   : > { %17231 = vst [vmem:[#allocation44_spill] sm:$0xff] %v12443_v31  ;;  %v878_v63 = vrot.slane %v785_v12, 1 }
 0x6e3   : > { %v12441_v42 = vpop.permute.xlu0 %4336  ;;  %v12451_v13 = vpop.permute.xlu1 %4338 }
 0x6e4   : > { %17230 = vst [vmem:[#allocation182_spill] sm:$0xff] %v12441_v42  ;;  %v17239_v42 = vld [vmem:[#allocation16_spill] sm:$0xff] }
 0x6e5   : > { %17236 = vst [vmem:[#allocation242_spill] sm:$0xff] %v12451_v13  ;;  %v875_v31 = vrot.slane %v17239_v42, 1  ;;  %v1020_v4 = vrot.slane %v17239_v42, 2  ;;  %v17240_v13 = vld [vmem:[#allocation13_spill] sm:$0xff] }
 0x6e6   : > { %v1234_v15 = vadd.f32 %v1195_v2, %v17240_v13  ;;  %v17245_v13 = vld [vmem:[#allocation136_spill] sm:$0xff] }
 0x6e7   : > { %v877_v28 = vsel %vm864_vm2, %v875_v31, %v876_v3  ;;  %v1023_v31 = vrot.slane %v785_v12, 2 }
 0x6e8   : > { %v1266_v38 = vadd.f32 %v1234_v15, %v17239_v42  ;;  %v12476_v2 = vpop.f32.mrf.mxu3  ;;  %v981_v27 = vadd.f32 %v877_v28, %v17239_v42  ;;  %v1197_v18 = vadd.f32 %v17248_v24, %v877_v28  ;;  %v17249_v15 = vld [vmem:[#allocation121_spill] sm:$0xff]  ;;  %v17252_v42 = vrot.slane %v17251_v39, 7 }
 0x6e9   : > { %17244 = vst [vmem:[#allocation174_spill] sm:$0xff] %v12476_v2  ;;  %v17250_v2 = vld [vmem:[#allocation7_spill] sm:$0xff] }
 0x6ea   : > { %v1298_v23 = vadd.f32 %v1266_v38, %v877_v28  ;;  %v1155_v57 = vadd.f32 %v1123_v35, %v17250_v2  ;;  %v17254_v2 = vld [vmem:[#allocation12_spill] sm:$0xff] }
 0x6eb   : > { %v4373_v46 = vpop.permute.xlu0 %4372 }
 0x6ec   : > { %v4682_v30 = vsel %vm3053_vm11, %v4650_v56, %v4373_v46  ;;  %v4523_v56 = vsel %vm2888_vm6, %v17246_v59, %v17245_v13  ;;  %v12482_v46 = vpop.permute.xlu2 %4340  ;;  %v4375_v13 = vpop.permute.xlu1 %4374 }
 0x6ed   : > { %7255 = vmatmul.msk.f32.vlgmr.msrb.gmra.mxu3 %vm3099_vm10, %v4682_v30  ;;  %17247 = vst [vmem:[#allocation46_spill] sm:$0xff] %v12482_v46  ;;  %v1022_v30 = vsel %vm1009_vm3, %v1020_v4, %v1021_v32  ;;  %v4555_v19 = vsel %vm2921_vm5, %v4523_v56, %v17249_v15  ;;  %v769_v4 = vsel %vm665_vm1, 0.0, %v17252_v42  ;;  %v1196_v56 = vadd.f32 %v1155_v57, %v17253_v37  ;;  %v17257_v37 = vld [vmem:[#allocation20_spill] sm:$0xff] }
 0x6ee   : > { %v4587_v29 = vsel %vm2954_vm7, %v4555_v19, %v11856_v26  ;;  %v1126_v59 = vadd.f32 %v1022_v30, %v981_v27  ;;  %v1236_v46 = vadd.f32 %v1197_v18, %v1022_v30  ;;  %v1330_v43 = vadd.f32 %v1298_v23, %v1022_v30  ;;  %v17255_v18 = vld [vmem:[#allocation229_spill] sm:$0xff]  ;;  %v17256_v27 = vld [vmem:[#allocation130_spill] sm:$0xff]  ;;  %v17259_v15 = vld [vmem:[#allocation292_spill] sm:$0xff] }
 0x6ef   : > { %v4619_v24 = vsel %vm2987_vm9, %v4587_v29, %v12081_v33  ;;  %v1235_v28 = vadd.f32 %v1196_v56, %v17254_v2  ;;  %v4462_v39 = vsel %vm422_vm0, %v17256_v27, %v17255_v18  ;;  %v879_v33 = vsel %vm864_vm2, %v876_v3, %v878_v63 }
 0x6f0   : > { %v4651_v38 = vsel %vm3020_vm8, %v4619_v24, %v12313_v41  ;;  %v1158_v12 = vadd.f32 %v1126_v59, %v769_v4  ;;  %v1362_v26 = vmul.f32 0.11111111, %v1330_v43  ;;  %v1024_v29 = vsel %vm1009_vm3, %v1021_v32, %v1023_v31  ;;  %v17258_v41 = vld [vmem:[#allocation162_spill] sm:$0xff]  ;;  %v17260_v59 = vld [vmem:[#allocation288_spill] sm:$0xff]  ;;  %v12519_v3 = vpop.f32.mrf.mxu3 }
 0x6f1   : > { %v4683_v35 = vsel %vm3053_vm11, %v4651_v38, %v4375_v13  ;;  %v1157_v23 = vadd.f32 %v17257_v37, %v17241_v51  ;;  %v4492_v57 = vsel %vm2855_vm4, %v4462_v39, %v17258_v41  ;;  %v982_v43 = vadd.f32 %v879_v33, %v17241_v51  ;;  %17261 = vst [vmem:[#allocation238_spill] sm:$0xff] %v12519_v3  ;;  %v17263_v37 = vld [vmem:[#allocation21_spill] sm:$0xff]  ;;  %v17265_v41 = vld [vmem:[#allocation282_spill] sm:$0xff] }
 0x6f2   : > { %7191 = vmatmul.msk.f32.vlgmr.msra.gmra.mxu1 %vm422_vm0, %v1362_v26  ;;  %v1267_v30 = vadd.f32 %v1235_v28, %v17241_v51  ;;  %v4524_v19 = vsel %vm2888_vm6, %v4492_v57, %v17259_v15  ;;  %v880_v38 = vrot.slane %v769_v4, 1  ;;  %v1025_v28 = vrot.slane %v769_v4, 2  ;;  %v17266_v57 = vld [vmem:[#allocation134_spill] sm:$0xff] }
 0x6f3   : > { %v1198_v13 = vadd.f32 %v1157_v23, %v879_v33  ;;  %v4556_v63 = vsel %vm2921_vm5, %v4524_v19, %v17260_v59  ;;  %v1127_v32 = vadd.f32 %v1024_v29, %v982_v43  ;;  %v1268_v43 = vadd.f32 %v1236_v46, %v769_v4  ;;  %v17268_v19 = vld [vmem:[#allocation256_spill] sm:$0xff] }
 0x6f4   : > { %v1299_v31 = vadd.f32 %v1267_v30, %v879_v33  ;;  %v4588_v42 = vsel %vm2954_vm7, %v4556_v63, %v11896_v44  ;;  %v4377_v24 = vpop.permute.xlu2 %4376  ;;  %v17264_v44 = vrot.slane %v17263_v37, 7  ;;  %v17267_v30 = vld [vmem:[#allocation169_spill] sm:$0xff] }
 0x6f5   : > { %7256 = vmatmul.msk.f32.gmra.mxu3 %vm3099_vm10, %v4683_v35  ;;  %v1237_v56 = vadd.f32 %v1198_v13, %v1024_v29  ;;  %v4620_v51 = vsel %vm2987_vm9, %v4588_v42, %v12013_v14  ;;  %v17262_v35 = vld [vmem:[#allocation25_spill] sm:$0xff]  ;;  %v4463_v14 = vsel %vm422_vm0, %v17266_v57, %v17265_v41  ;;  %v17269_v42 = vld [vmem:[#allocation151_spill] sm:$0xff] }
 0x6f6   : > { %v1159_v26 = vadd.f32 %v1127_v32, %v17262_v35  ;;  %v1331_v2 = vadd.f32 %v1299_v31, %v1024_v29  ;;  %v4652_v18 = vsel %vm3020_vm8, %v4620_v51, %v12292_v21  ;;  %v881_v33 = vrot.slane %v17262_v35, 1 }
 0x6f7   : > { %v4684_v27 = vsel %vm3053_vm11, %v4652_v18, %v4377_v24  ;;  %v786_v23 = vsel %vm665_vm1, %v17264_v44, 0.0  ;;  %v1026_v29 = vrot.slane %v17262_v35, 2  ;;  %v4493_v21 = vsel %vm2855_vm4, %v4463_v14, %v17267_v30  ;;  %v4379_v18 = vpop.permute.xlu0 %4378  ;;  %v17273_v14 = vld [vmem:[#allocation220_spill] sm:$0xff] }
 0x6f8   : > { %v1363_v39 = vmul.f32 0.11111111, %v1331_v2  ;;  %v882_v15 = vsel %vm864_vm2, %v880_v38, %v881_v33  ;;  %v4525_v13 = vsel %vm2888_vm6, %v4493_v21, %v17268_v19  ;;  %v883_v31 = vrot.slane %v786_v23, 1  ;;  %v17270_v38 = vld [vmem:[#allocation29_spill] sm:$0xff] }
 0x6f9   : > { %v983_v59 = vadd.f32 %v882_v15, %v769_v4  ;;  %v1027_v63 = vsel %vm1009_vm3, %v1025_v28, %v1026_v29  ;;  %v1199_v32 = vadd.f32 %v1158_v12, %v882_v15  ;;  %v4557_v24 = vsel %vm2921_vm5, %v4525_v13, %v17269_v42  ;;  %v12554_v12 = vpop.f32.mrf.mxu3 }
 0x6fa   : > { %7192 = vmatmul.msk.f32.gmra.mxu1 %vm422_vm0, %v1363_v39  ;;  %v1300_v51 = vadd.f32 %v1268_v43, %v882_v15  ;;  %v1028_v46 = vrot.slane %v786_v23, 2  ;;  %v4589_v2 = vsel %vm2954_vm7, %v4557_v24, %v11894_v53  ;;  %v17271_v37 = vrot.slane %v17270_v38, 7  ;;  %17272 = vst [vmem:[#allocation251_spill] sm:$0xff] %v12554_v12  ;;  %v17274_v15 = vld [vmem:[#allocation167_spill] sm:$0xff] }
 0x6fb   : > { %v1238_v39 = vadd.f32 %v1199_v32, %v1027_v63  ;;  %v4621_v4 = vsel %vm2987_vm9, %v4589_v2, %v12114_v0  ;;  %v4464_v43 = vsel %vm422_vm0, %v10509_v11, %v17273_v14  ;;  %v884_v30 = vsel %vm864_vm2, %v881_v33, %v883_v31  ;;  %v17276_v32 = vld [vmem:[#allocation133_spill] sm:$0xff] }
 0x6fc   : > { %v770_v44 = vsel %vm665_vm1, 0.0, %v17271_v37  ;;  %v1332_v28 = vadd.f32 %v1300_v51, %v1027_v63  ;;  %v4653_v41 = vsel %vm3020_vm8, %v4621_v4, %v12337_v54  ;;  %v1029_v0 = vsel %vm1009_vm3, %v1026_v29, %v1028_v46  ;;  %v4381_v29 = vpop.permute.xlu1 %4380  ;;  %v17282_v14 = vld [vmem:[#allocation197_spill] sm:$0xff] }
 0x6fd   : > { %7257 = vmatmul.msk.f32.gmra.mxu3 %vm3099_vm10, %v4684_v27  ;;  %v1128_v27 = vadd.f32 %v1027_v63, %v983_v59  ;;  %v4685_v57 = vsel %vm3053_vm11, %v4653_v41, %v4379_v18  ;;  %v1269_v21 = vadd.f32 %v1237_v56, %v17262_v35  ;;  %v4494_v19 = vsel %vm2855_vm4, %v4464_v43, %v17274_v15  ;;  %v17275_v59 = vld [vmem:[#allocation215_spill] sm:$0xff] }
 0x6fe   : > { %v1364_v53 = vmul.f32 0.11111111, %v1332_v28  ;;  %v984_v54 = vadd.f32 %v884_v30, %v17262_v35  ;;  %v1200_v13 = vadd.f32 %v1159_v26, %v884_v30  ;;  %v4526_v63 = vsel %vm2888_vm6, %v4494_v19, %v17275_v59  ;;  %v17277_v35 = vld [vmem:[#allocation31_spill] sm:$0xff] }
 0x6ff   : > { %v1160_v23 = vadd.f32 %v1128_v27, %v770_v44  ;;  %v1301_v11 = vadd.f32 %v1269_v21, %v884_v30  ;;  %v4558_v42 = vsel %vm2921_vm5, %v4526_v63, %v17276_v32  ;;  %v885_v51 = vrot.slane %v770_v44, 1  ;;  %v4383_v32 = vpop.permute.xlu2 %4382 }
 0x700   : > { %v1129_v33 = vadd.f32 %v1029_v0, %v984_v54  ;;  %v1239_v31 = vadd.f32 %v1200_v13, %v1029_v0  ;;  %v4590_v56 = vsel %vm2954_vm7, %v4558_v42, %v11868_v49  ;;  %v1030_v2 = vrot.slane %v770_v44, 2  ;;  %v17279_v49 = vld [vmem:[#allocation30_spill] sm:$0xff] }
 0x701   : > { %v1333_v24 = vadd.f32 %v1301_v11, %v1029_v0  ;;  %v4622_v46 = vsel %vm2987_vm9, %v4590_v56, %v12112_v47  ;;  %v12582_v37 = vpop.f32.mrf.mxu3  ;;  %v886_v4 = vrot.slane %v17277_v35, 1  ;;  %v17280_v28 = vrot.slane %v17279_v49, 7  ;;  %v17283_v0 = vld [vmem:[#allocation265_spill] sm:$0xff]  ;;  %v17284_v13 = vld [vmem:[#allocation226_spill] sm:$0xff]  ;;  %v17285_v56 = vld [vmem:[#allocation35_spill] sm:$0xff] }
 0x702   : > { %7193 = vmatmul.msk.f32.gmra.mxu1 %vm422_vm0, %v1364_v53  ;;  %v1161_v26 = vadd.f32 %v1129_v33, %v17277_v35  ;;  %v4654_v18 = vsel %vm3020_vm8, %v4622_v46, %v12335_v60  ;;  %17278 = vst [vmem:[#allocation45_spill] sm:$0xff] %v12582_v37  ;;  %v1031_v53 = vrot.slane %v17277_v35, 2  ;;  %v1270_v60 = vadd.f32 %v1238_v39, %v770_v44 }
 0x703   : > { %v1365_v27 = vmul.f32 0.11111111, %v1333_v24  ;;  %v4686_v38 = vsel %vm3053_vm11, %v4654_v18, %v4381_v29  ;;  %v787_v41 = vsel %vm665_vm1, %v17280_v28, 0.0  ;;  %v887_v30 = vsel %vm864_vm2, %v885_v51, %v886_v4  ;;  %v17288_v28 = vld [vmem:[#allocation286_spill] sm:$0xff] }
 0x704   : > { %v985_v15 = vadd.f32 %v887_v30, %v770_v44  ;;  %v1032_v19 = vsel %vm1009_vm3, %v1030_v2, %v1031_v53  ;;  %v1201_v54 = vadd.f32 %v1160_v23, %v887_v30  ;;  %v1302_v63 = vadd.f32 %v1270_v60, %v887_v30  ;;  %v17290_v60 = vld [vmem:[#allocation213_spill] sm:$0xff] }
 0x705   : > { %7258 = vmatmul.msk.f32.gmra.mxu3 %vm3099_vm10, %v4685_v57  ;;  %v17281_v57 = vld [vmem:[#allocation248_spill] sm:$0xff]  ;;  %v1033_v39 = vrot.slane %v787_v41, 2  ;;  %v17286_v29 = vrot.slane %v17285_v56, 7 }
 0x706   : > { %v4465_v47 = vsel %vm422_vm0, %v10516_v40, %v17281_v57  ;;  %v888_v40 = vrot.slane %v787_v41, 1  ;;  %v1130_v42 = vadd.f32 %v1032_v19, %v985_v15  ;;  %v1240_v33 = vadd.f32 %v1201_v54, %v1032_v19 }
 0x707   : > { %v4495_v43 = vsel %vm2855_vm4, %v4465_v47, %v17282_v14  ;;  %v771_v24 = vsel %vm665_vm1, 0.0, %v17286_v29  ;;  %v1334_v23 = vadd.f32 %v1302_v63, %v1032_v19  ;;  %v1034_v49 = vsel %vm1009_vm3, %v1031_v53, %v1033_v39  ;;  %v17293_v39 = vld [vmem:[#allocation36_spill] sm:$0xff]  ;;  %v17296_v29 = vld [vmem:[#allocation111_spill] sm:$0xff] }
 0x708   : > { %v4527_v21 = vsel %vm2888_vm6, %v4495_v43, %v17283_v0  ;;  %v1162_v46 = vadd.f32 %v1130_v42, %v771_v24  ;;  %v17291_v43 = vld [vmem:[#allocation259_spill] sm:$0xff]  ;;  %v4385_v0 = vpop.permute.xlu0 %4384  ;;  %v890_v15 = vrot.slane %v771_v24, 1  ;;  %v1035_v54 = vrot.slane %v771_v24, 2 }
 0x709   : > { %v4559_v59 = vsel %vm2921_vm5, %v4527_v21, %v17284_v13  ;;  %v1366_v18 = vmul.f32 0.11111111, %v1334_v23  ;;  %v1272_v56 = vadd.f32 %v1240_v33, %v771_v24  ;;  %v17297_v23 = vld [vmem:[#allocation110_spill] sm:$0xff] }
 0x70a   : > { %7194 = vmatmul.msk.f32.gmra.mxu1 %vm422_vm0, %v1365_v27  ;;  %v4591_v11 = vsel %vm2954_vm7, %v4559_v59, %v11908_v50  ;;  %v17287_v27 = vld [vmem:[#allocation193_spill] sm:$0xff] }
 0x70b   : > { %v4623_v44 = vsel %vm2987_vm9, %v4591_v11, %v12045_v62  ;;  %v4466_v50 = vsel %vm422_vm0, %v10512_v48, %v17287_v27  ;;  %v1271_v62 = vadd.f32 %v1239_v31, %v17277_v35  ;;  %v17294_v11 = vrot.slane %v17293_v39, 7 }
 0x70c   : > { %v4655_v51 = vsel %vm3020_vm8, %v4623_v44, %v12317_v45  ;;  %v4496_v41 = vsel %vm2855_vm4, %v4466_v50, %v17288_v28  ;;  %v12621_v45 = vpop.f32.mrf.mxu3  ;;  %v17298_v50 = vld [vmem:[#allocation285_spill] sm:$0xff] }
 0x70d   : > { %7259 = vmatmul.msk.f32.gmra.mxu3 %vm3099_vm10, %v4686_v38  ;;  %v4687_v2 = vsel %vm3053_vm11, %v4655_v51, %v4383_v32  ;;  %v889_v38 = vsel %vm864_vm2, %v886_v4, %v888_v40  ;;  %17289 = vst [vmem:[#allocation252_spill] sm:$0xff] %v12621_v45  ;;  %v4528_v48 = vsel %vm2888_vm6, %v4496_v41, %v17290_v60  ;;  %v17295_v32 = vld [vmem:[#allocation243_spill] sm:$0xff]  ;;  %v4387_v41 = vpop.permute.xlu1 %4386  ;;  %v17300_v60 = vld [vmem:[#allocation41_spill] sm:$0xff] }
 0x70e   : > { %v986_v57 = vadd.f32 %v889_v38, %v17277_v35  ;;  %v1202_v47 = vadd.f32 %v1161_v26, %v889_v38  ;;  %v1303_v14 = vadd.f32 %v1271_v62, %v889_v38  ;;  %v4560_v4 = vsel %vm2921_vm5, %v4528_v48, %v17291_v43  ;;  %v17292_v35 = vld [vmem:[#allocation37_spill] sm:$0xff] }
 0x70f   : > { %v4592_v31 = vsel %vm2954_vm7, %v4560_v4, %v11906_v8  ;;  %v891_v63 = vrot.slane %v17292_v35, 1  ;;  %v788_v8 = vsel %vm665_vm1, %v17294_v11, 0.0  ;;  %v4467_v42 = vsel %vm422_vm0, %v10498_v58, %v17295_v32 }
 0x710   : > { %v1131_v53 = vadd.f32 %v1034_v49, %v986_v57  ;;  %v1241_v30 = vadd.f32 %v1202_v47, %v1034_v49  ;;  %v1335_v21 = vadd.f32 %v1303_v14, %v1034_v49  ;;  %v4624_v19 = vsel %vm2987_vm9, %v4592_v31, %v12140_v5 }
 0x711   : > { %v4656_v40 = vsel %vm3020_vm8, %v4624_v19, %v12358_v36  ;;  %v1036_v5 = vrot.slane %v17292_v35, 2  ;;  %v4497_v36 = vsel %vm2855_vm4, %v4467_v42, %v17296_v29  ;;  %v892_v44 = vsel %vm864_vm2, %v890_v15, %v891_v63 }
 0x712   : > { %7195 = vmatmul.msk.f32.gmra.mxu1 %vm422_vm0, %v1366_v18  ;;  %v1163_v26 = vadd.f32 %v1131_v53, %v17292_v35  ;;  %v1367_v13 = vmul.f32 0.11111111, %v1335_v21  ;;  %v4688_v59 = vsel %vm3053_vm11, %v4656_v40, %v4385_v0  ;;  %v4529_v51 = vsel %vm2888_vm6, %v4497_v36, %v17297_v23  ;;  %v17302_v0 = vld [vmem:[#allocation254_spill] sm:$0xff] }
 0x713   : > { %v1037_v18 = vsel %vm1009_vm3, %v1035_v54, %v1036_v5  ;;  %v1203_v27 = vadd.f32 %v1162_v46, %v892_v44  ;;  %v893_v58 = vrot.slane %v788_v8, 1  ;;  %v4561_v38 = vsel %vm2921_vm5, %v4529_v51, %v17298_v50  ;;  %v17304_v54 = vld [vmem:[#allocation108_spill] sm:$0xff] }
 0x714   : > { %v12655_v49 = vpop.f32.mrf.mxu3  ;;  %v1304_v33 = vadd.f32 %v1272_v56, %v892_v44  ;;  %v1038_v62 = vrot.slane %v788_v8, 2  ;;  %v4593_v28 = vsel %vm2954_vm7, %v4561_v38, %v11880_v25  ;;  %v17301_v48 = vrot.slane %v17300_v60, 7  ;;  %v17303_v25 = vld [vmem:[#allocation125_spill] sm:$0xff]  ;;  %v17306_v8 = vld [vmem:[#allocation267_spill] sm:$0xff]  ;;  %v4389_v56 = vpop.permute.xlu2 %4388  ;;  %v17311_v38 = vld [vmem:[#allocation42_spill] sm:$0xff] }
 0x715   : > { %7260 = vmatmul.msk.f32.gmra.mxu3 %vm3099_vm10, %v4687_v2  ;;  %v987_v2 = vadd.f32 %v892_v44, %v771_v24  ;;  %17299 = vst [vmem:[#allocation272_spill] sm:$0xff] %v12655_v49  ;;  %v1242_v47 = vadd.f32 %v1203_v27, %v1037_v18  ;;  %v4625_v46 = vsel %vm2987_vm9, %v4593_v28, %v12138_v52  ;;  %v17308_v44 = vld [vmem:[#allocation148_spill] sm:$0xff]  ;;  %v17313_v28 = vld [vmem:[#allocation255_spill] sm:$0xff] }
 0x716   : > { %v772_v24 = vsel %vm665_vm1, 0.0, %v17301_v48  ;;  %v1336_v14 = vadd.f32 %v1304_v33, %v1037_v18  ;;  %v4657_v43 = vsel %vm3020_vm8, %v4625_v46, %v12356_v6  ;;  %v4468_v21 = vsel %vm422_vm0, %v17303_v25, %v17302_v0  ;;  %v17315_v46 = vld [vmem:[#allocation166_spill] sm:$0xff] }
 0x717   : > { %v1132_v57 = vadd.f32 %v1037_v18, %v987_v2  ;;  %v4689_v53 = vsel %vm3053_vm11, %v4657_v43, %v4387_v41  ;;  %v894_v15 = vsel %vm864_vm2, %v891_v63, %v893_v58  ;;  %v1039_v19 = vsel %vm1009_vm3, %v1036_v5, %v1038_v62  ;;  %v17307_v5 = vld [vmem:[#allocation299_spill] sm:$0xff]  ;;  %v17316_v43 = vld [vmem:[#allocation222_spill] sm:$0xff] }
 0x718   : > { %v1368_v31 = vmul.f32 0.11111111, %v1336_v14  ;;  %v1273_v52 = vadd.f32 %v1241_v30, %v17292_v35  ;;  %v4498_v40 = vsel %vm2855_vm4, %v4468_v21, %v17304_v54  ;;  %v988_v6 = vadd.f32 %v894_v15, %v17292_v35  ;;  %v17314_v41 = vld [vmem:[#allocation155_spill] sm:$0xff]  ;;  %v17318_v54 = vld [vmem:[#allocation298_spill] sm:$0xff] }
 0x719   : > { %v1164_v4 = vadd.f32 %v1132_v57, %v772_v24  ;;  %v895_v36 = vrot.slane %v772_v24, 1  ;;  %v1040_v2 = vrot.slane %v772_v24, 2  ;;  %v17312_v33 = vrot.slane %v17311_v38, 7 }
 0x71a   : > { %7196 = vmatmul.msk.f32.gmra.mxu1 %vm422_vm0, %v1367_v13  ;;  %v1204_v13 = vadd.f32 %v1163_v26, %v894_v15  ;;  %v1305_v11 = vadd.f32 %v1273_v52, %v894_v15  ;;  %v1133_v63 = vadd.f32 %v1039_v19, %v988_v6  ;;  %v17310_v26 = vld [vmem:[#allocation43_spill] sm:$0xff]  ;;  %v4469_v57 = vsel %vm422_vm0, %v17314_v41, %v17313_v28  ;;  %v17317_v15 = vld [vmem:[#allocation170_spill] sm:$0xff]  ;;  %v4391_v6 = vpop.permute.xlu0 %4390 }
 0x71b   : > { %v896_v50 = vrot.slane %v17310_v26, 1  ;;  %v789_v62 = vsel %vm665_vm1, %v17312_v33, 0.0  ;;  %v1041_v60 = vrot.slane %v17310_v26, 2  ;;  %v1274_v48 = vadd.f32 %v1242_v47, %v772_v24 }
 0x71c   : > { %v1243_v42 = vadd.f32 %v1204_v13, %v1039_v19  ;;  %v1337_v29 = vadd.f32 %v1305_v11, %v1039_v19  ;;  %v12686_v35 = vpop.f32.mrf.mxu3  ;;  %v1165_v51 = vadd.f32 %v1133_v63, %v17310_v26  ;;  %v898_v21 = vrot.slane %v789_v62, 1 }
 0x71d   : > { %7261 = vmatmul.msk.f32.gmra.mxu3 %vm3099_vm10, %v4688_v59  ;;  %v17305_v59 = vld [vmem:[#allocation201_spill] sm:$0xff]  ;;  %17309 = vst [vmem:[#allocation241_spill] sm:$0xff] %v12686_v35  ;;  %v897_v14 = vsel %vm864_vm2, %v895_v36, %v896_v50  ;;  %v1042_v0 = vsel %vm1009_vm3, %v1040_v2, %v1041_v60  ;;  %v1043_v47 = vrot.slane %v789_v62, 2  ;;  %v17323_v36 = vld [vmem:[#allocation175_spill] sm:$0xff] }
 0x71e   : > { %v4530_v39 = vsel %vm2888_vm6, %v4498_v40, %v17305_v59  ;;  %v1369_v27 = vmul.f32 0.11111111, %v1337_v29  ;;  %v1205_v25 = vadd.f32 %v1164_v4, %v897_v14  ;;  %v1306_v52 = vadd.f32 %v1274_v48, %v897_v14  ;;  %v17326_v62 = vld [vmem:[#allocation185_spill] sm:$0xff] }
 0x71f   : > { %v4562_v32 = vsel %vm2921_vm5, %v4530_v39, %v17306_v8  ;;  %v17319_v39 = vld [vmem:[#allocation47_spill] sm:$0xff]  ;;  %v899_v2 = vsel %vm864_vm2, %v896_v50, %v898_v21 }
 0x720   : > { %v4594_v30 = vsel %vm2954_vm7, %v4562_v32, %v17307_v5  ;;  %v1244_v59 = vadd.f32 %v1205_v25, %v1042_v0  ;;  %v17320_v11 = vrot.slane %v17319_v39, 7  ;;  %v1338_v4 = vadd.f32 %v1306_v52, %v1042_v0  ;;  %v17331_v52 = vld [vmem:[#allocation48_spill] sm:$0xff] }
 0x721   : > { %v4626_v23 = vsel %vm2987_vm9, %v4594_v30, %v17308_v44  ;;  %v17324_v44 = vld [vmem:[#allocation164_spill] sm:$0xff]  ;;  %v990_v38 = vadd.f32 %v899_v2, %v17310_v26  ;;  %v1206_v33 = vadd.f32 %v1165_v51, %v899_v2 }
 0x722   : > { %7197 = vmatmul.msk.f32.gmra.mxu1 %vm422_vm0, %v1368_v31  ;;  %v4658_v18 = vsel %vm3020_vm8, %v4626_v23, %v12341_v9  ;;  %v4499_v9 = vsel %vm2855_vm4, %v4469_v57, %v17315_v46  ;;  %v989_v31 = vadd.f32 %v897_v14, %v772_v24  ;;  %v773_v8 = vsel %vm665_vm1, 0.0, %v17320_v11  ;;  %v17321_v24 = vld [vmem:[#allocation17_spill] sm:$0xff] }
 0x723   : > { %v4690_v58 = vsel %vm3053_vm11, %v4658_v18, %v4389_v56  ;;  %v1370_v29 = vmul.f32 0.11111111, %v1338_v4  ;;  %v4470_v23 = vsel %vm422_vm0, %v17324_v44, %v17323_v36  ;;  %v1044_v18 = vsel %vm1009_vm3, %v1041_v60, %v1043_v47  ;;  %v17327_v57 = vld [vmem:[#allocation233_spill] sm:$0xff] }
 0x724   : > { %v1134_v13 = vadd.f32 %v1042_v0, %v989_v31  ;;  %v12720_v56 = vpop.f32.mrf.mxu3  ;;  %v1135_v50 = vadd.f32 %v1044_v18, %v990_v38  ;;  %v1245_v46 = vadd.f32 %v1206_v33, %v1044_v18  ;;  %v17328_v60 = vld [vmem:[#allocation261_spill] sm:$0xff]  ;;  %v1045_v0 = vrot.slane %v773_v8, 2  ;;  %v4395_v38 = vpop.permute.xlu2 %4394 }
 0x725   : > { %7262 = vmatmul.msk.f32.gmra.mxu3 %vm3099_vm10, %v4689_v53  ;;  %v4531_v53 = vsel %vm2888_vm6, %v4499_v9, %v17316_v43  ;;  %17322 = vst [vmem:[#allocation51_spill] sm:$0xff] %v12720_v56  ;;  %v4393_v9 = vpop.permute.xlu1 %4392  ;;  %v900_v43 = vrot.slane %v773_v8, 1  ;;  %v17332_v47 = vrot.slane %v17331_v52, 7  ;;  %v1276_v11 = vadd.f32 %v1244_v59, %v773_v8  ;;  %v17345_v52 = vld [vmem:[#allocation114_spill] sm:$0xff] }
 0x726   : > { %v4563_v19 = vsel %vm2921_vm5, %v4531_v53, %v17317_v15  ;;  %v1166_v5 = vadd.f32 %v1134_v13, %v773_v8  ;;  %v17329_v53 = vld [vmem:[#allocation123_spill] sm:$0xff] }
 0x727   : > { %v4595_v40 = vsel %vm2954_vm7, %v4563_v19, %v17318_v54  ;;  %v790_v54 = vsel %vm665_vm1, %v17332_v47, 0.0 }
 0x728   : > { %v4627_v32 = vsel %vm2987_vm9, %v4595_v40, %v17321_v24  ;;  %v17333_v40 = vld [vmem:[#allocation244_spill] sm:$0xff]  ;;  %v17335_v24 = vld [vmem:[#allocation253_spill] sm:$0xff] }
 0x729   : > { %v4659_v63 = vsel %vm3020_vm8, %v4627_v32, %v12377_v20 }
 0x72a   : > { %7198 = vmatmul.msk.f32.gmra.mxu1 %vm422_vm0, %v1369_v27  ;;  %v4691_v30 = vsel %vm3053_vm11, %v4659_v63, %v4391_v6  ;;  %v1275_v27 = vadd.f32 %v1243_v42, %v17310_v26  ;;  %v17330_v26 = vld [vmem:[#allocation50_spill] sm:$0xff]  ;;  %v17337_v63 = vld [vmem:[#allocation216_spill] sm:$0xff] }
 0x72b   : > { %v1167_v51 = vadd.f32 %v1135_v50, %v17330_v26  ;;  %v901_v19 = vrot.slane %v17330_v26, 1  ;;  %v17334_v6 = vld [vmem:[#allocation158_spill] sm:$0xff]  ;;  %v1046_v39 = vrot.slane %v17330_v26, 2  ;;  %v17341_v50 = vld [vmem:[#allocation105_spill] sm:$0xff] }
 0x72c   : > { %v1307_v41 = vadd.f32 %v1275_v27, %v899_v2  ;;  %v4471_v13 = vsel %vm422_vm0, %v17334_v6, %v17333_v40  ;;  %v12756_v32 = vpop.f32.mrf.mxu3  ;;  %v17338_v2 = vld [vmem:[#allocation176_spill] sm:$0xff]  ;;  %v1048_v27 = vrot.slane %v790_v54, 2 }
 0x72d   : > { %7263 = vmatmul.msk.f32.gmra.mxu3 %vm3099_vm10, %v4690_v58  ;;  %v17325_v58 = vld [vmem:[#allocation291_spill] sm:$0xff]  ;;  %17336 = vst [vmem:[#allocation192_spill] sm:$0xff] %v12756_v32  ;;  %v902_v4 = vsel %vm864_vm2, %v900_v43, %v901_v19  ;;  %v1047_v36 = vsel %vm1009_vm3, %v1045_v0, %v1046_v39  ;;  %v1277_v43 = vadd.f32 %v1245_v46, %v17330_v26  ;;  %v17347_v46 = vld [vmem:[#allocation301_spill] sm:$0xff] }
 0x72e   : > { %v4500_v20 = vsel %vm2855_vm4, %v4470_v23, %v17325_v58  ;;  %v1339_v14 = vadd.f32 %v1307_v41, %v1044_v18  ;;  %v1207_v44 = vadd.f32 %v1166_v5, %v902_v4  ;;  %v903_v23 = vrot.slane %v790_v54, 1  ;;  %v17339_v58 = vld [vmem:[#allocation302_spill] sm:$0xff] }
 0x72f   : > { %v4532_v28 = vsel %vm2888_vm6, %v4500_v20, %v17326_v62  ;;  %v1308_v18 = vadd.f32 %v1276_v11, %v902_v4 }
 0x730   : > { %v4564_v48 = vsel %vm2921_vm5, %v4532_v28, %v17327_v57  ;;  %v1371_v21 = vmul.f32 0.11111111, %v1339_v14  ;;  %v1246_v62 = vadd.f32 %v1207_v44, %v1047_v36  ;;  %v17340_v28 = vld [vmem:[#allocation112_spill] sm:$0xff]  ;;  %v1049_v14 = vsel %vm1009_vm3, %v1046_v39, %v1048_v27  ;;  %v17355_v27 = vld [vmem:[#allocation247_spill] sm:$0xff] }
 0x731   : > { %v4596_v42 = vsel %vm2954_vm7, %v4564_v48, %v17328_v60  ;;  %v1340_v57 = vadd.f32 %v1308_v18, %v1047_v36  ;;  %v17342_v60 = vld [vmem:[#allocation163_spill] sm:$0xff] }
 0x732   : > { %7199 = vmatmul.msk.f32.gmra.mxu1 %vm422_vm0, %v1370_v29  ;;  %v4628_v31 = vsel %vm2987_vm9, %v4596_v42, %v17329_v53  ;;  %v991_v29 = vadd.f32 %v902_v4, %v773_v8  ;;  %v4472_v42 = vsel %vm422_vm0, %v17342_v60, %v17341_v50  ;;  %v17343_v53 = vld [vmem:[#allocation179_spill] sm:$0xff]  ;;  %v17349_v4 = vld [vmem:[#allocation146_spill] sm:$0xff] }
 0x733   : > { %v4660_v25 = vsel %vm3020_vm8, %v4628_v31, %v12375_v22  ;;  %v4501_v22 = vsel %vm2855_vm4, %v4471_v13, %v17335_v24  ;;  %v1372_v48 = vmul.f32 0.11111111, %v1340_v57  ;;  %v4502_v31 = vsel %vm2855_vm4, %v4472_v42, %v17343_v53  ;;  %v4397_v13 = vpop.permute.xlu0 %4396  ;;  %v17359_v50 = vld [vmem:[#allocation190_spill] sm:$0xff]  ;;  %v17362_v53 = vld [vmem:[#allocation145_spill] sm:$0xff] }
 0x734   : > { %v4692_v15 = vsel %vm3053_vm11, %v4660_v25, %v4393_v9  ;;  %v1136_v33 = vadd.f32 %v1047_v36, %v991_v29  ;;  %v904_v9 = vsel %vm864_vm2, %v901_v19, %v903_v23  ;;  %v17344_v25 = vld [vmem:[#allocation289_spill] sm:$0xff]  ;;  %v12787_v19 = vpop.f32.mrf.mxu3  ;;  %v17351_v36 = vld [vmem:[#allocation263_spill] sm:$0xff] }
 0x735   : > { %7264 = vmatmul.msk.f32.gmra.mxu3 %vm3099_vm10, %v4691_v30  ;;  %v4533_v30 = vsel %vm2888_vm6, %v4501_v22, %v17337_v63  ;;  %v1208_v0 = vadd.f32 %v1167_v51, %v904_v9  ;;  %17346 = vst [vmem:[#allocation54_spill] sm:$0xff] %v12787_v19  ;;  %v17348_v22 = vld [vmem:[#allocation235_spill] sm:$0xff] }
 0x736   : > { %v4565_v59 = vsel %vm2921_vm5, %v4533_v30, %v17338_v2  ;;  %v4473_v63 = vsel %vm422_vm0, %v17349_v4, %v17348_v22  ;;  %v17350_v30 = vld [vmem:[#allocation56_spill] sm:$0xff] }
 0x737   : > { %v4597_v20 = vsel %vm2954_vm7, %v4565_v59, %v17339_v58  ;;  %v1247_v40 = vadd.f32 %v1208_v0, %v1049_v14  ;;  %v1278_v29 = vadd.f32 %v1246_v62, %v17350_v30  ;;  %v4503_v44 = vsel %vm2855_vm4, %v4473_v63, %v17351_v36  ;;  %v17354_v59 = vld [vmem:[#allocation160_spill] sm:$0xff]  ;;  %v17364_v0 = vld [vmem:[#allocation270_spill] sm:$0xff] }
 0x738   : > { %v4629_v41 = vsel %vm2987_vm9, %v4597_v20, %v17340_v28  ;;  %v4399_v20 = vpop.permute.xlu1 %4398  ;;  %v1168_v42 = vadd.f32 %v1136_v33, %v17350_v30  ;;  %v17366_v33 = vld [vmem:[#allocation319_spill] sm:$0xff]  ;;  %v17370_v22 = vld [vmem:[#allocation184_spill] sm:$0xff] }
 0x739   : > { %v4661_v8 = vsel %vm3020_vm8, %v4629_v41, %v12372_v34  ;;  %v992_v34 = vadd.f32 %v904_v9, %v17330_v26  ;;  %v17371_v30 = vld [vmem:[#allocation64_spill] sm:$0xff] }
 0x73a   : > { %7200 = vmatmul.msk.f32.gmra.mxu1 %vm422_vm0, %v1371_v21  ;;  %v4693_v5 = vsel %vm3053_vm11, %v4661_v8, %v4395_v38  ;;  %v4534_v21 = vsel %vm2888_vm6, %v4502_v31, %v17344_v25  ;;  %v17356_v38 = vld [vmem:[#allocation57_spill] sm:$0xff]  ;;  %v17363_v31 = vld [vmem:[#allocation318_spill] sm:$0xff]  ;;  %v17372_v36 = vld [vmem:[#allocation104_spill] sm:$0xff] }
 0x73b   : > { %v4566_v47 = vsel %vm2921_vm5, %v4534_v21, %v17345_v52  ;;  %v1137_v54 = vadd.f32 %v1049_v14, %v992_v34  ;;  %v17365_v21 = vld [vmem:[#allocation305_spill] sm:$0xff]  ;;  %v4401_v52 = vpop.permute.xlu2 %4400 }
 0x73c   : > { %v4598_v6 = vsel %vm2954_vm7, %v4566_v47, %v17347_v46  ;;  %v12814_v41 = vpop.f32.mrf.mxu3  ;;  %v17367_v46 = vld [vmem:[#allocation273_spill] sm:$0xff] }
 0x73d   : > { %7265 = vmatmul.msk.f32.gmra.mxu3 %vm3099_vm10, %v4692_v15  ;;  %v1309_v15 = vadd.f32 %v1277_v43, %v904_v9  ;;  %v4630_v26 = vsel %vm2987_vm9, %v4598_v6, %v12185_v7  ;;  %v17352_v7 = vld [vmem:[#allocation283_spill] sm:$0xff]  ;;  %17357 = vst [vmem:[#allocation53_spill] sm:$0xff] %v12814_v41  ;;  %v17360_v9 = vld [vmem:[#allocation60_spill] sm:$0xff] }
 0x73e   : > { %v4662_v51 = vsel %vm3020_vm8, %v4630_v26, %v12391_v10  ;;  %v4535_v23 = vsel %vm2888_vm6, %v4503_v44, %v17352_v7  ;;  %v17353_v10 = vld [vmem:[#allocation315_spill] sm:$0xff]  ;;  %v17361_v43 = vld [vmem:[#allocation188_spill] sm:$0xff]  ;;  %v1169_v63 = vadd.f32 %v1137_v54, %v17360_v9  ;;  %v17373_v44 = vld [vmem:[#allocation293_spill] sm:$0xff] }
 0x73f   : > { %v1341_v39 = vadd.f32 %v1309_v15, %v1049_v14  ;;  %v4694_v24 = vsel %vm3053_vm11, %v4662_v51, %v4397_v13  ;;  %v1310_v2 = vadd.f32 %v1278_v29, %v17353_v10  ;;  %v4567_v18 = vsel %vm2921_vm5, %v4535_v23, %v17354_v59  ;;  %v17374_v23 = vld [vmem:[#allocation320_spill] sm:$0xff] }
 0x740   : > { %v4599_v58 = vsel %vm2954_vm7, %v4567_v18, %v17355_v27  ;;  %v1279_v14 = vadd.f32 %v1247_v40, %v17360_v9  ;;  %v1209_v40 = vadd.f32 %v1168_v42, %v17353_v10  ;;  %v17376_v18 = vld [vmem:[#allocation304_spill] sm:$0xff]  ;;  %v17380_v42 = vld [vmem:[#allocation65_spill] sm:$0xff] }
 0x741   : > { %v1373_v11 = vmul.f32 0.11111111, %v1341_v39  ;;  %v1342_v28 = vadd.f32 %v1310_v2, %v17356_v38  ;;  %v4631_v62 = vsel %vm2987_vm9, %v4599_v58, %v12183_v61  ;;  %v17375_v2 = vld [vmem:[#allocation249_spill] sm:$0xff]  ;;  %v4403_v58 = vpop.permute.xlu0 %4402  ;;  %v17377_v54 = vld [vmem:[#allocation8_spill] sm:$0xff] }
 0x742   : > { %7201 = vmatmul.msk.f32.gmra.mxu1 %vm422_vm0, %v1372_v48  ;;  %v4663_v57 = vsel %vm3020_vm8, %v4631_v62, %v12389_v55  ;;  %v17358_v48 = vld [vmem:[#allocation274_spill] sm:$0xff]  ;;  %v1311_v34 = vadd.f32 %v1279_v14, %v17363_v31  ;;  %v1248_v26 = vadd.f32 %v1209_v40, %v17356_v38  ;;  %v1210_v38 = vadd.f32 %v1169_v63, %v17363_v31  ;;  %v17381_v14 = vld [vmem:[#allocation295_spill] sm:$0xff]  ;;  %v17385_v31 = vld [vmem:[#allocation116_spill] sm:$0xff] }
 0x743   : > { %v1374_v8 = vmul.f32 0.11111111, %v1342_v28  ;;  %v4474_v60 = vsel %vm422_vm0, %v17359_v50, %v17358_v48  ;;  %v17378_v48 = vld [vmem:[#allocation281_spill] sm:$0xff]  ;;  %v17389_v40 = vld [vmem:[#allocation27_spill] sm:$0xff]  ;;  %v17393_v63 = vld [vmem:[#allocation132_spill] sm:$0xff] }
 0x744   : > { %v4504_v61 = vsel %vm2855_vm4, %v4474_v60, %v17361_v43  ;;  %v1343_v47 = vadd.f32 %v1311_v34, %v17366_v33  ;;  %v1280_v29 = vadd.f32 %v1248_v26, %v17371_v30  ;;  %v17379_v50 = vld [vmem:[#allocation165_spill] sm:$0xff]  ;;  %v17391_v26 = vld [vmem:[#allocation187_spill] sm:$0xff] }
 0x745   : > { %7266 = vmatmul.msk.f32.gmra.mxu3 %vm3099_vm10, %v4693_v5  ;;  %v4695_v5 = vsel %vm3053_vm11, %v4663_v57, %v4399_v20  ;;  %v4536_v55 = vsel %vm2888_vm6, %v4504_v61, %v17362_v53  ;;  %v4476_v60 = vsel %vm422_vm0, %v17379_v50, %v17378_v48  ;;  %v17384_v53 = vld [vmem:[#allocation5_spill] sm:$0xff] }
 0x746   : > { %v4568_v25 = vsel %vm2921_vm5, %v4536_v55, %v17364_v0  ;;  %v1375_v39 = vmul.f32 0.11111111, %v1343_v47  ;;  %v1312_v10 = vadd.f32 %v1280_v29, %v17374_v23  ;;  %v4506_v43 = vsel %vm2855_vm4, %v4476_v60, %v17381_v14  ;;  %v17386_v0 = vld [vmem:[#allocation250_spill] sm:$0xff]  ;;  %v17394_v29 = vld [vmem:[#allocation128_spill] sm:$0xff]  ;;  %v4407_v23 = vpop.permute.xlu2 %4406  ;;  %v17401_v48 = vld [vmem:[#allocation217_spill] sm:$0xff] }
 0x747   : > { %v4600_v15 = vsel %vm2954_vm7, %v4568_v25, %v17365_v21  ;;  %v4405_v21 = vpop.permute.xlu1 %4404  ;;  %v17402_v60 = vld [vmem:[#allocation223_spill] sm:$0xff] }
 0x748   : > { %v4632_v6 = vsel %vm2987_vm9, %v4600_v15, %v17367_v46  ;;  %v1344_v20 = vadd.f32 %v1312_v10, %v17377_v54  ;;  %v17387_v15 = vld [vmem:[#allocation14_spill] sm:$0xff]  ;;  %v6234_v54 = vld [vmem:[%s15688_s9 + $0x80] sm:$0xff] }
 0x749   : > { %v4664_v13 = vsel %vm3020_vm8, %v4632_v6, %v12397_v1 }
 0x74a   : > { %7202 = vmatmul.msk.f32.gmra.mxu1 %vm422_vm0, %v1373_v11  ;;  %v4696_v51 = vsel %vm3053_vm11, %v4664_v13, %v4401_v52  ;;  %v12843_v11 = vpop.f32.mrf.mxu3  ;;  %v1376_v57 = vmul.f32 0.11111111, %v1344_v20 }
 0x74b   : > { %17368 = vst [vmem:[#allocation205_spill] sm:$0xff] %v12843_v11 }
 0x74d   : > { %7267 = vmatmul.msk.f32.gmra.mxu3 %vm3099_vm10, %v4694_v24  ;;  %v17369_v24 = vld [vmem:[#allocation141_spill] sm:$0xff] }
 0x74e   : > { %v4475_v4 = vsel %vm422_vm0, %v17370_v22, %v17369_v24  ;;  %v12899_v24 = vld [vmem:[%s15687_s8] ss:$0 sm:$0xff]  ;;  %v17392_v22 = vld [vmem:[#allocation172_spill] sm:$0xff] }
 0x74f   : > { %v4505_v1 = vsel %vm2855_vm4, %v4475_v4, %v17372_v36 }
 0x750   : > { %v4537_v7 = vsel %vm2888_vm6, %v4505_v1, %v17373_v44  ;;  %v17395_v44 = vld [vmem:[#allocation308_spill] sm:$0xff] }
 0x751   : > { %v4569_v59 = vsel %vm2921_vm5, %v4537_v7, %v17375_v2  ;;  %v6235_v2 = vld [vmem:[%s15688_s9 + $0x88] sm:$0xff] }
 0x752   : > { %7203 = vmatmul.msk.f32.gmra.mxu1 %vm422_vm0, %v1374_v8  ;;  %v4601_v27 = vsel %vm2954_vm7, %v4569_v59, %v17376_v18  ;;  %v1249_v8 = vadd.f32 %v1210_v38, %v17366_v33  ;;  %v17388_v33 = vld [vmem:[#allocation276_spill] sm:$0xff]  ;;  %v17396_v59 = vld [vmem:[#allocation9_spill] sm:$0xff] }
 0x753   : > { %v4633_v28 = vsel %vm2987_vm9, %v4601_v27, %v12204_v16  ;;  %v12876_v16 = vpop.f32.mrf.mxu3  ;;  %6431 = vmatpush.msrb.mxu1 %v6235_v2  ;;  %v17397_v27 = vld [vmem:[#allocation228_spill] sm:$0xff] }
 0x754   : > { %v4665_v62 = vsel %vm3020_vm8, %v4633_v28, %v12410_v17  ;;  %v1281_v9 = vadd.f32 %v1249_v8, %v17380_v42  ;;  %17382 = vst [vmem:[#allocation161_spill] sm:$0xff] %v12876_v16  ;;  %v17383_v17 = vld [vmem:[#allocation152_spill] sm:$0xff]  ;;  %v17398_v28 = vld [vmem:[#allocation103_spill] sm:$0xff] }
 0x755   : > { %7268 = vmatmul.msk.f32.gmra.mxu3 %vm3099_vm10, %v4695_v5  ;;  %v4697_v5 = vsel %vm3053_vm11, %v4665_v62, %v4403_v58  ;;  %v4538_v61 = vsel %vm2888_vm6, %v4506_v43, %v17383_v17  ;;  %6432 = vmatpush.msrb.mxu1 %v6234_v54  ;;  %v17399_v62 = vld [vmem:[#allocation202_spill] sm:$0xff]  ;;  %v17400_v8 = vld [vmem:[#allocation96_spill] sm:$0xff]  ;;  %v17403_v43 = vld [vmem:[#allocation307_spill] sm:$0xff] }
 0x756   : > { %v1313_v55 = vadd.f32 %v1281_v9, %v17384_v53  ;;  %v4570_v34 = vsel %vm2921_vm5, %v4538_v61, %v17385_v31  ;;  %v4409_v61 = vpop.permute.xlu0 %4408  ;;  %v17405_v31 = vld [vmem:[#allocation173_spill] sm:$0xff] }
 0x757   : > { %v4602_v25 = vsel %vm2954_vm7, %v4570_v34, %v17386_v0  ;;  %v17406_v0 = vld [vmem:[#allocation194_spill] sm:$0xff] }
 0x758   : > { %v1345_v52 = vadd.f32 %v1313_v55, %v17387_v15  ;;  %v4634_v47 = vsel %vm2987_vm9, %v4602_v25, %v17388_v33  ;;  %v17404_v55 = vld [vmem:[#allocation143_spill] sm:$0xff] }
 0x759   : > { %v4666_v46 = vsel %vm3020_vm8, %v4634_v47, %v17389_v40  ;;  %v4479_v34 = vsel %vm422_vm0, %v17405_v31, %v17404_v55  ;;  %v17409_v40 = vld [vmem:[#allocation139_spill] sm:$0xff] }
 0x75a   : > { %7204 = vmatmul.msk.f32.gmra.mxu1 %vm422_vm0, %v1375_v39  ;;  %v1377_v6 = vmul.f32 0.11111111, %v1345_v52  ;;  %v4698_v13 = vsel %vm3053_vm11, %v4666_v46, %v4405_v21  ;;  %v17390_v39 = vld [vmem:[#allocation157_spill] sm:$0xff]  ;;  %v17407_v21 = vld [vmem:[#allocation171_spill] sm:$0xff] }
 0x75b   : > { %v4509_v15 = vsel %vm2855_vm4, %v4479_v34, %v17407_v21  ;;  %v17408_v52 = vld [vmem:[#allocation211_spill] sm:$0xff]  ;;  %v4413_v21 = vpop.permute.xlu2 %4412 }
 0x75c   : > { %v4541_v46 = vsel %vm2888_vm6, %v4509_v15, %v17409_v40  ;;  %v17424_v40 = vld [vmem:[#allocation198_spill] sm:$0xff] }
 0x75d   : > { %7269 = vmatmul.msk.f32.gmra.mxu3 %vm3099_vm10, %v4696_v51  ;;  %v4477_v51 = vsel %vm422_vm0, %v17391_v26, %v17390_v39  ;;  %v17410_v39 = vld [vmem:[#allocation149_spill] sm:$0xff] }
 0x75e   : > { %v4507_v4 = vsel %vm2855_vm4, %v4477_v51, %v17392_v22  ;;  %v4573_v26 = vsel %vm2921_vm5, %v4541_v46, %v17410_v39  ;;  %v17411_v22 = vld [vmem:[#allocation300_spill] sm:$0xff] }
 0x75f   : > { %v4539_v30 = vsel %vm2888_vm6, %v4507_v4, %v17393_v63  ;;  %v4605_v4 = vsel %vm2954_vm7, %v4573_v26, %v17411_v22  ;;  %v17426_v26 = vld [vmem:[#allocation34_spill] sm:$0xff] }
 0x760   : > { %v4571_v36 = vsel %vm2921_vm5, %v4539_v30, %v17394_v29 }
 0x761   : > { %v4603_v7 = vsel %vm2954_vm7, %v4571_v36, %v17395_v44 }
 0x762   : > { %7205 = vmatmul.msk.f32.gmra.mxu1 %vm422_vm0, %v1376_v57  ;;  %v4635_v18 = vsel %vm2987_vm9, %v4603_v7, %v17396_v59  ;;  %v4478_v57 = vsel %vm422_vm0, %v17399_v62, %v17398_v28  ;;  %v17413_v59 = vld [vmem:[#allocation24_spill] sm:$0xff] }
 0x763   : > { %v4667_v58 = vsel %vm3020_vm8, %v4635_v18, %v17397_v27  ;;  %v4637_v18 = vsel %vm2987_vm9, %v4605_v4, %v17413_v59  ;;  %v4411_v27 = vpop.permute.xlu1 %4410  ;;  %v17414_v62 = vld [vmem:[#allocation32_spill] sm:$0xff]  ;;  %v17427_v4 = vld [vmem:[#allocation191_spill] sm:$0xff] }
 0x764   : > { %v4699_v20 = vsel %vm3053_vm11, %v4667_v58, %v4407_v23 }
 0x765   : > { %7270 = vmatmul.msk.f32.gmra.mxu3 %vm3099_vm10, %v4697_v5  ;;  %v4508_v5 = vsel %vm2855_vm4, %v4478_v57, %v17400_v8  ;;  %v4669_v57 = vsel %vm3020_vm8, %v4637_v18, %v17414_v62 }
 0x766   : > { %v4540_v50 = vsel %vm2888_vm6, %v4508_v5, %v17401_v48  ;;  %v4701_v5 = vsel %vm3053_vm11, %v4669_v57, %v4411_v27  ;;  %v17432_v57 = vld [vmem:[#allocation26_spill] sm:$0xff] }
 0x767   : > { %v4572_v42 = vsel %vm2921_vm5, %v4540_v50, %v17402_v60  ;;  %v17416_v60 = vld [vmem:[#allocation153_spill] sm:$0xff] }
 0x768   : > { %v4604_v17 = vsel %vm2954_vm7, %v4572_v42, %v17403_v43  ;;  %v17417_v42 = vld [vmem:[#allocation196_spill] sm:$0xff] }
 0x769   : > { %v4636_v25 = vsel %vm2987_vm9, %v4604_v17, %v17406_v0  ;;  %v17419_v17 = vld [vmem:[#allocation264_spill] sm:$0xff]  ;;  %v17421_v0 = vld [vmem:[#allocation311_spill] sm:$0xff] }
 0x76a   : > { %7206 = vmatmul.msk.f32.gmra.mxu1 %vm422_vm0, %v1377_v6  ;;  %v4668_v33 = vsel %vm3020_vm8, %v4636_v25, %v17408_v52  ;;  %v17422_v52 = vld [vmem:[#allocation144_spill] sm:$0xff] }
 0x76b   : > { %v4700_v6 = vsel %vm3053_vm11, %v4668_v33, %v4409_v61  ;;  %v17423_v33 = vld [vmem:[#allocation131_spill] sm:$0xff] }
 0x76d   : > { %7271 = vmatmul.msk.f32.gmra.mxu3 %vm3099_vm10, %v4698_v13 }
 0x770   : > { %v4840_v1 = vpop.f32.mrf.mxu3 }
 0x771   : > { %v4841_v10 = vadd.f32 %v12899_v24, %v4840_v1  ;;  %v17412_v1 = vld [vmem:[#allocation63_spill] sm:$0xff] }
 0x772   : > { %7423 = vrot.lane.b32.xlu0 %v17412_v1, %s8054_s22 }
 0x773   : > { %v4936_v38 = vmax.f32 %v4841_v10, 0.0 }
 0x775   : > { %7272 = vmatmul.msk.f32.gmra.mxu3 %vm3099_vm10, %v4699_v20  ;;  %v5000_v9 = vrot.slane %v4936_v38, 7 }
 0x777   : > { %v12948_v13 = vsel %vm665_vm1, 0.0, %v5000_v9 }
 0x778   : > { %v4843_v14 = vpop.f32.mrf.mxu3  ;;  %v5157_v63 = vrot.slane %v12948_v13, 1  ;;  %v5232_v30 = vrot.slane %v12948_v13, 2 }
 0x779   : > { %v4844_v53 = vadd.f32 %v12899_v24, %v4843_v14  ;;  %v17418_v14 = vld [vmem:[#allocation280_spill] sm:$0xff] }
 0x77b   : > { %v4937_v47 = vmax.f32 %v4844_v53, 0.0  ;;  %v17420_v53 = vld [vmem:[#allocation100_spill] sm:$0xff] }
 0x77d   : > { %v5001_v51 = vrot.slane %v4937_v47, 7  ;;  %7273 = vmatmul.msk.f32.gmra.mxu3 %vm3099_vm10, %v4700_v6  ;;  %v4481_v47 = vsel %vm422_vm0, %v17423_v33, %v17422_v52  ;;  %v17425_v6 = vld [vmem:[#allocation262_spill] sm:$0xff] }
 0x77e   : > { %v4511_v39 = vsel %vm2855_vm4, %v4481_v47, %v17425_v6  ;;  %v17437_v33 = vld [vmem:[#allocation142_spill] sm:$0xff] }
 0x77f   : > { %v12958_v29 = vsel %vm665_vm1, %v5000_v9, %v5001_v51  ;;  %v5111_v36 = vsel %vm665_vm1, %v5001_v51, 0.0  ;;  %v4480_v9 = vsel %vm422_vm0, %v17417_v42, %v17416_v60 }
 0x780   : > { %v5158_v44 = vrot.slane %v12958_v29, 1  ;;  %v5160_v7 = vrot.slane %v5111_v36, 1  ;;  %v5233_v23 = vrot.slane %v12958_v29, 2  ;;  %v5235_v10 = vrot.slane %v5111_v36, 2  ;;  %v4846_v2 = vpop.f32.mrf.mxu3 }
 0x781   : > { %v4847_v58 = vadd.f32 %v12899_v24, %v4846_v2  ;;  %v4510_v43 = vsel %vm2855_vm4, %v4480_v9, %v17418_v14 }
 0x782   : > { %v5159_v54 = vsel %vm864_vm2, %v5157_v63, %v5158_v44  ;;  %v5161_v20 = vsel %vm864_vm2, %v5158_v44, %v5160_v7  ;;  %v5234_v38 = vsel %vm1009_vm3, %v5232_v30, %v5233_v23  ;;  %v5236_v28 = vsel %vm1009_vm3, %v5233_v23, %v5235_v10  ;;  %v17429_v44 = vld [vmem:[#allocation232_spill] sm:$0xff]  ;;  %v17430_v10 = vld [vmem:[#allocation310_spill] sm:$0xff] }
 0x783   : > { %v12974_v8 = vpack.i.bf16 %v5161_v20, %v5159_v54  ;;  %v4938_v48 = vmax.f32 %v4847_v58, 0.0  ;;  %v12977_v50 = vpack.i.bf16 %v5236_v28, %v5234_v38  ;;  %v4542_v61 = vsel %vm2888_vm6, %v4510_v43, %v17419_v17  ;;  %v17433_v17 = vld [vmem:[#allocation156_spill] sm:$0xff] }
 0x784   : > { %v4574_v55 = vsel %vm2921_vm5, %v4542_v61, %v17420_v53  ;;  %v4543_v63 = vsel %vm2888_vm6, %v4511_v39, %v17427_v4 }
 0x785   : > { %17415 = vst [vmem:[#allocation120_spill] sm:$0xff] %v12977_v50  ;;  %7428 = vrot.lane.b32.xlu1 %v12974_v8, %s8054_s22  ;;  %7274 = vmatmul.msk.f32.gmra.mxu3 %vm3099_vm10, %v4701_v5  ;;  %v5003_v31 = vrot.slane %v4938_v48, 7  ;;  %v4606_v25 = vsel %vm2954_vm7, %v4574_v55, %v17421_v0  ;;  %v4575_v7 = vsel %vm2921_vm5, %v4543_v63, %v17429_v44  ;;  %v4415_v48 = vpop.permute.xlu0 %4414  ;;  %v17434_v0 = vld [vmem:[#allocation257_spill] sm:$0xff]  ;;  %v17440_v63 = vld [vmem:[#allocation122_spill] sm:$0xff] }
 0x786   : > { %v4638_v46 = vsel %vm2987_vm9, %v4606_v25, %v17424_v40  ;;  %v4607_v2 = vsel %vm2954_vm7, %v4575_v7, %v17430_v10  ;;  %v17435_v25 = vld [vmem:[#allocation118_spill] sm:$0xff]  ;;  %v17438_v40 = vld [vmem:[#allocation107_spill] sm:$0xff] }
 0x787   : > { %v4670_v51 = vsel %vm3020_vm8, %v4638_v46, %v17426_v26  ;;  %v13007_v36 = vsel %vm665_vm1, 0.0, %v5003_v31  ;;  %v4639_v5 = vsel %vm2987_vm9, %v4607_v2, %v17432_v57  ;;  %v17439_v26 = vld [vmem:[#allocation303_spill] sm:$0xff] }
 0x788   : > { %v4849_v34 = vpop.f32.mrf.mxu3  ;;  %v4702_v30 = vsel %vm3053_vm11, %v4670_v51, %v4413_v21  ;;  %17428 = vst [vmem:[#allocation61_spill] sm:$0xff] %v13007_v36  ;;  %v5162_v59 = vrot.slane %v13007_v36, 1  ;;  %v5237_v58 = vrot.slane %v13007_v36, 2  ;;  %v4671_v61 = vsel %vm3020_vm8, %v4639_v5, %v17433_v17  ;;  %v17442_v7 = vld [vmem:[#allocation19_spill] sm:$0xff] }
 0x789   : > { %v4850_v15 = vadd.f32 %v12899_v24, %v4849_v34  ;;  %v4482_v21 = vsel %vm422_vm0, %v17435_v25, %v17434_v0  ;;  %v17443_v10 = vld [vmem:[#allocation119_spill] sm:$0xff] }
 0x78a   : > { %v17449_v25 = vld [vmem:[#allocation195_spill] sm:$0xff] }
 0x78b   : > { %v4939_v22 = vmax.f32 %v4850_v15, 0.0  ;;  %v17436_v15 = vld [vmem:[#allocation117_spill] sm:$0xff] }
 0x78c   : > { %v4512_v52 = vsel %vm2855_vm4, %v4482_v21, %v17436_v15  ;;  %v4419_v15 = vpop.permute.xlu2 %4418 }
 0x78d   : > { %v5004_v23 = vrot.slane %v4939_v22, 7  ;;  %7275 = vmatmul.msk.f32.gmra.mxu3 %vm3099_vm10, %v4702_v30  ;;  %v4544_v47 = vsel %vm2888_vm6, %v4512_v52, %v17437_v33  ;;  %v4417_v22 = vpop.permute.xlu1 %4416  ;;  %v17441_v30 = vld [vmem:[#allocation212_spill] sm:$0xff] }
 0x78e   : > { %v4576_v46 = vsel %vm2921_vm5, %v4544_v47, %v17438_v40  ;;  %v4483_v44 = vsel %vm422_vm0, %v17441_v30, %v17440_v63  ;;  %v17452_v63 = vld [vmem:[#allocation113_spill] sm:$0xff]  ;;  %v17453_v30 = vld [vmem:[#allocation210_spill] sm:$0xff] }
 0x78f   : > { %v13016_v18 = vsel %vm665_vm1, %v5003_v31, %v5004_v23  ;;  %v5112_v27 = vsel %vm665_vm1, %v5004_v23, 0.0  ;;  %v4703_v31 = vsel %vm3053_vm11, %v4671_v61, %v4415_v48  ;;  %v4608_v51 = vsel %vm2954_vm7, %v4576_v46, %v17439_v26  ;;  %v17448_v48 = vld [vmem:[#allocation314_spill] sm:$0xff] }
 0x790   : > { %17431 = vst [vmem:[#allocation62_spill] sm:$0xff] %v13016_v18  ;;  %v5163_v54 = vrot.slane %v13016_v18, 1  ;;  %v5165_v20 = vrot.slane %v5112_v27, 1  ;;  %v5240_v38 = vrot.slane %v5112_v27, 2  ;;  %v4852_v28 = vpop.f32.mrf.mxu3  ;;  %v5238_v62 = vrot.slane %v13016_v18, 2 }
 0x791   : > { %v4853_v60 = vadd.f32 %v12899_v24, %v4852_v28  ;;  %v4640_v23 = vsel %vm2987_vm9, %v4608_v51, %v17442_v7  ;;  %v4513_v2 = vsel %vm2855_vm4, %v4483_v44, %v17443_v10  ;;  %v4484_v44 = vsel %vm422_vm0, %v17453_v30, %v17452_v63  ;;  %v17454_v7 = vld [vmem:[#allocation168_spill] sm:$0xff]  ;;  %v13104_v10 = vpop.f32.mrf.mxu1 }
 0x792   : > { %v5239_v42 = vsel %vm1009_vm3, %v5237_v58, %v5238_v62  ;;  %v5164_v9 = vsel %vm864_vm2, %v5162_v59, %v5163_v54  ;;  %v5166_v14 = vsel %vm864_vm2, %v5163_v54, %v5165_v20  ;;  %v5241_v43 = vsel %vm1009_vm3, %v5238_v62, %v5240_v38  ;;  %v17444_v59 = vld [vmem:[#allocation38_spill] sm:$0xff]  ;;  %v17445_v54 = vld [vmem:[#allocation203_spill] sm:$0xff]  ;;  %17455 = vst [vmem:[#allocation297_spill] sm:$0xff] %v13104_v10 }
 0x793   : > { %7287 = vmatmul.msk.f32.vlgmr.msrb.gmra.mxu1 %vm2855_vm4, %v5239_v42  ;;  %v13032_v53 = vpack.i.bf16 %v5166_v14, %v5164_v9  ;;  %v13034_v55 = vpack.i.bf16 %v5241_v43, %v5239_v42  ;;  %v4940_v34 = vmax.f32 %v4853_v60, 0.0  ;;  %v4672_v27 = vsel %vm3020_vm8, %v4640_v23, %v17444_v59  ;;  %v17447_v62 = vld [vmem:[#allocation135_spill] sm:$0xff] }
 0x794   : > { %v4545_v20 = vsel %vm2888_vm6, %v4513_v2, %v17445_v54  ;;  %v4704_v38 = vsel %vm3053_vm11, %v4672_v27, %v4417_v22  ;;  %v4514_v23 = vsel %vm2855_vm4, %v4484_v44, %v17454_v7  ;;  %v17456_v2 = vld [vmem:[#allocation221_spill] sm:$0xff] }
 0x795   : > { %7433 = vrot.lane.b32.xlu2 %v13032_v53, %s8054_s22  ;;  %7276 = vmatmul.msk.f32.gmra.mxu3 %vm3099_vm10, %v4703_v31  ;;  %v5006_v6 = vrot.slane %v4940_v34, 7  ;;  %v4577_v57 = vsel %vm2921_vm5, %v4545_v20, %v17447_v62  ;;  %v4546_v59 = vsel %vm2888_vm6, %v4514_v23, %v17456_v2  ;;  %v17457_v27 = vld [vmem:[#allocation129_spill] sm:$0xff] }
 0x796   : > { %v4609_v60 = vsel %vm2954_vm7, %v4577_v57, %v17448_v48  ;;  %v4421_v57 = vpop.permute.xlu0 %4420  ;;  %v17459_v48 = vld [vmem:[#allocation137_spill] sm:$0xff] }
 0x797   : > { %v13066_v28 = vsel %vm665_vm1, 0.0, %v5006_v6  ;;  %v4641_v21 = vsel %vm2987_vm9, %v4609_v60, %v17449_v25  ;;  %v17460_v60 = vld [vmem:[#allocation178_spill] sm:$0xff]  ;;  %v17464_v25 = vld [vmem:[#allocation99_spill] sm:$0xff] }
 0x798   : > { %v4855_v39 = vpop.f32.mrf.mxu3  ;;  %17446 = vst [vmem:[#allocation6_spill] sm:$0xff] %v13066_v28  ;;  %v5167_v42 = vrot.slane %v13066_v28, 1 }
 0x799   : > { %v4856_v4 = vadd.f32 %v12899_v24, %v4855_v39  ;;  %v13140_v30 = vpop.f32.mrf.mxu1 }
 0x79a   : > { %17469 = vst [vmem:[#allocation16_spill] sm:$0xff] %v13140_v30 }
 0x79b   : > { %v4941_v58 = vmax.f32 %v4856_v4, 0.0  ;;  %7288 = vmatmul.msk.f32.gmra.mxu1 %vm2855_vm4, %v5241_v43  ;;  %v5242_v43 = vrot.slane %v13066_v28, 2 }
 0x79d   : > { %v5007_v5 = vrot.slane %v4941_v58, 7  ;;  %7277 = vmatmul.msk.f32.gmra.mxu3 %vm3099_vm10, %v4704_v38  ;;  %v4578_v58 = vsel %vm2921_vm5, %v4546_v59, %v17457_v27  ;;  %v17458_v38 = vld [vmem:[#allocation313_spill] sm:$0xff]  ;;  %v17470_v27 = vld [vmem:[#allocation138_spill] sm:$0xff] }
 0x79e   : > { %v4610_v62 = vsel %vm2954_vm7, %v4578_v58, %v17458_v38 }
 0x79f   : > { %v13075_v9 = vsel %vm665_vm1, %v5006_v6, %v5007_v5  ;;  %v5113_v14 = vsel %vm665_vm1, %v5007_v5, 0.0  ;;  %v17450_v6 = vld [vmem:[#allocation40_spill] sm:$0xff] }
 0x7a0   : > { %v5168_v17 = vrot.slane %v13075_v9, 1  ;;  %v5170_v61 = vrot.slane %v5113_v14, 1  ;;  %v5245_v31 = vrot.slane %v5113_v14, 2  ;;  %v4858_v34 = vpop.f32.mrf.mxu3  ;;  %v5243_v0 = vrot.slane %v13075_v9, 2  ;;  %v17461_v14 = vld [vmem:[#allocation28_spill] sm:$0xff] }
 0x7a1   : > { %v4859_v52 = vadd.f32 %v12899_v24, %v4858_v34  ;;  %v4673_v39 = vsel %vm3020_vm8, %v4641_v21, %v17450_v6  ;;  %v17467_v6 = vld [vmem:[#allocation306_spill] sm:$0xff] }
 0x7a2   : > { %v5244_v33 = vsel %vm1009_vm3, %v5242_v43, %v5243_v0  ;;  %v5169_v47 = vsel %vm864_vm2, %v5167_v42, %v5168_v17  ;;  %v5171_v40 = vsel %vm864_vm2, %v5168_v17, %v5170_v61  ;;  %v5246_v46 = vsel %vm1009_vm3, %v5243_v0, %v5245_v31  ;;  %v17462_v17 = vld [vmem:[#allocation115_spill] sm:$0xff] }
 0x7a3   : > { %7289 = vmatmul.msk.f32.gmra.mxu1 %vm2855_vm4, %v5244_v33  ;;  %v13091_v26 = vpack.i.bf16 %v5171_v40, %v5169_v47  ;;  %v13093_v51 = vpack.i.bf16 %v5246_v46, %v5244_v33  ;;  %v4705_v22 = vsel %vm3053_vm11, %v4673_v39, %v4419_v15  ;;  %v4942_v4 = vmax.f32 %v4859_v52, 0.0  ;;  %v17463_v31 = vld [vmem:[#allocation227_spill] sm:$0xff]  ;;  %v17466_v33 = vld [vmem:[#allocation269_spill] sm:$0xff] }
 0x7a4   : > { %v4485_v42 = vsel %vm422_vm0, %v17460_v60, %v17459_v48  ;;  %v4642_v43 = vsel %vm2987_vm9, %v4610_v62, %v17461_v14  ;;  %v17471_v48 = vld [vmem:[#allocation39_spill] sm:$0xff] }
 0x7a5   : > { %17451 = vst [vmem:[#allocation296_spill] sm:$0xff] %v13093_v51  ;;  %7438 = vrot.lane.b32.xlu0 %v13091_v26, %s8054_s22  ;;  %7278 = vmatmul.msk.f32.gmra.mxu3 %vm3099_vm10, %v4705_v22  ;;  %v5009_v54 = vrot.slane %v4942_v4, 7  ;;  %v4515_v61 = vsel %vm2855_vm4, %v4485_v42, %v17462_v17  ;;  %v4674_v34 = vsel %vm3020_vm8, %v4642_v43, %v17463_v31  ;;  %v17474_v31 = vld [vmem:[#allocation231_spill] sm:$0xff] }
 0x7a6   : > { %v4547_v21 = vsel %vm2888_vm6, %v4515_v61, %v17464_v25  ;;  %v4706_v15 = vsel %vm3053_vm11, %v4674_v34, %v4421_v57  ;;  %v17473_v61 = vld [vmem:[#allocation277_spill] sm:$0xff] }
 0x7a7   : > { %v13127_v52 = vsel %vm665_vm1, 0.0, %v5009_v54  ;;  %v4579_v47 = vsel %vm2921_vm5, %v4547_v21, %v17466_v33  ;;  %v4486_v34 = vsel %vm422_vm0, %v17474_v31, %v17473_v61  ;;  %v17476_v21 = vld [vmem:[#allocation224_spill] sm:$0xff]  ;;  %v17477_v33 = vld [vmem:[#allocation177_spill] sm:$0xff] }
 0x7a8   : > { %v4861_v20 = vpop.f32.mrf.mxu3  ;;  %17465 = vst [vmem:[#allocation93_spill] sm:$0xff] %v13127_v52  ;;  %v4611_v39 = vsel %vm2954_vm7, %v4579_v47, %v17467_v6  ;;  %v5172_v22 = vrot.slane %v13127_v52, 1  ;;  %v5247_v63 = vrot.slane %v13127_v52, 2 }
 0x7a9   : > { %v4862_v5 = vadd.f32 %v12899_v24, %v4861_v20  ;;  %v4643_v58 = vsel %vm2987_vm9, %v4611_v39, %v17470_v27  ;;  %v4423_v20 = vpop.permute.xlu1 %4422  ;;  %v17478_v39 = vld [vmem:[#allocation317_spill] sm:$0xff]  ;;  %v13179_v27 = vpop.f32.mrf.mxu1 }
 0x7aa   : > { %v4675_v60 = vsel %vm3020_vm8, %v4643_v58, %v17471_v48  ;;  %17482 = vst [vmem:[#allocation23_spill] sm:$0xff] %v13179_v27  ;;  %v17483_v58 = vld [vmem:[#allocation183_spill] sm:$0xff] }
 0x7ab   : > { %v4943_v0 = vmax.f32 %v4862_v5, 0.0  ;;  %7290 = vmatmul.msk.f32.gmra.mxu1 %vm2855_vm4, %v5246_v46  ;;  %v4707_v43 = vsel %vm3053_vm11, %v4675_v60, %v4423_v20 }
 0x7ad   : > { %v5010_v40 = vrot.slane %v4943_v0, 7  ;;  %7279 = vmatmul.msk.f32.gmra.mxu3 %vm3099_vm10, %v4706_v15  ;;  %v17475_v0 = vld [vmem:[#allocation181_spill] sm:$0xff] }
 0x7ae   : > { %v4516_v25 = vsel %vm2855_vm4, %v4486_v34, %v17475_v0  ;;  %v17488_v34 = vld [vmem:[#allocation316_spill] sm:$0xff] }
 0x7af   : > { %v13136_v46 = vsel %vm665_vm1, %v5009_v54, %v5010_v40  ;;  %v5114_v4 = vsel %vm665_vm1, %v5010_v40, 0.0  ;;  %v4548_v15 = vsel %vm2888_vm6, %v4516_v25, %v17476_v21 }
 0x7b0   : > { %17468 = vst [vmem:[#allocation10_spill] sm:$0xff] %v13136_v46  ;;  %v5173_v44 = vrot.slane %v13136_v46, 1  ;;  %v5175_v7 = vrot.slane %v5114_v4, 1  ;;  %v5250_v23 = vrot.slane %v5114_v4, 2  ;;  %v4864_v2 = vpop.f32.mrf.mxu3  ;;  %v5248_v59 = vrot.slane %v13136_v46, 2  ;;  %v4425_v4 = vpop.permute.xlu2 %4424 }
 0x7b1   : > { %v4865_v54 = vadd.f32 %v12899_v24, %v4864_v2  ;;  %v4580_v47 = vsel %vm2921_vm5, %v4548_v15, %v17477_v33  ;;  %v17481_v2 = vld [vmem:[#allocation189_spill] sm:$0xff] }
 0x7b2   : > { %v5249_v38 = vsel %vm1009_vm3, %v5247_v63, %v5248_v59  ;;  %v5174_v62 = vsel %vm864_vm2, %v5172_v22, %v5173_v44  ;;  %v5176_v57 = vsel %vm864_vm2, %v5173_v44, %v5175_v7  ;;  %v5251_v5 = vsel %vm1009_vm3, %v5248_v59, %v5250_v23  ;;  %v17479_v44 = vld [vmem:[#allocation260_spill] sm:$0xff]  ;;  %v17480_v7 = vld [vmem:[#allocation199_spill] sm:$0xff] }
 0x7b3   : > { %7291 = vmatmul.msk.f32.gmra.mxu1 %vm2855_vm4, %v5249_v38  ;;  %v13154_v42 = vpack.i.bf16 %v5176_v57, %v5174_v62  ;;  %v13156_v14 = vpack.i.bf16 %v5251_v5, %v5249_v38  ;;  %v4944_v17 = vmax.f32 %v4865_v54, 0.0  ;;  %v4612_v22 = vsel %vm2954_vm7, %v4580_v47, %v17478_v39  ;;  %v17484_v54 = vld [vmem:[#allocation278_spill] sm:$0xff] }
 0x7b4   : > { %v4487_v23 = vsel %vm422_vm0, %v17480_v7, %v17479_v44  ;;  %v4644_v59 = vsel %vm2987_vm9, %v4612_v22, %v17481_v2  ;;  %v17485_v57 = vld [vmem:[#allocation230_spill] sm:$0xff]  ;;  %v4427_v44 = vpop.permute.xlu0 %4426 }
 0x7b5   : > { %17472 = vst [vmem:[#allocation13_spill] sm:$0xff] %v13154_v42  ;;  %7443 = vrot.lane.b32.xlu1 %v13154_v42, %s8054_s22  ;;  %7280 = vmatmul.msk.f32.gmra.mxu3 %vm3099_vm10, %v4707_v43  ;;  %v5012_v40 = vrot.slane %v4944_v17, 7  ;;  %v4517_v20 = vsel %vm2855_vm4, %v4487_v23, %v17483_v58  ;;  %v4676_v38 = vsel %vm3020_vm8, %v4644_v59, %v17484_v54  ;;  %v17487_v17 = vld [vmem:[#allocation147_spill] sm:$0xff]  ;;  %v17491_v58 = vld [vmem:[#allocation182_spill] sm:$0xff] }
 0x7b6   : > { %v4549_v48 = vsel %vm2888_vm6, %v4517_v20, %v17485_v57  ;;  %v4708_v60 = vsel %vm3053_vm11, %v4676_v38, %v4425_v4  ;;  %v17490_v4 = vld [vmem:[#allocation150_spill] sm:$0xff]  ;;  %v13220_v57 = vpop.f32.mrf.mxu1 }
 0x7b7   : > { %v13190_v43 = vsel %vm665_vm1, 0.0, %v5012_v40  ;;  %v4581_v61 = vsel %vm2921_vm5, %v4549_v48, %v17487_v17  ;;  %17492 = vst [vmem:[#allocation127_spill] sm:$0xff] %v13220_v57  ;;  %v17494_v17 = vld [vmem:[#allocation219_spill] sm:$0xff] }
 0x7b8   : > { %v4867_v6 = vpop.f32.mrf.mxu3  ;;  %17486 = vst [vmem:[#allocation15_spill] sm:$0xff] %v13190_v43  ;;  %v4613_v0 = vsel %vm2954_vm7, %v4581_v61, %v17488_v34  ;;  %v5177_v25 = vrot.slane %v13190_v43, 1  ;;  %v5252_v15 = vrot.slane %v13190_v43, 2 }
 0x7b9   : > { %v4868_v63 = vadd.f32 %v12899_v24, %v4867_v6 }
 0x7bb   : > { %v4945_v62 = vmax.f32 %v4868_v63, 0.0  ;;  %7292 = vmatmul.msk.f32.gmra.mxu1 %vm2855_vm4, %v5251_v5  ;;  %v4645_v63 = vsel %vm2987_vm9, %v4613_v0, %v17490_v4  ;;  %v17496_v0 = vld [vmem:[#allocation225_spill] sm:$0xff] }
 0x7bc   : > { %v4677_v20 = vsel %vm3020_vm8, %v4645_v63, %v17491_v58  ;;  %v17499_v63 = vld [vmem:[#allocation109_spill] sm:$0xff]  ;;  %v17503_v58 = vld [vmem:[#allocation214_spill] sm:$0xff] }
 0x7bd   : > { %v5013_v31 = vrot.slane %v4945_v62, 7  ;;  %7281 = vmatmul.msk.f32.gmra.mxu3 %vm3099_vm10, %v4708_v60  ;;  %v4709_v62 = vsel %vm3053_vm11, %v4677_v20, %v4427_v44  ;;  %v17493_v60 = vld [vmem:[#allocation159_spill] sm:$0xff] }
 0x7be   : > { %v4488_v61 = vsel %vm422_vm0, %v17494_v17, %v17493_v60  ;;  %v17500_v44 = vld [vmem:[#allocation279_spill] sm:$0xff]  ;;  %v17505_v60 = vld [vmem:[#allocation242_spill] sm:$0xff] }
 0x7bf   : > { %v13199_v5 = vsel %vm665_vm1, %v5012_v40, %v5013_v31  ;;  %v5115_v21 = vsel %vm665_vm1, %v5013_v31, 0.0  ;;  %v17495_v31 = vld [vmem:[#allocation207_spill] sm:$0xff] }
 0x7c0   : > { %17489 = vst [vmem:[#allocation136_spill] sm:$0xff] %v13199_v5  ;;  %v5178_v33 = vrot.slane %v13199_v5, 1  ;;  %v5180_v47 = vrot.slane %v5115_v21, 1  ;;  %v5255_v6 = vrot.slane %v5115_v21, 2  ;;  %v4870_v39 = vpop.f32.mrf.mxu3  ;;  %v5253_v22 = vrot.slane %v13199_v5, 2  ;;  %v17497_v21 = vld [vmem:[#allocation239_spill] sm:$0xff] }
 0x7c1   : > { %v4871_v7 = vadd.f32 %v12899_v24, %v4870_v39  ;;  %v4518_v34 = vsel %vm2855_vm4, %v4488_v61, %v17495_v31  ;;  %v17506_v31 = vld [vmem:[#allocation126_spill] sm:$0xff] }
 0x7c2   : > { %v5181_v40 = vsel %vm864_vm2, %v5178_v33, %v5180_v47  ;;  %v5254_v23 = vsel %vm1009_vm3, %v5252_v15, %v5253_v22  ;;  %v5179_v2 = vsel %vm864_vm2, %v5177_v25, %v5178_v33  ;;  %v5256_v59 = vsel %vm1009_vm3, %v5253_v22, %v5255_v6  ;;  %v17498_v6 = vld [vmem:[#allocation309_spill] sm:$0xff]  ;;  %v4429_v22 = vpop.permute.xlu1 %4428 }
 0x7c3   : > { %7293 = vmatmul.msk.f32.gmra.mxu1 %vm2855_vm4, %v5254_v23  ;;  %v13215_v54 = vpack.i.bf16 %v5181_v40, %v5179_v2  ;;  %v13217_v38 = vpack.i.bf16 %v5256_v59, %v5254_v23  ;;  %v4946_v48 = vmax.f32 %v4871_v7, 0.0  ;;  %v4550_v25 = vsel %vm2888_vm6, %v4518_v34, %v17496_v0  ;;  %v17501_v40 = vld [vmem:[#allocation275_spill] sm:$0xff]  ;;  %v17502_v2 = vld [vmem:[#allocation140_spill] sm:$0xff] }
 0x7c4   : > { %v4582_v15 = vsel %vm2921_vm5, %v4550_v25, %v17497_v21  ;;  %v4489_v7 = vsel %vm422_vm0, %v17500_v44, %v17499_v63  ;;  %v4490_v20 = vsel %vm422_vm0, %v17503_v58, %v17502_v2  ;;  %v17507_v0 = vld [vmem:[#allocation268_spill] sm:$0xff] }
 0x7c5   : > { %7448 = vrot.lane.b32.xlu2 %v13215_v54, %s8054_s22  ;;  %7282 = vmatmul.msk.f32.gmra.mxu3 %vm3099_vm10, %v4709_v62  ;;  %v5015_v33 = vrot.slane %v4946_v48, 7  ;;  %v4614_v39 = vsel %vm2954_vm7, %v4582_v15, %v17498_v6  ;;  %v17504_v62 = vld [vmem:[#allocation200_spill] sm:$0xff]  ;;  %v4520_v34 = vsel %vm2855_vm4, %v4490_v20, %v17506_v31  ;;  %v17515_v31 = vld [vmem:[#allocation154_spill] sm:$0xff] }
 0x7c6   : > { %v4646_v23 = vsel %vm2987_vm9, %v4614_v39, %v17501_v40  ;;  %v4519_v48 = vsel %vm2855_vm4, %v4489_v7, %v17504_v62  ;;  %v17510_v39 = vld [vmem:[#allocation204_spill] sm:$0xff]  ;;  %v17512_v7 = vld [vmem:[#allocation266_spill] sm:$0xff] }
 0x7c7   : > { %v4678_v17 = vsel %vm3020_vm8, %v4646_v23, %v17505_v60  ;;  %v4551_v25 = vsel %vm2888_vm6, %v4519_v48, %v17507_v0  ;;  %v13256_v15 = vsel %vm665_vm1, 0.0, %v5015_v33  ;;  %v13267_v23 = vpop.f32.mrf.mxu1  ;;  %v17516_v0 = vld [vmem:[#allocation209_spill] sm:$0xff] }
 0x7c8   : > { %v4873_v47 = vpop.f32.mrf.mxu3  ;;  %v4710_v21 = vsel %vm3053_vm11, %v4678_v17, %v4429_v22  ;;  %17508 = vst [vmem:[#allocation22_spill] sm:$0xff] %v13256_v15  ;;  %v4583_v63 = vsel %vm2921_vm5, %v4551_v25, %v17510_v39  ;;  %v5182_v22 = vrot.slane %v13256_v15, 1  ;;  %v5257_v20 = vrot.slane %v13256_v15, 2 }
 0x7c9   : > { %v4874_v4 = vadd.f32 %v12899_v24, %v4873_v47  ;;  %v17509_v47 = vld [vmem:[#allocation237_spill] sm:$0xff]  ;;  %v4615_v40 = vsel %vm2954_vm7, %v4583_v63, %v17512_v7  ;;  %17513 = vst [vmem:[#allocation121_spill] sm:$0xff] %v13267_v23 }
 0x7ca   : > { %v4552_v6 = vsel %vm2888_vm6, %v4520_v34, %v17509_v47  ;;  %v4647_v25 = vsel %vm2987_vm9, %v4615_v40, %v17516_v0 }
 0x7cb   : > { %v4947_v61 = vmax.f32 %v4874_v4, 0.0  ;;  %7294 = vmatmul.msk.f32.gmra.mxu1 %vm2855_vm4, %v5256_v59  ;;  %v17511_v59 = vld [vmem:[#allocation180_spill] sm:$0xff] }
 0x7cc   : > { %v4584_v44 = vsel %vm2921_vm5, %v4552_v6, %v17511_v59 }
 0x7cd   : > { %v5016_v4 = vrot.slane %v4947_v61, 7  ;;  %7283 = vmatmul.msk.f32.gmra.mxu3 %vm3099_vm10, %v4710_v21  ;;  %v4616_v34 = vsel %vm2954_vm7, %v4584_v44, %v17515_v31  ;;  %v4431_v21 = vpop.permute.xlu2 %4430 }
 0x7cf   : > { %v13271_v2 = vsel %vm665_vm1, %v5015_v33, %v5016_v4  ;;  %v5116_v58 = vsel %vm665_vm1, %v5016_v4, 0.0  ;;  %v17517_v4 = vld [vmem:[#allocation46_spill] sm:$0xff]  ;;  %v13305_v0 = vpop.f32.mrf.mxu1 }
 0x7d0   : > { %17514 = vst [vmem:[#allocation7_spill] sm:$0xff] %v13271_v2  ;;  %v5183_v62 = vrot.slane %v13271_v2, 1  ;;  %v5185_v48 = vrot.slane %v5116_v58, 1  ;;  %v5260_v60 = vrot.slane %v5116_v58, 2  ;;  %v4876_v17 = vpop.f32.mrf.mxu3  ;;  %v5258_v61 = vrot.slane %v13271_v2, 2 }
 0x7d1   : > { %v4877_v33 = vadd.f32 %v12899_v24, %v4876_v17  ;;  %v4679_v59 = vsel %vm3020_vm8, %v4647_v25, %v17517_v4  ;;  %17525 = vst [vmem:[#allocation12_spill] sm:$0xff] %v13305_v0 }
 0x7d2   : > { %v5186_v47 = vsel %vm864_vm2, %v5183_v62, %v5185_v48  ;;  %v5259_v6 = vsel %vm1009_vm3, %v5257_v20, %v5258_v61  ;;  %v5184_v39 = vsel %vm864_vm2, %v5182_v22, %v5183_v62  ;;  %v5261_v63 = vsel %vm1009_vm3, %v5258_v61, %v5260_v60  ;;  %v17520_v22 = vld [vmem:[#allocation290_spill] sm:$0xff]  ;;  %v17524_v61 = vld [vmem:[#allocation287_spill] sm:$0xff] }
 0x7d3   : > { %7295 = vmatmul.msk.f32.gmra.mxu1 %vm2855_vm4, %v5259_v6  ;;  %v13289_v44 = vpack.i.bf16 %v5186_v47, %v5184_v39  ;;  %v13291_v7 = vpack.i.bf16 %v5261_v63, %v5259_v6  ;;  %v4711_v40 = vsel %vm3053_vm11, %v4679_v59, %v4431_v21  ;;  %v4948_v58 = vmax.f32 %v4877_v33, 0.0  ;;  %v17522_v48 = vld [vmem:[#allocation102_spill] sm:$0xff]  ;;  %v17529_v59 = vld [vmem:[#allocation271_spill] sm:$0xff] }
 0x7d4   : > { %v17521_v20 = vunpack.i.l.bf16 %v17520_v22  ;;  %v17523_v60 = vld [vmem:[#allocation218_spill] sm:$0xff] }
 0x7d5   : > { %17518 = vst [vmem:[#allocation18_spill] sm:$0xff] %v13289_v44  ;;  %7453 = vrot.lane.b32.xlu0 %v13289_v44, %s8054_s22  ;;  %7284 = vmatmul.msk.f32.gmra.mxu3 %vm3099_vm10, %v4711_v40  ;;  %v4491_v17 = vsel %vm422_vm0, %v17523_v60, %v17522_v48  ;;  %v5018_v25 = vrot.slane %v4948_v58, 7  ;;  %v17526_v33 = vld [vmem:[#allocation186_spill] sm:$0xff] }
 0x7d6   : > { %17519 = vst [vmem:[#allocation11_spill] sm:$0xff] %v13291_v7  ;;  %v4648_v62 = vsel %vm2987_vm9, %v4616_v34, %v17521_v20  ;;  %v4521_v31 = vsel %vm2855_vm4, %v4491_v17, %v17524_v61  ;;  %v17527_v39 = vld [vmem:[#allocation294_spill] sm:$0xff]  ;;  %v17530_v20 = vld [vmem:[#allocation312_spill] sm:$0xff] }
 0x7d7   : > { %v4553_v47 = vsel %vm2888_vm6, %v4521_v31, %v17526_v33  ;;  %v17528_v4 = vunpack.i.l.bf16 %v17527_v39  ;;  %v13319_v58 = vsel %vm665_vm1, 0.0, %v5018_v25  ;;  %v17532_v17 = vld [vmem:[#allocation124_spill] sm:$0xff] }
 0x7d8   : > { %v4879_v21 = vpop.f32.mrf.mxu3  ;;  %v4585_v40 = vsel %vm2921_vm5, %v4553_v47, %v17529_v59  ;;  %17531 = vst [vmem:[#allocation229_spill] sm:$0xff] %v13319_v58  ;;  %v17533_v61 = vunpack.i.l.bf16 %v17532_v17  ;;  %v5187_v47 = vrot.slane %v13319_v58, 1 }
 0x7d9   : > { %v4880_v6 = vadd.f32 %v12899_v24, %v4879_v21  ;;  %v4680_v34 = vsel %vm3020_vm8, %v4648_v62, %v17528_v4  ;;  %v4617_v48 = vsel %vm2954_vm7, %v4585_v40, %v17530_v20  ;;  %v17534_v62 = vunpack.i.h.bf16 %v17520_v22 }
 0x7da   : > { %v4712_v31 = vsel %vm3053_vm11, %v4680_v34, %v17533_v61  ;;  %v5262_v4 = vrot.slane %v13319_v58, 2 }
 0x7db   : > { %v4949_v60 = vmax.f32 %v4880_v6, 0.0  ;;  %7296 = vmatmul.msk.f32.gmra.mxu1 %vm2855_vm4, %v5261_v63  ;;  %v4649_v33 = vsel %vm2987_vm9, %v4617_v48, %v17534_v62  ;;  %v17536_v48 = vunpack.i.h.bf16 %v17527_v39  ;;  %v17539_v39 = vunpack.i.h.bf16 %v17532_v17 }
 0x7dd   : > { %v5019_v21 = vrot.slane %v4949_v60, 7  ;;  %7285 = vmatmul.msk.f32.gmra.mxu3 %vm3099_vm10, %v4712_v31  ;;  %v4681_v61 = vsel %vm3020_vm8, %v4649_v33, %v17536_v48  ;;  %v13340_v31 = vpop.f32.mrf.mxu1 }
 0x7de   : > { %17537 = vst [vmem:[#allocation20_spill] sm:$0xff] %v13340_v31  ;;  %v4713_v33 = vsel %vm3053_vm11, %v4681_v61, %v17539_v39 }
 0x7df   : > { %v13330_v6 = vsel %vm665_vm1, %v5018_v25, %v5019_v21  ;;  %v5117_v63 = vsel %vm665_vm1, %v5019_v21, 0.0 }
 0x7e0   : > { %17535 = vst [vmem:[#allocation130_spill] sm:$0xff] %v13330_v6  ;;  %v5188_v59 = vrot.slane %v13330_v6, 1  ;;  %v5190_v40 = vrot.slane %v5117_v63, 1  ;;  %v5265_v34 = vrot.slane %v5117_v63, 2  ;;  %v4882_v20 = vpop.f32.mrf.mxu3  ;;  %v5263_v60 = vrot.slane %v13330_v6, 2 }
 0x7e1   : > { %v4883_v22 = vadd.f32 %v12899_v24, %v4882_v20 }
 0x7e2   : > { %v5191_v25 = vsel %vm864_vm2, %v5188_v59, %v5190_v40  ;;  %v5264_v21 = vsel %vm1009_vm3, %v5262_v4, %v5263_v60  ;;  %v5189_v62 = vsel %vm864_vm2, %v5187_v47, %v5188_v59  ;;  %v5266_v11 = vsel %vm1009_vm3, %v5263_v60, %v5265_v34 }
 0x7e3   : > { %7297 = vmatmul.msk.f32.gmra.mxu1 %vm2855_vm4, %v5264_v21  ;;  %v13347_v63 = vpack.i.bf16 %v5191_v25, %v5189_v62  ;;  %v13349_v32 = vpack.i.bf16 %v5266_v11, %v5264_v21  ;;  %v4950_v20 = vmax.f32 %v4883_v22, 0.0 }
 0x7e5   : > { %17538 = vst [vmem:[#allocation162_spill] sm:$0xff] %v13347_v63  ;;  %7458 = vrot.lane.b32.xlu1 %v13347_v63, %s8054_s22  ;;  %7286 = vmatmul.msk.f32.gmra.mxu3 %vm3099_vm10, %v4713_v33  ;;  %v5021_v47 = vrot.slane %v4950_v20, 7  ;;  %v13359_v34 = vpop.f32.mrf.mxu1 }
 0x7e6   : > { %17540 = vst [vmem:[#allocation292_spill] sm:$0xff] %v13359_v34 }
 0x7e7   : > { %v13362_v60 = vsel %vm665_vm1, 0.0, %v5021_v47 }
 0x7e8   : > { %v4885_v4 = vpop.f32.mrf.mxu3  ;;  %17541 = vst [vmem:[#allocation288_spill] sm:$0xff] %v13362_v60  ;;  %v5192_v61 = vrot.slane %v13362_v60, 1  ;;  %v5267_v33 = vrot.slane %v13362_v60, 2 }
 0x7e9   : > { %v4886_v59 = vadd.f32 %v12899_v24, %v4885_v4 }
 0x7eb   : > { %v4951_v40 = vmax.f32 %v4886_v59, 0.0  ;;  %7298 = vmatmul.msk.f32.gmra.mxu1 %vm2855_vm4, %v5266_v11 }
 0x7ed   : > { %v5022_v17 = vrot.slane %v4951_v40, 7  ;;  %v13384_v41 = vpop.f32.mrf.mxu1 }
 0x7ee   : > { %17543 = vst [vmem:[#allocation21_spill] sm:$0xff] %v13384_v41 }
 0x7ef   : > { %v13365_v22 = vsel %vm665_vm1, %v5021_v47, %v5022_v17  ;;  %v5118_v48 = vsel %vm665_vm1, %v5022_v17, 0.0 }
 0x7f0   : > { %17542 = vst [vmem:[#allocation25_spill] sm:$0xff] %v13365_v22  ;;  %v5193_v25 = vrot.slane %v13365_v22, 1  ;;  %v5195_v21 = vrot.slane %v5118_v48, 1  ;;  %v5270_v62 = vrot.slane %v5118_v48, 2  ;;  %v4888_v39 = vpop.f32.mrf.mxu3  ;;  %v5268_v20 = vrot.slane %v13365_v22, 2 }
 0x7f1   : > { %v4889_v11 = vadd.f32 %v12899_v24, %v4888_v39 }
 0x7f2   : > { %v5196_v4 = vsel %vm864_vm2, %v5193_v25, %v5195_v21  ;;  %v5194_v47 = vsel %vm864_vm2, %v5192_v61, %v5193_v25  ;;  %v5269_v59 = vsel %vm1009_vm3, %v5267_v33, %v5268_v20  ;;  %v5271_v48 = vsel %vm1009_vm3, %v5268_v20, %v5270_v62 }
 0x7f3   : > { %v13376_v40 = vpack.i.bf16 %v5196_v4, %v5194_v47  ;;  %v4952_v17 = vmax.f32 %v4889_v11, 0.0  ;;  %7299 = vmatmul.msk.f32.gmra.mxu1 %vm2855_vm4, %v5269_v59  ;;  %v13382_v39 = vpack.i.bf16 %v5271_v48, %v5269_v59 }
 0x7f5   : > { %7463 = vrot.lane.b32.xlu2 %v13376_v40, %s8054_s22  ;;  %v5024_v49 = vrot.slane %v4952_v17, 7  ;;  %v13397_v59 = vpop.f32.mrf.mxu1 }
 0x7f6   : > { %17546 = vst [vmem:[#allocation169_spill] sm:$0xff] %v13397_v59 }
 0x7f7   : > { %v13388_v33 = vsel %vm665_vm1, 0.0, %v5024_v49 }
 0x7f8   : > { %v4891_v21 = vpop.f32.mrf.mxu3  ;;  %17544 = vst [vmem:[#allocation282_spill] sm:$0xff] %v13388_v33  ;;  %v5197_v62 = vrot.slane %v13388_v33, 1  ;;  %v5272_v47 = vrot.slane %v13388_v33, 2 }
 0x7f9   : > { %v4892_v61 = vadd.f32 %v12899_v24, %v4891_v21 }
 0x7fb   : > { %v4953_v25 = vmax.f32 %v4892_v61, 0.0  ;;  %7300 = vmatmul.msk.f32.gmra.mxu1 %vm2855_vm4, %v5271_v48 }
 0x7fd   : > { %v5025_v11 = vrot.slane %v4953_v25, 7  ;;  %v13414_v35 = vpop.f32.mrf.mxu1 }
 0x7fe   : > { %17548 = vst [vmem:[#allocation151_spill] sm:$0xff] %v13414_v35 }
 0x7ff   : > { %v13393_v20 = vsel %vm665_vm1, %v5024_v49, %v5025_v11  ;;  %v5119_v4 = vsel %vm665_vm1, %v5025_v11, 0.0 }
 0x800   : > { %17545 = vst [vmem:[#allocation134_spill] sm:$0xff] %v13393_v20  ;;  %v5198_v17 = vrot.slane %v13393_v20, 1  ;;  %v5200_v21 = vrot.slane %v5119_v4, 1  ;;  %v5275_v61 = vrot.slane %v5119_v4, 2  ;;  %v4894_v56 = vpop.f32.mrf.mxu3  ;;  %v5273_v16 = vrot.slane %v13393_v20, 2 }
 0x801   : > { %v4895_v48 = vadd.f32 %v12899_v24, %v4894_v56 }
 0x802   : > { %v5201_v25 = vsel %vm864_vm2, %v5198_v17, %v5200_v21  ;;  %v5274_v49 = vsel %vm1009_vm3, %v5272_v47, %v5273_v16  ;;  %v5199_v12 = vsel %vm864_vm2, %v5197_v62, %v5198_v17  ;;  %v5276_v11 = vsel %vm1009_vm3, %v5273_v16, %v5275_v61 }
 0x803   : > { %v13406_v45 = vpack.i.bf16 %v5201_v25, %v5199_v12  ;;  %v13408_v19 = vpack.i.bf16 %v5276_v11, %v5274_v49  ;;  %v4954_v3 = vmax.f32 %v4895_v48, 0.0  ;;  %7301 = vmatmul.msk.f32.gmra.mxu1 %vm2855_vm4, %v5274_v49 }
 0x805   : > { %17547 = vst [vmem:[#allocation256_spill] sm:$0xff] %v13406_v45  ;;  %7468 = vrot.lane.b32.xlu0 %v13406_v45, %s8054_s22  ;;  %v5027_v4 = vrot.slane %v4954_v3, 7  ;;  %v13437_v41 = vpop.f32.mrf.mxu1 }
 0x806   : > { %17552 = vst [vmem:[#allocation215_spill] sm:$0xff] %v13437_v41 }
 0x807   : > { %v13417_v62 = vsel %vm665_vm1, 0.0, %v5027_v4 }
 0x808   : > { %v4897_v56 = vpop.f32.mrf.mxu3  ;;  %17549 = vst [vmem:[#allocation29_spill] sm:$0xff] %v13417_v62  ;;  %v5202_v16 = vrot.slane %v13417_v62, 1  ;;  %v5277_v3 = vrot.slane %v13417_v62, 2 }
 0x809   : > { %v4898_v21 = vadd.f32 %v12899_v24, %v4897_v56 }
 0x80b   : > { %v4955_v47 = vmax.f32 %v4898_v21, 0.0  ;;  %7302 = vmatmul.msk.f32.gmra.mxu1 %vm2855_vm4, %v5276_v11 }
 0x80d   : > { %v5028_v12 = vrot.slane %v4955_v47, 7 }
 0x80f   : > { %v13422_v17 = vsel %vm665_vm1, %v5027_v4, %v5028_v12  ;;  %v5120_v61 = vsel %vm665_vm1, %v5028_v12, 0.0 }
 0x810   : > { %17550 = vst [vmem:[#allocation220_spill] sm:$0xff] %v13422_v17  ;;  %v5203_v48 = vrot.slane %v13422_v17, 1  ;;  %v5205_v25 = vrot.slane %v5120_v61, 1  ;;  %v5280_v49 = vrot.slane %v5120_v61, 2  ;;  %v4900_v56 = vpop.f32.mrf.mxu3  ;;  %v5278_v21 = vrot.slane %v13422_v17, 2 }
 0x811   : > { %v4901_v37 = vadd.f32 %v12899_v24, %v4900_v56 }
 0x812   : > { %v5206_v11 = vsel %vm864_vm2, %v5203_v48, %v5205_v25  ;;  %v5279_v47 = vsel %vm1009_vm3, %v5277_v3, %v5278_v21  ;;  %v5204_v4 = vsel %vm864_vm2, %v5202_v16, %v5203_v48  ;;  %v5281_v59 = vsel %vm1009_vm3, %v5278_v21, %v5280_v49  ;;  %v13447_v49 = vpop.f32.mrf.mxu1 }
 0x813   : > { %v13433_v12 = vpack.i.bf16 %v5206_v11, %v5204_v4  ;;  %v13435_v31 = vpack.i.bf16 %v5281_v59, %v5279_v47  ;;  %7303 = vmatmul.msk.f32.gmra.mxu1 %vm2855_vm4, %v5279_v47  ;;  %v4956_v61 = vmax.f32 %v4901_v37, 0.0  ;;  %17554 = vst [vmem:[#allocation31_spill] sm:$0xff] %v13447_v49 }
 0x815   : > { %17551 = vst [vmem:[#allocation167_spill] sm:$0xff] %v13433_v12  ;;  %7473 = vrot.lane.b32.xlu1 %v13433_v12, %s8054_s22  ;;  %v5030_v25 = vrot.slane %v4956_v61, 7 }
 0x817   : > { %v13445_v16 = vsel %vm665_vm1, 0.0, %v5030_v25 }
 0x818   : > { %v4903_v56 = vpop.f32.mrf.mxu3  ;;  %17553 = vst [vmem:[#allocation133_spill] sm:$0xff] %v13445_v16  ;;  %v5207_v11 = vrot.slane %v13445_v16, 1 }
 0x819   : > { %v4904_v3 = vadd.f32 %v12899_v24, %v4903_v56 }
 0x81a   : > { %v13469_v10 = vpop.f32.mrf.mxu1 }
 0x81b   : > { %v4957_v57 = vmax.f32 %v4904_v3, 0.0  ;;  %7304 = vmatmul.msk.f32.gmra.mxu1 %vm2855_vm4, %v5281_v59  ;;  %v5282_v3 = vrot.slane %v13445_v16, 2  ;;  %17557 = vst [vmem:[#allocation197_spill] sm:$0xff] %v13469_v10 }
 0x81d   : > { %v5031_v48 = vrot.slane %v4957_v57, 7 }
 0x81f   : > { %v13450_v21 = vsel %vm665_vm1, %v5030_v25, %v5031_v48  ;;  %v5121_v37 = vsel %vm665_vm1, %v5031_v48, 0.0 }
 0x820   : > { %17555 = vst [vmem:[#allocation30_spill] sm:$0xff] %v13450_v21  ;;  %v5208_v47 = vrot.slane %v13450_v21, 1  ;;  %v5210_v4 = vrot.slane %v5121_v37, 1  ;;  %v5285_v61 = vrot.slane %v5121_v37, 2  ;;  %v4906_v56 = vpop.f32.mrf.mxu3  ;;  %v5283_v57 = vrot.slane %v13450_v21, 2 }
 0x821   : > { %v4907_v59 = vadd.f32 %v12899_v24, %v4906_v56 }
 0x822   : > { %v5211_v49 = vsel %vm864_vm2, %v5208_v47, %v5210_v4  ;;  %v5209_v25 = vsel %vm864_vm2, %v5207_v11, %v5208_v47  ;;  %v5284_v41 = vsel %vm1009_vm3, %v5282_v3, %v5283_v57  ;;  %v5286_v37 = vsel %vm1009_vm3, %v5283_v57, %v5285_v61 }
 0x823   : > { %v13461_v48 = vpack.i.bf16 %v5211_v49, %v5209_v25  ;;  %v4958_v0 = vmax.f32 %v4907_v59, 0.0  ;;  %7305 = vmatmul.msk.f32.gmra.mxu1 %vm2855_vm4, %v5284_v41  ;;  %v13467_v56 = vpack.i.bf16 %v5286_v37, %v5284_v41 }
 0x825   : > { %17556 = vst [vmem:[#allocation248_spill] sm:$0xff] %v13461_v48  ;;  %7478 = vrot.lane.b32.xlu2 %v13461_v48, %s8054_s22  ;;  %v5033_v35 = vrot.slane %v4958_v0, 7 }
 0x827   : > { %v13473_v49 = vsel %vm665_vm1, 0.0, %v5033_v35 }
 0x828   : > { %v4909_v4 = vpop.f32.mrf.mxu3  ;;  %17558 = vst [vmem:[#allocation265_spill] sm:$0xff] %v13473_v49  ;;  %v5212_v61 = vrot.slane %v13473_v49, 1  ;;  %v5287_v57 = vrot.slane %v13473_v49, 2 }
 0x829   : > { %v4910_v11 = vadd.f32 %v12899_v24, %v4909_v4 }
 0x82b   : > { %v4959_v47 = vmax.f32 %v4910_v11, 0.0  ;;  %7306 = vmatmul.msk.f32.gmra.mxu1 %vm2855_vm4, %v5286_v37  ;;  %v13485_v37 = vpop.f32.mrf.mxu1 }
 0x82c   : > { %17560 = vst [vmem:[#allocation35_spill] sm:$0xff] %v13485_v37 }
 0x82d   : > { %v5034_v59 = vrot.slane %v4959_v47, 7 }
 0x82f   : > { %v13478_v3 = vsel %vm665_vm1, %v5033_v35, %v5034_v59  ;;  %v5122_v41 = vsel %vm665_vm1, %v5034_v59, 0.0 }
 0x830   : > { %17559 = vst [vmem:[#allocation226_spill] sm:$0xff] %v13478_v3  ;;  %v5213_v0 = vrot.slane %v13478_v3, 1  ;;  %v5215_v25 = vrot.slane %v5122_v41, 1  ;;  %v5290_v4 = vrot.slane %v5122_v41, 2  ;;  %v4912_v11 = vpop.f32.mrf.mxu3  ;;  %v5288_v10 = vrot.slane %v13478_v3, 2 }
 0x831   : > { %v4913_v27 = vadd.f32 %v12899_v24, %v4912_v11 }
 0x832   : > { %v5216_v47 = vsel %vm864_vm2, %v5213_v0, %v5215_v25  ;;  %v5289_v35 = vsel %vm1009_vm3, %v5287_v57, %v5288_v10  ;;  %v5214_v34 = vsel %vm864_vm2, %v5212_v61, %v5213_v0  ;;  %v5291_v59 = vsel %vm1009_vm3, %v5288_v10, %v5290_v4  ;;  %v13501_v57 = vld [vmem:[%s15687_s8] ss:$0 sm:$0xff] }
 0x833   : > { %v13491_v23 = vpack.i.bf16 %v5216_v47, %v5214_v34  ;;  %v13493_v30 = vpack.i.bf16 %v5291_v59, %v5289_v35  ;;  %v4960_v41 = vmax.f32 %v4913_v27, 0.0  ;;  %7307 = vmatmul.msk.f32.gmra.mxu1 %vm2855_vm4, %v5289_v35  ;;  %v13504_v34 = vpop.f32.mrf.mxu1 }
 0x834   : > { %17563 = vst [vmem:[#allocation213_spill] sm:$0xff] %v13504_v34 }
 0x835   : > { %17561 = vst [vmem:[#allocation193_spill] sm:$0xff] %v13491_v23  ;;  %7483 = vrot.lane.b32.xlu0 %v13491_v23, %s8054_s22  ;;  %v5036_v24 = vrot.slane %v4960_v41, 7 }
 0x836   : > { %17562 = vst [vmem:[#allocation286_spill] sm:$0xff] %v13493_v30 }
 0x837   : > { %v13507_v0 = vsel %vm665_vm1, 0.0, %v5036_v24 }
 0x838   : > { %v4915_v11 = vpop.f32.mrf.mxu3  ;;  %17564 = vst [vmem:[#allocation259_spill] sm:$0xff] %v13507_v0  ;;  %v5217_v25 = vrot.slane %v13507_v0, 1  ;;  %v5292_v35 = vrot.slane %v13507_v0, 2 }
 0x839   : > { %v4916_v61 = vadd.f32 %v13501_v57, %v4915_v11 }
 0x83b   : > { %v4961_v10 = vmax.f32 %v4916_v61, 0.0  ;;  %7308 = vmatmul.msk.f32.gmra.mxu1 %vm2855_vm4, %v5291_v59  ;;  %v13530_v63 = vpop.f32.mrf.mxu1 }
 0x83c   : > { %17567 = vst [vmem:[#allocation243_spill] sm:$0xff] %v13530_v63 }
 0x83d   : > { %v5037_v27 = vrot.slane %v4961_v10, 7 }
 0x83f   : > { %v13512_v4 = vsel %vm665_vm1, %v5036_v24, %v5037_v27  ;;  %v5123_v47 = vsel %vm665_vm1, %v5037_v27, 0.0 }
 0x840   : > { %17565 = vst [vmem:[#allocation37_spill] sm:$0xff] %v13512_v4  ;;  %v5218_v41 = vrot.slane %v13512_v4, 1  ;;  %v5220_v11 = vrot.slane %v5123_v47, 1  ;;  %v5295_v61 = vrot.slane %v5123_v47, 2  ;;  %v4918_v34 = vpop.f32.mrf.mxu3  ;;  %v5293_v37 = vrot.slane %v13512_v4, 2 }
 0x841   : > { %v4919_v1 = vadd.f32 %v13501_v57, %v4918_v34 }
 0x842   : > { %v5221_v59 = vsel %vm864_vm2, %v5218_v41, %v5220_v11  ;;  %v5294_v10 = vsel %vm1009_vm3, %v5292_v35, %v5293_v37  ;;  %v5219_v24 = vsel %vm864_vm2, %v5217_v25, %v5218_v41  ;;  %v5296_v12 = vsel %vm1009_vm3, %v5293_v37, %v5295_v61  ;;  %v17569_v41 = vld [vmem:[#allocation59_spill] sm:$0xff] }
 0x843   : > { %v13523_v27 = vpack.i.bf16 %v5221_v59, %v5219_v24  ;;  %v13525_v23 = vpack.i.bf16 %v5296_v12, %v5294_v10  ;;  %7309 = vmatmul.msk.f32.gmra.mxu1 %vm2855_vm4, %v5294_v10  ;;  %v4962_v47 = vmax.f32 %v4919_v1, 0.0  ;;  %v13543_v59 = vpop.f32.mrf.mxu1 }
 0x844   : > { %17571 = vst [vmem:[#allocation285_spill] sm:$0xff] %v13543_v59 }
 0x845   : > { %17566 = vst [vmem:[#allocation36_spill] sm:$0xff] %v13523_v27  ;;  %7488 = vrot.lane.b32.xlu1 %v13523_v27, %s8054_s22  ;;  %v5039_v11 = vrot.slane %v4962_v47, 7 }
 0x847   : > { %v13535_v37 = vsel %vm665_vm1, 0.0, %v5039_v11 }
 0x848   : > { %v4921_v34 = vpop.f32.mrf.mxu3  ;;  %17568 = vst [vmem:[#allocation111_spill] sm:$0xff] %v13535_v37  ;;  %v5222_v10 = vrot.slane %v13535_v37, 1 }
 0x849   : > { %v4922_v35 = vadd.f32 %v13501_v57, %v4921_v34 }
 0x84b   : > { %v4963_v45 = vmax.f32 %v4922_v35, 0.0  ;;  %7310 = vmatmul.msk.f32.gmra.mxu1 %vm2855_vm4, %v5296_v12 }
 0x84d   : > { %v5040_v25 = vrot.slane %v4963_v45, 7  ;;  %7503 = vrot.lane.b32.xlu1 %v17569_v41, %s16961_s16  ;;  %v5297_v45 = vrot.slane %v13535_v37, 2 }
 0x84f   : > { %v13540_v1 = vsel %vm665_vm1, %v5039_v11, %v5040_v25  ;;  %v5124_v61 = vsel %vm665_vm1, %v5040_v25, 0.0 }
 0x850   : > { %17570 = vst [vmem:[#allocation110_spill] sm:$0xff] %v13540_v1  ;;  %v5223_v24 = vrot.slane %v13540_v1, 1  ;;  %v5225_v47 = vrot.slane %v5124_v61, 1  ;;  %v5300_v12 = vrot.slane %v5124_v61, 2  ;;  %v4924_v34 = vpop.f32.mrf.mxu3  ;;  %v5298_v41 = vrot.slane %v13540_v1, 2 }
 0x851   : > { %v4925_v35 = vadd.f32 %v13501_v57, %v4924_v34 }
 0x852   : > { %v5226_v11 = vsel %vm864_vm2, %v5223_v24, %v5225_v47  ;;  %v5224_v63 = vsel %vm864_vm2, %v5222_v10, %v5223_v24  ;;  %v5299_v25 = vsel %vm1009_vm3, %v5297_v45, %v5298_v41  ;;  %v5301_v61 = vsel %vm1009_vm3, %v5298_v41, %v5300_v12  ;;  %v13564_v24 = vpop.f32.mrf.mxu1 }
 0x853   : > { %v13553_v59 = vpack.i.bf16 %v5226_v11, %v5224_v63  ;;  %v4964_v27 = vmax.f32 %v4925_v35, 0.0  ;;  %7311 = vmatmul.msk.f32.gmra.mxu1 %vm2855_vm4, %v5299_v25  ;;  %v13561_v34 = vpack.i.bf16 %v5301_v61, %v5299_v25  ;;  %17573 = vst [vmem:[#allocation254_spill] sm:$0xff] %v13564_v24 }
 0x855   : > { %17572 = vst [vmem:[#allocation41_spill] sm:$0xff] %v13553_v59  ;;  %7518 = vrot.lane.b32.xlu1 %v13093_v51, %s16961_s16  ;;  %7493 = vrot.lane.b32.xlu2 %v13553_v59, %s8054_s22  ;;  %v5042_v47 = vrot.slane %v4964_v27, 7 }
 0x857   : > { %v13567_v35 = vsel %vm665_vm1, 0.0, %v5042_v47 }
 0x858   : > { %v4927_v42 = vpop.f32.mrf.mxu3  ;;  %17574 = vst [vmem:[#allocation125_spill] sm:$0xff] %v13567_v35  ;;  %v5227_v27 = vrot.slane %v13567_v35, 1  ;;  %v5302_v41 = vrot.slane %v13567_v35, 2 }
 0x859   : > { %v4928_v10 = vadd.f32 %v13501_v57, %v4927_v42 }
 0x85a   : > { %v13591_v44 = vpop.f32.mrf.mxu1 }
 0x85b   : > { %v4965_v63 = vmax.f32 %v4928_v10, 0.0  ;;  %7312 = vmatmul.msk.f32.gmra.mxu1 %vm2855_vm4, %v5301_v61  ;;  %17576 = vst [vmem:[#allocation201_spill] sm:$0xff] %v13591_v44 }
 0x85d   : > { %v5043_v12 = vrot.slane %v4965_v63, 7  ;;  %7533 = vrot.lane.b32.xlu1 %v13291_v7, %s16961_s16  ;;  %7508 = vrot.lane.b32.xlu2 %v12977_v50, %s16961_s16 }
 0x85f   : > { %v13576_v45 = vsel %vm665_vm1, %v5042_v47, %v5043_v12  ;;  %v5125_v42 = vsel %vm665_vm1, %v5043_v12, 0.0 }
 0x860   : > { %17575 = vst [vmem:[#allocation108_spill] sm:$0xff] %v13576_v45  ;;  %v5228_v11 = vrot.slane %v13576_v45, 1  ;;  %v5230_v25 = vrot.slane %v5125_v42, 1  ;;  %v5305_v61 = vrot.slane %v5125_v42, 2  ;;  %v4930_v10 = vpop.f32.mrf.mxu3  ;;  %v5303_v63 = vrot.slane %v13576_v45, 2 }
 0x861   : > { %v4931_v24 = vadd.f32 %v13501_v57, %v4930_v10 }
 0x862   : > { %v5231_v7 = vsel %vm864_vm2, %v5228_v11, %v5230_v25  ;;  %v5304_v51 = vsel %vm1009_vm3, %v5302_v41, %v5303_v63  ;;  %v5229_v47 = vsel %vm864_vm2, %v5227_v27, %v5228_v11  ;;  %v5306_v50 = vsel %vm1009_vm3, %v5303_v63, %v5305_v61  ;;  %v13598_v41 = vpop.f32.mrf.mxu2  ;;  %v13609_v61 = vpop.f32.mrf.mxu1 }
 0x863   : > { %v13587_v12 = vpack.i.bf16 %v5231_v7, %v5229_v47  ;;  %v13589_v59 = vpack.i.bf16 %v5306_v50, %v5304_v51  ;;  %v4966_v42 = vmax.f32 %v4931_v24, 0.0  ;;  %7313 = vmatmul.msk.f32.gmra.mxu1 %vm2855_vm4, %v5304_v51  ;;  %17577 = vst [vmem:[#allocation267_spill] sm:$0xff] %v13598_v41 }
 0x864   : > { %17578 = vst [vmem:[#allocation299_spill] sm:$0xff] %v13609_v61 }
 0x865   : > { %7548 = vrot.lane.b32.xlu1 %v13408_v19, %s16961_s16  ;;  %7498 = vrot.lane.b32.xlu0 %v13587_v12, %s8054_s22  ;;  %v5045_v7 = vrot.slane %v4966_v42, 7  ;;  %s8064_s22 = smov 80  }
 0x866   : > { %7523 = vrot.lane.b32.xlu2 %v13156_v14, %s16961_s16 }
 0x867   : > { %v5110_v24 = vsel %vm665_vm1, 0.0, %v5045_v7 }
 0x868   : > { %v4933_v27 = vpop.f32.mrf.mxu3  ;;  %v5309_v10 = vrot.slane %v5110_v24, 1  ;;  %v5314_v63 = vrot.slane %v5110_v24, 2 }
 0x869   : > { %v4934_v11 = vadd.f32 %v13501_v57, %v4933_v27 }
 0x86a   : > { %v13615_v42 = vpop.f32.mrf.mxu2 }
 0x86b   : > { %v4967_v25 = vmax.f32 %v4934_v11, 0.0  ;;  %7314 = vmatmul.msk.f32.gmra.mxu1 %vm2855_vm4, %v5306_v50  ;;  %17579 = vst [vmem:[#allocation148_spill] sm:$0xff] %v13615_v42 }
 0x86d   : > { %v5046_v51 = vrot.slane %v4967_v25, 7  ;;  %7563 = vrot.lane.b32.xlu1 %v13493_v30, %s16961_s16  ;;  %7513 = vrot.lane.b32.xlu0 %v13034_v55, %s16961_s16 }
 0x86e   : > { %7538 = vrot.lane.b32.xlu2 %v13349_v32, %s16961_s16 }
 0x86f   : > { %v5047_v57 = vsel %vm665_vm1, %v5045_v7, %v5046_v51  ;;  %v5126_v47 = vsel %vm665_vm1, %v5046_v51, 0.0  ;;  %v17584_v51 = vld [vmem:[#allocation58_spill] sm:$0xff] }
 0x870   : > { %v5310_v50 = vrot.slane %v5047_v57, 1  ;;  %v5312_v27 = vrot.slane %v5126_v47, 1  ;;  %v5317_v11 = vrot.slane %v5126_v47, 2  ;;  %v5315_v25 = vrot.slane %v5047_v57, 2 }
 0x871   : > { %v13617_v44 = vpack.i.bf16 %v5047_v57, %v5110_v24  ;;  %v13639_v24 = vpop.f32.mrf.mxu1  ;;  %v13659_v57 = vpack.i.bf16 %v13271_v2, %v13256_v15 }
 0x872   : > { %v13620_v41 = vsel %vm1009_vm3, %v5314_v63, %v5315_v25  ;;  %v13623_v61 = vsel %vm1009_vm3, %v5315_v25, %v5317_v11  ;;  %v5311_v30 = vsel %vm864_vm2, %v5309_v10, %v5310_v50  ;;  %v5313_v7 = vsel %vm864_vm2, %v5310_v50, %v5312_v27  ;;  %17580 = vst [vmem:[#allocation43_spill] sm:$0xff] %v13639_v24  ;;  %v13641_v10 = vpop.f32.mrf.mxu2  ;;  %v17582_v27 = vld [vmem:[#allocation55_spill] sm:$0xff]  ;;  %v13712_v24 = vpop.permute.xlu1 %7428 }
 0x873   : > { %v13629_v42 = vpack.i.bf16 %v5313_v7, %v5311_v30  ;;  %7315 = vmatmul.msk.f32.gmra.mxu1 %vm2855_vm4, %v13620_v41  ;;  %v13645_v30 = vpack.i.bf16 %v13075_v9, %v13066_v28  ;;  %v7582_v50 = vpack.i.bf16 %v12958_v29, %v12948_v13  ;;  %v13674_v11 = vpack.i.bf16 %v13393_v20, %v13388_v33 }
 0x874   : > { %v13680_v7 = vpack.i.bf16 %v13136_v46, %v13127_v52  ;;  %v13744_v33 = vpack.i.bf16 %v13365_v22, %v13362_v60  ;;  %v13762_v20 = vpack.i.bf16 %v13450_v21, %v13445_v16  ;;  %v13780_v16 = vpack.i.bf16 %v13540_v1, %v13535_v37  ;;  %v17594_v37 = vld [vmem:[#allocation18_spill] sm:$0xff] }
 0x875   : > { %7578 = vrot.lane.b32.xlu1 %v13589_v59, %s16961_s16  ;;  %7528 = vrot.lane.b32.xlu0 %v13217_v38, %s16961_s16 }
 0x876   : > { %7553 = vrot.lane.b32.xlu2 %v13435_v31, %s16961_s16 }
 0x879   : > { %v13655_v63 = vpop.f32.mrf.mxu1 }
 0x87a   : > { %17581 = vst [vmem:[#allocation42_spill] sm:$0xff] %v13655_v63  ;;  %v13661_v47 = vpop.f32.mrf.mxu2  ;;  %v13704_v63 = vpack.i.bf16 %v13330_v6, %v13319_v58 }
 0x87b   : > { %7316 = vmatmul.msk.f32.gmra.mxu1 %vm2855_vm4, %v13623_v61 }
 0x87d   : > { %7593 = vrot.lane.b32.xlu1 %v13645_v30, %s17071_s30  ;;  %7543 = vrot.lane.b32.xlu0 %v13382_v39, %s16961_s16 }
 0x87e   : > { %7568 = vrot.lane.b32.xlu2 %v13525_v23, %s16961_s16 }
 0x881   : > { %v13676_v25 = vpop.f32.mrf.mxu1 }
 0x882   : > { %17583 = vst [vmem:[#allocation255_spill] sm:$0xff] %v13676_v25  ;;  %v13696_v25 = vpack.i.bf16 %v13478_v3, %v13473_v49  ;;  %v13728_v49 = vpack.i.bf16 %v13422_v17, %v13417_v62  ;;  %v13736_v3 = vpop.permute.xlu1 %7443  ;;  %v13748_v62 = vpack.i.bf16 %v13512_v4, %v13507_v0  ;;  %v13766_v0 = vpop.permute.xlu0 %7423 }
 0x883   : > { %7317 = vmatmul.msk.f32.gmra.mxu1 %vm2855_vm4, %v17582_v27  ;;  %v13692_v27 = vpop.permute.xlu2 %7433  ;;  %17586 = vst [vmem:[#allocation166_spill] sm:$0xff] %v13736_v3 }
 0x884   : > { %17585 = vst [vmem:[#allocation155_spill] sm:$0xff] %v13692_v27 }
 0x885   : > { %7608 = vrot.lane.b32.xlu1 %v13659_v57, %s17071_s30  ;;  %7558 = vrot.lane.b32.xlu0 %v13467_v56, %s16961_s16 }
 0x886   : > { %7583 = vrot.lane.b32.xlu2 %v7582_v50, %s17071_s30  ;;  %v13688_v50 = vpop.f32.mrf.mxu2 }
 0x88a   : > { %v13756_v3 = vpop.permute.xlu1 %7458  ;;  %v13788_v60 = vpop.permute.xlu0 %7438 }
 0x88b   : > { %7318 = vmatmul.msk.f32.gmra.mxu1 %vm2855_vm4, %v17584_v51  ;;  %v13700_v51 = vpack.i.bf16 %v13016_v18, %v13007_v36  ;;  %v13714_v46 = vpop.permute.xlu2 %7448  ;;  %v13720_v18 = vpack.i.bf16 %v13576_v45, %v13567_v35  ;;  %v13724_v36 = vpack.i.bf16 %v13199_v5, %v13190_v43  ;;  %17588 = vst [vmem:[#allocation170_spill] sm:$0xff] %v13756_v3  ;;  %v17603_v43 = vld [vmem:[#allocation162_spill] sm:$0xff] }
 0x88d   : > { %7623 = vrot.lane.b32.xlu1 %v13674_v11, %s17071_s30  ;;  %7573 = vrot.lane.b32.xlu0 %v13561_v34, %s16961_s16 }
 0x88e   : > { %7598 = vrot.lane.b32.xlu2 %v13680_v7, %s17071_s30  ;;  %v13716_v52 = vpop.f32.mrf.mxu2 }
 0x892   : > { %v13774_v4 = vpop.permute.xlu1 %7473  ;;  %v13802_v1 = vpop.permute.xlu0 %7453 }
 0x893   : > { %v13738_v35 = vpop.permute.xlu2 %7463  ;;  %17590 = vst [vmem:[#allocation47_spill] sm:$0xff] %v13774_v4 }
 0x894   : > { %17587 = vst [vmem:[#allocation222_spill] sm:$0xff] %v13738_v35 }
 0x895   : > { %7638 = vrot.lane.b32.xlu1 %v13696_v25, %s17071_s30  ;;  %7588 = vrot.lane.b32.xlu0 %v13700_v51, %s17071_s30 }
 0x896   : > { %7613 = vrot.lane.b32.xlu2 %v13704_v63, %s17071_s30  ;;  %v13740_v45 = vpop.f32.mrf.mxu2 }
 0x89b   : > { %v13758_v17 = vpop.permute.xlu2 %7478 }
 0x89c   : > { %17589 = vst [vmem:[#allocation298_spill] sm:$0xff] %v13758_v17 }
 0x89d   : > { %7653 = vrot.lane.b32.xlu1 %v13720_v18, %s17071_s30  ;;  %7603 = vrot.lane.b32.xlu0 %v13724_v36, %s17071_s30 }
 0x89e   : > { %7628 = vrot.lane.b32.xlu2 %v13728_v49, %s17071_s30  ;;  %v13764_v58 = vpop.f32.mrf.mxu2 }
 0x8a5   : > { %7668 = vrot.lane.b32.xlu1 %v13032_v53, %s8062_s25  ;;  %7618 = vrot.lane.b32.xlu0 %v13744_v33, %s17071_s30 }
 0x8a6   : > { %7643 = vrot.lane.b32.xlu2 %v13748_v62, %s17071_s30  ;;  %v13786_v21 = vpop.f32.mrf.mxu2 }
 0x8ad   : > { %7683 = vrot.lane.b32.xlu1 %v13215_v54, %s8062_s25  ;;  %7633 = vrot.lane.b32.xlu0 %v13762_v20, %s17071_s30 }
 0x8ae   : > { %7658 = vrot.lane.b32.xlu2 %v13617_v44, %s17071_s30  ;;  %v13806_v15 = vpop.f32.mrf.mxu2 }
 0x8af   : > { %v13776_v6 = vpop.permute.xlu2 %7493 }
 0x8b0   : > { %17591 = vst [vmem:[#allocation17_spill] sm:$0xff] %v13776_v6 }
 0x8b5   : > { %7698 = vrot.lane.b32.xlu1 %v13376_v40, %s8062_s25  ;;  %7648 = vrot.lane.b32.xlu0 %v13780_v16, %s17071_s30 }
 0x8b6   : > { %7673 = vrot.lane.b32.xlu2 %v13091_v26, %s8062_s25 }
 0x8b7   : > { %v13792_v22 = vpop.permute.xlu1 %7488  ;;  %v13794_v6 = vpop.permute.xlu2 %7508 }
 0x8b8   : > { %17592 = vst [vmem:[#allocation175_spill] sm:$0xff] %v13792_v22  ;;  %v17597_v22 = vld [vmem:[#allocation13_spill] sm:$0xff] }
 0x8b9   : > { %17593 = vst [vmem:[#allocation164_spill] sm:$0xff] %v13794_v6  ;;  %v17598_v6 = vld [vmem:[#allocation41_spill] sm:$0xff] }
 0x8bd   : > { %7713 = vrot.lane.b32.xlu1 %v13461_v48, %s8062_s25  ;;  %7663 = vrot.lane.b32.xlu0 %v12974_v8, %s8062_s25  ;;  %v17599_v48 = vld [vmem:[#allocation256_spill] sm:$0xff]  ;;  %v13816_v8 = vpop.permute.xlu0 %7468 }
 0x8be   : > { %7688 = vrot.lane.b32.xlu2 %v17594_v37, %s8062_s25  ;;  %17600 = vst [vmem:[#allocation233_spill] sm:$0xff] %v13816_v8 }
 0x8bf   : > { %v13804_v4 = vpop.permute.xlu1 %7503 }
 0x8c0   : > { %17595 = vst [vmem:[#allocation291_spill] sm:$0xff] %v13804_v4  ;;  %v13808_v2 = vpop.permute.xlu2 %7523  ;;  %v13822_v4 = vpop.f32.mrf.mxu2 }
 0x8c1   : > { %17596 = vst [vmem:[#allocation185_spill] sm:$0xff] %v13808_v2  ;;  %v17604_v2 = vld [vmem:[#allocation120_spill] sm:$0xff] }
 0x8c5   : > { %7678 = vrot.lane.b32.xlu0 %v17597_v22, %s8062_s25  ;;  %7728 = vrot.lane.b32.xlu1 %v17598_v6, %s8062_s25  ;;  %v17605_v6 = vld [vmem:[#allocation193_spill] sm:$0xff]  ;;  %v13830_v5 = vpop.permute.xlu0 %7483 }
 0x8c6   : > { %7703 = vrot.lane.b32.xlu2 %v17599_v48, %s8062_s25  ;;  %17606 = vst [vmem:[#allocation50_spill] sm:$0xff] %v13830_v5 }
 0x8c7   : > { %v13818_v17 = vpop.permute.xlu1 %7518 }
 0x8c8   : > { %17601 = vst [vmem:[#allocation261_spill] sm:$0xff] %v13818_v17  ;;  %v13820_v3 = vpop.permute.xlu2 %7538  ;;  %v13836_v17 = vpop.f32.mrf.mxu2 }
 0x8c9   : > { %17602 = vst [vmem:[#allocation123_spill] sm:$0xff] %v13820_v3  ;;  %v17609_v3 = vld [vmem:[#allocation167_spill] sm:$0xff] }
 0x8cd   : > { %7693 = vrot.lane.b32.xlu0 %v17603_v43, %s8062_s25  ;;  %7743 = vrot.lane.b32.xlu1 %v17604_v2, %s8064_s22 }
 0x8ce   : > { %7718 = vrot.lane.b32.xlu2 %v17605_v6, %s8062_s25 }
 0x8cf   : > { %v13832_v35 = vpop.permute.xlu1 %7533 }
 0x8d0   : > { %17607 = vst [vmem:[#allocation48_spill] sm:$0xff] %v13832_v35  ;;  %v13834_v8 = vpop.permute.xlu2 %7553  ;;  %v17613_v35 = vld [vmem:[#allocation36_spill] sm:$0xff] }
 0x8d1   : > { %17608 = vst [vmem:[#allocation244_spill] sm:$0xff] %v13834_v8  ;;  %v6233_v8 = vld [vmem:[%s15688_s9 + $0x78] sm:$0xff] }
 0x8d2   : > { %6304 = vmatpush.msrb.mxu0 %v6233_v8  ;;  %7328 = vmatpush.msra.mxu2 %v6233_v8  ;;  %v6232_v8 = vld [vmem:[%s15688_s9 + $0x70] sm:$0xff] }
 0x8d4   : > { %6305 = vmatpush.msrb.mxu0 %v6232_v8  ;;  %7329 = vmatpush.msra.mxu2 %v6232_v8  ;;  %v6231_v8 = vld [vmem:[%s15688_s9 + $0x68] sm:$0xff] }
 0x8d5   : > { %7708 = vrot.lane.b32.xlu0 %v17609_v3, %s8062_s25  ;;  %7758 = vrot.lane.b32.xlu1 %v13156_v14, %s8064_s22  ;;  %v13857_v14 = vpop.f32.mrf.mxu2 }
 0x8d6   : > { %7733 = vrot.lane.b32.xlu2 %v13587_v12, %s8062_s25  ;;  %6306 = vmatpush.msrb.mxu0 %v6231_v8 }
 0x8d7   : > { %v13844_v2 = vpop.permute.xlu1 %7548  ;;  %v13846_v28 = vpop.permute.xlu0 %7498  ;;  %7330 = vmatpush.msra.mxu2 %v6231_v8  ;;  %v6230_v8 = vld [vmem:[%s15688_s9 + $0x60] sm:$0xff] }
 0x8d8   : > { %17610 = vst [vmem:[#allocation158_spill] sm:$0xff] %v13844_v2  ;;  %v13848_v5 = vpop.permute.xlu2 %7568  ;;  %6307 = vmatpush.msrb.mxu0 %v6230_v8 }
 0x8d9   : > { %17611 = vst [vmem:[#allocation253_spill] sm:$0xff] %v13846_v28  ;;  %7331 = vmatpush.msra.mxu2 %v6230_v8  ;;  %v6229_v8 = vld [vmem:[%s15688_s9 + $0x58] sm:$0xff] }
 0x8da   : > { %17612 = vst [vmem:[#allocation216_spill] sm:$0xff] %v13848_v5  ;;  %6308 = vmatpush.msrb.mxu0 %v6229_v8 }
 0x8db   : > { %7332 = vmatpush.msra.mxu2 %v6229_v8 }
 0x8dd   : > { %7723 = vrot.lane.b32.xlu0 %v17613_v35, %s8062_s25  ;;  %7773 = vrot.lane.b32.xlu1 %v13349_v32, %s8064_s22 }
 0x8de   : > { %7748 = vrot.lane.b32.xlu2 %v13034_v55, %s8064_s22 }
 0x8df   : > { %v13861_v28 = vpop.permute.xlu1 %7563  ;;  %v13863_v2 = vpop.permute.xlu0 %7513 }
 0x8e0   : > { %17614 = vst [vmem:[#allocation176_spill] sm:$0xff] %v13861_v28  ;;  %v13865_v5 = vpop.permute.xlu2 %7583 }
 0x8e1   : > { %17615 = vst [vmem:[#allocation302_spill] sm:$0xff] %v13863_v2  ;;  %v13880_v2 = vpop.f32.mrf.mxu2 }
 0x8e5   : > { %7788 = vrot.lane.b32.xlu1 %v13435_v31, %s8064_s22  ;;  %7738 = vrot.lane.b32.xlu0 %v13629_v42, %s8062_s25  ;;  %v17619_v31 = vld [vmem:[#allocation296_spill] sm:$0xff]  ;;  %s377_s25 = sand.u32 1, %s8043_s18  }
 0x8e6   : > { %7763 = vrot.lane.b32.xlu2 %v13217_v38, %s8064_s22 }
 0x8e7   : > { %v13876_v32 = vpop.permute.xlu1 %7578  ;;  %v13878_v55 = vpop.permute.xlu0 %7528 }
 0x8e8   : > { %17616 = vst [vmem:[#allocation112_spill] sm:$0xff] %v13876_v32  ;;  %v13882_v28 = vpop.permute.xlu2 %7598 }
 0x8e9   : > { %17617 = vst [vmem:[#allocation105_spill] sm:$0xff] %v13878_v55  ;;  %v13899_v32 = vpop.f32.mrf.mxu2 }
 0x8ea   : > { %17618 = vst [vmem:[#allocation163_spill] sm:$0xff] %v13882_v28 }
 0x8ed   : > { %7803 = vrot.lane.b32.xlu1 %v13525_v23, %s8064_s22  ;;  %7753 = vrot.lane.b32.xlu0 %v17619_v31, %s8064_s22  ;;  %v17623_v23 = vpack.i.bf16 %v13623_v61, %v13620_v41 }
 0x8ee   : > { %7778 = vrot.lane.b32.xlu2 %v13382_v39, %s8064_s22  ;;  %v17624_v39 = vld [vmem:[#allocation11_spill] sm:$0xff] }
 0x8ef   : > { %v13893_v38 = vpop.permute.xlu1 %7593  ;;  %v13895_v55 = vpop.permute.xlu0 %7543 }
 0x8f0   : > { %17620 = vst [vmem:[#allocation179_spill] sm:$0xff] %v13893_v38  ;;  %v13897_v28 = vpop.permute.xlu2 %7613 }
 0x8f1   : > { %17621 = vst [vmem:[#allocation289_spill] sm:$0xff] %v13895_v55  ;;  %v13921_v55 = vpop.f32.mrf.mxu2 }
 0x8f2   : > { %17622 = vst [vmem:[#allocation114_spill] sm:$0xff] %v13897_v28 }
 0x8f5   : > { %7818 = vrot.lane.b32.xlu1 %v17623_v23, %s8064_s22  ;;  %7768 = vrot.lane.b32.xlu0 %v17624_v39, %s8064_s22  ;;  %v17626_v23 = vld [vmem:[#allocation286_spill] sm:$0xff] }
 0x8f6   : > { %7793 = vrot.lane.b32.xlu2 %v13467_v56, %s8064_s22 }
 0x8f7   : > { %v13912_v31 = vpop.permute.xlu1 %7608  ;;  %v13914_v38 = vpop.permute.xlu0 %7558 }
 0x8f8   : > { %v13916_v28 = vpop.permute.xlu2 %7628 }
 0x8f9   : > { %v13939_v39 = vpop.f32.mrf.mxu2 }
 0x8fd   : > { %7833 = vrot.lane.b32.xlu1 %v13680_v7, %s8065_s13  ;;  %7783 = vrot.lane.b32.xlu0 %v13408_v19, %s8064_s22  ;;  %v6228_v19 = vld [vmem:[%s15688_s9 + $0x50] sm:$0xff] }
 0x8fe   : > { %7808 = vrot.lane.b32.xlu2 %v13561_v34, %s8064_s22  ;;  %6309 = vmatpush.msrb.mxu0 %v6228_v19 }
 0x8ff   : > { %v13929_v56 = vpop.permute.xlu1 %7623  ;;  %v13931_v41 = vpop.permute.xlu0 %7573  ;;  %7333 = vmatpush.msra.mxu2 %v6228_v19 }
 0x900   : > { %v13933_v61 = vpop.permute.xlu2 %7643 }
 0x901   : > { %17625 = vst [vmem:[#allocation301_spill] sm:$0xff] %v13933_v61  ;;  %v13965_v19 = vpop.f32.mrf.mxu2 }
 0x905   : > { %7848 = vrot.lane.b32.xlu1 %v13032_v53, %s8063_s15  ;;  %7798 = vrot.lane.b32.xlu0 %v17626_v23, %s8064_s22  ;;  %v6227_v53 = vld [vmem:[%s15688_s9 + $0x48] sm:$0xff] }
 0x906   : > { %7823 = vrot.lane.b32.xlu2 %v13700_v51, %s8065_s13  ;;  %6310 = vmatpush.msrb.mxu0 %v6227_v53 }
 0x907   : > { %v13946_v34 = vpop.permute.xlu1 %7638  ;;  %v13948_v7 = vpop.permute.xlu0 %7588  ;;  %7334 = vmatpush.msra.mxu2 %v6227_v53 }
 0x908   : > { %17627 = vst [vmem:[#allocation235_spill] sm:$0xff] %v13946_v34  ;;  %v13950_v8 = vpop.permute.xlu2 %7658  ;;  %v17657_v34 = vld [vmem:[#allocation148_spill] sm:$0xff] }
 0x909   : > { %17628 = vst [vmem:[#allocation146_spill] sm:$0xff] %v13948_v7  ;;  %v17655_v7 = vld [vmem:[#allocation267_spill] sm:$0xff] }
 0x90d   : > { %7863 = vrot.lane.b32.xlu1 %v13091_v26, %s8063_s15  ;;  %7813 = vrot.lane.b32.xlu0 %v13589_v59, %s8064_s22 }
 0x90e   : > { %7838 = vrot.lane.b32.xlu2 %v13724_v36, %s8065_s13  ;;  %v6226_v36 = vld [vmem:[%s15688_s9 + $0x40] sm:$0xff] }
 0x90f   : > { %v13961_v51 = vpop.permute.xlu1 %7653  ;;  %v13963_v23 = vpop.permute.xlu0 %7603  ;;  %6311 = vmatpush.msrb.mxu0 %v6226_v36  ;;  %7335 = vmatpush.msra.mxu2 %v6226_v36 }
 0x910   : > { %17629 = vst [vmem:[#allocation56_spill] sm:$0xff] %v13961_v51  ;;  %v13967_v61 = vpop.permute.xlu2 %7673 }
 0x911   : > { %17630 = vst [vmem:[#allocation263_spill] sm:$0xff] %v13963_v23  ;;  %v13984_v23 = vpop.f32.mrf.mxu2 }
 0x912   : > { %17631 = vst [vmem:[#allocation283_spill] sm:$0xff] %v13967_v61 }
 0x913   : > { %17634 = vst [vmem:[#allocation247_spill] sm:$0xff] %v13984_v23 }
 0x915   : > { %7878 = vrot.lane.b32.xlu1 %v13728_v49, %s8065_s13  ;;  %7828 = vrot.lane.b32.xlu0 %v13645_v30, %s8065_s13  ;;  %v6225_v49 = vld [vmem:[%s15688_s9 + $0x38] sm:$0xff] }
 0x916   : > { %7853 = vrot.lane.b32.xlu2 %v13704_v63, %s8065_s13  ;;  %6312 = vmatpush.msrb.mxu0 %v6225_v49 }
 0x917   : > { %v13978_v26 = vpop.permute.xlu1 %7668  ;;  %v13980_v59 = vpop.permute.xlu0 %7618  ;;  %7336 = vmatpush.msra.mxu2 %v6225_v49  ;;  %v6224_v49 = vld [vmem:[%s15688_s9 + $0x30] sm:$0xff] }
 0x918   : > { %17632 = vst [vmem:[#allocation315_spill] sm:$0xff] %v13978_v26  ;;  %v13982_v53 = vpop.permute.xlu2 %7688  ;;  %6313 = vmatpush.msrb.mxu0 %v6224_v49 }
 0x919   : > { %17633 = vst [vmem:[#allocation160_spill] sm:$0xff] %v13980_v59  ;;  %v14001_v23 = vpop.f32.mrf.mxu2  ;;  %7337 = vmatpush.msra.mxu2 %v6224_v49  ;;  %v14035_v49 = vld [vmem:[%s15685_s6] ss:$0 sm:$0xff] }
 0x91a   : > { %v14108_v51 = vadd.f32 %v14035_v49, %v13661_v47 }
 0x91c   : > { %17659 = vst [vmem:[#allocation104_spill] sm:$0xff] %v14108_v51 }
 0x91d   : > { %7893 = vrot.lane.b32.xlu1 %v13696_v25, %s8065_s13  ;;  %7843 = vrot.lane.b32.xlu0 %v13659_v57, %s8065_s13 }
 0x91e   : > { %7868 = vrot.lane.b32.xlu2 %v13674_v11, %s8065_s13 }
 0x91f   : > { %v13995_v30 = vpop.permute.xlu1 %7683  ;;  %v13997_v63 = vpop.permute.xlu0 %7633 }
 0x920   : > { %17635 = vst [vmem:[#allocation57_spill] sm:$0xff] %v13995_v30  ;;  %v13999_v36 = vpop.permute.xlu2 %7703 }
 0x921   : > { %17636 = vst [vmem:[#allocation274_spill] sm:$0xff] %v13997_v63 }
 0x922   : > { %17637 = vst [vmem:[#allocation190_spill] sm:$0xff] %v13999_v36 }
 0x925   : > { %7908 = vrot.lane.b32.xlu1 %v13780_v16, %s8065_s13  ;;  %7858 = vrot.lane.b32.xlu0 %v13744_v33, %s8065_s13  ;;  %v14022_v33 = vpop.f32.mrf.mxu2 }
 0x926   : > { %7883 = vrot.lane.b32.xlu2 %v13762_v20, %s8065_s13  ;;  %17640 = vst [vmem:[#allocation145_spill] sm:$0xff] %v14022_v33  ;;  %v17645_v33 = vld [vmem:[#allocation208_spill] sm:$0xff] }
 0x927   : > { %v14009_v57 = vpop.permute.xlu1 %7698  ;;  %v14011_v11 = vpop.permute.xlu0 %7648  ;;  %v14046_v61 = vadd.f32 %v14035_v49, %v17645_v33 }
 0x928   : > { %17638 = vst [vmem:[#allocation60_spill] sm:$0xff] %v14009_v57  ;;  %v14013_v25 = vpop.permute.xlu2 %7718  ;;  %v6222_v57 = vld [vmem:[%s15688_s9 + $0x20] sm:$0xff] }
 0x929   : > { %17639 = vst [vmem:[#allocation188_spill] sm:$0xff] %v14013_v25  ;;  %v17647_v25 = vld [vmem:[#allocation240_spill] sm:$0xff] }
 0x92d   : > { %7923 = vrot.lane.b32.xlu1 %v13617_v44, %s8065_s13  ;;  %7873 = vrot.lane.b32.xlu0 %v17597_v22, %s8063_s15  ;;  %v6223_v44 = vld [vmem:[%s15688_s9 + $0x28] sm:$0xff]  ;;  %v14086_v59 = vpop.f32.mrf.mxu2 }
 0x92e   : > { %7898 = vrot.lane.b32.xlu2 %v13748_v62, %s8065_s13  ;;  %6314 = vmatpush.msrb.mxu0 %v6223_v44  ;;  %v17644_v22 = vld [vmem:[#allocation234_spill] sm:$0xff]  ;;  %17654 = vst [vmem:[#allocation141_spill] sm:$0xff] %v14086_v59  ;;  %v7425_v59 = vunpack.i.l.bf16 %v13766_v0 }
 0x92f   : > { %v14026_v20 = vpop.permute.xlu1 %7713  ;;  %v14028_v16 = vpop.permute.xlu0 %7663  ;;  %7338 = vmatpush.msra.mxu2 %v6223_v44  ;;  %v14042_v62 = vadd.f32 %v14035_v49, %v17644_v22  ;;  %v14058_v44 = vadd.f32 %v14035_v49, %v17647_v25  ;;  %v17648_v22 = vld [vmem:[#allocation245_spill] sm:$0xff] }
 0x930   : > { %17641 = vst [vmem:[#allocation318_spill] sm:$0xff] %v14026_v20  ;;  %v14030_v30 = vpop.permute.xlu2 %7733  ;;  %v17646_v20 = vld [vmem:[#allocation236_spill] sm:$0xff]  ;;  %v14064_v33 = vadd.f32 %v14035_v49, %v17648_v22  ;;  %6315 = vmatpush.msrb.mxu0 %v6222_v57 }
 0x931   : > { %17642 = vst [vmem:[#allocation270_spill] sm:$0xff] %v14028_v16  ;;  %v14054_v63 = vadd.f32 %v14035_v49, %v17646_v20  ;;  %v17651_v20 = vld [vmem:[#allocation206_spill] sm:$0xff]  ;;  %v17653_v22 = vld [vmem:[#allocation284_spill] sm:$0xff]  ;;  %7339 = vmatpush.msra.mxu2 %v6222_v57  ;;  %v14131_v57 = vadd.f32 %v14035_v49, %v13786_v21  ;;  %v14148_v21 = vadd.f32 %v14035_v49, %v13836_v17 }
 0x932   : > { %17643 = vst [vmem:[#allocation305_spill] sm:$0xff] %v14030_v30  ;;  %v14076_v30 = vadd.f32 %v14035_v49, %v17651_v20  ;;  %v14084_v16 = vadd.f32 %v14035_v49, %v17653_v22  ;;  %v14092_v20 = vadd.f32 %v14035_v49, %v17655_v7  ;;  %v14112_v7 = vadd.f32 %v14035_v49, %v13688_v50 }
 0x933   : > { %v14118_v22 = vadd.f32 %v14035_v49, %v13716_v52  ;;  %v14127_v50 = vadd.f32 %v14035_v49, %v13764_v58  ;;  %17663 = vst [vmem:[#allocation304_spill] sm:$0xff] %v14131_v57  ;;  %v14144_v58 = vadd.f32 %v14035_v49, %v13822_v4  ;;  %v14181_v17 = vadd.f32 %v14035_v49, %v13939_v39  ;;  %v17693_v57 = vld [vmem:[#allocation288_spill] sm:$0xff] }
 0x934   : > { %17656 = vst [vmem:[#allocation184_spill] sm:$0xff] %v14092_v20  ;;  %v7431_v4 = vunpack.i.h.bf16 %v13712_v24  ;;  %v7426_v39 = vunpack.i.h.bf16 %v13766_v0  ;;  %v7440_v0 = vunpack.i.l.bf16 %v13788_v60 }
 0x935   : > { %7938 = vrot.lane.b32.xlu1 %v17599_v48, %s8063_s15  ;;  %7888 = vrot.lane.b32.xlu0 %v13215_v54, %s8063_s15  ;;  %v17649_v54 = vld [vmem:[#allocation258_spill] sm:$0xff]  ;;  %17660 = vst [vmem:[#allocation293_spill] sm:$0xff] %v14118_v22 }
 0x936   : > { %7913 = vrot.lane.b32.xlu2 %v17603_v43, %s8063_s15  ;;  %v14072_v26 = vadd.f32 %v14035_v49, %v17649_v54  ;;  %v14104_v43 = vadd.f32 %v14035_v49, %v13641_v10  ;;  %v14122_v10 = vadd.f32 %v14035_v49, %v13740_v45  ;;  %17662 = vst [vmem:[#allocation249_spill] sm:$0xff] %v14127_v50  ;;  %v17703_v22 = vld [vmem:[#allocation30_spill] sm:$0xff] }
 0x937   : > { %v14066_v36 = vpop.permute.xlu1 %7728  ;;  %v14068_v48 = vpop.permute.xlu0 %7678  ;;  %17665 = vst [vmem:[#allocation281_spill] sm:$0xff] %v14144_v58  ;;  %v14168_v54 = vadd.f32 %v14035_v49, %v13880_v2  ;;  %v6221_v2 = vld [vmem:[%s15688_s9 + $0x18] sm:$0xff]  ;;  %v14191_v45 = vadd.f32 %v14035_v49, %v14001_v23  ;;  %v14202_v23 = vadd.f32 %v14035_v49, %v13921_v55  ;;  %v7451_v55 = vunpack.i.h.bf16 %v13714_v46 }
 0x938   : > { %17650 = vst [vmem:[#allocation319_spill] sm:$0xff] %v14072_v26  ;;  %v14078_v25 = vpop.permute.xlu2 %7748  ;;  %6316 = vmatpush.msrb.mxu0 %v6221_v2  ;;  %7340 = vmatpush.msra.mxu2 %v6221_v2  ;;  %v17722_v26 = vld [vmem:[#allocation259_spill] sm:$0xff] }
 0x939   : > { %17652 = vst [vmem:[#allocation273_spill] sm:$0xff] %v14078_v25  ;;  %v14096_v25 = vadd.f32 %v14035_v49, %v17657_v34  ;;  %v14135_v34 = vadd.f32 %v14035_v49, %v13806_v15  ;;  %v14152_v15 = vadd.f32 %v14035_v49, %v13857_v14  ;;  %v7450_v14 = vunpack.i.l.bf16 %v13714_v46 }
 0x93a   : > { %17658 = vst [vmem:[#allocation64_spill] sm:$0xff] %v14104_v43 }
 0x93b   : > { %17661 = vst [vmem:[#allocation320_spill] sm:$0xff] %v14122_v10 }
 0x93c   : > { %17664 = vst [vmem:[#allocation8_spill] sm:$0xff] %v14135_v34 }
 0x93d   : > { %7953 = vrot.lane.b32.xlu1 %v17605_v6, %s8063_s15  ;;  %7903 = vrot.lane.b32.xlu0 %v17594_v37, %s8063_s15  ;;  %17666 = vst [vmem:[#allocation165_spill] sm:$0xff] %v14148_v21  ;;  %v3303_v6 = vpop.f32.mrf.mxu2 }
 0x93e   : > { %17667 = vst [vmem:[#allocation65_spill] sm:$0xff] %v14152_v15  ;;  %7928 = vrot.lane.b32.xlu2 %v13376_v40, %s8063_s15  ;;  %v14172_v40 = vadd.f32 %v14035_v49, %v13899_v32  ;;  %v7430_v32 = vunpack.i.l.bf16 %v13712_v24  ;;  %v14216_v2 = vadd.f32 %v14035_v49, %v3303_v6  ;;  %v17679_v24 = vld [vmem:[#allocation52_spill] sm:$0xff] }
 0x93f   : > { %v14160_v52 = vpop.permute.xlu1 %7743  ;;  %v14162_v47 = vpop.permute.xlu0 %7693  ;;  %17670 = vst [vmem:[#allocation5_spill] sm:$0xff] %v14168_v54  ;;  %v17700_v54 = vld [vmem:[#allocation17_spill] sm:$0xff] }
 0x940   : > { %17668 = vst [vmem:[#allocation295_spill] sm:$0xff] %v14160_v52  ;;  %v14174_v37 = vpop.permute.xlu2 %7763  ;;  %v7650_v52 = vunpack.i.l.bf16 %v14011_v11 }
 0x941   : > { %17669 = vst [vmem:[#allocation152_spill] sm:$0xff] %v14162_v47  ;;  %v14207_v47 = vadd.f32 %v14035_v49, %v13965_v19  ;;  %v17678_v19 = vld [vmem:[#allocation49_spill] sm:$0xff]  ;;  %v14233_v49 = vsel %vm2855_vm4, %v17679_v24, %v7425_v59  ;;  %v17682_v59 = vld [vmem:[#allocation6_spill] sm:$0xff] }
 0x942   : > { %17671 = vst [vmem:[#allocation116_spill] sm:$0xff] %v14172_v40  ;;  %v14253_v24 = vsel %vm2855_vm4, %v17682_v59, %v7440_v0  ;;  %v6220_v0 = vld [vmem:[%s15688_s9 + $0x10] sm:$0xff]  ;;  %v17687_v59 = vld [vmem:[#allocation233_spill] sm:$0xff] }
 0x943   : > { %17672 = vst [vmem:[#allocation250_spill] sm:$0xff] %v14174_v37  ;;  %v7441_v37 = vunpack.i.h.bf16 %v13788_v60  ;;  %v17683_v60 = vld [vmem:[#allocation222_spill] sm:$0xff]  ;;  %6317 = vmatpush.msrb.mxu0 %v6220_v0  ;;  %7341 = vmatpush.msra.mxu2 %v6220_v0 }
 0x944   : > { %17673 = vst [vmem:[#allocation14_spill] sm:$0xff] %v14181_v17  ;;  %v7466_v15 = vunpack.i.h.bf16 %v17683_v60  ;;  %v7465_v34 = vunpack.i.l.bf16 %v17683_v60  ;;  %v7470_v60 = vunpack.i.l.bf16 %v17687_v59  ;;  %v17692_v17 = vld [vmem:[#allocation25_spill] sm:$0xff]  ;;  %v17694_v0 = vld [vmem:[#allocation50_spill] sm:$0xff] }
 0x945   : > { %17674 = vst [vmem:[#allocation276_spill] sm:$0xff] %v14191_v45  ;;  %7968 = vrot.lane.b32.xlu1 %v13587_v12, %s8063_s15  ;;  %7918 = vrot.lane.b32.xlu0 %v13720_v18, %s8065_s13  ;;  %v14225_v12 = vsel %vm2855_vm4, %v12958_v29, %v7431_v4  ;;  %v14229_v18 = vsel %vm2855_vm4, %v17678_v19, %v7426_v39  ;;  %v7456_v4 = vunpack.i.h.bf16 %v13802_v1  ;;  %v7455_v39 = vunpack.i.l.bf16 %v13802_v1  ;;  %v17691_v45 = vld [vmem:[#allocation47_spill] sm:$0xff] }
 0x946   : > { %17675 = vst [vmem:[#allocation27_spill] sm:$0xff] %v14202_v23  ;;  %7943 = vrot.lane.b32.xlu2 %v17609_v3, %s8063_s15  ;;  %v14241_v3 = vsel %vm2855_vm4, %v12948_v13, %v7430_v32  ;;  %v14245_v29 = vsel %vm2855_vm4, %v13075_v9, %v7441_v37  ;;  %v17684_v13 = vld [vmem:[#allocation136_spill] sm:$0xff]  ;;  %v17685_v9 = vld [vmem:[#allocation15_spill] sm:$0xff]  ;;  %v17686_v23 = vld [vmem:[#allocation170_spill] sm:$0xff]  ;;  %v7476_v21 = vunpack.i.h.bf16 %v17691_v45  ;;  %v7475_v10 = vunpack.i.l.bf16 %v17691_v45 }
 0x947   : > { %17676 = vst [vmem:[#allocation157_spill] sm:$0xff] %v14207_v47  ;;  %v14235_v6 = vpop.permute.xlu1 %7758  ;;  %v14237_v46 = vpop.permute.xlu0 %7708  ;;  %v14259_v32 = vsel %vm2855_vm4, %v17684_v13, %v7451_v55  ;;  %v14263_v37 = vsel %vm2855_vm4, %v17685_v9, %v7450_v14  ;;  %v7461_v1 = vunpack.i.h.bf16 %v17686_v23  ;;  %v7460_v27 = vunpack.i.l.bf16 %v17686_v23  ;;  %v17689_v14 = vld [vmem:[#allocation7_spill] sm:$0xff]  ;;  %v17690_v9 = vld [vmem:[#allocation22_spill] sm:$0xff] }
 0x948   : > { %17677 = vst [vmem:[#allocation187_spill] sm:$0xff] %v14216_v2  ;;  %v14249_v19 = vpop.permute.xlu2 %7778  ;;  %v7471_v47 = vunpack.i.h.bf16 %v17687_v59  ;;  %v17688_v2 = vld [vmem:[#allocation298_spill] sm:$0xff]  ;;  %v14276_v13 = vsel %vm2855_vm4, %v17689_v14, %v7456_v4  ;;  %v14280_v23 = vsel %vm2855_vm4, %v17690_v9, %v7455_v39  ;;  %v14286_v59 = vsel %vm2855_vm4, %v17692_v17, %v7466_v15  ;;  %v17699_v15 = vld [vmem:[#allocation229_spill] sm:$0xff] }
 0x949   : > { %17680 = vst [vmem:[#allocation172_spill] sm:$0xff] %v14237_v46  ;;  %v7481_v40 = vunpack.i.h.bf16 %v17688_v2  ;;  %v7480_v55 = vunpack.i.l.bf16 %v17688_v2  ;;  %v14290_v2 = vsel %vm2855_vm4, %v17693_v57, %v7465_v34  ;;  %v7486_v51 = vunpack.i.h.bf16 %v17694_v0  ;;  %v17697_v14 = vld [vmem:[#allocation106_spill] sm:$0xff]  ;;  %v17720_v46 = vld [vmem:[#allocation123_spill] sm:$0xff] }
 0x94a   : > { %17681 = vst [vmem:[#allocation132_spill] sm:$0xff] %v14249_v19  ;;  %v7485_v4 = vunpack.i.l.bf16 %v17694_v0  ;;  %v17696_v39 = vmax.f32 %v14042_v62, 0.0  ;;  %v17698_v45 = vld [vmem:[#allocation130_spill] sm:$0xff]  ;;  %v6005_v17 = vsel %vm2855_vm4, %v17699_v15, %v7460_v27  ;;  %v7496_v34 = vunpack.i.h.bf16 %v17700_v54  ;;  %v17704_v27 = vld [vmem:[#allocation133_spill] sm:$0xff] }
 0x94b   : > { %v6006_v9 = vsel %vm2855_vm4, %v17698_v45, %v7461_v1  ;;  %v7495_v57 = vunpack.i.l.bf16 %v17700_v54  ;;  %v17701_v0 = vld [vmem:[#allocation134_spill] sm:$0xff]  ;;  %v14317_v1 = vsel %vm2855_vm4, %v17703_v22, %v7481_v40  ;;  %v14321_v45 = vsel %vm2855_vm4, %v17704_v27, %v7480_v55 }
 0x94c   : > { %v14309_v62 = vsel %vm2855_vm4, %v17701_v0, %v7471_v47  ;;  %v17708_v0 = vld [vmem:[#allocation29_spill] sm:$0xff]  ;;  %v17711_v55 = vld [vmem:[#allocation226_spill] sm:$0xff]  ;;  %v7541_v43 = vunpack.i.h.bf16 %v17720_v46  ;;  %v7540_v19 = vunpack.i.l.bf16 %v17720_v46  ;;  %v7651_v46 = vunpack.i.h.bf16 %v14011_v11 }
 0x94d   : > { %6594 = vrot.lane.b32.xlu1 %v17696_v39, %s17695_s12  ;;  %7933 = vrot.lane.b32.xlu0 %v17697_v14, %s8065_s13  ;;  %v17702_v39 = vld [vmem:[#allocation282_spill] sm:$0xff]  ;;  %v14341_v27 = vsel %vm2855_vm4, %v17711_v55, %v7486_v51  ;;  %v17718_v55 = vld [vmem:[#allocation291_spill] sm:$0xff]  ;;  %s17817_s13 = smov 24  }
 0x94e   : > { %7958 = vrot.lane.b32.xlu2 %v17613_v35, %s8063_s15  ;;  %v14313_v14 = vsel %vm2855_vm4, %v17702_v39, %v7470_v60  ;;  %v17707_v35 = vld [vmem:[#allocation220_spill] sm:$0xff]  ;;  %v14333_v60 = vsel %vm2855_vm4, %v17708_v0, %v7475_v10  ;;  %v17709_v39 = vld [vmem:[#allocation175_spill] sm:$0xff]  ;;  %17712 = vst [vmem:[#allocation228_spill] sm:$0xff] %v14341_v27  ;;  %v6219_v10 = vld [vmem:[%s15688_s9 + $0x8] sm:$0xff]  ;;  %v7506_v27 = vunpack.i.h.bf16 %v17718_v55 }
 0x94f   : > { %v14323_v54 = vpop.permute.xlu1 %7773  ;;  %v14325_v15 = vpop.permute.xlu0 %7723  ;;  %v14329_v47 = vsel %vm2855_vm4, %v17707_v35, %v7476_v21  ;;  %v7491_v20 = vunpack.i.h.bf16 %v17709_v39  ;;  %v7490_v22 = vunpack.i.l.bf16 %v17709_v39  ;;  %v17715_v21 = vld [vmem:[#allocation164_spill] sm:$0xff]  ;;  %v17716_v0 = vld [vmem:[#allocation110_spill] sm:$0xff]  ;;  %6318 = vmatpush.msrb.mxu0 %v6219_v10  ;;  %7342 = vmatpush.msra.mxu2 %v6219_v10 }
 0x950   : > { %17705 = vst [vmem:[#allocation128_spill] sm:$0xff] %v14323_v54  ;;  %v14337_v40 = vpop.permute.xlu2 %7793  ;;  %v17713_v54 = vld [vmem:[#allocation265_spill] sm:$0xff]  ;;  %v7511_v35 = vunpack.i.h.bf16 %v17715_v21  ;;  %v7510_v58 = vunpack.i.l.bf16 %v17715_v21  ;;  %v14354_v39 = vsel %vm2855_vm4, %v17716_v0, %v7496_v34 }
 0x951   : > { %17706 = vst [vmem:[#allocation308_spill] sm:$0xff] %v14325_v15  ;;  %v14345_v15 = vsel %vm2855_vm4, %v17713_v54, %v7485_v4  ;;  %v7505_v4 = vunpack.i.l.bf16 %v17718_v55  ;;  %v17719_v54 = vld [vmem:[#allocation261_spill] sm:$0xff] }
 0x952   : > { %17710 = vst [vmem:[#allocation9_spill] sm:$0xff] %v14337_v40  ;;  %v17717_v40 = vld [vmem:[#allocation111_spill] sm:$0xff]  ;;  %v7521_v21 = vunpack.i.h.bf16 %v17719_v54  ;;  %v17721_v34 = vld [vmem:[#allocation37_spill] sm:$0xff]  ;;  %v14374_v10 = vsel %vm2921_vm5, %v14225_v12, %v7511_v35  ;;  %v6024_v12 = vsel %vm2921_vm5, %v14229_v18, %v7506_v27  ;;  %v14400_v35 = vsel %vm2921_vm5, %v6006_v9, %v7541_v43 }
 0x953   : > { %17714 = vst [vmem:[#allocation103_spill] sm:$0xff] %v14345_v15  ;;  %v14358_v51 = vsel %vm2855_vm4, %v17717_v40, %v7495_v57  ;;  %v7520_v15 = vunpack.i.l.bf16 %v17719_v54  ;;  %v6018_v0 = vsel %vm2855_vm4, %v17721_v34, %v7491_v20  ;;  %v6017_v57 = vsel %vm2855_vm4, %v17722_v26, %v7490_v22  ;;  %v17723_v40 = vld [vmem:[#allocation216_spill] sm:$0xff] }
 0x954   : > { %v7571_v50 = vunpack.i.h.bf16 %v17723_v40  ;;  %v7570_v55 = vunpack.i.l.bf16 %v17723_v40  ;;  %v14378_v54 = vsel %vm2921_vm5, %v14241_v3, %v7510_v58  ;;  %v17724_v20 = vmax.f32 %v14058_v44, 0.0  ;;  %v17725_v26 = vld [vmem:[#allocation248_spill] sm:$0xff] }
 0x955   : > { %7948 = vrot.lane.b32.xlu0 %v17725_v26, %s8063_s15  ;;  %v6023_v22 = vsel %vm2921_vm5, %v14233_v49, %v7505_v4  ;;  %v7731_v58 = vunpack.i.h.bf16 %v14066_v36  ;;  %v7730_v3 = vunpack.i.l.bf16 %v14066_v36  ;;  %v6029_v11 = vsel %vm2921_vm5, %v14253_v24, %v7520_v15  ;;  %v17726_v36 = vld [vmem:[#allocation48_spill] sm:$0xff] }
 0x956   : > { %6600 = vrot.lane.b32.xlu1 %v17724_v20, %s17695_s12  ;;  %7973 = vrot.lane.b32.xlu2 %v13629_v42, %s8063_s15  ;;  %v6030_v44 = vsel %vm2921_vm5, %v14245_v29, %v7521_v21  ;;  %v14403_v49 = vsel %vm2921_vm5, %v6005_v17, %v7540_v19  ;;  %v7536_v4 = vunpack.i.h.bf16 %v17726_v36  ;;  %v7535_v42 = vunpack.i.l.bf16 %v17726_v36  ;;  %v6218_v17 = vld [vmem:[%s15688_s9] sm:$0xff]  ;;  %v17727_v21 = vld [vmem:[#allocation244_spill] sm:$0xff] }
 0x957   : > { %v14405_v18 = vpop.permute.xlu1 %7788  ;;  %v14407_v27 = vpop.permute.xlu0 %7738  ;;  %v6050_v34 = vsel %vm2921_vm5, %v6018_v0, %v7571_v50  ;;  %v6049_v24 = vsel %vm2921_vm5, %v6017_v57, %v7570_v55  ;;  %v7556_v40 = vunpack.i.h.bf16 %v17727_v21  ;;  %6319 = vmatpush.msrb.mxu0 %v6218_v17  ;;  %7343 = vmatpush.msra.mxu2 %v6218_v17  ;;  %v7555_v50 = vunpack.i.l.bf16 %v17727_v21  ;;  %v17728_v0 = vld [vmem:[#allocation158_spill] sm:$0xff]  ;;  %v17735_v17 = vld [vmem:[#allocation163_spill] sm:$0xff] }
 0x958   : > { %v7809_v15 = vpop.permute.xlu2 %7808  ;;  %v6082_v29 = vsel %vm2987_vm9, %v6050_v34, %v7651_v46  ;;  %v6081_v43 = vsel %vm2987_vm9, %v6049_v24, %v7650_v52  ;;  %v7550_v57 = vunpack.i.l.bf16 %v17728_v0  ;;  %v14431_v46 = vsel %vm2921_vm5, %v14280_v23, %v7535_v42  ;;  %v17734_v42 = vld [vmem:[#allocation41_spill] sm:$0xff] }
 0x959   : > { %v7811_v9 = vunpack.i.h.bf16 %v7809_v15  ;;  %v7810_v19 = vunpack.i.l.bf16 %v7809_v15  ;;  %v6113_v20 = vsel %vm3053_vm11, %v6081_v43, %v7730_v3  ;;  %v6114_v26 = vsel %vm3053_vm11, %v6082_v29, %v7731_v58  ;;  %v17731_v58 = vld [vmem:[#allocation253_spill] sm:$0xff]  ;;  %v17732_v43 = vld [vmem:[#allocation112_spill] sm:$0xff] }
 0x95a   : > { %v7551_v3 = vunpack.i.h.bf16 %v17728_v0  ;;  %v7501_v36 = vunpack.i.h.bf16 %v17731_v58  ;;  %v7500_v34 = vunpack.i.l.bf16 %v17731_v58  ;;  %v14438_v24 = vsel %vm2921_vm5, %v14276_v13, %v7536_v4 }
 0x95b   : > { %v14424_v52 = vsel %vm6119_vm12, %v6113_v20, %v7810_v19  ;;  %v14427_v55 = vsel %vm6119_vm12, %v6114_v26, %v7811_v9  ;;  %v7586_v15 = vunpack.i.h.bf16 %v13865_v5  ;;  %v7585_v29 = vunpack.i.l.bf16 %v13865_v5  ;;  %v17736_v20 = vld [vmem:[#allocation105_spill] sm:$0xff] }
 0x95c   : > { %17729 = vst [vmem:[#allocation202_spill] sm:$0xff] %v14424_v52  ;;  %v7580_v9 = vunpack.i.l.bf16 %v17732_v43  ;;  %v17733_v23 = vmax.f32 %v14076_v30, 0.0  ;;  %v7581_v19 = vunpack.i.h.bf16 %v17732_v43  ;;  %v7600_v21 = vunpack.i.l.bf16 %v17735_v17 }
 0x95d   : > { %17730 = vst [vmem:[#allocation96_spill] sm:$0xff] %v14427_v55  ;;  %7963 = vrot.lane.b32.xlu0 %v17734_v42, %s8063_s15  ;;  %v7531_v13 = vunpack.i.h.bf16 %v17736_v20  ;;  %v7530_v4 = vunpack.i.l.bf16 %v17736_v20  ;;  %v17737_v5 = vmax.f32 %v14046_v61, 0.0  ;;  %v14457_v26 = vsel %vm2921_vm5, %v14329_v47, %v7556_v40  ;;  %v17738_v47 = vld [vmem:[#allocation108_spill] sm:$0xff]  ;;  %v17739_v42 = vld [vmem:[#allocation125_spill] sm:$0xff] }
 0x95e   : > { %6606 = vrot.lane.b32.xlu1 %v17733_v23, %s17695_s12  ;;  %v14461_v30 = vsel %vm2921_vm5, %v14333_v60, %v7555_v50  ;;  %v14465_v0 = vsel %vm2921_vm5, %v14313_v14, %v7550_v57  ;;  %v7601_v58 = vunpack.i.h.bf16 %v17735_v17  ;;  %v14474_v61 = vsel %vm2921_vm5, %v14309_v62, %v7551_v3  ;;  %v17740_v50 = vld [vmem:[#allocation176_spill] sm:$0xff] }
 0x95f   : > { %6596 = vrot.lane.b32.xlu2 %v17737_v5, %s17695_s12  ;;  %v14468_v43 = vpop.permute.xlu1 %7803  ;;  %v14470_v23 = vpop.permute.xlu0 %7753  ;;  %v6022_v40 = vsel %vm2855_vm4, %v17738_v47, %v7501_v36  ;;  %v6021_v60 = vsel %vm2855_vm4, %v17739_v42, %v7500_v34  ;;  %v14484_v57 = vsel %vm2987_vm9, %v6023_v22, %v7585_v29  ;;  %v14487_v17 = vsel %vm2987_vm9, %v6024_v12, %v7586_v15  ;;  %v17741_v15 = vld [vmem:[#allocation289_spill] sm:$0xff] }
 0x960   : > { %v14481_v14 = vpop.permute.xlu2 %7823  ;;  %v6053_v5 = vsel %vm2921_vm5, %v6021_v60, %v7580_v9  ;;  %v6054_v62 = vsel %vm2921_vm5, %v6022_v40, %v7581_v19  ;;  %v6061_v3 = vsel %vm2987_vm9, %v6029_v11, %v7600_v21  ;;  %v6034_v36 = vsel %vm2921_vm5, %v14259_v32, %v7531_v13 }
 0x961   : > { %v6033_v34 = vsel %vm2921_vm5, %v14263_v37, %v7530_v4  ;;  %v6062_v47 = vsel %vm2987_vm9, %v6030_v44, %v7601_v58  ;;  %v7661_v22 = vunpack.i.h.bf16 %v13950_v8  ;;  %v7660_v29 = vunpack.i.l.bf16 %v13950_v8  ;;  %v17743_v4 = vld [vmem:[#allocation63_spill] sm:$0xff] }
 0x962   : > { %v7681_v12 = vunpack.i.h.bf16 %v14068_v48  ;;  %v7546_v9 = vunpack.i.h.bf16 %v17741_v15  ;;  %v7545_v19 = vunpack.i.l.bf16 %v17741_v15  ;;  %v7611_v11 = vunpack.i.h.bf16 %v13912_v31 }
 0x963   : > { %v7680_v21 = vunpack.i.l.bf16 %v14068_v48  ;;  %v7610_v32 = vunpack.i.l.bf16 %v13912_v31  ;;  %v7561_v37 = vunpack.i.h.bf16 %v13914_v38  ;;  %v7741_v44 = vunpack.i.h.bf16 %v14407_v27 }
 0x964   : > { %v7740_v13 = vunpack.i.l.bf16 %v14407_v27  ;;  %v17742_v8 = vmax.f32 %v14096_v25, 0.0  ;;  %v7631_v58 = vunpack.i.h.bf16 %v13916_v28  ;;  %v7560_v40 = vunpack.i.l.bf16 %v13914_v38 }
 0x965   : > { %7978 = vrot.lane.b32.xlu0 %v17743_v4, %s8063_s15  ;;  %v7761_v48 = vunpack.i.h.bf16 %v14235_v6  ;;  %v7760_v31 = vunpack.i.l.bf16 %v14235_v6  ;;  %v17744_v42 = vmax.f32 %v14064_v33, 0.0  ;;  %v7630_v27 = vunpack.i.l.bf16 %v13916_v28  ;;  %s7156_s15 = sshll.u32 %s377_s25, 8 }
 0x966   : > { %6612 = vrot.lane.b32.xlu1 %v17742_v8, %s17695_s12  ;;  %v6086_v25 = vsel %vm2987_vm9, %v6054_v62, %v7661_v22  ;;  %v6085_v60 = vsel %vm2987_vm9, %v6053_v5, %v7660_v29  ;;  %v6094_v15 = vsel %vm3053_vm11, %v6062_v47, %v7681_v12  ;;  %v6093_v6 = vsel %vm3053_vm11, %v6061_v3, %v7680_v21  ;;  %s15431_s30 = scalar_lea.vmem [#allocation2], %s7156_s15 }
 0x967   : > { %6602 = vrot.lane.b32.xlu2 %v17744_v42, %s17695_s12  ;;  %v7819_v8 = vpop.permute.xlu1 %7818  ;;  %v7769_v4 = vpop.permute.xlu0 %7768  ;;  %v6118_v52 = vsel %vm3053_vm11, %v6086_v25, %v7741_v44  ;;  %v6117_v33 = vsel %vm3053_vm11, %v6085_v60, %v7740_v13  ;;  %v6126_v5 = vsel %vm6119_vm12, %v6093_v6, %v7760_v31  ;;  %v6127_v47 = vsel %vm6119_vm12, %v6094_v15, %v7761_v48  ;;  %s7087_s14 = sshll.u32 %s15431_s30, 4  ;;  %s7088_s14 = int_to_ptr.vmem [resolvable:$true] %s7087_s14 }
 0x968   : > { %v7839_v20 = vpop.permute.xlu2 %7838  ;;  %v7821_v38 = vunpack.i.h.bf16 %v7819_v8  ;;  %v7820_v55 = vunpack.i.l.bf16 %v7819_v8  ;;  %v7626_v29 = vunpack.i.h.bf16 %v13929_v56  ;;  %v7625_v3 = vunpack.i.l.bf16 %v13929_v56  ;;  %v17750_v8 = vld [vmem:[#allocation56_spill] sm:$0xff] }
 0x969   : > { %v7841_v42 = vunpack.i.h.bf16 %v7839_v20  ;;  %v7840_v28 = vunpack.i.l.bf16 %v7839_v20  ;;  %v6039_v20 = vsel %vm2921_vm5, %v14290_v2, %v7545_v19  ;;  %v7576_v44 = vunpack.i.h.bf16 %v13931_v41 }
 0x96a   : > { %v14528_v62 = vsel %vm6119_vm12, %v6118_v52, %v7821_v38  ;;  %v14533_v22 = vsel %vm6119_vm12, %v6117_v33, %v7820_v55  ;;  %v6040_v52 = vsel %vm2921_vm5, %v14286_v59, %v7546_v9  ;;  %v7575_v55 = vunpack.i.l.bf16 %v13931_v41  ;;  %v17751_v38 = vld [vmem:[#allocation160_spill] sm:$0xff] }
 0x96b   : > { %v14538_v12 = vsel %vm6152_vm13, %v6126_v5, %v7840_v28  ;;  %v14541_v21 = vsel %vm6152_vm13, %v6127_v47, %v7841_v42  ;;  %v6065_v13 = vsel %vm2987_vm9, %v6033_v34, %v7610_v32  ;;  %v6066_v56 = vsel %vm2987_vm9, %v6034_v36, %v7611_v11  ;;  %v17748_v11 = vld [vmem:[#allocation235_spill] sm:$0xff]  ;;  %v17752_v42 = vld [vmem:[#allocation270_spill] sm:$0xff] }
 0x96c   : > { %v7691_v48 = vunpack.i.h.bf16 %v13982_v53  ;;  %v7690_v31 = vunpack.i.l.bf16 %v13982_v53  ;;  %v17745_v25 = vmax.f32 %v14112_v7, 0.0  ;;  %v17746_v59 = vmax.f32 %v14054_v63, 0.0 }
 0x96d   : > { %v14561_v2 = vsel %vm2921_vm5, %v14317_v1, %v7561_v37  ;;  %v6045_v41 = vsel %vm2921_vm5, %v14321_v45, %v7560_v40  ;;  %v7771_v36 = vunpack.i.h.bf16 %v7769_v4  ;;  %v7770_v34 = vunpack.i.l.bf16 %v7769_v4 }
 0x96e   : > { %6618 = vrot.lane.b32.xlu1 %v17745_v25, %s17695_s12  ;;  %6598 = vrot.lane.b32.xlu0 %v17746_v59, %s17695_s12  ;;  %v17747_v53 = vmax.f32 %v14084_v16, 0.0  ;;  %v14570_v7 = vsel %vm2987_vm9, %v14465_v0, %v7630_v27  ;;  %v14574_v63 = vsel %vm2987_vm9, %v14474_v61, %v7631_v58  ;;  %v14577_v1 = vsel %vm2987_vm9, %v6039_v20, %v7625_v3  ;;  %v17749_v61 = vld [vmem:[#allocation146_spill] sm:$0xff]  ;;  %v17753_v3 = vld [vmem:[#allocation60_spill] sm:$0xff]  ;;  %v17755_v25 = vld [vmem:[#allocation249_spill] sm:$0xff] }
 0x96f   : > { %v14580_v9 = vsel %vm2987_vm9, %v6040_v52, %v7626_v29  ;;  %v14582_v45 = vpop.permute.xlu1 %7833  ;;  %v14584_v19 = vpop.permute.xlu0 %7783  ;;  %v6052_v16 = vsel %vm2921_vm5, %v14354_v39, %v7576_v44  ;;  %v6051_v0 = vsel %vm2921_vm5, %v14358_v51, %v7575_v55  ;;  %v7640_v32 = vunpack.i.l.bf16 %v17748_v11  ;;  %v17754_v44 = vld [vmem:[#allocation295_spill] sm:$0xff] }
 0x970   : > { %6608 = vrot.lane.b32.xlu2 %v17747_v53, %s17695_s12  ;;  %v7590_v37 = vunpack.i.l.bf16 %v17749_v61  ;;  %v7854_v58 = vpop.permute.xlu2 %7853  ;;  %v6098_v40 = vsel %vm3053_vm11, %v6066_v56, %v7691_v48  ;;  %v6097_v27 = vsel %vm3053_vm11, %v6065_v13, %v7690_v31  ;;  %v7655_v4 = vunpack.i.l.bf16 %v17750_v8 }
 0x971   : > { %v7856_v60 = vunpack.i.h.bf16 %v7854_v58  ;;  %v7855_v15 = vunpack.i.l.bf16 %v7854_v58  ;;  %v7621_v6 = vunpack.i.h.bf16 %v17751_v38  ;;  %v6130_v39 = vsel %vm6119_vm12, %v6097_v27, %v7770_v34 }
 0x972   : > { %v6131_v33 = vsel %vm6119_vm12, %v6098_v40, %v7771_v36  ;;  %v7620_v51 = vunpack.i.l.bf16 %v17751_v38  ;;  %v7665_v28 = vunpack.i.l.bf16 %v17752_v42  ;;  %v7641_v29 = vunpack.i.h.bf16 %v17748_v11  ;;  %v17757_v36 = vld [vmem:[#allocation319_spill] sm:$0xff]  ;;  %v17775_v11 = vld [vmem:[#allocation5_spill] sm:$0xff] }
 0x973   : > { %v14601_v5 = vsel %vm6152_vm13, %v6130_v39, %v7855_v15  ;;  %v14604_v47 = vsel %vm6152_vm13, %v6131_v33, %v7856_v60  ;;  %v7701_v52 = vunpack.i.h.bf16 %v17753_v3  ;;  %v7700_v20 = vunpack.i.l.bf16 %v17753_v3 }
 0x974   : > { %v7745_v55 = vunpack.i.l.bf16 %v17754_v44  ;;  %v14611_v13 = vsel %vm2987_vm9, %v6045_v41, %v7640_v32  ;;  %v7591_v56 = vunpack.i.h.bf16 %v17749_v61  ;;  %v14616_v48 = vsel %vm2987_vm9, %v14378_v54, %v7590_v37  ;;  %v17759_v32 = vld [vmem:[#allocation132_spill] sm:$0xff] }
 0x975   : > { %v7825_v31 = vunpack.i.l.bf16 %v14481_v14  ;;  %v17756_v59 = vmax.f32 %v17755_v25, 0.0  ;;  %v17758_v34 = vmax.f32 %v17757_v36, 0.0  ;;  %v7656_v53 = vunpack.i.h.bf16 %v17750_v8  ;;  %v17760_v54 = vld [vmem:[#allocation64_spill] sm:$0xff] }
 0x976   : > { %v6083_v41 = vsel %vm2987_vm9, %v6051_v0, %v7655_v4  ;;  %v7781_v58 = vunpack.i.h.bf16 %v17759_v32  ;;  %v7780_v40 = vunpack.i.l.bf16 %v17759_v32  ;;  %v17761_v37 = vmax.f32 %v17760_v54, 0.0  ;;  %v17764_v54 = vld [vmem:[#allocation172_spill] sm:$0xff] }
 0x977   : > { %6624 = vrot.lane.b32.xlu1 %v17756_v59, %s17695_s12  ;;  %6604 = vrot.lane.b32.xlu0 %v17758_v34, %s17695_s12  ;;  %v6070_v27 = vsel %vm2987_vm9, %v14400_v35, %v7621_v6  ;;  %v6069_v60 = vsel %vm2987_vm9, %v14403_v49, %v7620_v51  ;;  %v6087_v15 = vsel %vm3053_vm11, %v14484_v57, %v7665_v28  ;;  %v7849_v8 = vpop.permute.xlu1 %7848  ;;  %v14638_v38 = vpop.permute.xlu0 %7798  ;;  %v7666_v35 = vunpack.i.h.bf16 %v17752_v42  ;;  %v17762_v51 = vld [vmem:[#allocation305_spill] sm:$0xff]  ;;  %v17763_v34 = vld [vmem:[#allocation315_spill] sm:$0xff] }
 0x978   : > { %6614 = vrot.lane.b32.xlu2 %v17761_v37, %s17695_s12  ;;  %v6101_v0 = vsel %vm3053_vm11, %v6069_v60, %v7700_v20  ;;  %v6102_v4 = vsel %vm3053_vm11, %v6070_v27, %v7701_v52  ;;  %v7869_v39 = vpop.permute.xlu2 %7868  ;;  %v7850_v33 = vunpack.i.l.bf16 %v7849_v8  ;;  %v6120_v3 = vsel %vm6119_vm12, %v6087_v15, %v7745_v55 }
 0x979   : > { %v7871_v6 = vunpack.i.h.bf16 %v7869_v39  ;;  %v7870_v25 = vunpack.i.l.bf16 %v7869_v39  ;;  %v6153_v49 = vsel %vm6152_vm13, %v6120_v3, %v7825_v31  ;;  %v7736_v57 = vunpack.i.h.bf16 %v17762_v51  ;;  %v17770_v39 = vld [vmem:[#allocation188_spill] sm:$0xff] }
 0x97a   : > { %v6186_v28 = vsel %vm6185_vm14, %v6153_v49, %v7850_v33  ;;  %v6134_v59 = vsel %vm6119_vm12, %v6101_v0, %v7780_v40  ;;  %v6135_v20 = vsel %vm6119_vm12, %v6102_v4, %v7781_v58  ;;  %v7735_v52 = vunpack.i.l.bf16 %v17762_v51  ;;  %v17765_v58 = vld [vmem:[#allocation190_spill] sm:$0xff]  ;;  %v17766_v0 = vld [vmem:[#allocation281_spill] sm:$0xff] }
 0x97b   : > { %v7746_v36 = vunpack.i.h.bf16 %v17754_v44  ;;  %6320 = vmatmul.f32.vlgmr.msrb.gmra.mxu0 %v6186_v28  ;;  %v14652_v55 = vsel %vm6152_vm13, %v6134_v59, %v7870_v25  ;;  %v14655_v42 = vsel %vm6152_vm13, %v6135_v20, %v7871_v6  ;;  %v6084_v31 = vsel %vm2987_vm9, %v6052_v16, %v7656_v53  ;;  %v17768_v16 = vld [vmem:[#allocation184_spill] sm:$0xff]  ;;  %v17771_v25 = vld [vmem:[#allocation293_spill] sm:$0xff] }
 0x97c   : > { %v7670_v32 = vunpack.i.l.bf16 %v17763_v34  ;;  %v7711_v37 = vunpack.i.h.bf16 %v17764_v54  ;;  %v7710_v40 = vunpack.i.l.bf16 %v17764_v54  ;;  %v7706_v27 = vunpack.i.h.bf16 %v17765_v58 }
 0x97d   : > { %v7705_v60 = vunpack.i.l.bf16 %v17765_v58  ;;  %v7790_v44 = vunpack.i.l.bf16 %v14405_v18  ;;  %v7826_v15 = vunpack.i.h.bf16 %v14481_v14  ;;  %v17767_v4 = vmax.f32 %v17766_v0, 0.0 }
 0x97e   : > { %v17769_v53 = vmax.f32 %v17768_v16, 0.0  ;;  %v7721_v33 = vunpack.i.h.bf16 %v17770_v39  ;;  %v7791_v3 = vunpack.i.h.bf16 %v14405_v18  ;;  %v7851_v6 = vunpack.i.h.bf16 %v7849_v8 }
 0x97f   : > { %6630 = vrot.lane.b32.xlu1 %v17767_v4, %s17695_s12  ;;  %v17772_v49 = vmax.f32 %v17771_v25, 0.0  ;;  %v6088_v14 = vsel %vm3053_vm11, %v14487_v17, %v7666_v35  ;;  %v7720_v51 = vunpack.i.l.bf16 %v17770_v39  ;;  %v6116_v28 = vsel %vm3053_vm11, %v6084_v31, %v7736_v57  ;;  %v14681_v20 = vpop.permute.xlu1 %7863  ;;  %v7814_v54 = vpop.permute.xlu0 %7813  ;;  %v17774_v25 = vld [vmem:[#allocation274_spill] sm:$0xff] }
 0x980   : > { %6610 = vrot.lane.b32.xlu0 %v17769_v53, %s17695_s12  ;;  %v6115_v59 = vsel %vm3053_vm11, %v6083_v41, %v7735_v52  ;;  %v6121_v58 = vsel %vm6119_vm12, %v6088_v14, %v7746_v36  ;;  %v6105_v18 = vsel %vm3053_vm11, %v14570_v7, %v7710_v40  ;;  %v6106_v8 = vsel %vm3053_vm11, %v14574_v63, %v7711_v37  ;;  %v7884_v0 = vpop.permute.xlu2 %7883  ;;  %v17773_v63 = vld [vmem:[#allocation273_spill] sm:$0xff] }
 0x981   : > { %6620 = vrot.lane.b32.xlu2 %v17772_v49, %s17695_s12  ;;  %v7816_v4 = vunpack.i.h.bf16 %v7814_v54  ;;  %v7815_v17 = vunpack.i.l.bf16 %v7814_v54  ;;  %v7886_v35 = vunpack.i.h.bf16 %v7884_v0  ;;  %v7885_v16 = vunpack.i.l.bf16 %v7884_v0 }
 0x982   : > { %v6154_v57 = vsel %vm6152_vm13, %v6121_v58, %v7826_v15  ;;  %v6138_v41 = vsel %vm6119_vm12, %v6105_v18, %v7790_v44  ;;  %v6139_v31 = vsel %vm6119_vm12, %v6106_v8, %v7791_v3  ;;  %v7750_v37 = vunpack.i.l.bf16 %v17773_v63  ;;  %v17781_v58 = vld [vmem:[#allocation318_spill] sm:$0xff] }
 0x983   : > { %v6187_v52 = vsel %vm6185_vm14, %v6154_v57, %v7851_v6  ;;  %v14693_v36 = vsel %vm6119_vm12, %v6115_v59, %v7815_v17  ;;  %v14696_v7 = vsel %vm6119_vm12, %v6116_v28, %v7816_v4  ;;  %v7785_v40 = vunpack.i.l.bf16 %v14584_v19 }
 0x984   : > { %6323 = vmatmul.f32.gmra.mxu0 %v6187_v52  ;;  %v14701_v53 = vsel %vm6152_vm13, %v6138_v41, %v7885_v16  ;;  %v14704_v44 = vsel %vm6152_vm13, %v6139_v31, %v7886_v35  ;;  %v6078_v15 = vsel %vm2987_vm9, %v14561_v2, %v7641_v29  ;;  %v7671_v39 = vunpack.i.h.bf16 %v17763_v34  ;;  %v17777_v2 = vld [vmem:[#allocation104_spill] sm:$0xff] }
 0x985   : > { %v7786_v3 = vunpack.i.h.bf16 %v14584_v19  ;;  %v6089_v6 = vsel %vm3053_vm11, %v14616_v48, %v7670_v32  ;;  %v7636_v49 = vunpack.i.h.bf16 %v17774_v25  ;;  %v7635_v14 = vunpack.i.l.bf16 %v17774_v25  ;;  %v17779_v32 = vld [vmem:[#allocation304_spill] sm:$0xff] }
 0x986   : > { %v6104_v28 = vsel %vm3053_vm11, %v14580_v9, %v7706_v27  ;;  %v7800_v59 = vunpack.i.l.bf16 %v14638_v38  ;;  %v17776_v54 = vmax.f32 %v17775_v11, 0.0  ;;  %v17778_v29 = vmax.f32 %v17777_v2, 0.0 }
 0x987   : > { %v6103_v19 = vsel %vm3053_vm11, %v14577_v1, %v7705_v60  ;;  %v6110_v48 = vsel %vm3053_vm11, %v6078_v15, %v7721_v33  ;;  %v6109_v34 = vsel %vm3053_vm11, %v14611_v13, %v7720_v51  ;;  %v7801_v9 = vunpack.i.h.bf16 %v14638_v38  ;;  %v7879_v0 = vpop.permute.xlu1 %7878  ;;  %v7829_v4 = vpop.permute.xlu0 %7828 }
 0x988   : > { %6636 = vrot.lane.b32.xlu1 %v17776_v54, %s17695_s12  ;;  %6616 = vrot.lane.b32.xlu0 %v17778_v29, %s17695_s12  ;;  %v17780_v27 = vmax.f32 %v17779_v32, 0.0  ;;  %v7716_v18 = vunpack.i.h.bf16 %v17781_v58  ;;  %v7715_v8 = vunpack.i.l.bf16 %v17781_v58  ;;  %v6122_v17 = vsel %vm6119_vm12, %v6089_v6, %v7750_v37  ;;  %v7899_v60 = vpop.permute.xlu2 %7898  ;;  %v17783_v29 = vld [vmem:[#allocation301_spill] sm:$0xff]  ;;  %v17785_v32 = vld [vmem:[#allocation14_spill] sm:$0xff]  ;;  %v17787_v58 = vld [vmem:[#allocation320_spill] sm:$0xff] }
 0x989   : > { %v6136_v1 = vsel %vm6119_vm12, %v6103_v19, %v7785_v40  ;;  %v7881_v33 = vunpack.i.h.bf16 %v7879_v0  ;;  %v7880_v35 = vunpack.i.l.bf16 %v7879_v0  ;;  %v7830_v13 = vunpack.i.l.bf16 %v7829_v4 }
 0x98a   : > { %6626 = vrot.lane.b32.xlu2 %v17780_v27, %s17695_s12  ;;  %v6137_v38 = vsel %vm6119_vm12, %v6104_v28, %v7786_v3  ;;  %v7865_v51 = vunpack.i.l.bf16 %v14681_v20  ;;  %v7901_v16 = vunpack.i.h.bf16 %v7899_v60  ;;  %v7900_v57 = vunpack.i.l.bf16 %v7899_v60 }
 0x98b   : > { %v6142_v41 = vsel %vm6119_vm12, %v6109_v34, %v7800_v59  ;;  %v6155_v52 = vsel %vm6152_vm13, %v6122_v17, %v7830_v13  ;;  %v14743_v31 = vsel %vm6152_vm13, %v6136_v1, %v7880_v35  ;;  %v14746_v37 = vsel %vm6152_vm13, %v6137_v38, %v7881_v33  ;;  %v17782_v59 = vld [vmem:[#allocation114_spill] sm:$0xff]  ;;  %v17791_v35 = vld [vmem:[#allocation152_spill] sm:$0xff] }
 0x98c   : > { %v6143_v40 = vsel %vm6119_vm12, %v6110_v48, %v7801_v9  ;;  %v7751_v15 = vunpack.i.h.bf16 %v17773_v63  ;;  %v6188_v3 = vsel %vm6185_vm14, %v6155_v52, %v7865_v51  ;;  %v14752_v6 = vsel %vm6152_vm13, %v6142_v41, %v7900_v57  ;;  %v17784_v48 = vld [vmem:[#allocation9_spill] sm:$0xff]  ;;  %v17792_v52 = vld [vmem:[#allocation128_spill] sm:$0xff] }
 0x98d   : > { %v14755_v25 = vsel %vm6152_vm13, %v6143_v40, %v7901_v16  ;;  %v7565_v28 = vunpack.i.l.bf16 %v17740_v50  ;;  %v7616_v11 = vunpack.i.h.bf16 %v17782_v59  ;;  %v7615_v54 = vunpack.i.l.bf16 %v17782_v59  ;;  %6326 = vmatmul.f32.gmra.mxu0 %v6188_v3 }
 0x98e   : > { %v7831_v2 = vunpack.i.h.bf16 %v7829_v4  ;;  %v7646_v19 = vunpack.i.h.bf16 %v17783_v29  ;;  %v6058_v63 = vsel %vm2987_vm9, %v14374_v10, %v7591_v56  ;;  %v7796_v34 = vunpack.i.h.bf16 %v17784_v48  ;;  %v17789_v56 = vld [vmem:[#allocation165_spill] sm:$0xff] }
 0x98f   : > { %v7795_v9 = vunpack.i.l.bf16 %v17784_v48  ;;  %v17786_v27 = vmax.f32 %v17785_v32, 0.0  ;;  %v17788_v0 = vmax.f32 %v17787_v58, 0.0  ;;  %v7645_v4 = vunpack.i.l.bf16 %v17783_v29  ;;  %v7894_v38 = vpop.permute.xlu1 %7893  ;;  %v14785_v51 = vpop.permute.xlu0 %7843  ;;  %v17793_v29 = vld [vmem:[#allocation308_spill] sm:$0xff] }
 0x990   : > { %v6076_v61 = vsel %vm2987_vm9, %v14457_v26, %v7636_v49  ;;  %v6075_v10 = vsel %vm2987_vm9, %v14461_v30, %v7635_v14  ;;  %v17790_v17 = vmax.f32 %v17789_v56, 0.0  ;;  %v6090_v1 = vsel %vm3053_vm11, %v6058_v63, %v7671_v39  ;;  %v14789_v30 = vpop.permute.xlu2 %7913 }
 0x991   : > { %6642 = vrot.lane.b32.xlu1 %v17786_v27, %s17695_s12  ;;  %6622 = vrot.lane.b32.xlu0 %v17788_v0, %s17695_s12  ;;  %v6107_v60 = vsel %vm3053_vm11, %v6075_v10, %v7715_v8  ;;  %v6108_v33 = vsel %vm3053_vm11, %v6076_v61, %v7716_v18  ;;  %v7696_v13 = vunpack.i.h.bf16 %v17791_v35  ;;  %v6123_v26 = vsel %vm6119_vm12, %v6090_v1, %v7751_v15  ;;  %v17796_v27 = vld [vmem:[#allocation228_spill] sm:$0xff]  ;;  %v17797_v0 = vld [vmem:[#allocation302_spill] sm:$0xff]  ;;  %v17798_v10 = vld [vmem:[#allocation179_spill] sm:$0xff] }
 0x992   : > { %6632 = vrot.lane.b32.xlu2 %v17790_v17, %s17695_s12  ;;  %v7695_v49 = vunpack.i.l.bf16 %v17791_v35  ;;  %v7896_v14 = vunpack.i.h.bf16 %v7894_v38  ;;  %v7895_v16 = vunpack.i.l.bf16 %v7894_v38  ;;  %v6156_v57 = vsel %vm6152_vm13, %v6123_v26, %v7831_v2 }
 0x993   : > { %v7866_v39 = vunpack.i.h.bf16 %v14681_v20  ;;  %v7916_v8 = vunpack.i.h.bf16 %v14789_v30  ;;  %v6140_v18 = vsel %vm6119_vm12, %v6107_v60, %v7795_v9  ;;  %v6141_v41 = vsel %vm6119_vm12, %v6108_v33, %v7796_v34  ;;  %v17794_v34 = vld [vmem:[#allocation103_spill] sm:$0xff]  ;;  %v17801_v33 = vld [vmem:[#allocation8_spill] sm:$0xff] }
 0x994   : > { %v7776_v40 = vunpack.i.h.bf16 %v17792_v52  ;;  %v7775_v15 = vunpack.i.l.bf16 %v17792_v52  ;;  %v14799_v3 = vsel %vm6152_vm13, %v6140_v18, %v7895_v16  ;;  %v14802_v59 = vsel %vm6152_vm13, %v6141_v41, %v7896_v14 }
 0x995   : > { %v7726_v2 = vunpack.i.h.bf16 %v17793_v29  ;;  %v7725_v20 = vunpack.i.l.bf16 %v17793_v29  ;;  %v6189_v63 = vsel %vm6185_vm14, %v6156_v57, %v7866_v39  ;;  %v14809_v48 = vsel %vm6185_vm14, %v14604_v47, %v7916_v8 }
 0x996   : > { %v6047_v9 = vsel %vm2921_vm5, %v17794_v34, %v7565_v28  ;;  %v17795_v32 = vunpack.i.h.bf16 %v17740_v50  ;;  %v7515_v61 = vunpack.i.l.bf16 %v17797_v0  ;;  %v7595_v56 = vunpack.i.l.bf16 %v17798_v10  ;;  %6329 = vmatmul.f32.gmra.mxu0 %v6189_v63  ;;  %v17799_v50 = vld [vmem:[#allocation276_spill] sm:$0xff] }
 0x997   : > { %v6067_v17 = vsel %vm2987_vm9, %v14431_v46, %v7615_v54  ;;  %v6068_v47 = vsel %vm2987_vm9, %v14438_v24, %v7616_v11  ;;  %v7806_v1 = vunpack.i.h.bf16 %v14468_v43  ;;  %v7805_v28 = vunpack.i.l.bf16 %v14468_v43  ;;  %v17803_v11 = vld [vmem:[#allocation116_spill] sm:$0xff]  ;;  %v7909_v16 = vpop.permute.xlu1 %7908  ;;  %v7859_v57 = vpop.permute.xlu0 %7858 }
 0x998   : > { %v6048_v58 = vsel %vm2921_vm5, %v17796_v27, %v17795_v32  ;;  %v17800_v60 = vmax.f32 %v17799_v50, 0.0  ;;  %v17802_v35 = vmax.f32 %v17801_v33, 0.0  ;;  %v6079_v38 = vsel %vm2987_vm9, %v6047_v9, %v7645_v4  ;;  %v7929_v8 = vpop.permute.xlu2 %7928  ;;  %v17806_v32 = vld [vmem:[#allocation283_spill] sm:$0xff] }
 0x999   : > { %v6080_v26 = vsel %vm2987_vm9, %v6048_v58, %v7646_v19  ;;  %v6099_v46 = vsel %vm3053_vm11, %v6067_v17, %v7695_v49  ;;  %v6100_v24 = vsel %vm3053_vm11, %v6068_v47, %v7696_v13  ;;  %v17804_v54 = vmax.f32 %v17803_v11, 0.0  ;;  %v17807_v47 = vld [vmem:[#allocation157_spill] sm:$0xff] }
 0x99a   : > { %6648 = vrot.lane.b32.xlu1 %v17800_v60, %s17695_s12  ;;  %6628 = vrot.lane.b32.xlu0 %v17802_v35, %s17695_s12  ;;  %v6111_v43 = vsel %vm3053_vm11, %v6079_v38, %v7725_v20  ;;  %v6112_v14 = vsel %vm3053_vm11, %v6080_v26, %v7726_v2  ;;  %v6132_v39 = vsel %vm6119_vm12, %v6099_v46, %v7775_v15  ;;  %v7911_v19 = vunpack.i.h.bf16 %v7909_v16  ;;  %v17805_v15 = vld [vmem:[#allocation187_spill] sm:$0xff]  ;;  %v17810_v60 = vld [vmem:[#allocation61_spill] sm:$0xff] }
 0x99b   : > { %6638 = vrot.lane.b32.xlu2 %v17804_v54, %s17695_s12  ;;  %v6133_v4 = vsel %vm6119_vm12, %v6100_v24, %v7776_v40  ;;  %v7910_v18 = vunpack.i.l.bf16 %v7909_v16  ;;  %v7861_v49 = vunpack.i.h.bf16 %v7859_v57  ;;  %v7860_v41 = vunpack.i.l.bf16 %v7859_v57  ;;  %v14869_v38 = vld [vmem:[%s15683_s4] ss:$0 sm:$0xff]  ;;  %v17813_v54 = vld [vmem:[#allocation27_spill] sm:$0xff] }
 0x99c   : > { %v7931_v13 = vunpack.i.h.bf16 %v7929_v8  ;;  %v7930_v52 = vunpack.i.l.bf16 %v7929_v8  ;;  %v6144_v29 = vsel %vm6119_vm12, %v6111_v43, %v7805_v28  ;;  %v6145_v63 = vsel %vm6119_vm12, %v6112_v14, %v7806_v1  ;;  %v17808_v28 = vld [vmem:[#allocation155_spill] sm:$0xff]  ;;  %v17811_v24 = vld [vmem:[#allocation65_spill] sm:$0xff] }
 0x99d   : > { %v6165_v20 = vsel %vm6152_vm13, %v6132_v39, %v7860_v41  ;;  %v6166_v2 = vsel %vm6152_vm13, %v6133_v4, %v7861_v49  ;;  %v14847_v34 = vsel %vm6152_vm13, %v6144_v29, %v7910_v18  ;;  %v14850_v40 = vsel %vm6152_vm13, %v6145_v63, %v7911_v19  ;;  %v7988_v16 = vld [vmem:[%s15685_s6] ss:$0 sm:$0xff]  ;;  %v17815_v39 = vld [vmem:[#allocation16_spill] sm:$0xff] }
 0x99e   : > { %v3339_v9 = vmax.f32 %v17805_v15, 0.0  ;;  %v7675_v27 = vunpack.i.l.bf16 %v17806_v32  ;;  %v14855_v58 = vsel %vm6185_vm14, %v6165_v20, %v7930_v52  ;;  %v14858_v17 = vsel %vm6185_vm14, %v6166_v2, %v7931_v13  ;;  %v17814_v57 = vld [vmem:[#allocation145_spill] sm:$0xff] }
 0x99f   : > { %v3334_v1 = vmax.f32 %v17807_v47, 0.0  ;;  %v17809_v50 = vunpack.i.l.bf16 %v17808_v28  ;;  %v7755_v35 = vunpack.i.l.bf16 %v14470_v23  ;;  %v7835_v46 = vunpack.i.l.bf16 %v14582_v45  ;;  %v7924_v19 = vpop.permute.xlu1 %7923  ;;  %v7874_v18 = vpop.permute.xlu0 %7873 }
 0x9a0   : > { %v17812_v11 = vmax.f32 %v17811_v24, 0.0  ;;  %v3332_v43 = vmax.f32 %v17813_v54, 0.0  ;;  %v1516_v4 = vadd.f32 %v14869_v38, %v17815_v39  ;;  %v7436_v8 = vunpack.i.h.bf16 %v17808_v28  ;;  %v7944_v41 = vpop.permute.xlu2 %7943 }
 0x9a1   : > { %v5995_v33 = vsel %vm2855_vm4, %v17810_v60, %v17809_v50  ;;  %v7926_v13 = vunpack.i.h.bf16 %v7924_v19  ;;  %v7875_v52 = vunpack.i.l.bf16 %v7874_v18  ;;  %v7516_v63 = vunpack.i.h.bf16 %v17797_v0 }
 0x9a2   : > { %v6027_v26 = vsel %vm2921_vm5, %v5995_v33, %v7515_v61  ;;  %6634 = vrot.lane.b32.xlu0 %v17812_v11, %s17695_s12  ;;  %6654 = vrot.lane.b32.xlu1 %v3339_v9, %s17695_s12  ;;  %v3298_v61 = vadd.f32 %v7988_v16, %v17814_v57  ;;  %v7946_v20 = vunpack.i.h.bf16 %v7944_v41  ;;  %v7945_v2 = vunpack.i.l.bf16 %v7944_v41  ;;  %v17816_v33 = vld [vmem:[#allocation62_spill] sm:$0xff]  ;;  %v17819_v11 = vld [vmem:[#allocation121_spill] sm:$0xff] }
 0x9a3   : > { %v6059_v14 = vsel %vm2987_vm9, %v6027_v26, %v7595_v56  ;;  %6644 = vrot.lane.b32.xlu2 %v3334_v1, %s17695_s12  ;;  %v7925_v56 = vunpack.i.l.bf16 %v7924_v19  ;;  %v7596_v9 = vunpack.i.h.bf16 %v17798_v10  ;;  %v1609_v28 = vmax.f32 %v1516_v4, 0.0  ;;  %v3306_v26 = vpop.f32.mrf.mxu2 }
 0x9a4   : > { %v6091_v49 = vsel %vm3053_vm11, %v6059_v14, %v7675_v27  ;;  %v6182_v27 = vsel %vm6152_vm13, %v14696_v7, %v7926_v13  ;;  %v7676_v50 = vunpack.i.h.bf16 %v17806_v32  ;;  %v14900_v0 = vsel %vm6185_vm14, %v14743_v31, %v7945_v2 }
 0x9a5   : > { %v6124_v29 = vsel %vm6119_vm12, %v6091_v49, %v7755_v35  ;;  %v6181_v1 = vsel %vm6152_vm13, %v14693_v36, %v7925_v56  ;;  %v14904_v60 = vsel %vm6185_vm14, %v14746_v37, %v7946_v20  ;;  %v3337_v10 = vmax.f32 %v3298_v61, 0.0  ;;  %v17818_v37 = vld [vmem:[#allocation247_spill] sm:$0xff]  ;;  %v17821_v20 = vld [vmem:[#allocation292_spill] sm:$0xff] }
 0x9a6   : > { %v6157_v15 = vsel %vm6152_vm13, %v6124_v29, %v7835_v46  ;;  %v5996_v35 = vsel %vm2855_vm4, %v17816_v33, %v7436_v8  ;;  %v7756_v36 = vunpack.i.h.bf16 %v14470_v23  ;;  %v7836_v32 = vunpack.i.h.bf16 %v14582_v45  ;;  %v17820_v29 = vld [vmem:[#allocation141_spill] sm:$0xff] }
 0x9a7   : > { %v6190_v47 = vsel %vm6185_vm14, %v6157_v15, %v7875_v52  ;;  %v6028_v7 = vsel %vm2921_vm5, %v5996_v35, %v7516_v63  ;;  %v7876_v46 = vunpack.i.h.bf16 %v7874_v18  ;;  %v3292_v24 = vadd.f32 %v7988_v16, %v17818_v37  ;;  %v14918_v23 = vpop.permute.xlu1 %7938  ;;  %v7889_v14 = vpop.permute.xlu0 %7888  ;;  %v17823_v37 = vld [vmem:[#allocation151_spill] sm:$0xff] }
 0x9a8   : > { %6332 = vmatmul.f32.gmra.mxu0 %v6190_v47  ;;  %v6060_v31 = vsel %vm2987_vm9, %v6028_v7, %v7596_v9  ;;  %v1525_v54 = vadd.f32 %v14869_v38, %v17819_v11  ;;  %v3307_v45 = vadd.f32 %v7988_v16, %v3306_v26  ;;  %v7959_v61 = vpop.permute.xlu2 %7958  ;;  %v7890_v52 = vunpack.i.l.bf16 %v7889_v14  ;;  %v17822_v9 = vld [vmem:[#allocation23_spill] sm:$0xff]  ;;  %v17825_v11 = vld [vmem:[#allocation12_spill] sm:$0xff] }
 0x9a9   : > { %v6092_v57 = vsel %vm3053_vm11, %v6060_v31, %v7676_v50  ;;  %v7961_v39 = vunpack.i.h.bf16 %v7959_v61  ;;  %v7960_v4 = vunpack.i.l.bf16 %v7959_v61  ;;  %v3335_v18 = vmax.f32 %v3292_v24, 0.0 }
 0x9aa   : > { %6640 = vrot.lane.b32.xlu0 %v3332_v43, %s17695_s12  ;;  %6724 = vrot.lane.b32.xlu1 %v1609_v28, %s17817_s13  ;;  %v6125_v43 = vsel %vm6119_vm12, %v6092_v57, %v7756_v36  ;;  %v1612_v49 = vmax.f32 %v1525_v54, 0.0  ;;  %v3340_v56 = vmax.f32 %v3307_v45, 0.0  ;;  %v3301_v63 = vadd.f32 %v7988_v16, %v17820_v29  ;;  %v17826_v54 = vld [vmem:[#allocation166_spill] sm:$0xff] }
 0x9ab   : > { %6650 = vrot.lane.b32.xlu2 %v3337_v10, %s17695_s12  ;;  %v6158_v8 = vsel %vm6152_vm13, %v6125_v43, %v7836_v32  ;;  %v14926_v41 = vsel %vm6185_vm14, %v14752_v6, %v7960_v4  ;;  %v14930_v13 = vsel %vm6185_vm14, %v14755_v25, %v7961_v39  ;;  %v1534_v2 = vadd.f32 %v14869_v38, %v17821_v20  ;;  %v17829_v29 = vld [vmem:[#allocation202_spill] sm:$0xff]  ;;  %v17830_v20 = vld [vmem:[#allocation96_spill] sm:$0xff] }
 0x9ac   : > { %v6191_v19 = vsel %vm6185_vm14, %v6158_v8, %v7876_v46  ;;  %v1519_v25 = vadd.f32 %v14869_v38, %v17822_v9  ;;  %v6192_v35 = vsel %vm6185_vm14, %v14538_v12, %v7890_v52  ;;  %v3338_v26 = vmax.f32 %v3301_v63, 0.0  ;;  %v17831_v9 = vld [vmem:[#allocation57_spill] sm:$0xff] }
 0x9ad   : > { %v1615_v7 = vmax.f32 %v1534_v2, 0.0  ;;  %v1543_v12 = vadd.f32 %v14869_v38, %v17823_v37  ;;  %v7845_v37 = vunpack.i.l.bf16 %v14785_v51 }
 0x9ae   : > { %v1610_v46 = vmax.f32 %v1519_v25, 0.0  ;;  %v7685_v25 = vunpack.i.l.bf16 %v17831_v9 }
 0x9af   : > { %v7954_v15 = vpop.permute.xlu1 %7953  ;;  %v14938_v6 = vpop.permute.xlu0 %7903 }
 0x9b0   : > { %6335 = vmatmul.f32.gmra.mxu0 %v6191_v19  ;;  %v7956_v47 = vunpack.i.h.bf16 %v7954_v15  ;;  %v7955_v28 = vunpack.i.l.bf16 %v7954_v15  ;;  %v7974_v50 = vpop.permute.xlu2 %7973  ;;  %v1618_v19 = vmax.f32 %v1543_v12, 0.0 }
 0x9b1   : > { %v7976_v10 = vunpack.i.h.bf16 %v7974_v50  ;;  %v7975_v33 = vunpack.i.l.bf16 %v7974_v50 }
 0x9b2   : > { %6646 = vrot.lane.b32.xlu0 %v3335_v18, %s17695_s12  ;;  %6730 = vrot.lane.b32.xlu1 %v1612_v49, %s17817_s13  ;;  %v14946_v16 = vsel %vm6185_vm14, %v14799_v3, %v7955_v28  ;;  %v14950_v36 = vsel %vm6185_vm14, %v14802_v59, %v7956_v47  ;;  %v7891_v3 = vunpack.i.h.bf16 %v7889_v14  ;;  %v17824_v59 = vld [vmem:[#allocation297_spill] sm:$0xff]  ;;  %v17828_v49 = vld [vmem:[#allocation263_spill] sm:$0xff] }
 0x9b3   : > { %6656 = vrot.lane.b32.xlu2 %v3340_v56, %s17695_s12  ;;  %v14953_v32 = vsel %vm6185_vm14, %v6181_v1, %v7975_v33  ;;  %v14956_v31 = vsel %vm6185_vm14, %v6182_v27, %v7976_v10  ;;  %v1513_v24 = vadd.f32 %v14869_v38, %v17824_v59  ;;  %v1528_v1 = vadd.f32 %v14869_v38, %v17825_v11  ;;  %v17827_v14 = vld [vmem:[#allocation185_spill] sm:$0xff]  ;;  %v17833_v33 = vld [vmem:[#allocation250_spill] sm:$0xff]  ;;  %v17835_v59 = vld [vmem:[#allocation127_spill] sm:$0xff] }
 0x9b4   : > { %v7445_v27 = vunpack.i.l.bf16 %v17826_v54  ;;  %v7525_v18 = vunpack.i.l.bf16 %v17827_v14  ;;  %v7605_v56 = vunpack.i.l.bf16 %v17828_v49  ;;  %v6193_v52 = vsel %vm6185_vm14, %v14541_v21, %v7891_v3  ;;  %v17832_v10 = vld [vmem:[#allocation93_spill] sm:$0xff] }
 0x9b5   : > { %v1608_v15 = vmax.f32 %v1513_v24, 0.0  ;;  %v1613_v50 = vmax.f32 %v1528_v1, 0.0  ;;  %v7905_v3 = vunpack.i.l.bf16 %v14938_v6  ;;  %v1522_v24 = vadd.f32 %v14869_v38, %v17835_v59 }
 0x9b6   : > { %v5999_v21 = vsel %vm2855_vm4, %v17832_v10, %v7445_v27 }
 0x9b7   : > { %v7969_v57 = vpop.permute.xlu1 %7968  ;;  %v7919_v45 = vpop.permute.xlu0 %7918 }
 0x9b8   : > { %6338 = vmatmul.f32.gmra.mxu0 %v6192_v35  ;;  %v7971_v61 = vunpack.i.h.bf16 %v7969_v57  ;;  %v7970_v43 = vunpack.i.l.bf16 %v7969_v57  ;;  %v7921_v4 = vunpack.i.h.bf16 %v7919_v45  ;;  %v7920_v8 = vunpack.i.l.bf16 %v7919_v45  ;;  %v17836_v57 = vld [vmem:[#allocation21_spill] sm:$0xff] }
 0x9b9   : > { %v14968_v39 = vpop.permute.xlu2 %6596  ;;  %v7765_v35 = vunpack.i.l.bf16 %v17833_v33  ;;  %v1537_v45 = vadd.f32 %v14869_v38, %v17836_v57 }
 0x9ba   : > { %6652 = vrot.lane.b32.xlu0 %v3338_v26, %s17695_s12  ;;  %6736 = vrot.lane.b32.xlu1 %v1615_v7, %s17817_s13  ;;  %v6179_v63 = vsel %vm6152_vm13, %v17829_v29, %v7920_v8  ;;  %v6180_v2 = vsel %vm6152_vm13, %v17830_v20, %v7921_v4  ;;  %v17834_v26 = vld [vmem:[#allocation197_spill] sm:$0xff]  ;;  %v7686_v20 = vunpack.i.h.bf16 %v17831_v9 }
 0x9bb   : > { %6726 = vrot.lane.b32.xlu2 %v1610_v46, %s17817_s13  ;;  %v14980_v47 = vsel %vm6185_vm14, %v6179_v63, %v7970_v43  ;;  %v14983_v28 = vsel %vm6185_vm14, %v6180_v2, %v7971_v61  ;;  %v1552_v7 = vadd.f32 %v14869_v38, %v17834_v26  ;;  %v6031_v46 = vsel %vm2921_vm5, %v5999_v21, %v7525_v18  ;;  %v17840_v26 = vld [vmem:[#allocation20_spill] sm:$0xff] }
 0x9bc   : > { %v6063_v12 = vsel %vm2987_vm9, %v6031_v46, %v7605_v56  ;;  %v7446_v61 = vunpack.i.h.bf16 %v17826_v54  ;;  %v7526_v18 = vunpack.i.h.bf16 %v17827_v14  ;;  %v1611_v54 = vmax.f32 %v1522_v24, 0.0 }
 0x9bd   : > { %v6095_v11 = vsel %vm3053_vm11, %v6063_v12, %v7685_v25  ;;  %v1616_v2 = vmax.f32 %v1537_v45, 0.0  ;;  %v7766_v14 = vunpack.i.h.bf16 %v17833_v33  ;;  %v7906_v21 = vunpack.i.h.bf16 %v14938_v6 }
 0x9be   : > { %v6128_v8 = vsel %vm6119_vm12, %v6095_v11, %v7765_v35  ;;  %v17839_v35 = vld [vmem:[#allocation33_spill] sm:$0xff] }
 0x9bf   : > { %v15000_v1 = vpop.permute.xlu1 %6594  ;;  %v15002_v27 = vpop.permute.xlu0 %7933  ;;  %v6161_v56 = vsel %vm6152_vm13, %v6128_v8, %v7845_v37  ;;  %v1561_v33 = vadd.f32 %v14869_v38, %v17839_v35 }
 0x9c0   : > { %6341 = vmatmul.f32.gmra.mxu0 %v6193_v52  ;;  %v7935_v4 = vunpack.i.l.bf16 %v15002_v27  ;;  %v7606_v52 = vunpack.i.h.bf16 %v17828_v49  ;;  %v6194_v29 = vsel %vm6185_vm14, %v6161_v56, %v7905_v3  ;;  %v7846_v49 = vunpack.i.h.bf16 %v14785_v51 }
 0x9c1   : > { %v15007_v43 = vpop.permute.xlu2 %6602  ;;  %v7915_v56 = vunpack.i.l.bf16 %v14789_v30 }
 0x9c2   : > { %6722 = vrot.lane.b32.xlu0 %v1608_v15, %s17817_s13  ;;  %6742 = vrot.lane.b32.xlu1 %v1618_v19, %s17817_s13  ;;  %v1621_v19 = vmax.f32 %v1552_v7, 0.0  ;;  %v15017_v63 = vsel %vm6152_vm13, %v14533_v22, %v7935_v4  ;;  %v17837_v15 = vld [vmem:[#allocation10_spill] sm:$0xff]  ;;  %v17838_v22 = vld [vmem:[#allocation215_spill] sm:$0xff]  ;;  %v1531_v7 = vadd.f32 %v14869_v38, %v17840_v26  ;;  %v1624_v4 = vmax.f32 %v1561_v33, 0.0 }
 0x9c3   : > { %6732 = vrot.lane.b32.xlu2 %v1613_v50, %s17817_s13  ;;  %v6000_v25 = vsel %vm2855_vm4, %v17837_v15, %v7446_v61  ;;  %v1546_v10 = vadd.f32 %v14869_v38, %v17838_v22  ;;  %v17846_v26 = vld [vmem:[#allocation246_spill] sm:$0xff] }
 0x9c4   : > { %v6032_v50 = vsel %vm2921_vm5, %v6000_v25, %v7526_v18  ;;  %v1614_v8 = vmax.f32 %v1531_v7, 0.0  ;;  %v1564_v7 = vadd.f32 %v14869_v38, %v17846_v26 }
 0x9c5   : > { %v6064_v9 = vsel %vm2987_vm9, %v6032_v50, %v7606_v52  ;;  %v1619_v11 = vmax.f32 %v1546_v10, 0.0  ;;  %v6196_v50 = vsel %vm6185_vm14, %v14601_v5, %v7915_v56  ;;  %v17844_v5 = vld [vmem:[#allocation45_spill] sm:$0xff]  ;;  %v17849_v56 = vld [vmem:[#allocation238_spill] sm:$0xff] }
 0x9c6   : > { %v6096_v51 = vsel %vm3053_vm11, %v6064_v9, %v7686_v20  ;;  %v7936_v9 = vunpack.i.h.bf16 %v15002_v27 }
 0x9c7   : > { %v7949_v37 = vpop.permute.xlu0 %7948  ;;  %v6129_v24 = vsel %vm6119_vm12, %v6096_v51, %v7766_v14 }
 0x9c8   : > { %6344 = vmatmul.f32.gmra.mxu0 %v6194_v29  ;;  %v15037_v46 = vpop.permute.xlu1 %6600  ;;  %v7951_v3 = vunpack.i.h.bf16 %v7949_v37  ;;  %v7950_v59 = vunpack.i.l.bf16 %v7949_v37  ;;  %v6162_v6 = vsel %vm6152_vm13, %v6129_v24, %v7846_v49  ;;  %v17843_v29 = vld [vmem:[#allocation169_spill] sm:$0xff] }
 0x9c9   : > { %v6195_v57 = vsel %vm6185_vm14, %v6162_v6, %v7906_v21  ;;  %v1579_v21 = vadd.f32 %v14869_v38, %v17844_v5 }
 0x9ca   : > { %6728 = vrot.lane.b32.xlu0 %v1611_v54, %s17817_s13  ;;  %6748 = vrot.lane.b32.xlu1 %v1621_v19, %s17817_s13  ;;  %v15039_v12 = vpop.permute.xlu2 %6608  ;;  %v15046_v45 = vsel %vm6185_vm14, %v14701_v53, %v7950_v59  ;;  %v15050_v61 = vsel %vm6185_vm14, %v14704_v44, %v7951_v3  ;;  %v17841_v19 = vld [vmem:[#allocation35_spill] sm:$0xff]  ;;  %v17842_v53 = vld [vmem:[#allocation174_spill] sm:$0xff]  ;;  %v1540_v44 = vadd.f32 %v14869_v38, %v17843_v29 }
 0x9cb   : > { %6738 = vrot.lane.b32.xlu2 %v1616_v2, %s17817_s13  ;;  %v1555_v18 = vadd.f32 %v14869_v38, %v17841_v19  ;;  %v1570_v52 = vadd.f32 %v14869_v38, %v17842_v53  ;;  %v6184_v3 = vsel %vm6152_vm13, %v14528_v62, %v7936_v9  ;;  %v1630_v6 = vmax.f32 %v1579_v21, 0.0  ;;  %v17848_v62 = vld [vmem:[#allocation241_spill] sm:$0xff] }
 0x9cc   : > { %v1617_v10 = vmax.f32 %v1540_v44, 0.0  ;;  %v1588_v19 = vadd.f32 %v14869_v38, %v17848_v62  ;;  %v7941_v62 = vunpack.i.h.bf16 %v14918_v23 }
 0x9cd   : > { %v1622_v14 = vmax.f32 %v1555_v18, 0.0  ;;  %v1627_v22 = vmax.f32 %v1570_v52, 0.0 }
 0x9ce   : > { %v1633_v29 = vmax.f32 %v1588_v19, 0.0  ;;  %v17856_v19 = vld [vmem:[#allocation272_spill] sm:$0xff] }
 0x9cf   : > { %v7964_v20 = vpop.permute.xlu0 %7963 }
 0x9d0   : > { %6347 = vmatmul.f32.gmra.mxu0 %v6195_v57  ;;  %v15062_v54 = vpop.permute.xlu1 %6606  ;;  %v7966_v15 = vunpack.i.h.bf16 %v7964_v20  ;;  %v7965_v25 = vunpack.i.l.bf16 %v7964_v20  ;;  %v1625_v57 = vmax.f32 %v1564_v7, 0.0  ;;  %v17850_v20 = vld [vmem:[#allocation44_spill] sm:$0xff]  ;;  %v17854_v7 = vld [vmem:[#allocation161_spill] sm:$0xff] }
 0x9d2   : > { %6734 = vrot.lane.b32.xlu0 %v1614_v8, %s17817_s13  ;;  %6754 = vrot.lane.b32.xlu1 %v1624_v4, %s17817_s13  ;;  %v15064_v2 = vpop.permute.xlu2 %6614  ;;  %v15070_v30 = vsel %vm6185_vm14, %v14847_v34, %v7965_v25  ;;  %v15074_v49 = vsel %vm6185_vm14, %v14850_v40, %v7966_v15  ;;  %v17845_v34 = vld [vmem:[#allocation31_spill] sm:$0xff]  ;;  %v17847_v4 = vld [vmem:[#allocation213_spill] sm:$0xff]  ;;  %v1567_v15 = vadd.f32 %v14869_v38, %v17850_v20  ;;  %v17851_v25 = vld [vmem:[#allocation54_spill] sm:$0xff] }
 0x9d3   : > { %6744 = vrot.lane.b32.xlu2 %v1619_v11, %s17817_s13  ;;  %v1549_v35 = vadd.f32 %v14869_v38, %v17845_v34  ;;  %v1558_v8 = vadd.f32 %v14869_v38, %v17847_v4  ;;  %v15165_v20 = vld [vmem:[%s15689_s10] ss:$0 sm:$0xff] }
 0x9d4   : > { %v1626_v5 = vmax.f32 %v1567_v15, 0.0  ;;  %v6201_v15 = vsel %vm6185_vm14, %v14655_v42, %v7941_v62 }
 0x9d5   : > { %v1620_v11 = vmax.f32 %v1549_v35, 0.0  ;;  %v1623_v52 = vmax.f32 %v1558_v8, 0.0  ;;  %v7940_v35 = vunpack.i.l.bf16 %v14918_v23 }
 0x9d7   : > { %v7979_v40 = vpop.permute.xlu0 %7978 }
 0x9d8   : > { %6350 = vmatmul.f32.gmra.mxu0 %v6196_v50  ;;  %v15084_v33 = vpop.permute.xlu1 %6612  ;;  %v7981_v27 = vunpack.i.h.bf16 %v7979_v40  ;;  %v7980_v37 = vunpack.i.l.bf16 %v7979_v40  ;;  %v17853_v40 = vld [vmem:[#allocation251_spill] sm:$0xff] }
 0x9d9   : > { %v1576_v26 = vadd.f32 %v14869_v38, %v17853_v40  ;;  %v17859_v40 = vld [vmem:[#allocation243_spill] sm:$0xff] }
 0x9da   : > { %6740 = vrot.lane.b32.xlu0 %v1617_v10, %s17817_s13  ;;  %6760 = vrot.lane.b32.xlu1 %v1627_v22, %s17817_s13  ;;  %v6217_v59 = vsel %vm6185_vm14, %v6184_v3, %v7981_v27  ;;  %v15095_v24 = vsel %vm6185_vm14, %v15017_v63, %v7980_v37  ;;  %v17852_v10 = vld [vmem:[#allocation252_spill] sm:$0xff]  ;;  %v1606_v27 = vadd.f32 %v14869_v38, %v17854_v7 }
 0x9db   : > { %6750 = vrot.lane.b32.xlu2 %v1622_v14, %s17817_s13  ;;  %v15088_v51 = vpop.permute.xlu2 %6620  ;;  %6413 = vmatmul.f32.vlgmr.msra.gmra.mxu2 %v6217_v59  ;;  %v1597_v14 = vadd.f32 %v14869_v38, %v17851_v25 }
 0x9dc   : > { %v1639_v4 = vmax.f32 %v1606_v27, 0.0 }
 0x9dd   : > { %v1636_v21 = vmax.f32 %v1597_v14, 0.0 }
 0x9e0   : > { %6353 = vmatmul.f32.gmra.mxu0 %v14809_v48  ;;  %v15105_v63 = vpop.permute.xlu1 %6618  ;;  %v15107_v18 = vpop.permute.xlu0 %6598  ;;  %v1573_v48 = vadd.f32 %v14869_v38, %v17849_v56  ;;  %v1585_v56 = vadd.f32 %v14869_v38, %v17856_v19 }
 0x9e2   : > { %6746 = vrot.lane.b32.xlu0 %v1620_v11, %s17817_s13  ;;  %6766 = vrot.lane.b32.xlu1 %v1630_v6, %s17817_s13  ;;  %v1628_v44 = vmax.f32 %v1573_v48, 0.0  ;;  %v6200_v11 = vsel %vm6185_vm14, %v14652_v55, %v7940_v35  ;;  %v17857_v55 = vld [vmem:[#allocation53_spill] sm:$0xff]  ;;  %v1632_v25 = vmax.f32 %v1585_v56, 0.0 }
 0x9e3   : > { %6756 = vrot.lane.b32.xlu2 %v1625_v57, %s17817_s13  ;;  %v1629_v57 = vmax.f32 %v1576_v26, 0.0 }
 0x9e4   : > { %v15111_v53 = vpop.permute.xlu2 %6626 }
 0x9e8   : > { %6356 = vmatmul.f32.gmra.mxu0 %v14855_v58  ;;  %v1582_v58 = vadd.f32 %v14869_v38, %v17852_v10 }
 0x9e9   : > { %v15121_v50 = vpop.permute.xlu1 %6624  ;;  %v15123_v22 = vpop.permute.xlu0 %6604 }
 0x9ea   : > { %6752 = vrot.lane.b32.xlu0 %v1623_v52, %s17817_s13  ;;  %6772 = vrot.lane.b32.xlu1 %v1633_v29, %s17817_s13  ;;  %v1631_v34 = vmax.f32 %v1582_v58, 0.0  ;;  %v1600_v29 = vadd.f32 %v14869_v38, %v17857_v55  ;;  %v15171_v58 = vpop.f32.mrf.mxu1 }
 0x9eb   : > { %6762 = vrot.lane.b32.xlu2 %v1628_v44, %s17817_s13 }
 0x9ec   : > { %v15127_v9 = vpop.permute.xlu2 %6632  ;;  %v1637_v14 = vmax.f32 %v1600_v29, 0.0  ;;  %v17861_v29 = vld [vmem:[#allocation254_spill] sm:$0xff] }
 0x9f0   : > { %6359 = vmatmul.f32.gmra.mxu0 %v14858_v17  ;;  %v17855_v17 = vld [vmem:[#allocation51_spill] sm:$0xff] }
 0x9f1   : > { %v15138_v37 = vpop.permute.xlu1 %6630  ;;  %v1591_v59 = vadd.f32 %v14869_v38, %v17855_v17 }
 0x9f2   : > { %6758 = vrot.lane.b32.xlu0 %v1626_v5, %s17817_s13  ;;  %6778 = vrot.lane.b32.xlu1 %v1636_v21, %s17817_s13  ;;  %v15140_v3 = vpop.permute.xlu0 %6610  ;;  %v17858_v5 = vld [vmem:[#allocation192_spill] sm:$0xff] }
 0x9f3   : > { %6768 = vrot.lane.b32.xlu2 %v1631_v34, %s17817_s13  ;;  %v1634_v8 = vmax.f32 %v1591_v59, 0.0  ;;  %v1594_v21 = vadd.f32 %v14869_v38, %v17858_v5  ;;  %v17860_v59 = vld [vmem:[#allocation205_spill] sm:$0xff]  ;;  %v17863_v5 = vld [vmem:[#allocation70_spill] sm:$0xff] }
 0x9f5   : > { %v15144_v6 = vpop.permute.xlu2 %6638  ;;  %v1635_v27 = vmax.f32 %v1594_v21, 0.0  ;;  %v6948_v21 = vsel %vm422_vm0, %v17863_v5, %v15107_v18  ;;  %v17865_v18 = vld [vmem:[#allocation68_spill] sm:$0xff] }
 0x9f8   : > { %6362 = vmatmul.f32.gmra.mxu0 %v6200_v11  ;;  %v6321_v23 = vpop.f32.mrf.mxu0  ;;  %v1603_v11 = vadd.f32 %v14869_v38, %v17860_v59  ;;  %v17864_v59 = vld [vmem:[#allocation201_spill] sm:$0xff] }
 0x9f9   : > { %v6322_v10 = vadd.f32 %v15165_v20, %v6321_v23 }
 0x9fa   : > { %6764 = vrot.lane.b32.xlu0 %v1629_v57, %s17817_s13  ;;  %6784 = vrot.lane.b32.xlu1 %v1639_v4, %s17817_s13  ;;  %v15154_v48 = vpop.permute.xlu1 %6636  ;;  %v15156_v52 = vpop.permute.xlu0 %6616 }
 0x9fb   : > { %6774 = vrot.lane.b32.xlu2 %v1634_v8, %s17817_s13  ;;  %v6435_v42 = vadd.f32 %v17859_v40, %v6322_v10  ;;  %v15192_v8 = vpop.f32.mrf.mxu1 }
 0x9fd   : > { %v15160_v44 = vpop.permute.xlu2 %6644  ;;  %v6530_v17 = vmax.f32 %v6435_v42, 0.0 }
 0xa00   : > { %6365 = vmatmul.f32.gmra.mxu0 %v6201_v15  ;;  %v17862_v15 = vld [vmem:[#allocation285_spill] sm:$0xff] }
 0xa01   : > { %v6324_v7 = vpop.f32.mrf.mxu0 }
 0xa02   : > { %6770 = vrot.lane.b32.xlu0 %v1632_v25, %s17817_s13  ;;  %v6325_v55 = vadd.f32 %v15165_v20, %v6324_v7 }
 0xa03   : > { %6780 = vrot.lane.b32.xlu2 %v1637_v14, %s17817_s13  ;;  %v15176_v34 = vpop.permute.xlu1 %6642  ;;  %v15178_v35 = vpop.permute.xlu0 %6622 }
 0xa04   : > { %v6438_v25 = vadd.f32 %v17862_v15, %v6325_v55  ;;  %v15213_v7 = vpop.f32.mrf.mxu1 }
 0xa05   : > { %v15181_v26 = vpop.permute.xlu2 %6650 }
 0xa08   : > { %6368 = vmatmul.f32.gmra.mxu0 %v14900_v0  ;;  %v1638_v0 = vmax.f32 %v1603_v11, 0.0 }
 0xa0a   : > { %6776 = vrot.lane.b32.xlu0 %v1635_v27, %s17817_s13  ;;  %v6327_v19 = vpop.f32.mrf.mxu0 }
 0xa0b   : > { %6850 = vrot.lane.b32.xlu2 %v6530_v17, %s16961_s16  ;;  %v6328_v56 = vadd.f32 %v15165_v20, %v6327_v19  ;;  %v6531_v17 = vmax.f32 %v6438_v25, 0.0 }
 0xa0c   : > { %v15188_v57 = vpop.permute.xlu1 %6648  ;;  %v15190_v4 = vpop.permute.xlu0 %6628 }
 0xa0d   : > { %v15194_v62 = vpop.permute.xlu2 %6656  ;;  %v6441_v23 = vadd.f32 %v17861_v29, %v6328_v56  ;;  %v6947_v56 = vsel %vm422_vm0, %v17865_v18, %v14968_v39  ;;  %v17866_v29 = vld [vmem:[#allocation76_spill] sm:$0xff]  ;;  %v15235_v25 = vpop.f32.mrf.mxu1  ;;  %v17867_v39 = vld [vmem:[#allocation74_spill] sm:$0xff] }
 0xa0e   : > { %v6950_v5 = vsel %vm422_vm0, %v17867_v39, %v15007_v43 }
 0xa0f   : > { %v6532_v38 = vmax.f32 %v6441_v23, 0.0  ;;  %v6951_v23 = vsel %vm422_vm0, %v17866_v29, %v15123_v22 }
 0xa10   : > { %6371 = vmatmul.f32.gmra.mxu0 %v14904_v60 }
 0xa11   : > { %6854 = vrot.lane.b32.xlu1 %v6532_v38, %s16961_s16 }
 0xa12   : > { %6782 = vrot.lane.b32.xlu0 %v1638_v0, %s17817_s13 }
 0xa13   : > { %v6330_v42 = vpop.f32.mrf.mxu0 }
 0xa14   : > { %v15202_v14 = vpop.permute.xlu0 %6634  ;;  %v15204_v10 = vpop.permute.xlu1 %6654  ;;  %v6331_v27 = vadd.f32 %v15165_v20, %v6330_v42 }
 0xa15   : > { %v6727_v40 = vpop.permute.xlu2 %6726 }
 0xa16   : > { %v15211_v60 = vsel %vm2888_vm6, %v6948_v21, %v6727_v40  ;;  %v6444_v11 = vadd.f32 %v17864_v59, %v6331_v27  ;;  %v17868_v40 = vld [vmem:[#allocation82_spill] sm:$0xff] }
 0xa17   : > { %v6954_v42 = vsel %vm422_vm0, %v17868_v40, %v15140_v3 }
 0xa18   : > { %6374 = vmatmul.f32.gmra.mxu0 %v15046_v45  ;;  %v6533_v19 = vmax.f32 %v6444_v11, 0.0 }
 0xa1a   : > { %6852 = vrot.lane.b32.xlu0 %v6531_v17, %s16961_s16  ;;  %6856 = vrot.lane.b32.xlu2 %v6533_v19, %s16961_s16  ;;  %v17869_v19 = vld [vmem:[#allocation299_spill] sm:$0xff] }
 0xa1c   : > { %v15222_v0 = vpop.permute.xlu0 %6640  ;;  %v6725_v55 = vpop.permute.xlu1 %6724 }
 0xa1d   : > { %v6733_v38 = vpop.permute.xlu2 %6732  ;;  %v15228_v15 = vsel %vm2888_vm6, %v6947_v56, %v6725_v55  ;;  %v15254_v56 = vpop.f32.mrf.mxu1  ;;  %v17870_v55 = vld [vmem:[#allocation80_spill] sm:$0xff] }
 0xa1e   : > { %v15232_v45 = vsel %vm2888_vm6, %v6951_v23, %v6733_v38  ;;  %v6953_v3 = vsel %vm422_vm0, %v17870_v55, %v15039_v12  ;;  %v17871_v38 = vld [vmem:[#allocation88_spill] sm:$0xff]  ;;  %v17872_v12 = vld [vmem:[#allocation43_spill] sm:$0xff] }
 0xa1f   : > { %v6957_v39 = vsel %vm422_vm0, %v17871_v38, %v15156_v52 }
 0xa20   : > { %6377 = vmatmul.f32.gmra.mxu0 %v15050_v61 }
 0xa24   : > { %v15240_v21 = vpop.permute.xlu0 %6646  ;;  %v6731_v22 = vpop.permute.xlu1 %6730 }
 0xa25   : > { %v6739_v27 = vpop.permute.xlu2 %6738  ;;  %v15246_v17 = vsel %vm2888_vm6, %v6950_v5, %v6731_v22  ;;  %v6333_v59 = vpop.f32.mrf.mxu0 }
 0xa26   : > { %v15249_v61 = vsel %vm2888_vm6, %v6954_v42, %v6739_v27  ;;  %v6334_v11 = vadd.f32 %v15165_v20, %v6333_v59 }
 0xa28   : > { %v6447_v18 = vadd.f32 %v17869_v19, %v6334_v11  ;;  %6380 = vmatmul.f32.gmra.mxu0 %v14946_v16  ;;  %v17873_v11 = vld [vmem:[#allocation86_spill] sm:$0xff] }
 0xa29   : > { %v6956_v19 = vsel %vm422_vm0, %v17873_v11, %v15064_v2  ;;  %v15290_v2 = vpop.f32.mrf.mxu1  ;;  %v17877_v11 = vld [vmem:[#allocation67_spill] sm:$0xff] }
 0xa2a   : > { %v6534_v43 = vmax.f32 %v6447_v18, 0.0 }
 0xa2c   : > { %v15259_v29 = vpop.permute.xlu0 %6652  ;;  %6858 = vrot.lane.b32.xlu0 %v6534_v43, %s16961_s16  ;;  %v6737_v23 = vpop.permute.xlu1 %6736  ;;  %v17874_v43 = vld [vmem:[#allocation95_spill] sm:$0xff] }
 0xa2d   : > { %v6745_v5 = vpop.permute.xlu2 %6744  ;;  %v15266_v22 = vsel %vm2888_vm6, %v6953_v3, %v6737_v23  ;;  %v6336_v16 = vpop.f32.mrf.mxu0  ;;  %v6960_v55 = vsel %vm422_vm0, %v17874_v43, %v15178_v35 }
 0xa2e   : > { %v15269_v40 = vsel %vm2888_vm6, %v6957_v39, %v6745_v5  ;;  %v6337_v42 = vadd.f32 %v15165_v20, %v6336_v16  ;;  %v17875_v5 = vld [vmem:[#allocation42_spill] sm:$0xff] }
 0xa30   : > { %v6450_v27 = vadd.f32 %v17872_v12, %v6337_v42  ;;  %6383 = vmatmul.f32.gmra.mxu0 %v14950_v36  ;;  %v17876_v12 = vld [vmem:[#allocation92_spill] sm:$0xff] }
 0xa31   : > { %v6959_v35 = vsel %vm422_vm0, %v17876_v12, %v15088_v51  ;;  %v17878_v51 = vld [vmem:[#allocation255_spill] sm:$0xff] }
 0xa32   : > { %v6535_v59 = vmax.f32 %v6450_v27, 0.0 }
 0xa34   : > { %v15277_v52 = vpop.permute.xlu0 %6722  ;;  %6860 = vrot.lane.b32.xlu1 %v6535_v59, %s16961_s16  ;;  %v6743_v18 = vpop.permute.xlu1 %6742 }
 0xa35   : > { %v6751_v3 = vpop.permute.xlu2 %6750  ;;  %v15284_v23 = vsel %vm2888_vm6, %v6956_v19, %v6743_v18  ;;  %v6339_v38 = vpop.f32.mrf.mxu0  ;;  %v6963_v19 = vsel %vm422_vm0, %v17877_v11, %v15190_v4  ;;  %v17881_v11 = vld [vmem:[#allocation72_spill] sm:$0xff] }
 0xa36   : > { %v15287_v36 = vsel %vm2888_vm6, %v6960_v55, %v6751_v3  ;;  %v6340_v39 = vadd.f32 %v15165_v20, %v6339_v38 }
 0xa38   : > { %v6453_v16 = vadd.f32 %v17875_v5, %v6340_v39  ;;  %6386 = vmatmul.f32.gmra.mxu0 %v14926_v41  ;;  %v15312_v39 = vpop.f32.mrf.mxu1 }
 0xa3a   : > { %v6536_v42 = vmax.f32 %v6453_v16, 0.0  ;;  %v17879_v16 = vld [vmem:[#allocation78_spill] sm:$0xff] }
 0xa3b   : > { %v6952_v4 = vsel %vm422_vm0, %v17879_v16, %v15062_v54 }
 0xa3c   : > { %v15297_v27 = vpop.permute.xlu0 %6728  ;;  %6862 = vrot.lane.b32.xlu2 %v6536_v42, %s16961_s16  ;;  %v6749_v59 = vpop.permute.xlu1 %6748  ;;  %v17880_v42 = vld [vmem:[#allocation101_spill] sm:$0xff] }
 0xa3d   : > { %v6757_v18 = vpop.permute.xlu2 %6756  ;;  %v15304_v43 = vsel %vm2888_vm6, %v6959_v35, %v6749_v59  ;;  %v6342_v55 = vpop.f32.mrf.mxu0  ;;  %v6962_v12 = vsel %vm422_vm0, %v17880_v42, %v15111_v53 }
 0xa3e   : > { %v15307_v41 = vsel %vm2888_vm6, %v6963_v19, %v6757_v18  ;;  %v6343_v3 = vadd.f32 %v15165_v20, %v6342_v55  ;;  %v6966_v19 = vsel %vm422_vm0, %v17881_v11, %v15202_v14  ;;  %v17882_v14 = vld [vmem:[#allocation84_spill] sm:$0xff] }
 0xa3f   : > { %v6955_v16 = vsel %vm422_vm0, %v17882_v14, %v15084_v33 }
 0xa40   : > { %v6456_v38 = vadd.f32 %v17878_v51, %v6343_v3  ;;  %6389 = vmatmul.f32.gmra.mxu0 %v14930_v13 }
 0xa42   : > { %v6537_v5 = vmax.f32 %v6456_v38, 0.0 }
 0xa44   : > { %v6735_v35 = vpop.permute.xlu0 %6734  ;;  %6864 = vrot.lane.b32.xlu0 %v6537_v5, %s16961_s16  ;;  %v6755_v59 = vpop.permute.xlu1 %6754 }
 0xa45   : > { %v15325_v13 = vsel %vm2888_vm6, %v6952_v4, %v6735_v35  ;;  %v6763_v18 = vpop.permute.xlu2 %6762  ;;  %v15328_v55 = vsel %vm2888_vm6, %v6962_v12, %v6755_v59  ;;  %v6345_v54 = vpop.f32.mrf.mxu0  ;;  %v17883_v4 = vld [vmem:[#allocation71_spill] sm:$0xff] }
 0xa46   : > { %v15331_v3 = vsel %vm2888_vm6, %v6966_v19, %v6763_v18  ;;  %v6346_v53 = vadd.f32 %v15165_v20, %v6345_v54  ;;  %v15336_v5 = vpop.f32.mrf.mxu1  ;;  %v6965_v42 = vsel %vm422_vm0, %v17883_v4, %v15127_v9  ;;  %v17884_v59 = vld [vmem:[#allocation79_spill] sm:$0xff] }
 0xa48   : > { %v6459_v51 = vadd.f32 %v15171_v58, %v6346_v53  ;;  %6392 = vmatmul.f32.gmra.mxu0 %v15070_v30  ;;  %v6969_v58 = vsel %vm422_vm0, %v17884_v59, %v15222_v0  ;;  %v17885_v0 = vld [vmem:[#allocation90_spill] sm:$0xff] }
 0xa4a   : > { %v6538_v38 = vmax.f32 %v6459_v51, 0.0  ;;  %v6958_v51 = vsel %vm422_vm0, %v17885_v0, %v15105_v63 }
 0xa4c   : > { %v6741_v12 = vpop.permute.xlu0 %6740  ;;  %6866 = vrot.lane.b32.xlu1 %v6538_v38, %s16961_s16  ;;  %v6761_v35 = vpop.permute.xlu1 %6760  ;;  %v17886_v38 = vld [vmem:[#allocation77_spill] sm:$0xff] }
 0xa4d   : > { %v15349_v30 = vsel %vm2888_vm6, %v6955_v16, %v6741_v12  ;;  %v6769_v11 = vpop.permute.xlu2 %6768  ;;  %v15352_v19 = vsel %vm2888_vm6, %v6965_v42, %v6761_v35  ;;  %v6348_v33 = vpop.f32.mrf.mxu0  ;;  %v6968_v14 = vsel %vm422_vm0, %v17886_v38, %v15144_v6  ;;  %v17887_v42 = vld [vmem:[#allocation85_spill] sm:$0xff]  ;;  %v17890_v38 = vld [vmem:[#allocation91_spill] sm:$0xff] }
 0xa4e   : > { %v15355_v18 = vsel %vm2888_vm6, %v6969_v58, %v6769_v11  ;;  %v6349_v9 = vadd.f32 %v15165_v20, %v6348_v33  ;;  %v6972_v12 = vsel %vm422_vm0, %v17887_v42, %v15240_v21  ;;  %v15380_v58 = vpop.f32.mrf.mxu1  ;;  %v17888_v33 = vld [vmem:[#allocation98_spill] sm:$0xff] }
 0xa50   : > { %v6462_v54 = vadd.f32 %v15192_v8, %v6349_v9  ;;  %6395 = vmatmul.f32.gmra.mxu0 %v15074_v49  ;;  %v6961_v9 = vsel %vm422_vm0, %v17888_v33, %v15121_v50 }
 0xa52   : > { %v6539_v53 = vmax.f32 %v6462_v54, 0.0  ;;  %v17889_v54 = vld [vmem:[#allocation83_spill] sm:$0xff] }
 0xa54   : > { %v6747_v16 = vpop.permute.xlu0 %6746  ;;  %6868 = vrot.lane.b32.xlu2 %v6539_v53, %s16961_s16  ;;  %v6767_v4 = vpop.permute.xlu1 %6766  ;;  %v6971_v53 = vsel %vm422_vm0, %v17889_v54, %v15160_v44 }
 0xa55   : > { %v15371_v8 = vsel %vm2888_vm6, %v6958_v51, %v6747_v16  ;;  %v6775_v49 = vpop.permute.xlu2 %6774  ;;  %v15374_v35 = vsel %vm2888_vm6, %v6968_v14, %v6767_v4  ;;  %v6351_v63 = vpop.f32.mrf.mxu0 }
 0xa56   : > { %v15377_v59 = vsel %vm2888_vm6, %v6972_v12, %v6775_v49  ;;  %v6352_v6 = vadd.f32 %v15165_v20, %v6351_v63  ;;  %v15407_v12 = vpop.f32.mrf.mxu1  ;;  %v17891_v49 = vld [vmem:[#allocation66_spill] sm:$0xff] }
 0xa57   : > { %v6946_v63 = vsel %vm422_vm0, %v17891_v49, %v15000_v1 }
 0xa58   : > { %v6465_v11 = vadd.f32 %v15213_v7, %v6352_v6  ;;  %6398 = vmatmul.f32.gmra.mxu0 %v14980_v47  ;;  %v6975_v7 = vsel %vm422_vm0, %v17890_v38, %v15259_v29  ;;  %v17892_v6 = vld [vmem:[#allocation69_spill] sm:$0xff] }
 0xa5a   : > { %v6540_v21 = vmax.f32 %v6465_v11, 0.0  ;;  %v6964_v11 = vsel %vm422_vm0, %v17892_v6, %v15138_v37 }
 0xa5c   : > { %v6753_v0 = vpop.permute.xlu0 %6752  ;;  %6870 = vrot.lane.b32.xlu0 %v6540_v21, %s16961_s16  ;;  %v6773_v51 = vpop.permute.xlu1 %6772  ;;  %v17893_v21 = vld [vmem:[#allocation89_spill] sm:$0xff] }
 0xa5d   : > { %v15395_v47 = vsel %vm2888_vm6, %v6961_v9, %v6753_v0  ;;  %v6781_v14 = vpop.permute.xlu2 %6780  ;;  %v15398_v16 = vsel %vm2888_vm6, %v6971_v53, %v6773_v51  ;;  %v6354_v50 = vpop.f32.mrf.mxu0  ;;  %v6974_v33 = vsel %vm422_vm0, %v17893_v21, %v15181_v26  ;;  %v6978_v9 = vsel %vm2888_vm6, %v6946_v63, %v15277_v52 }
 0xa5e   : > { %v15401_v4 = vsel %vm2888_vm6, %v6975_v7, %v6781_v14  ;;  %v6355_v44 = vadd.f32 %v15165_v20, %v6354_v50  ;;  %v15437_v38 = vpop.f32.mrf.mxu1  ;;  %v17894_v7 = vld [vmem:[#allocation75_spill] sm:$0xff]  ;;  %v17895_v50 = vld [vmem:[#allocation97_spill] sm:$0xff] }
 0xa5f   : > { %v6967_v14 = vsel %vm422_vm0, %v17894_v7, %v15154_v48 }
 0xa60   : > { %v6468_v42 = vadd.f32 %v15235_v25, %v6355_v44  ;;  %6401 = vmatmul.f32.gmra.mxu0 %v14983_v28  ;;  %v6977_v44 = vsel %vm422_vm0, %v17895_v50, %v15194_v62  ;;  %v17896_v62 = vld [vmem:[#allocation81_spill] sm:$0xff] }
 0xa62   : > { %v6541_v29 = vmax.f32 %v6468_v42, 0.0 }
 0xa64   : > { %v6759_v25 = vpop.permute.xlu0 %6758  ;;  %6872 = vrot.lane.b32.xlu1 %v6541_v29, %s16961_s16  ;;  %v6779_v28 = vpop.permute.xlu1 %6778 }
 0xa65   : > { %v15424_v54 = vsel %vm2888_vm6, %v6964_v11, %v6759_v25  ;;  %v6851_v53 = vpop.permute.xlu2 %6850  ;;  %v15427_v1 = vsel %vm2888_vm6, %v6974_v33, %v6779_v28  ;;  %v6357_v0 = vpop.f32.mrf.mxu0  ;;  %v6970_v11 = vsel %vm422_vm0, %v17896_v62, %v15176_v34 }
 0xa66   : > { %v7010_v37 = vsel %vm2921_vm5, %v6978_v9, %v6851_v53  ;;  %v6358_v51 = vadd.f32 %v15165_v20, %v6357_v0  ;;  %v6491_v33 = vpop.f32.mrf.mxu1  ;;  %v17897_v9 = vld [vmem:[#allocation73_spill] sm:$0xff] }
 0xa67   : > { %7042 = vst.msk [vmem:[%s15431_s30] sm:$0xff] %vm2987_vm9, %v7010_v37 }
 0xa68   : > { %v6471_v26 = vadd.f32 %v15254_v56, %v6358_v51  ;;  %6404 = vmatmul.f32.gmra.mxu0 %v14953_v32 }
 0xa6a   : > { %v6542_v52 = vmax.f32 %v6471_v26, 0.0  ;;  %v17898_v26 = vld [vmem:[#allocation87_spill] sm:$0xff] }
 0xa6c   : > { %v6765_v42 = vpop.permute.xlu0 %6764  ;;  %6874 = vrot.lane.b32.xlu2 %v6542_v52, %s16961_s16  ;;  %v6785_v29 = vpop.permute.xlu1 %6784  ;;  %v6973_v52 = vsel %vm422_vm0, %v17898_v26, %v15188_v57 }
 0xa6d   : > { %v15447_v49 = vsel %vm2888_vm6, %v6967_v14, %v6765_v42  ;;  %v15450_v32 = vsel %vm2888_vm6, %v6977_v44, %v6785_v29  ;;  %v6360_v56 = vpop.f32.mrf.mxu0  ;;  %v17899_v44 = vld [vmem:[#allocation94_spill] sm:$0xff] }
 0xa6e   : > { %v6361_v63 = vadd.f32 %v15165_v20, %v6360_v56  ;;  %v6494_v14 = vpop.f32.mrf.mxu1  ;;  %v6976_v42 = vsel %vm422_vm0, %v17899_v44, %v15204_v10 }
 0xa70   : > { %v6474_v6 = vadd.f32 %v15290_v2, %v6361_v63  ;;  %6407 = vmatmul.f32.gmra.mxu0 %v14956_v31  ;;  %v6949_v2 = vsel %vm422_vm0, %v17897_v9, %v15037_v46 }
 0xa71   : > { %v6981_v31 = vsel %vm2888_vm6, %v6949_v2, %v15297_v27 }
 0xa72   : > { %v6543_v48 = vmax.f32 %v6474_v6, 0.0 }
 0xa74   : > { %v6771_v21 = vpop.permute.xlu0 %6770  ;;  %6876 = vrot.lane.b32.xlu0 %v6543_v48, %s16961_s16  ;;  %v6857_v0 = vpop.permute.xlu2 %6856 }
 0xa75   : > { %v15460_v25 = vsel %vm2888_vm6, %v6970_v11, %v6771_v21  ;;  %v6363_v28 = vpop.f32.mrf.mxu0  ;;  %v7013_v37 = vsel %vm2921_vm5, %v6981_v31, %v6857_v0 }
 0xa76   : > { %v6364_v53 = vadd.f32 %v15165_v20, %v6363_v28  ;;  %7045 = vst.msk [vmem:[%s15431_s30 + $0x18] sm:$0xff] %vm2987_vm9, %v7013_v37  ;;  %v6497_v62 = vpop.f32.mrf.mxu1 }
 0xa78   : > { %v6477_v34 = vadd.f32 %v15312_v39, %v6364_v53  ;;  %6410 = vmatmul.f32.gmra.mxu0 %v15095_v24 }
 0xa7a   : > { %v6544_v51 = vmax.f32 %v6477_v34, 0.0 }
 0xa7c   : > { %v6777_v46 = vpop.permute.xlu0 %6776  ;;  %6878 = vrot.lane.b32.xlu1 %v6544_v51, %s16961_s16 }
 0xa7d   : > { %v15478_v7 = vsel %vm2888_vm6, %v6973_v52, %v6777_v46  ;;  %v6366_v27 = vpop.f32.mrf.mxu0 }
 0xa7e   : > { %v6367_v39 = vadd.f32 %v15165_v20, %v6366_v27 }
 0xa80   : > { %v6480_v24 = vadd.f32 %v15336_v5, %v6367_v39 }
 0xa82   : > { %v6545_v50 = vmax.f32 %v6480_v24, 0.0 }
 0xa83   : > { %v6855_v6 = vpop.permute.xlu1 %6854 }
 0xa84   : > { %v6783_v57 = vpop.permute.xlu0 %6782  ;;  %6880 = vrot.lane.b32.xlu2 %v6545_v50, %s16961_s16  ;;  %v7012_v5 = vsel %vm2921_vm5, %v15211_v60, %v6855_v6  ;;  %v6500_v60 = vpop.f32.mrf.mxu1 }
 0xa85   : > { %v15487_v29 = vsel %vm2888_vm6, %v6976_v42, %v6783_v57  ;;  %v6369_v56 = vpop.f32.mrf.mxu0  ;;  %7044 = vst.msk [vmem:[%s15431_s30 + $0x10] sm:$0xff] %vm2987_vm9, %v7012_v5 }
 0xa86   : > { %v6370_v63 = vadd.f32 %v15165_v20, %v6369_v56 }
 0xa88   : > { %v6483_v48 = vadd.f32 %v15380_v58, %v6370_v63 }
 0xa8a   : > { %v6546_v10 = vmax.f32 %v6483_v48, 0.0 }
 0xa8c   : > { %v6853_v11 = vpop.permute.xlu0 %6852  ;;  %6882 = vrot.lane.b32.xlu0 %v6546_v10, %s16961_s16 }
 0xa8d   : > { %v7011_v21 = vsel %vm2921_vm5, %v15228_v15, %v6853_v11  ;;  %v6372_v28 = vpop.f32.mrf.mxu0 }
 0xa8e   : > { %7043 = vst.msk [vmem:[%s15431_s30 + $0x8] sm:$0xff] %vm2987_vm9, %v7011_v21  ;;  %v6373_v9 = vadd.f32 %v15165_v20, %v6372_v28 }
 0xa90   : > { %v6486_v58 = vadd.f32 %v15407_v12, %v6373_v9  ;;  %v6503_v12 = vpop.f32.mrf.mxu1 }
 0xa92   : > { %v6547_v2 = vmax.f32 %v6486_v58, 0.0 }
 0xa94   : > { %6884 = vrot.lane.b32.xlu1 %v6547_v2, %s16961_s16 }
 0xa95   : > { %v6375_v53 = vpop.f32.mrf.mxu0 }
 0xa96   : > { %v6376_v31 = vadd.f32 %v15165_v20, %v6375_v53  ;;  %v6863_v0 = vpop.permute.xlu2 %6862 }
 0xa97   : > { %v7016_v34 = vsel %vm2921_vm5, %v15325_v13, %v6863_v0 }
 0xa98   : > { %v6489_v15 = vadd.f32 %v15437_v38, %v6376_v31  ;;  %7048 = vst.msk [vmem:[%s15431_s30 + $0x30] sm:$0xff] %vm2987_vm9, %v7016_v34  ;;  %v6506_v50 = vpop.f32.mrf.mxu1 }
 0xa9a   : > { %v6548_v37 = vmax.f32 %v6489_v15, 0.0 }
 0xa9c   : > { %6886 = vrot.lane.b32.xlu2 %v6548_v37, %s16961_s16 }
 0xa9d   : > { %v6378_v51 = vpop.f32.mrf.mxu0 }
 0xa9e   : > { %v6379_v26 = vadd.f32 %v15165_v20, %v6378_v51  ;;  %v6859_v52 = vpop.permute.xlu0 %6858 }
 0xa9f   : > { %v7014_v46 = vsel %vm2921_vm5, %v15246_v17, %v6859_v52 }
 0xaa0   : > { %v6492_v27 = vadd.f32 %v6491_v33, %v6379_v26  ;;  %7046 = vst.msk [vmem:[%s15431_s30 + $0x20] sm:$0xff] %vm2987_vm9, %v7014_v46  ;;  %v6509_v48 = vpop.f32.mrf.mxu1 }
 0xaa2   : > { %v6549_v13 = vmax.f32 %v6492_v27, 0.0 }
 0xaa4   : > { %6888 = vrot.lane.b32.xlu0 %v6549_v13, %s16961_s16 }
 0xaa5   : > { %v6381_v38 = vpop.f32.mrf.mxu0 }
 0xaa6   : > { %v6382_v39 = vadd.f32 %v15165_v20, %v6381_v38  ;;  %v6861_v24 = vpop.permute.xlu1 %6860 }
 0xaa7   : > { %v7015_v44 = vsel %vm2921_vm5, %v15232_v45, %v6861_v24 }
 0xaa8   : > { %v6495_v42 = vadd.f32 %v6494_v14, %v6382_v39  ;;  %7047 = vst.msk [vmem:[%s15431_s30 + $0x28] sm:$0xff] %vm2987_vm9, %v7015_v44 }
 0xaaa   : > { %v6550_v57 = vmax.f32 %v6495_v42, 0.0 }
 0xaac   : > { %6890 = vrot.lane.b32.xlu1 %v6550_v57, %s16961_s16 }
 0xaad   : > { %v6384_v17 = vpop.f32.mrf.mxu0 }
 0xaae   : > { %v6385_v33 = vadd.f32 %v15165_v20, %v6384_v17  ;;  %v6869_v56 = vpop.permute.xlu2 %6868 }
 0xaaf   : > { %v7019_v63 = vsel %vm2921_vm5, %v15349_v30, %v6869_v56  ;;  %v6512_v30 = vpop.f32.mrf.mxu1 }
 0xab0   : > { %v6498_v6 = vadd.f32 %v6497_v62, %v6385_v33  ;;  %7051 = vst.msk [vmem:[%s15431_s30 + $0x48] sm:$0xff] %vm2987_vm9, %v7019_v63 }
 0xab2   : > { %v6551_v5 = vmax.f32 %v6498_v6, 0.0 }
 0xab4   : > { %6892 = vrot.lane.b32.xlu2 %v6551_v5, %s16961_s16 }
 0xab5   : > { %v6387_v45 = vpop.f32.mrf.mxu0 }
 0xab6   : > { %v6388_v14 = vadd.f32 %v15165_v20, %v6387_v45  ;;  %v6865_v10 = vpop.permute.xlu0 %6864  ;;  %v6414_v45 = vpop.f32.mrf.mxu2 }
 0xab7   : > { %v7017_v11 = vsel %vm2921_vm5, %v15266_v22, %v6865_v10  ;;  %v6515_v22 = vpop.f32.mrf.mxu1 }
 0xab8   : > { %v6501_v21 = vadd.f32 %v6500_v60, %v6388_v14  ;;  %7049 = vst.msk [vmem:[%s15431_s30 + $0x38] sm:$0xff] %vm2987_vm9, %v7017_v11 }
 0xaba   : > { %v6552_v28 = vmax.f32 %v6501_v21, 0.0 }
 0xabc   : > { %6894 = vrot.lane.b32.xlu0 %v6552_v28, %s16961_s16 }
 0xabd   : > { %v6390_v62 = vpop.f32.mrf.mxu0 }
 0xabe   : > { %v6391_v9 = vadd.f32 %v15165_v20, %v6390_v62  ;;  %v6867_v58 = vpop.permute.xlu1 %6866 }
 0xabf   : > { %v7018_v2 = vsel %vm2921_vm5, %v15249_v61, %v6867_v58  ;;  %v6518_v52 = vpop.f32.mrf.mxu1 }
 0xac0   : > { %v6504_v53 = vadd.f32 %v6503_v12, %v6391_v9  ;;  %7050 = vst.msk [vmem:[%s15431_s30 + $0x40] sm:$0xff] %vm2987_vm9, %v7018_v2 }
 0xac2   : > { %v6553_v31 = vmax.f32 %v6504_v53, 0.0 }
 0xac4   : > { %6896 = vrot.lane.b32.xlu1 %v6553_v31, %s16961_s16 }
 0xac5   : > { %v6393_v60 = vpop.f32.mrf.mxu0 }
 0xac6   : > { %v6394_v0 = vadd.f32 %v15165_v20, %v6393_v60  ;;  %v6875_v34 = vpop.permute.xlu2 %6874 }
 0xac7   : > { %v7022_v15 = vsel %vm2921_vm5, %v15371_v8, %v6875_v34  ;;  %v6521_v44 = vpop.f32.mrf.mxu1 }
 0xac8   : > { %v6507_v37 = vadd.f32 %v6506_v50, %v6394_v0  ;;  %7054 = vst.msk [vmem:[%s15431_s30 + $0x60] sm:$0xff] %vm2987_vm9, %v7022_v15 }
 0xaca   : > { %v6554_v51 = vmax.f32 %v6507_v37, 0.0 }
 0xacc   : > { %6898 = vrot.lane.b32.xlu2 %v6554_v51, %s16961_s16 }
 0xacd   : > { %v6396_v61 = vpop.f32.mrf.mxu0 }
 0xace   : > { %v6397_v12 = vadd.f32 %v15165_v20, %v6396_v61  ;;  %v6871_v26 = vpop.permute.xlu0 %6870 }
 0xacf   : > { %v7020_v46 = vsel %vm2921_vm5, %v15284_v23, %v6871_v26  ;;  %v6524_v63 = vpop.f32.mrf.mxu1 }
 0xad0   : > { %v6510_v27 = vadd.f32 %v6509_v48, %v6397_v12  ;;  %7052 = vst.msk [vmem:[%s15431_s30 + $0x50] sm:$0xff] %vm2987_vm9, %v7020_v46 }
 0xad2   : > { %v6555_v13 = vmax.f32 %v6510_v27, 0.0 }
 0xad4   : > { %6900 = vrot.lane.b32.xlu0 %v6555_v13, %s16961_s16 }
 0xad5   : > { %v6399_v8 = vpop.f32.mrf.mxu0 }
 0xad6   : > { %v6400_v38 = vadd.f32 %v15165_v20, %v6399_v8  ;;  %v6873_v39 = vpop.permute.xlu1 %6872 }
 0xad7   : > { %v7021_v24 = vsel %vm2921_vm5, %v15269_v40, %v6873_v39  ;;  %v6527_v21 = vpop.f32.mrf.mxu1 }
 0xad8   : > { %v6513_v50 = vadd.f32 %v6512_v30, %v6400_v38  ;;  %7053 = vst.msk [vmem:[%s15431_s30 + $0x58] sm:$0xff] %vm2987_vm9, %v7021_v24 }
 0xada   : > { %v6556_v42 = vmax.f32 %v6513_v50, 0.0 }
 0xadc   : > { %6902 = vrot.lane.b32.xlu1 %v6556_v42, %s16961_s16 }
 0xadd   : > { %v6402_v23 = vpop.f32.mrf.mxu0 }
 0xade   : > { %v6403_v57 = vadd.f32 %v15165_v20, %v6402_v23  ;;  %v6881_v17 = vpop.permute.xlu2 %6880 }
 0xadf   : > { %v7025_v33 = vsel %vm2921_vm5, %v15395_v47, %v6881_v17  ;;  %v6415_v47 = vadd.f32 %v15165_v20, %v6414_v45 }
 0xae0   : > { %v6516_v56 = vadd.f32 %v6515_v22, %v6403_v57  ;;  %7057 = vst.msk [vmem:[%s15431_s30 + $0x78] sm:$0xff] %vm2987_vm9, %v7025_v33 }
 0xae1   : > { %v6528_v30 = vadd.f32 %v6527_v21, %v6415_v47 }
 0xae2   : > { %v6557_v40 = vmax.f32 %v6516_v56, 0.0 }
 0xae4   : > { %6904 = vrot.lane.b32.xlu2 %v6557_v40, %s16961_s16 }
 0xae5   : > { %v6405_v6 = vpop.f32.mrf.mxu0 }
 0xae6   : > { %v6406_v48 = vadd.f32 %v15165_v20, %v6405_v6  ;;  %v6877_v5 = vpop.permute.xlu0 %6876 }
 0xae7   : > { %v7023_v14 = vsel %vm2921_vm5, %v15304_v43, %v6877_v5  ;;  %v6561_v43 = vmax.f32 %v6528_v30, 0.0 }
 0xae8   : > { %v6519_v10 = vadd.f32 %v6518_v52, %v6406_v48  ;;  %7055 = vst.msk [vmem:[%s15431_s30 + $0x68] sm:$0xff] %vm2987_vm9, %v7023_v14 }
 0xaea   : > { %v6558_v11 = vmax.f32 %v6519_v10, 0.0 }
 0xaec   : > { %6906 = vrot.lane.b32.xlu0 %v6558_v11, %s16961_s16 }
 0xaed   : > { %v6408_v28 = vpop.f32.mrf.mxu0 }
 0xaee   : > { %v6409_v62 = vadd.f32 %v15165_v20, %v6408_v28  ;;  %v6879_v9 = vpop.permute.xlu1 %6878 }
 0xaef   : > { %v7024_v58 = vsel %vm2921_vm5, %v15287_v36, %v6879_v9 }
 0xaf0   : > { %v6522_v2 = vadd.f32 %v6521_v44, %v6409_v62  ;;  %7056 = vst.msk [vmem:[%s15431_s30 + $0x70] sm:$0xff] %vm2987_vm9, %v7024_v58 }
 0xaf2   : > { %v6559_v53 = vmax.f32 %v6522_v2, 0.0 }
 0xaf4   : > { %6912 = vrot.lane.b32.xlu0 %v6561_v43, %s16961_s16  ;;  %6908 = vrot.lane.b32.xlu1 %v6559_v53, %s16961_s16 }
 0xaf5   : > { %v6411_v31 = vpop.f32.mrf.mxu0 }
 0xaf6   : > { %v6412_v22 = vadd.f32 %v15165_v20, %v6411_v31  ;;  %v6887_v60 = vpop.permute.xlu2 %6886 }
 0xaf7   : > { %v7028_v0 = vsel %vm2921_vm5, %v15424_v54, %v6887_v60 }
 0xaf8   : > { %v6525_v36 = vadd.f32 %v6524_v63, %v6412_v22  ;;  %7060 = vst.msk [vmem:[%s15431_s30 + $0x90] sm:$0xff] %vm2987_vm9, %v7028_v0 }
 0xafa   : > { %v6560_v34 = vmax.f32 %v6525_v36, 0.0 }
 0xafc   : > { %6910 = vrot.lane.b32.xlu2 %v6560_v34, %s16961_s16  ;;  %s7325_s16 = sshll.u32 %s8148_s21, 8  ;;  %s7075_s21 = scalar_lea.sflag [#allocation3], %s377_s25 }
 0xafd   : > { %s7086_s13 = scalar_lea.hbm %s15690_s11, %s7325_s16 }
 0xafe   : > { %v6883_v15 = vpop.permute.xlu0 %6882  ;;  %s7089_s29 = sshll.u32 %s7086_s13, 4  ;;  %s8009_s13 = scalar_lea.hbm %s15690_s11, 512  ;;  %s7090_s29 = int_to_ptr.hbm [resolvable:$true] %s7089_s29 }
 0xaff   : > { %v7026_v37 = vsel %vm2921_vm5, %v15328_v55, %v6883_v15  ;;  %s8003_s15 = sshra.s32 %s7090_s29, 4  ;;  %s8004_s15 = int_to_ptr.hbm [resolvable:$true] %s8003_s15 }
 0xb00   : > { %7058 = vst.msk [vmem:[%s15431_s30 + $0x80] sm:$0xff] %vm2987_vm9, %v7026_v37  ;;  %s8005_s16 = scalar_lea.hbm %s8004_s15, 256  ;;  %p8010_p0 = scmp.lt.s32.totalorder %s8004_s15, %s15690_s11 }
 0xb01   : > { %p8006_p11 = scmp.ne.s32.totalorder %s8004_s15, %s8005_s16  ;;  %p8011_p1 = scmp.lt.s32.totalorder %s8009_s13, %s8005_s16 }
 0xb03   : > { %p8007_p12 = pnand %p8006_p11, %p8165_p5  ;;  %p8012_p2 = por %p8011_p1, %p8010_p0 }
 0xb05   : > { %p8008_p13 = pneg %p8007_p12 }
 0xb06   : > { %v6885_v20 = vpop.permute.xlu1 %6884 }
 0xb07   : > { %v7027_v51 = vsel %vm2921_vm5, %v15307_v41, %v6885_v20  ;;  %p8013_p3 = pnand %p8012_p2, %p8008_p13 }
 0xb08   : > { %7059 = vst.msk [vmem:[%s15431_s30 + $0x88] sm:$0xff] %vm2987_vm9, %v7027_v51 }
 0xb0e   : > { %v6893_v54 = vpop.permute.xlu2 %6892 }
 0xb0f   : > { %v7031_v61 = vsel %vm2921_vm5, %v15447_v49, %v6893_v54 }
 0xb10   : > { %7063 = vst.msk [vmem:[%s15431_s30 + $0xa8] sm:$0xff] %vm2987_vm9, %v7031_v61 }
 0xb16   : > { %v6889_v12 = vpop.permute.xlu0 %6888 }
 0xb17   : > { %v7029_v55 = vsel %vm2921_vm5, %v15352_v19, %v6889_v12 }
 0xb18   : > { %7061 = vst.msk [vmem:[%s15431_s30 + $0x98] sm:$0xff] %vm2987_vm9, %v7029_v55 }
 0xb1e   : > { %v6891_v26 = vpop.permute.xlu1 %6890 }
 0xb1f   : > { %v7030_v41 = vsel %vm2921_vm5, %v15331_v3, %v6891_v26 }
 0xb20   : > { %7062 = vst.msk [vmem:[%s15431_s30 + $0xa0] sm:$0xff] %vm2987_vm9, %v7030_v41 }
 0xb26   : > { %v6899_v52 = vpop.permute.xlu2 %6898 }
 0xb27   : > { %v7034_v49 = vsel %vm2921_vm5, %v15460_v25, %v6899_v52 }
 0xb28   : > { %7066 = vst.msk [vmem:[%s15431_s30 + $0xc0] sm:$0xff] %vm2987_vm9, %v7034_v49 }
 0xb2e   : > { %v6895_v46 = vpop.permute.xlu0 %6894 }
 0xb2f   : > { %v7032_v19 = vsel %vm2921_vm5, %v15374_v35, %v6895_v46 }
 0xb30   : > { %7064 = vst.msk [vmem:[%s15431_s30 + $0xb0] sm:$0xff] %vm2987_vm9, %v7032_v19 }
 0xb36   : > { %v6897_v27 = vpop.permute.xlu1 %6896 }
 0xb37   : > { %v7033_v3 = vsel %vm2921_vm5, %v15355_v18, %v6897_v27 }
 0xb38   : > { %7065 = vst.msk [vmem:[%s15431_s30 + $0xb8] sm:$0xff] %vm2987_vm9, %v7033_v3 }
 0xb3e   : > { %v6905_v13 = vpop.permute.xlu2 %6904 }
 0xb3f   : > { %v7037_v25 = vsel %vm2921_vm5, %v15478_v7, %v6905_v13 }
 0xb40   : > { %7069 = vst.msk [vmem:[%s15431_s30 + $0xd8] sm:$0xff] %vm2987_vm9, %v7037_v25 }
 0xb46   : > { %v6901_v8 = vpop.permute.xlu0 %6900 }
 0xb47   : > { %v7035_v35 = vsel %vm2921_vm5, %v15398_v16, %v6901_v8 }
 0xb48   : > { %7067 = vst.msk [vmem:[%s15431_s30 + $0xc8] sm:$0xff] %vm2987_vm9, %v7035_v35 }
 0xb4e   : > { %v6903_v38 = vpop.permute.xlu1 %6902 }
 0xb4f   : > { %v7036_v18 = vsel %vm2921_vm5, %v15377_v59, %v6903_v38 }
 0xb50   : > { %7068 = vst.msk [vmem:[%s15431_s30 + $0xd0] sm:$0xff] %vm2987_vm9, %v7036_v18 }
 0xb56   : > { %v6911_v39 = vpop.permute.xlu2 %6910 }
 0xb57   : > { %v7040_v7 = vsel %vm2921_vm5, %v15487_v29, %v6911_v39 }
 0xb58   : > { %7072 = vst.msk [vmem:[%s15431_s30 + $0xf0] sm:$0xff] %vm2987_vm9, %v7040_v7 }
 0xb5e   : > { %v6907_v24 = vpop.permute.xlu0 %6906 }
 0xb5f   : > { %v7038_v16 = vsel %vm2921_vm5, %v15427_v1, %v6907_v24 }
 0xb60   : > { %7070 = vst.msk [vmem:[%s15431_s30 + $0xe0] sm:$0xff] %vm2987_vm9, %v7038_v16 }
 0xb66   : > { %v6913_v59 = vpop.permute.xlu0 %6912  ;;  %v6909_v29 = vpop.permute.xlu1 %6908 }
 0xb67   : > { %v7041_v50 = vsel %vm2921_vm5, %v15450_v32, %v6913_v59  ;;  %v7039_v44 = vsel %vm2921_vm5, %v15401_v4, %v6909_v29 }
 0xb68   : > { %7073 = vst.msk [vmem:[%s15431_s30 + $0xf8] sm:$0xff] %vm2987_vm9, %v7041_v50 }
 0xb69   : > { %7071 = vst.msk [vmem:[%s15431_s30 + $0xe8] sm:$0xff] %vm2987_vm9, %v7039_v44 }
 0xb6a   : > { %8016 = shalt.err (!%p8013_p3)
}
 0xb6b   : > { %s8066_s25 = smov 128  }
 0xb6c   : > { %7344 = dma.vmem_to_hbm [thread:$0]  (%p8165_p5), %s7088_s14, 4096, %s7090_s29, %s7075_s21, %s8066_s25, %s8066_s25, %s17695_s12  }
 0xb6d PF: > { %p7350_p4 = scmp.ge.s32.totalorder %s8051_s20, 2  ;;  %s7104_s30 = sand.u32 1, %s8039_s17  }
 0xb6e   : > { %s7105_s0 = scalar_lea.sflag [#allocation3], %s7104_s30 }
 0xb6f   : > { %p7347_p7 = pnand %p7350_p4, %p8169_p6 }
 0xb71   : > { %p7348_p8 = pneg %p7347_p7 }
 0xb73   : > { %8034 = dma.done.wait (%p7348_p8), %s7105_s0, 4096  }
 0xb74   : > { %8036 = vsyncadd (%p7348_p8), %s7105_s0, 4294963200  ;;  %p21_p9 = scmp.ge.s32.totalorder %s8152_s23, 4   ;;  %s17900_s17 = smov %s8043_s18 }
 0xb75   : > { %s17901_s18 = smov %s8047_s19  ;;  %s17902_s19 = smov %s8163_s26 }
 0xb76   : > { %s17903_s20 = smov %s8152_s23  ;;  %23 = sbr.rel (!%p21_p9) target bundleno = 6 (0x6), region = 99 }
 0xb7b   :  { %7111 = vsyncpa [#allocation3], 1 }
 0xb7c   :  { %7113 = vsyncpa [#allocation3 + $0x1], 1 }

</bundles_post_ra>
